<compile_context>
chip_gen: v7x
topology: tpu7x:2x2x1
jax: 0.10.0
libtpu: 0.0.40
codegen_flags: <defaults>
</compile_context>

<pallas_src>
import functools

import jax
import jax.numpy as jnp
from jax.experimental import pallas as pl
from jax.experimental.pallas import tpu as pltpu

Z_DIM = 10
NC = 3


# ----------------------------------------------------------------------------
# Pallas kernels
# ----------------------------------------------------------------------------
def _matmul_bias_act_kernel(x_ref, w_ref, b_ref, o_ref, *, relu):
    # bf16 operands -> f32 accumulation on the MXU; bias + ReLU fused (VPU filler).
    acc = jnp.dot(x_ref[...], w_ref[...], preferred_element_type=jnp.float32)
    acc = acc + b_ref[...]
    if relu:
        acc = jnp.maximum(acc, 0.0)
    o_ref[...] = acc.astype(o_ref.dtype)


def _pick_tm(m):
    """M-tile: 512 on large-M layers, full M on tiny ones, >=2 grid steps when sensible."""
    tm = min(m, 512)
    if tm == m and m >= 256:
        tm = m // 2  # keep at least 2 grid steps on mid-size layers (megacore)
    return tm


def matmul_bias_act(x, w, b, *, relu, out_dtype):
    """(M,K) @ (K,N) + b, optional ReLU. x/w are bf16 (or f32), accum in f32."""
    m, k = x.shape
    k2, n = w.shape
    assert k == k2
    tm = _pick_tm(m)
    assert m % tm == 0
    return pl.pallas_call(
        functools.partial(_matmul_bias_act_kernel, relu=relu),
        out_shape=jax.ShapeDtypeStruct((m, n), out_dtype),
        grid=(m // tm,),
        in_specs=[
            pl.BlockSpec((tm, k), lambda i: (i, 0)),   # K is the full extent: no padding
            pl.BlockSpec((k, n), lambda i: (0, 0)),    # weight resident across the grid
            pl.BlockSpec((1, n), lambda i: (0, 0)),    # bias (f32)
        ],
        out_specs=pl.BlockSpec((tm, n), lambda i: (i, 0)),
        compiler_params=pltpu.CompilerParams(dimension_semantics=("parallel",)),
    )(x, w, b)


def _latent_kernel(h_ref, eps_ref, we5_ref, be5_ref, wmu_ref, bmu_ref,
                   wlv_ref, blv_ref, wfc_ref, bfc_ref, wd1_ref, bd1_ref,
                   mu_ref, lv_ref, hd1_ref):
    """Fused encoder-tail + latent path: e5 conv -> e_fc -> reparametrize -> d_fc -> d1.

    All operands are tiny (B=2), so everything stays f32 in VMEM; one launch total.
    """
    h = h_ref[...].astype(jnp.float32)                       # (B, 4*4*64)
    # e5: Conv2d(64,256,4,s=1,p=0) on a 4x4 map == matmul, + ReLU
    h5 = jnp.dot(h, we5_ref[...], preferred_element_type=jnp.float32) + be5_ref[...]
    h5 = jnp.maximum(h5, 0.0)
    # e_fc split into mu / logvar columns (avoids in-kernel lane slicing)
    mu = jnp.dot(h5, wmu_ref[...], preferred_element_type=jnp.float32) + bmu_ref[...]
    lv = jnp.dot(h5, wlv_ref[...], preferred_element_type=jnp.float32) + blv_ref[...]
    # reparametrize: z = mu + exp(logvar/2) * eps  (f32 exp on the EUP)
    z = mu + jnp.exp(0.5 * lv) * eps_ref[...]
    # d_fc + ReLU
    hd = jnp.dot(z, wfc_ref[...], preferred_element_type=jnp.float32) + bfc_ref[...]
    hd = jnp.maximum(hd, 0.0)
    # d1: ConvTranspose2d(256,64,4,s=1,p=0) on a 1x1 map == matmul to (4*4*64), + ReLU
    hd1 = jnp.dot(hd, wd1_ref[...], preferred_element_type=jnp.float32) + bd1_ref[...]
    hd1 = jnp.maximum(hd1, 0.0)
    mu_ref[...] = mu
    lv_ref[...] = lv
    hd1_ref[...] = hd1.astype(hd1_ref.dtype)


def latent_path(h_flat, eps, pp):
    b = h_flat.shape[0]
    return pl.pallas_call(
        _latent_kernel,
        out_shape=(
            jax.ShapeDtypeStruct((b, Z_DIM), jnp.float32),       # mu
            jax.ShapeDtypeStruct((b, Z_DIM), jnp.float32),       # logvar
            jax.ShapeDtypeStruct((b, 4 * 4 * 64), jnp.bfloat16), # d1 output (NHWC-flat)
        ),
    )(h_flat, eps, pp["e5_w"], pp["e5_b"], pp["mu_w"], pp["mu_b"],
      pp["lv_w"], pp["lv_b"], pp["dfc_w"], pp["dfc_b"], pp["d1_w"], pp["d1_b"])


# ----------------------------------------------------------------------------
# im2col glue (NHWC, no transposes; compute stays in the Pallas matmul)
# ----------------------------------------------------------------------------
def _im2col_nhwc(x, kh, kw, stride, pad):
    n, h, w, c = x.shape
    xp = jnp.pad(x, ((0, 0), (pad, pad), (pad, pad), (0, 0)))
    oh = (h + 2 * pad - kh) // stride + 1
    ow = (w + 2 * pad - kw) // stride + 1
    taps = []
    for i in range(kh):
        for j in range(kw):
            taps.append(xp[:, i:i + stride * oh:stride, j:j + stride * ow:stride, :])
    pat = jnp.stack(taps, axis=3)                        # (N, OH, OW, KH*KW, C) — already ordered
    return pat.reshape(n * oh * ow, kh * kw * c), oh, ow


def conv2d_nhwc(x, w_mat, b_mat, kh, kw, stride, pad, relu, out_dtype):
    """PyTorch-equivalent Conv2d on NHWC input. w_mat: (KH*KW*IC, OC)."""
    n = x.shape[0]
    oc = w_mat.shape[1]
    pat, oh, ow = _im2col_nhwc(x, kh, kw, stride, pad)
    out = matmul_bias_act(pat, w_mat, b_mat, relu=relu, out_dtype=out_dtype)
    return out.reshape(n, oh, ow, oc)


def conv_transpose2x_nhwc(x, w_mat, b_mat, relu, out_dtype):
    """PyTorch ConvTranspose2d(IC, OC, 4, stride=2, padding=1) as a sub-pixel conv.

    One stride-1 3x3-tap matmul produces the 2x2 output phases, then depth-to-space.
    """
    n, h, w, _ = x.shape
    oc = w_mat.shape[1] // 4
    pat, oh, ow = _im2col_nhwc(x, 3, 3, 1, 1)             # oh=h, ow=w
    out = matmul_bias_act(pat, w_mat, b_mat, relu=relu, out_dtype=out_dtype)
    out = out.reshape(n, h, w, 2, 2, oc)                  # (..., py, px, oc)
    out = out.transpose(0, 1, 3, 2, 4, 5).reshape(n, 2 * h, 2 * w, oc)
    return out


# ----------------------------------------------------------------------------
# Parameter preparation (all weight reshapes / bias tiling hoisted out of forward)
# ----------------------------------------------------------------------------
# (phase, tap) -> kernel index for the 4x4/stride-2/pad-1 ConvTranspose sub-pixel split.
_PHASE_TAP_TO_K = {(0, 0): 3, (0, 1): 1, (1, 1): 2, (1, 2): 0}


def _conv_weight_mat(w):
    """(OC, IC, KH, KW) torch Conv2d weight -> (KH*KW*IC, OC) matmul weight."""
    oc, ic, kh, kw = w.shape
    return w.transpose(2, 3, 1, 0).reshape(kh * kw * ic, oc)


def _convT_subpixel_weight(w, b):
    """ConvTranspose2d(IC, OC, 4, stride=2, padding=1) -> sub-pixel conv weights.

    Returns W (3*3*IC, 4*OC) and bias (1, 4*OC) such that
    im2col(pad1, 3x3, stride 1) @ W followed by depth-to-space reproduces PyTorch.
    """
    ic, oc = w.shape[0], w.shape[1]
    wb = jnp.zeros((3, 3, ic, 2, 2, oc), jnp.float32)
    for (py, dy), ky in _PHASE_TAP_TO_K.items():
        for (px, dx), kx in _PHASE_TAP_TO_K.items():
            wb = wb.at[dy, dx, :, py, px, :].set(w[:, :, ky, kx])
    w_mat = wb.reshape(9 * ic, 4 * oc)
    b_mat = jnp.tile(b, 4).reshape(1, 4 * oc)             # (py*2+px)*OC + oc ordering
    return w_mat, b_mat


def prepare_params(p):
    """One-time transform of torch-layout params into kernel-ready matrices."""
    pp = {}
    # Encoder convs e1..e4: bf16 matmul weights, f32 (1, OC) biases.
    for name in ("e1", "e2", "e3", "e4"):
        pp[name + "_w"] = _conv_weight_mat(p[name + "_w"]).astype(jnp.bfloat16)
        pp[name + "_b"] = p[name + "_b"].reshape(1, -1).astype(jnp.float32)
    # e5 (1x1 spatial output conv) as a plain matmul; stays f32 for the fused latent kernel.
    pp["e5_w"] = _conv_weight_mat(p["e5_w"]).astype(jnp.float32)       # (1024, 256)
    pp["e5_b"] = p["e5_b"].reshape(1, -1).astype(jnp.float32)
    # e_fc split into mu / logvar columns.
    w_fc = p["e_fc_w"].T                                               # (256, 2*Z)
    pp["mu_w"], pp["lv_w"] = w_fc[:, :Z_DIM], w_fc[:, Z_DIM:]
    pp["mu_b"] = p["e_fc_b"][:Z_DIM].reshape(1, -1)
    pp["lv_b"] = p["e_fc_b"][Z_DIM:].reshape(1, -1)
    # d_fc
    pp["dfc_w"] = p["d_fc_w"].T                                        # (Z, 256)
    pp["dfc_b"] = p["d_fc_b"].reshape(1, -1)
    # d1: ConvTranspose2d(256, 64, 4) on 1x1 input == matmul to (4*4*64) in (oy, ox, oc) order.
    pp["d1_w"] = p["d1_w"].transpose(0, 2, 3, 1).reshape(256, 4 * 4 * 64)
    pp["d1_b"] = jnp.tile(p["d1_b"], 16).reshape(1, -1)
    # d2..d5: stride-2 conv-transposes as sub-pixel convs (bf16 operands).
    for name in ("d2", "d3", "d4", "d5"):
        w_mat, b_mat = _convT_subpixel_weight(p[name + "_w"], p[name + "_b"])
        pp[name + "_w"] = w_mat.astype(jnp.bfloat16)
        pp[name + "_b"] = b_mat
    return pp


def init_params(key):
    """Deterministic synthetic kaiming-style init matching BetaVAE_H.__init__ shapes."""
    def kaiming(k, shape):
        fan_in = 1
        for s in shape[1:]:
            fan_in *= s
        return jax.random.normal(k, shape, jnp.float32) * jnp.sqrt(2.0 / fan_in)

    shapes = {
        "e1_w": (32, NC, 4, 4), "e2_w": (32, 32, 4, 4), "e3_w": (64, 32, 4, 4),
        "e4_w": (64, 64, 4, 4), "e5_w": (256, 64, 4, 4),
        "e_fc_w": (Z_DIM * 2, 256),
        "d_fc_w": (256, Z_DIM),
        "d1_w": (256, 64, 4, 4), "d2_w": (64, 64, 4, 4), "d3_w": (64, 32, 4, 4),
        "d4_w": (32, 32, 4, 4), "d5_w": (32, NC, 4, 4),
    }
    biases = {
        "e1_b": 32, "e2_b": 32, "e3_b": 64, "e4_b": 64, "e5_b": 256,
        "e_fc_b": Z_DIM * 2, "d_fc_b": 256,
        "d1_b": 64, "d2_b": 64, "d3_b": 32, "d4_b": 32, "d5_b": NC,
    }
    params = {}
    keys = jax.random.split(key, len(shapes))
    for k_rng, (name, shp) in zip(keys, sorted(shapes.items())):
        params[name] = kaiming(k_rng, shp)
    for name, n in biases.items():
        params[name] = jnp.zeros((n,), jnp.float32)
    return params


# ----------------------------------------------------------------------------
# Forward pass (BetaVAE_H.forward)
# ----------------------------------------------------------------------------
def betavae_forward(pp, x_nchw, eps):
    # External boundary: NCHW -> NHWC once, bf16 activations through the conv stack.
    x = jnp.transpose(x_nchw, (0, 2, 3, 1)).astype(jnp.bfloat16)           # (N,64,64,3)

    # ---- encoder ----
    h = conv2d_nhwc(x, pp["e1_w"], pp["e1_b"], 4, 4, 2, 1, True, jnp.bfloat16)  # (N,32,32,32)
    h = conv2d_nhwc(h, pp["e2_w"], pp["e2_b"], 4, 4, 2, 1, True, jnp.bfloat16)  # (N,16,16,32)
    h = conv2d_nhwc(h, pp["e3_w"], pp["e3_b"], 4, 4, 2, 1, True, jnp.bfloat16)  # (N,8,8,64)
    h = conv2d_nhwc(h, pp["e4_w"], pp["e4_b"], 4, 4, 2, 1, True, jnp.bfloat16)  # (N,4,4,64)
    h_flat = h.reshape(h.shape[0], 4 * 4 * 64)                                  # (N,1024)

    # ---- fused: e5 + e_fc + reparametrize + d_fc + d1 (one Pallas launch) ----
    mu, logvar, hd1 = latent_path(h_flat, eps, pp)
    h = hd1.reshape(-1, 4, 4, 64)                                               # (N,4,4,64)

    # ---- decoder (sub-pixel conv-transposes) ----
    h = conv_transpose2x_nhwc(h, pp["d2_w"], pp["d2_b"], True, jnp.bfloat16)    # (N,8,8,64)
    h = conv_transpose2x_nhwc(h, pp["d3_w"], pp["d3_b"], True, jnp.bfloat16)    # (N,16,16,32)
    h = conv_transpose2x_nhwc(h, pp["d4_w"], pp["d4_b"], True, jnp.bfloat16)    # (N,32,32,32)
    xr = conv_transpose2x_nhwc(h, pp["d5_w"], pp["d5_b"], False, jnp.float32)   # (N,64,64,3)

    x_recon = jnp.transpose(xr, (0, 3, 1, 2))                                   # back to NCHW
    return x_recon, mu, logvar


# ----------------------------------------------------------------------------
if __name__ == "__main__":
    key = jax.random.PRNGKey(0)
    k_param, k_x, k_eps = jax.random.split(key, 3)

    B = 2
    # Architecture implies 64x64 spatial input (4 stride-2 convs + one 4x4 valid conv -> 1x1).
    x = jax.random.normal(k_x, (B, NC, 64, 64), jnp.float32)
    eps = jax.random.normal(k_eps, (B, Z_DIM), jnp.float32)

    params = init_params(k_param)
    pp = prepare_params(params)          # one-time weight re-layout (hoisted out of forward)

    fwd = jax.jit(betavae_forward)
    x_recon, mu, logvar = fwd(pp, x, eps)
    jax.block_until_ready((x_recon, mu, logvar))

    assert x_recon.shape == (B, NC, 64, 64)
    assert mu.shape == (B, Z_DIM)
    assert logvar.shape == (B, Z_DIM)
    print("KERNEL_OK")
</pallas_src>

<mosaic_0001>
module attributes {stable_mosaic.version = 11 : i64} {
  func.func @_matmul_bias_act_kernel(%arg0: i32, %arg1: memref<512x48xbf16, #tpu.memory_space<vmem>>, %arg2: memref<48x32xbf16, #tpu.memory_space<vmem>>, %arg3: memref<1x32xf32, #tpu.memory_space<vmem>>, %arg4: memref<512x32xbf16, #tpu.memory_space<vmem>>) attributes {dimension_semantics = [#tpu.dimension_semantics<parallel>], iteration_bounds = array<i64: 4>, scalar_prefetch = 0 : i64, scratch_operands = 0 : i64, tpu.core_type = #tpu.core_type<tc>, window_params = [{transform_indices = @transform_0, window_bounds = array<i64: 512, 48>}, {pipeline_mode = #tpu.pipeline_mode<synchronous>, transform_indices = @transform_1, window_bounds = array<i64: 48, 32>}, {pipeline_mode = #tpu.pipeline_mode<synchronous>, transform_indices = @transform_2, window_bounds = array<i64: 1, 32>}, {transform_indices = @transform_3, window_bounds = array<i64: 512, 32>}]} {
    %c0 = arith.constant 0 : index
    %c0_0 = arith.constant 0 : index
    %0 = vector.load %arg1[%c0, %c0_0] : memref<512x48xbf16, #tpu.memory_space<vmem>>, vector<512x48xbf16>
    %c0_1 = arith.constant 0 : index
    %c0_2 = arith.constant 0 : index
    %1 = vector.load %arg2[%c0_1, %c0_2] : memref<48x32xbf16, #tpu.memory_space<vmem>>, vector<48x32xbf16>
    %cst = arith.constant dense<0.000000e+00> : vector<512x32xf32>
    %2 = tpu.matmul %0, %1, %cst {dimension_numbers = #tpu.dot_dimension_numbers<[1], [0], [0], [1], [0, 0, 1, 1], [], []>} : vector<512x48xbf16>, vector<48x32xbf16>, vector<512x32xf32> -> vector<512x32xf32>
    %c0_3 = arith.constant 0 : index
    %c0_4 = arith.constant 0 : index
    %3 = vector.load %arg3[%c0_3, %c0_4] : memref<1x32xf32, #tpu.memory_space<vmem>>, vector<1x32xf32>
    %4 = vector.broadcast %3 : vector<1x32xf32> to vector<512x32xf32>
    %5 = arith.addf %2, %4 : vector<512x32xf32>
    %cst_5 = arith.constant 0.000000e+00 : f32
    %6 = vector.broadcast %cst_5 : f32 to vector<512x32xf32>
    %7 = arith.maximumf %5, %6 : vector<512x32xf32>
    %8 = arith.truncf %7 : vector<512x32xf32> to vector<512x32xbf16>
    %c0_6 = arith.constant 0 : index
    %c0_7 = arith.constant 0 : index
    %9 = vector.load %arg4[%c0_6, %c0_7] : memref<512x32xbf16, #tpu.memory_space<vmem>>, vector<512x32xbf16>
    tpu.vector_store %arg4[%c0_6, %c0_7], %8 {strides = array<i32>} : memref<512x32xbf16, #tpu.memory_space<vmem>>, vector<512x32xbf16>,
    return
  }
  func.func @transform_0(%arg0: i32) -> (i32, i32) {
    %c0_i32 = arith.constant 0 : i32
    %c0_i32_0 = arith.constant 0 : i32
    return %arg0, %c0_i32 : i32, i32
  }
  func.func @transform_1(%arg0: i32) -> (i32, i32) {
    %c0_i32 = arith.constant 0 : i32
    %c0_i32_0 = arith.constant 0 : i32
    %c0_i32_1 = arith.constant 0 : i32
    return %c0_i32, %c0_i32_0 : i32, i32
  }
  func.func @transform_2(%arg0: i32) -> (i32, i32) {
    %c0_i32 = arith.constant 0 : i32
    %c0_i32_0 = arith.constant 0 : i32
    %c0_i32_1 = arith.constant 0 : i32
    return %c0_i32, %c0_i32_0 : i32, i32
  }
  func.func @transform_3(%arg0: i32) -> (i32, i32) {
    %c0_i32 = arith.constant 0 : i32
    %c0_i32_0 = arith.constant 0 : i32
    return %arg0, %c0_i32 : i32, i32
  }
}

module attributes {stable_mosaic.version = 11 : i64} {
  func.func @_matmul_bias_act_kernel(%arg0: i32, %arg1: memref<256x512xbf16, #tpu.memory_space<vmem>>, %arg2: memref<512x32xbf16, #tpu.memory_space<vmem>>, %arg3: memref<1x32xf32, #tpu.memory_space<vmem>>, %arg4: memref<256x32xbf16, #tpu.memory_space<vmem>>) attributes {dimension_semantics = [#tpu.dimension_semantics<parallel>], iteration_bounds = array<i64: 2>, scalar_prefetch = 0 : i64, scratch_operands = 0 : i64, tpu.core_type = #tpu.core_type<tc>, window_params = [{transform_indices = @transform_0, window_bounds = array<i64: 256, 512>}, {pipeline_mode = #tpu.pipeline_mode<synchronous>, transform_indices = @transform_1, window_bounds = array<i64: 512, 32>}, {pipeline_mode = #tpu.pipeline_mode<synchronous>, transform_indices = @transform_2, window_bounds = array<i64: 1, 32>}, {transform_indices = @transform_3, window_bounds = array<i64: 256, 32>}]} {
    %c0 = arith.constant 0 : index
    %c0_0 = arith.constant 0 : index
    %0 = vector.load %arg1[%c0, %c0_0] : memref<256x512xbf16, #tpu.memory_space<vmem>>, vector<256x512xbf16>
    %c0_1 = arith.constant 0 : index
    %c0_2 = arith.constant 0 : index
    %1 = vector.load %arg2[%c0_1, %c0_2] : memref<512x32xbf16, #tpu.memory_space<vmem>>, vector<512x32xbf16>
    %cst = arith.constant dense<0.000000e+00> : vector<256x32xf32>
    %2 = tpu.matmul %0, %1, %cst {dimension_numbers = #tpu.dot_dimension_numbers<[1], [0], [0], [1], [0, 0, 1, 1], [], []>} : vector<256x512xbf16>, vector<512x32xbf16>, vector<256x32xf32> -> vector<256x32xf32>
    %c0_3 = arith.constant 0 : index
    %c0_4 = arith.constant 0 : index
    %3 = vector.load %arg3[%c0_3, %c0_4] : memref<1x32xf32, #tpu.memory_space<vmem>>, vector<1x32xf32>
    %4 = vector.broadcast %3 : vector<1x32xf32> to vector<256x32xf32>
    %5 = arith.addf %2, %4 : vector<256x32xf32>
    %cst_5 = arith.constant 0.000000e+00 : f32
    %6 = vector.broadcast %cst_5 : f32 to vector<256x32xf32>
    %7 = arith.maximumf %5, %6 : vector<256x32xf32>
    %8 = arith.truncf %7 : vector<256x32xf32> to vector<256x32xbf16>
    %c0_6 = arith.constant 0 : index
    %c0_7 = arith.constant 0 : index
    %9 = vector.load %arg4[%c0_6, %c0_7] : memref<256x32xbf16, #tpu.memory_space<vmem>>, vector<256x32xbf16>
    tpu.vector_store %arg4[%c0_6, %c0_7], %8 {strides = array<i32>} : memref<256x32xbf16, #tpu.memory_space<vmem>>, vector<256x32xbf16>,
    return
  }
  func.func @transform_0(%arg0: i32) -> (i32, i32) {
    %c0_i32 = arith.constant 0 : i32
    %c0_i32_0 = arith.constant 0 : i32
    return %arg0, %c0_i32 : i32, i32
  }
  func.func @transform_1(%arg0: i32) -> (i32, i32) {
    %c0_i32 = arith.constant 0 : i32
    %c0_i32_0 = arith.constant 0 : i32
    %c0_i32_1 = arith.constant 0 : i32
    return %c0_i32, %c0_i32_0 : i32, i32
  }
  func.func @transform_2(%arg0: i32) -> (i32, i32) {
    %c0_i32 = arith.constant 0 : i32
    %c0_i32_0 = arith.constant 0 : i32
    %c0_i32_1 = arith.constant 0 : i32
    return %c0_i32, %c0_i32_0 : i32, i32
  }
  func.func @transform_3(%arg0: i32) -> (i32, i32) {
    %c0_i32 = arith.constant 0 : i32
    %c0_i32_0 = arith.constant 0 : i32
    return %arg0, %c0_i32 : i32, i32
  }
}

module attributes {stable_mosaic.version = 11 : i64} {
  func.func @_matmul_bias_act_kernel(%arg0: i32, %arg1: memref<128x512xbf16, #tpu.memory_space<vmem>>, %arg2: memref<512x64xbf16, #tpu.memory_space<vmem>>, %arg3: memref<1x64xf32, #tpu.memory_space<vmem>>, %arg4: memref<128x64xbf16, #tpu.memory_space<vmem>>) attributes {dimension_semantics = [#tpu.dimension_semantics<parallel>], iteration_bounds = array<i64: 1>, scalar_prefetch = 0 : i64, scratch_operands = 0 : i64, tpu.core_type = #tpu.core_type<tc>, window_params = [{transform_indices = @transform_0, window_bounds = array<i64: 128, 512>}, {pipeline_mode = #tpu.pipeline_mode<synchronous>, transform_indices = @transform_1, window_bounds = array<i64: 512, 64>}, {pipeline_mode = #tpu.pipeline_mode<synchronous>, transform_indices = @transform_2, window_bounds = array<i64: 1, 64>}, {transform_indices = @transform_3, window_bounds = array<i64: 128, 64>}]} {
    %c0 = arith.constant 0 : index
    %c0_0 = arith.constant 0 : index
    %0 = vector.load %arg1[%c0, %c0_0] : memref<128x512xbf16, #tpu.memory_space<vmem>>, vector<128x512xbf16>
    %c0_1 = arith.constant 0 : index
    %c0_2 = arith.constant 0 : index
    %1 = vector.load %arg2[%c0_1, %c0_2] : memref<512x64xbf16, #tpu.memory_space<vmem>>, vector<512x64xbf16>
    %cst = arith.constant dense<0.000000e+00> : vector<128x64xf32>
    %2 = tpu.matmul %0, %1, %cst {dimension_numbers = #tpu.dot_dimension_numbers<[1], [0], [0], [1], [0, 0, 1, 1], [], []>} : vector<128x512xbf16>, vector<512x64xbf16>, vector<128x64xf32> -> vector<128x64xf32>
    %c0_3 = arith.constant 0 : index
    %c0_4 = arith.constant 0 : index
    %3 = vector.load %arg3[%c0_3, %c0_4] : memref<1x64xf32, #tpu.memory_space<vmem>>, vector<1x64xf32>
    %4 = vector.broadcast %3 : vector<1x64xf32> to vector<128x64xf32>
    %5 = arith.addf %2, %4 : vector<128x64xf32>
    %cst_5 = arith.constant 0.000000e+00 : f32
    %6 = vector.broadcast %cst_5 : f32 to vector<128x64xf32>
    %7 = arith.maximumf %5, %6 : vector<128x64xf32>
    %8 = arith.truncf %7 : vector<128x64xf32> to vector<128x64xbf16>
    %c0_6 = arith.constant 0 : index
    %c0_7 = arith.constant 0 : index
    %9 = vector.load %arg4[%c0_6, %c0_7] : memref<128x64xbf16, #tpu.memory_space<vmem>>, vector<128x64xbf16>
    tpu.vector_store %arg4[%c0_6, %c0_7], %8 {strides = array<i32>} : memref<128x64xbf16, #tpu.memory_space<vmem>>, vector<128x64xbf16>,
    return
  }
  func.func @transform_0(%arg0: i32) -> (i32, i32) {
    %c0_i32 = arith.constant 0 : i32
    %c0_i32_0 = arith.constant 0 : i32
    return %arg0, %c0_i32 : i32, i32
  }
  func.func @transform_1(%arg0: i32) -> (i32, i32) {
    %c0_i32 = arith.constant 0 : i32
    %c0_i32_0 = arith.constant 0 : i32
    %c0_i32_1 = arith.constant 0 : i32
    return %c0_i32, %c0_i32_0 : i32, i32
  }
  func.func @transform_2(%arg0: i32) -> (i32, i32) {
    %c0_i32 = arith.constant 0 : i32
    %c0_i32_0 = arith.constant 0 : i32
    %c0_i32_1 = arith.constant 0 : i32
    return %c0_i32, %c0_i32_0 : i32, i32
  }
  func.func @transform_3(%arg0: i32) -> (i32, i32) {
    %c0_i32 = arith.constant 0 : i32
    %c0_i32_0 = arith.constant 0 : i32
    return %arg0, %c0_i32 : i32, i32
  }
}

module attributes {stable_mosaic.version = 11 : i64} {
  func.func @_matmul_bias_act_kernel(%arg0: i32, %arg1: memref<32x1024xbf16, #tpu.memory_space<vmem>>, %arg2: memref<1024x64xbf16, #tpu.memory_space<vmem>>, %arg3: memref<1x64xf32, #tpu.memory_space<vmem>>, %arg4: memref<32x64xbf16, #tpu.memory_space<vmem>>) attributes {dimension_semantics = [#tpu.dimension_semantics<parallel>], iteration_bounds = array<i64: 1>, scalar_prefetch = 0 : i64, scratch_operands = 0 : i64, tpu.core_type = #tpu.core_type<tc>, window_params = [{transform_indices = @transform_0, window_bounds = array<i64: 32, 1024>}, {pipeline_mode = #tpu.pipeline_mode<synchronous>, transform_indices = @transform_1, window_bounds = array<i64: 1024, 64>}, {pipeline_mode = #tpu.pipeline_mode<synchronous>, transform_indices = @transform_2, window_bounds = array<i64: 1, 64>}, {transform_indices = @transform_3, window_bounds = array<i64: 32, 64>}]} {
    %c0 = arith.constant 0 : index
    %c0_0 = arith.constant 0 : index
    %0 = vector.load %arg1[%c0, %c0_0] : memref<32x1024xbf16, #tpu.memory_space<vmem>>, vector<32x1024xbf16>
    %c0_1 = arith.constant 0 : index
    %c0_2 = arith.constant 0 : index
    %1 = vector.load %arg2[%c0_1, %c0_2] : memref<1024x64xbf16, #tpu.memory_space<vmem>>, vector<1024x64xbf16>
    %cst = arith.constant dense<0.000000e+00> : vector<32x64xf32>
    %2 = tpu.matmul %0, %1, %cst {dimension_numbers = #tpu.dot_dimension_numbers<[1], [0], [0], [1], [0, 0, 1, 1], [], []>} : vector<32x1024xbf16>, vector<1024x64xbf16>, vector<32x64xf32> -> vector<32x64xf32>
    %c0_3 = arith.constant 0 : index
    %c0_4 = arith.constant 0 : index
    %3 = vector.load %arg3[%c0_3, %c0_4] : memref<1x64xf32, #tpu.memory_space<vmem>>, vector<1x64xf32>
    %4 = vector.broadcast %3 : vector<1x64xf32> to vector<32x64xf32>
    %5 = arith.addf %2, %4 : vector<32x64xf32>
    %cst_5 = arith.constant 0.000000e+00 : f32
    %6 = vector.broadcast %cst_5 : f32 to vector<32x64xf32>
    %7 = arith.maximumf %5, %6 : vector<32x64xf32>
    %8 = arith.truncf %7 : vector<32x64xf32> to vector<32x64xbf16>
    %c0_6 = arith.constant 0 : index
    %c0_7 = arith.constant 0 : index
    %9 = vector.load %arg4[%c0_6, %c0_7] : memref<32x64xbf16, #tpu.memory_space<vmem>>, vector<32x64xbf16>
    tpu.vector_store %arg4[%c0_6, %c0_7], %8 {strides = array<i32>} : memref<32x64xbf16, #tpu.memory_space<vmem>>, vector<32x64xbf16>,
    return
  }
  func.func @transform_0(%arg0: i32) -> (i32, i32) {
    %c0_i32 = arith.constant 0 : i32
    %c0_i32_0 = arith.constant 0 : i32
    return %arg0, %c0_i32 : i32, i32
  }
  func.func @transform_1(%arg0: i32) -> (i32, i32) {
    %c0_i32 = arith.constant 0 : i32
    %c0_i32_0 = arith.constant 0 : i32
    %c0_i32_1 = arith.constant 0 : i32
    return %c0_i32, %c0_i32_0 : i32, i32
  }
  func.func @transform_2(%arg0: i32) -> (i32, i32) {
    %c0_i32 = arith.constant 0 : i32
    %c0_i32_0 = arith.constant 0 : i32
    %c0_i32_1 = arith.constant 0 : i32
    return %c0_i32, %c0_i32_0 : i32, i32
  }
  func.func @transform_3(%arg0: i32) -> (i32, i32) {
    %c0_i32 = arith.constant 0 : i32
    %c0_i32_0 = arith.constant 0 : i32
    return %arg0, %c0_i32 : i32, i32
  }
}

module attributes {stable_mosaic.version = 11 : i64} {
  func.func @_latent_kernel(%arg0: memref<2x1024xbf16, #tpu.memory_space<vmem>>, %arg1: memref<2x10xf32, #tpu.memory_space<vmem>>, %arg2: memref<1024x256xf32, #tpu.memory_space<vmem>>, %arg3: memref<1x256xf32, #tpu.memory_space<vmem>>, %arg4: memref<256x10xf32, #tpu.memory_space<vmem>>, %arg5: memref<1x10xf32, #tpu.memory_space<vmem>>, %arg6: memref<256x10xf32, #tpu.memory_space<vmem>>, %arg7: memref<1x10xf32, #tpu.memory_space<vmem>>, %arg8: memref<10x256xf32, #tpu.memory_space<vmem>>, %arg9: memref<1x256xf32, #tpu.memory_space<vmem>>, %arg10: memref<256x1024xf32, #tpu.memory_space<vmem>>, %arg11: memref<1x1024xf32, #tpu.memory_space<vmem>>, %arg12: memref<2x10xf32, #tpu.memory_space<vmem>>, %arg13: memref<2x10xf32, #tpu.memory_space<vmem>>, %arg14: memref<2x1024xbf16, #tpu.memory_space<vmem>>) attributes {dimension_semantics = [], scalar_prefetch = 0 : i64, scratch_operands = 0 : i64, tpu.core_type = #tpu.core_type<tc>} {
    %c0 = arith.constant 0 : index
    %c0_0 = arith.constant 0 : index
    %0 = vector.load %arg0[%c0, %c0_0] : memref<2x1024xbf16, #tpu.memory_space<vmem>>, vector<2x1024xbf16>
    %1 = arith.extf %0 : vector<2x1024xbf16> to vector<2x1024xf32>
    %c0_1 = arith.constant 0 : index
    %c0_2 = arith.constant 0 : index
    %2 = vector.load %arg2[%c0_1, %c0_2] : memref<1024x256xf32, #tpu.memory_space<vmem>>, vector<1024x256xf32>
    %cst = arith.constant dense<0.000000e+00> : vector<2x256xf32>
    %3 = tpu.matmul %1, %2, %cst {dimension_numbers = #tpu.dot_dimension_numbers<[1], [0], [0], [1], [0, 0, 1, 1], [], []>} : vector<2x1024xf32>, vector<1024x256xf32>, vector<2x256xf32> -> vector<2x256xf32>
    %c0_3 = arith.constant 0 : index
    %c0_4 = arith.constant 0 : index
    %4 = vector.load %arg3[%c0_3, %c0_4] : memref<1x256xf32, #tpu.memory_space<vmem>>, vector<1x256xf32>
    %5 = vector.broadcast %4 : vector<1x256xf32> to vector<2x256xf32>
    %6 = arith.addf %3, %5 : vector<2x256xf32>
    %cst_5 = arith.constant 0.000000e+00 : f32
    %7 = vector.broadcast %cst_5 : f32 to vector<2x256xf32>
    %8 = arith.maximumf %6, %7 : vector<2x256xf32>
    %c0_6 = arith.constant 0 : index
    %c0_7 = arith.constant 0 : index
    %9 = vector.load %arg4[%c0_6, %c0_7] : memref<256x10xf32, #tpu.memory_space<vmem>>, vector<256x10xf32>
    %cst_8 = arith.constant dense<0.000000e+00> : vector<2x10xf32>
    %10 = tpu.matmul %8, %9, %cst_8 {dimension_numbers = #tpu.dot_dimension_numbers<[1], [0], [0], [1], [0, 0, 1, 1], [], []>} : vector<2x256xf32>, vector<256x10xf32>, vector<2x10xf32> -> vector<2x10xf32>
    %c0_9 = arith.constant 0 : index
    %c0_10 = arith.constant 0 : index
    %11 = vector.load %arg5[%c0_9, %c0_10] : memref<1x10xf32, #tpu.memory_space<vmem>>, vector<1x10xf32>
    %12 = vector.broadcast %11 : vector<1x10xf32> to vector<2x10xf32>
    %13 = arith.addf %10, %12 : vector<2x10xf32>
    %c0_11 = arith.constant 0 : index
    %c0_12 = arith.constant 0 : index
    %14 = vector.load %arg6[%c0_11, %c0_12] : memref<256x10xf32, #tpu.memory_space<vmem>>, vector<256x10xf32>
    %cst_13 = arith.constant dense<0.000000e+00> : vector<2x10xf32>
    %15 = tpu.matmul %8, %14, %cst_13 {dimension_numbers = #tpu.dot_dimension_numbers<[1], [0], [0], [1], [0, 0, 1, 1], [], []>} : vector<2x256xf32>, vector<256x10xf32>, vector<2x10xf32> -> vector<2x10xf32>
    %c0_14 = arith.constant 0 : index
    %c0_15 = arith.constant 0 : index
    %16 = vector.load %arg7[%c0_14, %c0_15] : memref<1x10xf32, #tpu.memory_space<vmem>>, vector<1x10xf32>
    %17 = vector.broadcast %16 : vector<1x10xf32> to vector<2x10xf32>
    %18 = arith.addf %15, %17 : vector<2x10xf32>
    %cst_16 = arith.constant 5.000000e-01 : f32
    %19 = vector.broadcast %cst_16 : f32 to vector<2x10xf32>
    %20 = arith.mulf %19, %18 : vector<2x10xf32>
    %21 = math.exp %20 : vector<2x10xf32>
    %c0_17 = arith.constant 0 : index
    %c0_18 = arith.constant 0 : index
    %22 = vector.load %arg1[%c0_17, %c0_18] : memref<2x10xf32, #tpu.memory_space<vmem>>, vector<2x10xf32>
    %23 = arith.mulf %21, %22 : vector<2x10xf32>
    %24 = arith.addf %13, %23 : vector<2x10xf32>
    %c0_19 = arith.constant 0 : index
    %c0_20 = arith.constant 0 : index
    %25 = vector.load %arg8[%c0_19, %c0_20] : memref<10x256xf32, #tpu.memory_space<vmem>>, vector<10x256xf32>
    %cst_21 = arith.constant dense<0.000000e+00> : vector<2x256xf32>
    %26 = tpu.matmul %24, %25, %cst_21 {dimension_numbers = #tpu.dot_dimension_numbers<[1], [0], [0], [1], [0, 0, 1, 1], [], []>} : vector<2x10xf32>, vector<10x256xf32>, vector<2x256xf32> -> vector<2x256xf32>
    %c0_22 = arith.constant 0 : index
    %c0_23 = arith.constant 0 : index
    %27 = vector.load %arg9[%c0_22, %c0_23] : memref<1x256xf32, #tpu.memory_space<vmem>>, vector<1x256xf32>
    %28 = vector.broadcast %27 : vector<1x256xf32> to vector<2x256xf32>
    %29 = arith.addf %26, %28 : vector<2x256xf32>
    %cst_24 = arith.constant 0.000000e+00 : f32
    %30 = vector.broadcast %cst_24 : f32 to vector<2x256xf32>
    %31 = arith.maximumf %29, %30 : vector<2x256xf32>
    %c0_25 = arith.constant 0 : index
    %c0_26 = arith.constant 0 : index
    %32 = vector.load %arg10[%c0_25, %c0_26] : memref<256x1024xf32, #tpu.memory_space<vmem>>, vector<256x1024xf32>
    %cst_27 = arith.constant dense<0.000000e+00> : vector<2x1024xf32>
    %33 = tpu.matmul %31, %32, %cst_27 {dimension_numbers = #tpu.dot_dimension_numbers<[1], [0], [0], [1], [0, 0, 1, 1], [], []>} : vector<2x256xf32>, vector<256x1024xf32>, vector<2x1024xf32> -> vector<2x1024xf32>
    %c0_28 = arith.constant 0 : index
    %c0_29 = arith.constant 0 : index
    %34 = vector.load %arg11[%c0_28, %c0_29] : memref<1x1024xf32, #tpu.memory_space<vmem>>, vector<1x1024xf32>
    %35 = vector.broadcast %34 : vector<1x1024xf32> to vector<2x1024xf32>
    %36 = arith.addf %33, %35 : vector<2x1024xf32>
    %cst_30 = arith.constant 0.000000e+00 : f32
    %37 = vector.broadcast %cst_30 : f32 to vector<2x1024xf32>
    %38 = arith.maximumf %36, %37 : vector<2x1024xf32>
    %c0_31 = arith.constant 0 : index
    %c0_32 = arith.constant 0 : index
    %39 = vector.load %arg12[%c0_31, %c0_32] : memref<2x10xf32, #tpu.memory_space<vmem>>, vector<2x10xf32>
    tpu.vector_store %arg12[%c0_31, %c0_32], %13 {strides = array<i32>} : memref<2x10xf32, #tpu.memory_space<vmem>>, vector<2x10xf32>,
    %c0_33 = arith.constant 0 : index
    %c0_34 = arith.constant 0 : index
    %40 = vector.load %arg13[%c0_33, %c0_34] : memref<2x10xf32, #tpu.memory_space<vmem>>, vector<2x10xf32>
    tpu.vector_store %arg13[%c0_33, %c0_34], %18 {strides = array<i32>} : memref<2x10xf32, #tpu.memory_space<vmem>>, vector<2x10xf32>,
    %41 = arith.truncf %38 : vector<2x1024xf32> to vector<2x1024xbf16>
    %c0_35 = arith.constant 0 : index
    %c0_36 = arith.constant 0 : index
    %42 = vector.load %arg14[%c0_35, %c0_36] : memref<2x1024xbf16, #tpu.memory_space<vmem>>, vector<2x1024xbf16>
    tpu.vector_store %arg14[%c0_35, %c0_36], %41 {strides = array<i32>} : memref<2x1024xbf16, #tpu.memory_space<vmem>>, vector<2x1024xbf16>,
    return
  }
}

module attributes {stable_mosaic.version = 11 : i64} {
  func.func @_matmul_bias_act_kernel(%arg0: i32, %arg1: memref<32x576xbf16, #tpu.memory_space<vmem>>, %arg2: memref<576x256xbf16, #tpu.memory_space<vmem>>, %arg3: memref<1x256xf32, #tpu.memory_space<vmem>>, %arg4: memref<32x256xbf16, #tpu.memory_space<vmem>>) attributes {dimension_semantics = [#tpu.dimension_semantics<parallel>], iteration_bounds = array<i64: 1>, scalar_prefetch = 0 : i64, scratch_operands = 0 : i64, tpu.core_type = #tpu.core_type<tc>, window_params = [{transform_indices = @transform_0, window_bounds = array<i64: 32, 576>}, {pipeline_mode = #tpu.pipeline_mode<synchronous>, transform_indices = @transform_1, window_bounds = array<i64: 576, 256>}, {pipeline_mode = #tpu.pipeline_mode<synchronous>, transform_indices = @transform_2, window_bounds = array<i64: 1, 256>}, {transform_indices = @transform_3, window_bounds = array<i64: 32, 256>}]} {
    %c0 = arith.constant 0 : index
    %c0_0 = arith.constant 0 : index
    %0 = vector.load %arg1[%c0, %c0_0] : memref<32x576xbf16, #tpu.memory_space<vmem>>, vector<32x576xbf16>
    %c0_1 = arith.constant 0 : index
    %c0_2 = arith.constant 0 : index
    %1 = vector.load %arg2[%c0_1, %c0_2] : memref<576x256xbf16, #tpu.memory_space<vmem>>, vector<576x256xbf16>
    %cst = arith.constant dense<0.000000e+00> : vector<32x256xf32>
    %2 = tpu.matmul %0, %1, %cst {dimension_numbers = #tpu.dot_dimension_numbers<[1], [0], [0], [1], [0, 0, 1, 1], [], []>} : vector<32x576xbf16>, vector<576x256xbf16>, vector<32x256xf32> -> vector<32x256xf32>
    %c0_3 = arith.constant 0 : index
    %c0_4 = arith.constant 0 : index
    %3 = vector.load %arg3[%c0_3, %c0_4] : memref<1x256xf32, #tpu.memory_space<vmem>>, vector<1x256xf32>
    %4 = vector.broadcast %3 : vector<1x256xf32> to vector<32x256xf32>
    %5 = arith.addf %2, %4 : vector<32x256xf32>
    %cst_5 = arith.constant 0.000000e+00 : f32
    %6 = vector.broadcast %cst_5 : f32 to vector<32x256xf32>
    %7 = arith.maximumf %5, %6 : vector<32x256xf32>
    %8 = arith.truncf %7 : vector<32x256xf32> to vector<32x256xbf16>
    %c0_6 = arith.constant 0 : index
    %c0_7 = arith.constant 0 : index
    %9 = vector.load %arg4[%c0_6, %c0_7] : memref<32x256xbf16, #tpu.memory_space<vmem>>, vector<32x256xbf16>
    tpu.vector_store %arg4[%c0_6, %c0_7], %8 {strides = array<i32>} : memref<32x256xbf16, #tpu.memory_space<vmem>>, vector<32x256xbf16>,
    return
  }
  func.func @transform_0(%arg0: i32) -> (i32, i32) {
    %c0_i32 = arith.constant 0 : i32
    %c0_i32_0 = arith.constant 0 : i32
    return %arg0, %c0_i32 : i32, i32
  }
  func.func @transform_1(%arg0: i32) -> (i32, i32) {
    %c0_i32 = arith.constant 0 : i32
    %c0_i32_0 = arith.constant 0 : i32
    %c0_i32_1 = arith.constant 0 : i32
    return %c0_i32, %c0_i32_0 : i32, i32
  }
  func.func @transform_2(%arg0: i32) -> (i32, i32) {
    %c0_i32 = arith.constant 0 : i32
    %c0_i32_0 = arith.constant 0 : i32
    %c0_i32_1 = arith.constant 0 : i32
    return %c0_i32, %c0_i32_0 : i32, i32
  }
  func.func @transform_3(%arg0: i32) -> (i32, i32) {
    %c0_i32 = arith.constant 0 : i32
    %c0_i32_0 = arith.constant 0 : i32
    return %arg0, %c0_i32 : i32, i32
  }
}

module attributes {stable_mosaic.version = 11 : i64} {
  func.func @_matmul_bias_act_kernel(%arg0: i32, %arg1: memref<128x576xbf16, #tpu.memory_space<vmem>>, %arg2: memref<576x128xbf16, #tpu.memory_space<vmem>>, %arg3: memref<1x128xf32, #tpu.memory_space<vmem>>, %arg4: memref<128x128xbf16, #tpu.memory_space<vmem>>) attributes {dimension_semantics = [#tpu.dimension_semantics<parallel>], iteration_bounds = array<i64: 1>, scalar_prefetch = 0 : i64, scratch_operands = 0 : i64, tpu.core_type = #tpu.core_type<tc>, window_params = [{transform_indices = @transform_0, window_bounds = array<i64: 128, 576>}, {pipeline_mode = #tpu.pipeline_mode<synchronous>, transform_indices = @transform_1, window_bounds = array<i64: 576, 128>}, {pipeline_mode = #tpu.pipeline_mode<synchronous>, transform_indices = @transform_2, window_bounds = array<i64: 1, 128>}, {transform_indices = @transform_3, window_bounds = array<i64: 128, 128>}]} {
    %c0 = arith.constant 0 : index
    %c0_0 = arith.constant 0 : index
    %0 = vector.load %arg1[%c0, %c0_0] : memref<128x576xbf16, #tpu.memory_space<vmem>>, vector<128x576xbf16>
    %c0_1 = arith.constant 0 : index
    %c0_2 = arith.constant 0 : index
    %1 = vector.load %arg2[%c0_1, %c0_2] : memref<576x128xbf16, #tpu.memory_space<vmem>>, vector<576x128xbf16>
    %cst = arith.constant dense<0.000000e+00> : vector<128x128xf32>
    %2 = tpu.matmul %0, %1, %cst {dimension_numbers = #tpu.dot_dimension_numbers<[1], [0], [0], [1], [0, 0, 1, 1], [], []>} : vector<128x576xbf16>, vector<576x128xbf16>, vector<128x128xf32> -> vector<128x128xf32>
    %c0_3 = arith.constant 0 : index
    %c0_4 = arith.constant 0 : index
    %3 = vector.load %arg3[%c0_3, %c0_4] : memref<1x128xf32, #tpu.memory_space<vmem>>, vector<1x128xf32>
    %4 = vector.broadcast %3 : vector<1x128xf32> to vector<128x128xf32>
    %5 = arith.addf %2, %4 : vector<128x128xf32>
    %cst_5 = arith.constant 0.000000e+00 : f32
    %6 = vector.broadcast %cst_5 : f32 to vector<128x128xf32>
    %7 = arith.maximumf %5, %6 : vector<128x128xf32>
    %8 = arith.truncf %7 : vector<128x128xf32> to vector<128x128xbf16>
    %c0_6 = arith.constant 0 : index
    %c0_7 = arith.constant 0 : index
    %9 = vector.load %arg4[%c0_6, %c0_7] : memref<128x128xbf16, #tpu.memory_space<vmem>>, vector<128x128xbf16>
    tpu.vector_store %arg4[%c0_6, %c0_7], %8 {strides = array<i32>} : memref<128x128xbf16, #tpu.memory_space<vmem>>, vector<128x128xbf16>,
    return
  }
  func.func @transform_0(%arg0: i32) -> (i32, i32) {
    %c0_i32 = arith.constant 0 : i32
    %c0_i32_0 = arith.constant 0 : i32
    return %arg0, %c0_i32 : i32, i32
  }
  func.func @transform_1(%arg0: i32) -> (i32, i32) {
    %c0_i32 = arith.constant 0 : i32
    %c0_i32_0 = arith.constant 0 : i32
    %c0_i32_1 = arith.constant 0 : i32
    return %c0_i32, %c0_i32_0 : i32, i32
  }
  func.func @transform_2(%arg0: i32) -> (i32, i32) {
    %c0_i32 = arith.constant 0 : i32
    %c0_i32_0 = arith.constant 0 : i32
    %c0_i32_1 = arith.constant 0 : i32
    return %c0_i32, %c0_i32_0 : i32, i32
  }
  func.func @transform_3(%arg0: i32) -> (i32, i32) {
    %c0_i32 = arith.constant 0 : i32
    %c0_i32_0 = arith.constant 0 : i32
    return %arg0, %c0_i32 : i32, i32
  }
}

module attributes {stable_mosaic.version = 11 : i64} {
  func.func @_matmul_bias_act_kernel(%arg0: i32, %arg1: memref<256x288xbf16, #tpu.memory_space<vmem>>, %arg2: memref<288x128xbf16, #tpu.memory_space<vmem>>, %arg3: memref<1x128xf32, #tpu.memory_space<vmem>>, %arg4: memref<256x128xbf16, #tpu.memory_space<vmem>>) attributes {dimension_semantics = [#tpu.dimension_semantics<parallel>], iteration_bounds = array<i64: 2>, scalar_prefetch = 0 : i64, scratch_operands = 0 : i64, tpu.core_type = #tpu.core_type<tc>, window_params = [{transform_indices = @transform_0, window_bounds = array<i64: 256, 288>}, {pipeline_mode = #tpu.pipeline_mode<synchronous>, transform_indices = @transform_1, window_bounds = array<i64: 288, 128>}, {pipeline_mode = #tpu.pipeline_mode<synchronous>, transform_indices = @transform_2, window_bounds = array<i64: 1, 128>}, {transform_indices = @transform_3, window_bounds = array<i64: 256, 128>}]} {
    %c0 = arith.constant 0 : index
    %c0_0 = arith.constant 0 : index
    %0 = vector.load %arg1[%c0, %c0_0] : memref<256x288xbf16, #tpu.memory_space<vmem>>, vector<256x288xbf16>
    %c0_1 = arith.constant 0 : index
    %c0_2 = arith.constant 0 : index
    %1 = vector.load %arg2[%c0_1, %c0_2] : memref<288x128xbf16, #tpu.memory_space<vmem>>, vector<288x128xbf16>
    %cst = arith.constant dense<0.000000e+00> : vector<256x128xf32>
    %2 = tpu.matmul %0, %1, %cst {dimension_numbers = #tpu.dot_dimension_numbers<[1], [0], [0], [1], [0, 0, 1, 1], [], []>} : vector<256x288xbf16>, vector<288x128xbf16>, vector<256x128xf32> -> vector<256x128xf32>
    %c0_3 = arith.constant 0 : index
    %c0_4 = arith.constant 0 : index
    %3 = vector.load %arg3[%c0_3, %c0_4] : memref<1x128xf32, #tpu.memory_space<vmem>>, vector<1x128xf32>
    %4 = vector.broadcast %3 : vector<1x128xf32> to vector<256x128xf32>
    %5 = arith.addf %2, %4 : vector<256x128xf32>
    %cst_5 = arith.constant 0.000000e+00 : f32
    %6 = vector.broadcast %cst_5 : f32 to vector<256x128xf32>
    %7 = arith.maximumf %5, %6 : vector<256x128xf32>
    %8 = arith.truncf %7 : vector<256x128xf32> to vector<256x128xbf16>
    %c0_6 = arith.constant 0 : index
    %c0_7 = arith.constant 0 : index
    %9 = vector.load %arg4[%c0_6, %c0_7] : memref<256x128xbf16, #tpu.memory_space<vmem>>, vector<256x128xbf16>
    tpu.vector_store %arg4[%c0_6, %c0_7], %8 {strides = array<i32>} : memref<256x128xbf16, #tpu.memory_space<vmem>>, vector<256x128xbf16>,
    return
  }
  func.func @transform_0(%arg0: i32) -> (i32, i32) {
    %c0_i32 = arith.constant 0 : i32
    %c0_i32_0 = arith.constant 0 : i32
    return %arg0, %c0_i32 : i32, i32
  }
  func.func @transform_1(%arg0: i32) -> (i32, i32) {
    %c0_i32 = arith.constant 0 : i32
    %c0_i32_0 = arith.constant 0 : i32
    %c0_i32_1 = arith.constant 0 : i32
    return %c0_i32, %c0_i32_0 : i32, i32
  }
  func.func @transform_2(%arg0: i32) -> (i32, i32) {
    %c0_i32 = arith.constant 0 : i32
    %c0_i32_0 = arith.constant 0 : i32
    %c0_i32_1 = arith.constant 0 : i32
    return %c0_i32, %c0_i32_0 : i32, i32
  }
  func.func @transform_3(%arg0: i32) -> (i32, i32) {
    %c0_i32 = arith.constant 0 : i32
    %c0_i32_0 = arith.constant 0 : i32
    return %arg0, %c0_i32 : i32, i32
  }
}

module attributes {stable_mosaic.version = 11 : i64} {
  func.func @_matmul_bias_act_kernel(%arg0: i32, %arg1: memref<512x288xbf16, #tpu.memory_space<vmem>>, %arg2: memref<288x12xbf16, #tpu.memory_space<vmem>>, %arg3: memref<1x12xf32, #tpu.memory_space<vmem>>, %arg4: memref<512x12xf32, #tpu.memory_space<vmem>>) attributes {dimension_semantics = [#tpu.dimension_semantics<parallel>], iteration_bounds = array<i64: 4>, scalar_prefetch = 0 : i64, scratch_operands = 0 : i64, tpu.core_type = #tpu.core_type<tc>, window_params = [{transform_indices = @transform_0, window_bounds = array<i64: 512, 288>}, {pipeline_mode = #tpu.pipeline_mode<synchronous>, transform_indices = @transform_1, window_bounds = array<i64: 288, 12>}, {pipeline_mode = #tpu.pipeline_mode<synchronous>, transform_indices = @transform_2, window_bounds = array<i64: 1, 12>}, {transform_indices = @transform_3, window_bounds = array<i64: 512, 12>}]} {
    %c0 = arith.constant 0 : index
    %c0_0 = arith.constant 0 : index
    %0 = vector.load %arg1[%c0, %c0_0] : memref<512x288xbf16, #tpu.memory_space<vmem>>, vector<512x288xbf16>
    %c0_1 = arith.constant 0 : index
    %c0_2 = arith.constant 0 : index
    %1 = vector.load %arg2[%c0_1, %c0_2] : memref<288x12xbf16, #tpu.memory_space<vmem>>, vector<288x12xbf16>
    %cst = arith.constant dense<0.000000e+00> : vector<512x12xf32>
    %2 = tpu.matmul %0, %1, %cst {dimension_numbers = #tpu.dot_dimension_numbers<[1], [0], [0], [1], [0, 0, 1, 1], [], []>} : vector<512x288xbf16>, vector<288x12xbf16>, vector<512x12xf32> -> vector<512x12xf32>
    %c0_3 = arith.constant 0 : index
    %c0_4 = arith.constant 0 : index
    %3 = vector.load %arg3[%c0_3, %c0_4] : memref<1x12xf32, #tpu.memory_space<vmem>>, vector<1x12xf32>
    %4 = vector.broadcast %3 : vector<1x12xf32> to vector<512x12xf32>
    %5 = arith.addf %2, %4 : vector<512x12xf32>
    %c0_5 = arith.constant 0 : index
    %c0_6 = arith.constant 0 : index
    %6 = vector.load %arg4[%c0_5, %c0_6] : memref<512x12xf32, #tpu.memory_space<vmem>>, vector<512x12xf32>
    tpu.vector_store %arg4[%c0_5, %c0_6], %5 {strides = array<i32>} : memref<512x12xf32, #tpu.memory_space<vmem>>, vector<512x12xf32>,
    return
  }
  func.func @transform_0(%arg0: i32) -> (i32, i32) {
    %c0_i32 = arith.constant 0 : i32
    %c0_i32_0 = arith.constant 0 : i32
    return %arg0, %c0_i32 : i32, i32
  }
  func.func @transform_1(%arg0: i32) -> (i32, i32) {
    %c0_i32 = arith.constant 0 : i32
    %c0_i32_0 = arith.constant 0 : i32
    %c0_i32_1 = arith.constant 0 : i32
    return %c0_i32, %c0_i32_0 : i32, i32
  }
  func.func @transform_2(%arg0: i32) -> (i32, i32) {
    %c0_i32 = arith.constant 0 : i32
    %c0_i32_0 = arith.constant 0 : i32
    %c0_i32_1 = arith.constant 0 : i32
    return %c0_i32, %c0_i32_0 : i32, i32
  }
  func.func @transform_3(%arg0: i32) -> (i32, i32) {
    %c0_i32 = arith.constant 0 : i32
    %c0_i32_0 = arith.constant 0 : i32
    return %arg0, %c0_i32 : i32, i32
  }
}

</mosaic_0001>

<bundles_post_ra>
// kernel: betavae_forward.9
= control target key start
LH: loop header
LB: loop body
LE: loop exit
PB: predicated region body
PF: predicated region fallthrough
CT: control target
= control target key end

     0   :  { %s1646_s12 = smov 0   ;;  %s1944_s0 = inlined_call_operand.vmem [shape: bf16[2048,48], index: 0, kind: input, shape index: {}]   ;;  %s1945_s1 = inlined_call_operand.vmem [shape: bf16[48,32], index: 1, kind: input, shape index: {}]   ;;  %s1946_s2 = inlined_call_operand.vmem [shape: f32[1,32], index: 2, kind: input, shape index: {}]   ;;  %s1947_s3 = inlined_call_operand.vmem [shape: bf16[2048,32], index: 3, kind: output, shape index: {}]  }
   0x1 LB: > { %s1257_s13 = sadd.s32 4294967295, %s1624_s12   ;;  %p1261_p0 = scmp.ge.s32.totalorder %s1624_s12, 1  ;;  %s1624_s12 = sphi %s1646_s12, %s13_s12  }
   0x2   : > { %p138_p1 = scmp.lt.s32.totalorder %s1624_s12, 5 }
   0x4   : > { %p139_p2 = pnand %p1261_p0, %p138_p1 }
   0x5   : > { %v1583_v0 = vld [vmem:[%s1945_s1] sm:$0xff] (!%p139_p2)   ;;  %s1262_s16 = sshll.u32 (!%p139_p2), %s1257_s13, 6  ;;  %v1584_v1 = vld [vmem:[%s1945_s1 + $0x8] sm:$0xff] (!%p139_p2)   ;;  %v1585_v2 = vld [vmem:[%s1945_s1 + $0x10] sm:$0xff] (!%p139_p2)   ;;  %vm430_vm0 = vcmask (!%p139_p2), 392192   ;;  %vm1136_vm1 = vcmask (!%p139_p2), 257024  }
   0x6   : > { %142 = sbr.rel (%p139_p2) target bundleno = 297 (0x129), region = 32  ;;  %p163_p3 = scmp.lt.s32.totalorder (!%p139_p2), %s1262_s16, 255  ;;  %1499 = vmatprep.subr.bf16.mxu0 (!%p139_p2), %v1583_v0  ;;  %1569 = vmatprep.subr.bf16.mxu1 (!%p139_p2), %v1583_v0  ;;  %v1740_v35 = vld [vmem:[%s1946_s2] ss:$0 sm:$0xff] (!%p139_p2) }
   0x7   : > { %1500 = vmatpush3.bf16.msra.mxu0 (!%p139_p2), %v1583_v0  ;;  %1572 = vmatpush3.bf16.msra.mxu1 (!%p139_p2), %v1583_v0 }
   0x8   : > { %1501 = vmatprep.subr.bf16.mxu0 (!%p139_p2), %v1584_v1  ;;  %1570 = vmatprep.subr.bf16.mxu1 (!%p139_p2), %v1584_v1 }
   0xb   : > { %1502 = vmatpush3.bf16.msra.mxu0 (!%p139_p2), %v1584_v1  ;;  %1573 = vmatpush3.bf16.msra.mxu1 (!%p139_p2), %v1584_v1 }
   0xc   : > { %1503 = vmatprep.subr.bf16.mxu0 (!%p139_p2), %v1585_v2  ;;  %1571 = vmatprep.subr.bf16.mxu1 (!%p139_p2), %v1585_v2 }
   0xd   : > { %s1949_s16 = smov (!%p163_p3, %s1262_s16), 255 }
   0xe   : > { %s1263_s21 = sshll.u32 %s1949_s16, 2 }
   0xf   : > { %s1671_s24 = scalar_lea.vmem %s1944_s0, %s1263_s21  ;;  %1504 = vmatpush3.bf16.msra.mxu0 %v1585_v2  ;;  %1574 = vmatpush3.bf16.msra.mxu1 %v1585_v2  ;;  %s1753_s29 = scalar_lea.vmem %s1947_s3, %s1263_s21 }
  0x10   : > { %v1586_v3 = vld [vmem:[%s1671_s24] sm:$0xff]   ;;  %v1588_v5 = vld [vmem:[%s1671_s24 + $0x8] sm:$0xff]   ;;  %v1590_v7 = vld [vmem:[%s1671_s24 + $0x10] sm:$0xff]  }
  0x11   : > { %v1587_v4 = vld [vmem:[%s1671_s24 + $0x80] sm:$0xff]   ;;  %1505 = vmatprep.mubr.msk.bf16.mxu0 %vm430_vm0, %v1586_v3  ;;  %v1589_v6 = vld [vmem:[%s1671_s24 + $0x88] sm:$0xff]   ;;  %v1591_v8 = vld [vmem:[%s1671_s24 + $0x90] sm:$0xff]  }
  0x12   : > { %1537 = vmatprep.mubr.msk.bf16.mxu1 %vm430_vm0, %v1587_v4  ;;  %1506 = vmatmul.mubr.msk.bf16.vlgmr.msra.gmra.mrb[0].mxu0 %vm430_vm0, %v1588_v5  ;;  %v1592_v9 = vld [vmem:[%s1671_s24 + $0x18] sm:$0xff]   ;;  %v1594_v11 = vld [vmem:[%s1671_s24 + $0x20] sm:$0xff]   ;;  %v1596_v13 = vld [vmem:[%s1671_s24 + $0x28] sm:$0xff]  }
  0x13   : > { %1538 = vmatmul.mubr.msk.bf16.vlgmr.msra.gmra.mrb[0].mxu1 %vm430_vm0, %v1589_v6  ;;  %1509 = vmatprep.mubr.msk.bf16.mxu0 %vm430_vm0, %v1590_v7  ;;  %v1593_v10 = vld [vmem:[%s1671_s24 + $0x98] sm:$0xff]   ;;  %v1595_v12 = vld [vmem:[%s1671_s24 + $0xa0] sm:$0xff]   ;;  %v1597_v14 = vld [vmem:[%s1671_s24 + $0xa8] sm:$0xff]  }
  0x14   : > { %1541 = vmatprep.mubr.msk.bf16.mxu1 %vm430_vm0, %v1591_v8  ;;  %v1598_v15 = vld [vmem:[%s1671_s24 + $0x30] sm:$0xff]   ;;  %v1600_v17 = vld [vmem:[%s1671_s24 + $0x38] sm:$0xff]   ;;  %v1602_v19 = vld [vmem:[%s1671_s24 + $0x40] sm:$0xff]  }
  0x15   : > { %v1599_v16 = vld [vmem:[%s1671_s24 + $0xb0] sm:$0xff]   ;;  %v1601_v18 = vld [vmem:[%s1671_s24 + $0xb8] sm:$0xff]   ;;  %v1603_v20 = vld [vmem:[%s1671_s24 + $0xc0] sm:$0xff]  }
  0x16   : > { %v1604_v21 = vld [vmem:[%s1671_s24 + $0x48] sm:$0xff]   ;;  %v1606_v23 = vld [vmem:[%s1671_s24 + $0x50] sm:$0xff]   ;;  %v1608_v25 = vld [vmem:[%s1671_s24 + $0x58] sm:$0xff]  }
  0x17   : > { %v1605_v22 = vld [vmem:[%s1671_s24 + $0xc8] sm:$0xff]   ;;  %v1607_v24 = vld [vmem:[%s1671_s24 + $0xd0] sm:$0xff]   ;;  %v1609_v26 = vld [vmem:[%s1671_s24 + $0xd8] sm:$0xff]  }
  0x18   : > { %v1610_v27 = vld [vmem:[%s1671_s24 + $0x60] sm:$0xff]   ;;  %v1612_v29 = vld [vmem:[%s1671_s24 + $0x68] sm:$0xff]   ;;  %v1614_v31 = vld [vmem:[%s1671_s24 + $0x70] sm:$0xff]  }
  0x19   : > { %v1611_v28 = vld [vmem:[%s1671_s24 + $0xe0] sm:$0xff]   ;;  %v1613_v30 = vld [vmem:[%s1671_s24 + $0xe8] sm:$0xff]   ;;  %v1615_v32 = vld [vmem:[%s1671_s24 + $0xf0] sm:$0xff]  }
  0x1a   : > { %1510 = vmatmul.mubr.msk.bf16.gmra.mrb[4].mxu0 %vm430_vm0, %v1592_v9  ;;  %v1616_v33 = vld [vmem:[%s1671_s24 + $0x78] sm:$0xff]  }
  0x1b   : > { %1542 = vmatmul.mubr.msk.bf16.gmra.mrb[4].mxu1 %vm430_vm0, %v1593_v10  ;;  %1513 = vmatprep.mubr.msk.bf16.mxu0 %vm430_vm0, %v1594_v11  ;;  %v1617_v34 = vld [vmem:[%s1671_s24 + $0xf8] sm:$0xff]  }
  0x1c   : > { %1545 = vmatprep.mubr.msk.bf16.mxu1 %vm430_vm0, %v1595_v12 }
  0x22   : > { %1514 = vmatmul.mubr.msk.bf16.gmra.mrb[8].mxu0 %vm430_vm0, %v1596_v13 }
  0x23   : > { %1546 = vmatmul.mubr.msk.bf16.gmra.mrb[8].mxu1 %vm430_vm0, %v1597_v14  ;;  %1517 = vmatprep.mubr.msk.bf16.mxu0 %vm430_vm0, %v1598_v15 }
  0x24   : > { %1549 = vmatprep.mubr.msk.bf16.mxu1 %vm430_vm0, %v1599_v16 }
  0x2a   : > { %1518 = vmatmul.mubr.msk.bf16.gmra.mrb[12].mxu0 %vm430_vm0, %v1600_v17 }
  0x2b   : > { %1550 = vmatmul.mubr.msk.bf16.gmra.mrb[12].mxu1 %vm430_vm0, %v1601_v18  ;;  %1521 = vmatprep.mubr.msk.bf16.mxu0 %vm430_vm0, %v1602_v19 }
  0x2c   : > { %1553 = vmatprep.mubr.msk.bf16.mxu1 %vm430_vm0, %v1603_v20 }
  0x32   : > { %1522 = vmatmul.mubr.msk.bf16.gmra.mrb[16].mxu0 %vm430_vm0, %v1604_v21 }
  0x33   : > { %1554 = vmatmul.mubr.msk.bf16.gmra.mrb[16].mxu1 %vm430_vm0, %v1605_v22  ;;  %1525 = vmatprep.mubr.msk.bf16.mxu0 %vm430_vm0, %v1606_v23 }
  0x34   : > { %1557 = vmatprep.mubr.msk.bf16.mxu1 %vm430_vm0, %v1607_v24 }
  0x3a   : > { %1526 = vmatmul.mubr.msk.bf16.gmra.mrb[20].mxu0 %vm430_vm0, %v1608_v25 }
  0x3b   : > { %1558 = vmatmul.mubr.msk.bf16.gmra.mrb[20].mxu1 %vm430_vm0, %v1609_v26  ;;  %1529 = vmatprep.mubr.msk.bf16.mxu0 %vm430_vm0, %v1610_v27 }
  0x3c   : > { %1561 = vmatprep.mubr.msk.bf16.mxu1 %vm430_vm0, %v1611_v28 }
  0x42   : > { %1530 = vmatmul.mubr.msk.bf16.gmra.mrb[24].mxu0 %vm430_vm0, %v1612_v29 }
  0x43   : > { %1562 = vmatmul.mubr.msk.bf16.gmra.mrb[24].mxu1 %vm430_vm0, %v1613_v30  ;;  %1533 = vmatprep.mubr.msk.bf16.mxu0 %vm430_vm0, %v1614_v31 }
  0x44   : > { %1565 = vmatprep.mubr.msk.bf16.mxu1 %vm430_vm0, %v1615_v32 }
  0x4a   : > { %1534 = vmatmul.mubr.msk.bf16.gmra.mrb[28].mxu0 %vm430_vm0, %v1616_v33 }
  0x4b   : > { %1566 = vmatmul.mubr.msk.bf16.gmra.mrb[28].mxu1 %vm430_vm0, %v1617_v34 }
  0xe5   : > { %v1507_v36 = vpop.f32.mrb[0].mxu0 }
  0xe6   : > { %v1539_v37 = vpop.f32.mrb[0].mxu1  ;;  %v570_v38 = vadd.f32 %v1507_v36, %v1740_v35  ;;  %v561_v40 = vpop.f32.mrb[1].mxu0 }
  0xe7   : > { %v698_v39 = vadd.f32 %v1539_v37, %v1740_v35  ;;  %v689_v41 = vpop.f32.mrb[1].mxu1  ;;  %v562_v42 = vadd.f32 %v1740_v35, %v561_v40  ;;  %v1508_v44 = vpop.f32.mrb[2].mxu0 }
  0xe8   : > { %v690_v43 = vadd.f32 %v1740_v35, %v689_v41  ;;  %v1540_v45 = vpop.f32.mrb[2].mxu1  ;;  %v818_v46 = vmax.f32 %v570_v38, 0.0  ;;  %v573_v48 = vadd.f32 %v1508_v44, %v1740_v35  ;;  %v564_v50 = vpop.f32.mrb[3].mxu0 }
  0xe9   : > { %v850_v47 = vmax.f32 %v698_v39, 0.0  ;;  %v701_v49 = vadd.f32 %v1540_v45, %v1740_v35  ;;  %v692_v51 = vpop.f32.mrb[3].mxu1  ;;  %v816_v52 = vmax.f32 %v562_v42, 0.0  ;;  %v565_v54 = vadd.f32 %v1740_v35, %v564_v50 }
  0xea   : > { %v848_v53 = vmax.f32 %v690_v43, 0.0  ;;  %v693_v55 = vadd.f32 %v1740_v35, %v692_v51  ;;  %v1402_v56 = vpack.c.bf16 %v818_v46, %v818_v46  ;;  %v819_v58 = vmax.f32 %v573_v48, 0.0 }
  0xeb   : > { %v1434_v57 = vpack.c.bf16 %v850_v47, %v850_v47  ;;  %v851_v59 = vmax.f32 %v701_v49, 0.0  ;;  %v1400_v60 = vpack.c.bf16 %v816_v52, %v816_v52  ;;  %v817_v62 = vmax.f32 %v565_v54, 0.0 }
  0xec   : > { %v1432_v61 = vpack.c.bf16 %v848_v53, %v848_v53  ;;  %v849_v63 = vmax.f32 %v693_v55, 0.0  ;;  %1139 = vst.msk [vmem:[%s1753_s29 + $0x8] sm:$0xf] %vm1136_vm1, %v1402_v56  ;;  %v1403_v0 = vpack.c.bf16 %v819_v58, %v819_v58 }
  0xed   : > { %1171 = vst.msk [vmem:[%s1753_s29 + $0x88] sm:$0xf] %vm1136_vm1, %v1434_v57  ;;  %v1435_v1 = vpack.c.bf16 %v851_v59, %v851_v59  ;;  %1137 = vst.msk [vmem:[%s1753_s29] sm:$0xf] %vm1136_vm1, %v1400_v60  ;;  %v1401_v2 = vpack.c.bf16 %v817_v62, %v817_v62  ;;  %v1511_v4 = vpop.f32.mrb[4].mxu0 }
  0xee   : > { %1169 = vst.msk [vmem:[%s1753_s29 + $0x80] sm:$0xf] %vm1136_vm1, %v1432_v61  ;;  %v1433_v3 = vpack.c.bf16 %v849_v63, %v849_v63  ;;  %v1543_v5 = vpop.f32.mrb[4].mxu1  ;;  %1140 = vst.msk [vmem:[%s1753_s29 + $0xc] sm:$0xf] %vm1136_vm1, %v1403_v0  ;;  %v586_v6 = vadd.f32 %v1511_v4, %v1740_v35  ;;  %v577_v8 = vpop.f32.mrb[5].mxu0 }
  0xef   : > { %1172 = vst.msk [vmem:[%s1753_s29 + $0x8c] sm:$0xf] %vm1136_vm1, %v1435_v1  ;;  %v714_v7 = vadd.f32 %v1543_v5, %v1740_v35  ;;  %v705_v9 = vpop.f32.mrb[5].mxu1  ;;  %1138 = vst.msk [vmem:[%s1753_s29 + $0x4] sm:$0xf] %vm1136_vm1, %v1401_v2  ;;  %v578_v10 = vadd.f32 %v1740_v35, %v577_v8  ;;  %v1512_v12 = vpop.f32.mrb[6].mxu0 }
  0xf0   : > { %1170 = vst.msk [vmem:[%s1753_s29 + $0x84] sm:$0xf] %vm1136_vm1, %v1433_v3  ;;  %v706_v11 = vadd.f32 %v1740_v35, %v705_v9  ;;  %v1544_v13 = vpop.f32.mrb[6].mxu1  ;;  %v822_v14 = vmax.f32 %v586_v6, 0.0  ;;  %v589_v16 = vadd.f32 %v1512_v12, %v1740_v35  ;;  %v580_v18 = vpop.f32.mrb[7].mxu0 }
  0xf1   : > { %v854_v15 = vmax.f32 %v714_v7, 0.0  ;;  %v717_v17 = vadd.f32 %v1544_v13, %v1740_v35  ;;  %v708_v19 = vpop.f32.mrb[7].mxu1  ;;  %v820_v20 = vmax.f32 %v578_v10, 0.0  ;;  %v581_v22 = vadd.f32 %v1740_v35, %v580_v18 }
  0xf2   : > { %v852_v21 = vmax.f32 %v706_v11, 0.0  ;;  %v709_v23 = vadd.f32 %v1740_v35, %v708_v19  ;;  %v1406_v24 = vpack.c.bf16 %v822_v14, %v822_v14  ;;  %v823_v26 = vmax.f32 %v589_v16, 0.0 }
  0xf3   : > { %v1438_v25 = vpack.c.bf16 %v854_v15, %v854_v15  ;;  %v855_v27 = vmax.f32 %v717_v17, 0.0  ;;  %v1404_v28 = vpack.c.bf16 %v820_v20, %v820_v20  ;;  %v821_v30 = vmax.f32 %v581_v22, 0.0 }
  0xf4   : > { %v1436_v29 = vpack.c.bf16 %v852_v21, %v852_v21  ;;  %v853_v31 = vmax.f32 %v709_v23, 0.0  ;;  %1143 = vst.msk [vmem:[%s1753_s29 + $0x18] sm:$0xf] %vm1136_vm1, %v1406_v24  ;;  %v1407_v32 = vpack.c.bf16 %v823_v26, %v823_v26 }
  0xf5   : > { %1175 = vst.msk [vmem:[%s1753_s29 + $0x98] sm:$0xf] %vm1136_vm1, %v1438_v25  ;;  %v1439_v33 = vpack.c.bf16 %v855_v27, %v855_v27  ;;  %1141 = vst.msk [vmem:[%s1753_s29 + $0x10] sm:$0xf] %vm1136_vm1, %v1404_v28  ;;  %v1405_v34 = vpack.c.bf16 %v821_v30, %v821_v30  ;;  %v1515_v37 = vpop.f32.mrb[8].mxu0 }
  0xf6   : > { %1173 = vst.msk [vmem:[%s1753_s29 + $0x90] sm:$0xf] %vm1136_vm1, %v1436_v29  ;;  %v1437_v36 = vpack.c.bf16 %v853_v31, %v853_v31  ;;  %v1547_v38 = vpop.f32.mrb[8].mxu1  ;;  %1144 = vst.msk [vmem:[%s1753_s29 + $0x1c] sm:$0xf] %vm1136_vm1, %v1407_v32  ;;  %v602_v39 = vadd.f32 %v1515_v37, %v1740_v35  ;;  %v593_v41 = vpop.f32.mrb[9].mxu0 }
  0xf7   : > { %1176 = vst.msk [vmem:[%s1753_s29 + $0x9c] sm:$0xf] %vm1136_vm1, %v1439_v33  ;;  %v730_v40 = vadd.f32 %v1547_v38, %v1740_v35  ;;  %v721_v42 = vpop.f32.mrb[9].mxu1  ;;  %1142 = vst.msk [vmem:[%s1753_s29 + $0x14] sm:$0xf] %vm1136_vm1, %v1405_v34  ;;  %v594_v43 = vadd.f32 %v1740_v35, %v593_v41  ;;  %v1516_v45 = vpop.f32.mrb[10].mxu0 }
  0xf8   : > { %1174 = vst.msk [vmem:[%s1753_s29 + $0x94] sm:$0xf] %vm1136_vm1, %v1437_v36  ;;  %v722_v44 = vadd.f32 %v1740_v35, %v721_v42  ;;  %v1548_v46 = vpop.f32.mrb[10].mxu1  ;;  %v826_v47 = vmax.f32 %v602_v39, 0.0  ;;  %v605_v49 = vadd.f32 %v1516_v45, %v1740_v35  ;;  %v596_v51 = vpop.f32.mrb[11].mxu0 }
  0xf9   : > { %v858_v48 = vmax.f32 %v730_v40, 0.0  ;;  %v733_v50 = vadd.f32 %v1548_v46, %v1740_v35  ;;  %v724_v52 = vpop.f32.mrb[11].mxu1  ;;  %v824_v53 = vmax.f32 %v594_v43, 0.0  ;;  %v597_v55 = vadd.f32 %v1740_v35, %v596_v51 }
  0xfa   : > { %v856_v54 = vmax.f32 %v722_v44, 0.0  ;;  %v725_v56 = vadd.f32 %v1740_v35, %v724_v52  ;;  %v1410_v57 = vpack.c.bf16 %v826_v47, %v826_v47  ;;  %v827_v59 = vmax.f32 %v605_v49, 0.0 }
  0xfb   : > { %v1442_v58 = vpack.c.bf16 %v858_v48, %v858_v48  ;;  %v859_v60 = vmax.f32 %v733_v50, 0.0  ;;  %v1408_v61 = vpack.c.bf16 %v824_v53, %v824_v53  ;;  %v825_v63 = vmax.f32 %v597_v55, 0.0 }
  0xfc   : > { %v1440_v62 = vpack.c.bf16 %v856_v54, %v856_v54  ;;  %v857_v0 = vmax.f32 %v725_v56, 0.0  ;;  %1147 = vst.msk [vmem:[%s1753_s29 + $0x28] sm:$0xf] %vm1136_vm1, %v1410_v57  ;;  %v1411_v1 = vpack.c.bf16 %v827_v59, %v827_v59 }
  0xfd   : > { %1179 = vst.msk [vmem:[%s1753_s29 + $0xa8] sm:$0xf] %vm1136_vm1, %v1442_v58  ;;  %v1443_v2 = vpack.c.bf16 %v859_v60, %v859_v60  ;;  %1145 = vst.msk [vmem:[%s1753_s29 + $0x20] sm:$0xf] %vm1136_vm1, %v1408_v61  ;;  %v1409_v3 = vpack.c.bf16 %v825_v63, %v825_v63  ;;  %v1519_v5 = vpop.f32.mrb[12].mxu0 }
  0xfe   : > { %1177 = vst.msk [vmem:[%s1753_s29 + $0xa0] sm:$0xf] %vm1136_vm1, %v1440_v62  ;;  %v1441_v4 = vpack.c.bf16 %v857_v0, %v857_v0  ;;  %v1551_v6 = vpop.f32.mrb[12].mxu1  ;;  %1148 = vst.msk [vmem:[%s1753_s29 + $0x2c] sm:$0xf] %vm1136_vm1, %v1411_v1  ;;  %v618_v7 = vadd.f32 %v1519_v5, %v1740_v35  ;;  %v609_v9 = vpop.f32.mrb[13].mxu0 }
  0xff   : > { %1180 = vst.msk [vmem:[%s1753_s29 + $0xac] sm:$0xf] %vm1136_vm1, %v1443_v2  ;;  %v746_v8 = vadd.f32 %v1551_v6, %v1740_v35  ;;  %v737_v10 = vpop.f32.mrb[13].mxu1  ;;  %1146 = vst.msk [vmem:[%s1753_s29 + $0x24] sm:$0xf] %vm1136_vm1, %v1409_v3  ;;  %v610_v11 = vadd.f32 %v1740_v35, %v609_v9  ;;  %v1520_v13 = vpop.f32.mrb[14].mxu0 }
 0x100   : > { %1178 = vst.msk [vmem:[%s1753_s29 + $0xa4] sm:$0xf] %vm1136_vm1, %v1441_v4  ;;  %v738_v12 = vadd.f32 %v1740_v35, %v737_v10  ;;  %v1552_v14 = vpop.f32.mrb[14].mxu1  ;;  %v830_v15 = vmax.f32 %v618_v7, 0.0  ;;  %v621_v17 = vadd.f32 %v1520_v13, %v1740_v35  ;;  %v612_v19 = vpop.f32.mrb[15].mxu0 }
 0x101   : > { %v862_v16 = vmax.f32 %v746_v8, 0.0  ;;  %v749_v18 = vadd.f32 %v1552_v14, %v1740_v35  ;;  %v740_v20 = vpop.f32.mrb[15].mxu1  ;;  %v828_v21 = vmax.f32 %v610_v11, 0.0  ;;  %v613_v23 = vadd.f32 %v1740_v35, %v612_v19 }
 0x102   : > { %v860_v22 = vmax.f32 %v738_v12, 0.0  ;;  %v741_v24 = vadd.f32 %v1740_v35, %v740_v20  ;;  %v1414_v25 = vpack.c.bf16 %v830_v15, %v830_v15  ;;  %v831_v27 = vmax.f32 %v621_v17, 0.0 }
 0x103   : > { %v1446_v26 = vpack.c.bf16 %v862_v16, %v862_v16  ;;  %v863_v28 = vmax.f32 %v749_v18, 0.0  ;;  %v1412_v29 = vpack.c.bf16 %v828_v21, %v828_v21  ;;  %v829_v31 = vmax.f32 %v613_v23, 0.0 }
 0x104   : > { %v1444_v30 = vpack.c.bf16 %v860_v22, %v860_v22  ;;  %v861_v32 = vmax.f32 %v741_v24, 0.0  ;;  %1151 = vst.msk [vmem:[%s1753_s29 + $0x38] sm:$0xf] %vm1136_vm1, %v1414_v25  ;;  %v1415_v33 = vpack.c.bf16 %v831_v27, %v831_v27 }
 0x105   : > { %1183 = vst.msk [vmem:[%s1753_s29 + $0xb8] sm:$0xf] %vm1136_vm1, %v1446_v26  ;;  %v1447_v34 = vpack.c.bf16 %v863_v28, %v863_v28  ;;  %1149 = vst.msk [vmem:[%s1753_s29 + $0x30] sm:$0xf] %vm1136_vm1, %v1412_v29  ;;  %v1413_v36 = vpack.c.bf16 %v829_v31, %v829_v31  ;;  %v1523_v38 = vpop.f32.mrb[16].mxu0 }
 0x106   : > { %1181 = vst.msk [vmem:[%s1753_s29 + $0xb0] sm:$0xf] %vm1136_vm1, %v1444_v30  ;;  %v1445_v37 = vpack.c.bf16 %v861_v32, %v861_v32  ;;  %v1555_v39 = vpop.f32.mrb[16].mxu1  ;;  %1152 = vst.msk [vmem:[%s1753_s29 + $0x3c] sm:$0xf] %vm1136_vm1, %v1415_v33  ;;  %v634_v40 = vadd.f32 %v1523_v38, %v1740_v35  ;;  %v625_v42 = vpop.f32.mrb[17].mxu0 }
 0x107   : > { %1184 = vst.msk [vmem:[%s1753_s29 + $0xbc] sm:$0xf] %vm1136_vm1, %v1447_v34  ;;  %v762_v41 = vadd.f32 %v1555_v39, %v1740_v35  ;;  %v753_v43 = vpop.f32.mrb[17].mxu1  ;;  %1150 = vst.msk [vmem:[%s1753_s29 + $0x34] sm:$0xf] %vm1136_vm1, %v1413_v36  ;;  %v626_v44 = vadd.f32 %v1740_v35, %v625_v42  ;;  %v1524_v46 = vpop.f32.mrb[18].mxu0 }
 0x108   : > { %1182 = vst.msk [vmem:[%s1753_s29 + $0xb4] sm:$0xf] %vm1136_vm1, %v1445_v37  ;;  %v754_v45 = vadd.f32 %v1740_v35, %v753_v43  ;;  %v1556_v47 = vpop.f32.mrb[18].mxu1  ;;  %v834_v48 = vmax.f32 %v634_v40, 0.0  ;;  %v637_v50 = vadd.f32 %v1524_v46, %v1740_v35  ;;  %v628_v52 = vpop.f32.mrb[19].mxu0 }
 0x109   : > { %v866_v49 = vmax.f32 %v762_v41, 0.0  ;;  %v765_v51 = vadd.f32 %v1556_v47, %v1740_v35  ;;  %v756_v53 = vpop.f32.mrb[19].mxu1  ;;  %v832_v54 = vmax.f32 %v626_v44, 0.0  ;;  %v629_v56 = vadd.f32 %v1740_v35, %v628_v52 }
 0x10a   : > { %v864_v55 = vmax.f32 %v754_v45, 0.0  ;;  %v757_v57 = vadd.f32 %v1740_v35, %v756_v53  ;;  %v1418_v58 = vpack.c.bf16 %v834_v48, %v834_v48  ;;  %v835_v60 = vmax.f32 %v637_v50, 0.0 }
 0x10b   : > { %v1450_v59 = vpack.c.bf16 %v866_v49, %v866_v49  ;;  %v867_v61 = vmax.f32 %v765_v51, 0.0  ;;  %v1416_v62 = vpack.c.bf16 %v832_v54, %v832_v54  ;;  %v833_v0 = vmax.f32 %v629_v56, 0.0 }
 0x10c   : > { %v1448_v63 = vpack.c.bf16 %v864_v55, %v864_v55  ;;  %v865_v1 = vmax.f32 %v757_v57, 0.0  ;;  %1155 = vst.msk [vmem:[%s1753_s29 + $0x48] sm:$0xf] %vm1136_vm1, %v1418_v58  ;;  %v1419_v2 = vpack.c.bf16 %v835_v60, %v835_v60 }
 0x10d   : > { %1187 = vst.msk [vmem:[%s1753_s29 + $0xc8] sm:$0xf] %vm1136_vm1, %v1450_v59  ;;  %v1451_v3 = vpack.c.bf16 %v867_v61, %v867_v61  ;;  %1153 = vst.msk [vmem:[%s1753_s29 + $0x40] sm:$0xf] %vm1136_vm1, %v1416_v62  ;;  %v1417_v4 = vpack.c.bf16 %v833_v0, %v833_v0  ;;  %v1527_v6 = vpop.f32.mrb[20].mxu0 }
 0x10e   : > { %1185 = vst.msk [vmem:[%s1753_s29 + $0xc0] sm:$0xf] %vm1136_vm1, %v1448_v63  ;;  %v1449_v5 = vpack.c.bf16 %v865_v1, %v865_v1  ;;  %v1559_v7 = vpop.f32.mrb[20].mxu1  ;;  %1156 = vst.msk [vmem:[%s1753_s29 + $0x4c] sm:$0xf] %vm1136_vm1, %v1419_v2  ;;  %v650_v8 = vadd.f32 %v1527_v6, %v1740_v35  ;;  %v641_v10 = vpop.f32.mrb[21].mxu0 }
 0x10f   : > { %1188 = vst.msk [vmem:[%s1753_s29 + $0xcc] sm:$0xf] %vm1136_vm1, %v1451_v3  ;;  %v778_v9 = vadd.f32 %v1559_v7, %v1740_v35  ;;  %v769_v11 = vpop.f32.mrb[21].mxu1  ;;  %1154 = vst.msk [vmem:[%s1753_s29 + $0x44] sm:$0xf] %vm1136_vm1, %v1417_v4  ;;  %v642_v12 = vadd.f32 %v1740_v35, %v641_v10  ;;  %v1528_v14 = vpop.f32.mrb[22].mxu0 }
 0x110   : > { %1186 = vst.msk [vmem:[%s1753_s29 + $0xc4] sm:$0xf] %vm1136_vm1, %v1449_v5  ;;  %v770_v13 = vadd.f32 %v1740_v35, %v769_v11  ;;  %v1560_v15 = vpop.f32.mrb[22].mxu1  ;;  %v838_v16 = vmax.f32 %v650_v8, 0.0  ;;  %v653_v18 = vadd.f32 %v1528_v14, %v1740_v35  ;;  %v644_v20 = vpop.f32.mrb[23].mxu0 }
 0x111   : > { %v870_v17 = vmax.f32 %v778_v9, 0.0  ;;  %v781_v19 = vadd.f32 %v1560_v15, %v1740_v35  ;;  %v772_v21 = vpop.f32.mrb[23].mxu1  ;;  %v836_v22 = vmax.f32 %v642_v12, 0.0  ;;  %v645_v24 = vadd.f32 %v1740_v35, %v644_v20 }
 0x112   : > { %v868_v23 = vmax.f32 %v770_v13, 0.0  ;;  %v773_v25 = vadd.f32 %v1740_v35, %v772_v21  ;;  %v1422_v26 = vpack.c.bf16 %v838_v16, %v838_v16  ;;  %v839_v28 = vmax.f32 %v653_v18, 0.0 }
 0x113   : > { %v1454_v27 = vpack.c.bf16 %v870_v17, %v870_v17  ;;  %v871_v29 = vmax.f32 %v781_v19, 0.0  ;;  %v1420_v30 = vpack.c.bf16 %v836_v22, %v836_v22  ;;  %v837_v32 = vmax.f32 %v645_v24, 0.0 }
 0x114   : > { %v1452_v31 = vpack.c.bf16 %v868_v23, %v868_v23  ;;  %v869_v33 = vmax.f32 %v773_v25, 0.0  ;;  %1159 = vst.msk [vmem:[%s1753_s29 + $0x58] sm:$0xf] %vm1136_vm1, %v1422_v26  ;;  %v1423_v34 = vpack.c.bf16 %v839_v28, %v839_v28 }
 0x115   : > { %1191 = vst.msk [vmem:[%s1753_s29 + $0xd8] sm:$0xf] %vm1136_vm1, %v1454_v27  ;;  %v1455_v36 = vpack.c.bf16 %v871_v29, %v871_v29  ;;  %1157 = vst.msk [vmem:[%s1753_s29 + $0x50] sm:$0xf] %vm1136_vm1, %v1420_v30  ;;  %v1421_v37 = vpack.c.bf16 %v837_v32, %v837_v32  ;;  %v1531_v39 = vpop.f32.mrb[24].mxu0 }
 0x116   : > { %1189 = vst.msk [vmem:[%s1753_s29 + $0xd0] sm:$0xf] %vm1136_vm1, %v1452_v31  ;;  %v1453_v38 = vpack.c.bf16 %v869_v33, %v869_v33  ;;  %v1563_v40 = vpop.f32.mrb[24].mxu1  ;;  %1160 = vst.msk [vmem:[%s1753_s29 + $0x5c] sm:$0xf] %vm1136_vm1, %v1423_v34  ;;  %v666_v41 = vadd.f32 %v1531_v39, %v1740_v35  ;;  %v657_v43 = vpop.f32.mrb[25].mxu0 }
 0x117   : > { %1192 = vst.msk [vmem:[%s1753_s29 + $0xdc] sm:$0xf] %vm1136_vm1, %v1455_v36  ;;  %v794_v42 = vadd.f32 %v1563_v40, %v1740_v35  ;;  %v785_v44 = vpop.f32.mrb[25].mxu1  ;;  %1158 = vst.msk [vmem:[%s1753_s29 + $0x54] sm:$0xf] %vm1136_vm1, %v1421_v37  ;;  %v658_v45 = vadd.f32 %v1740_v35, %v657_v43  ;;  %v1532_v47 = vpop.f32.mrb[26].mxu0 }
 0x118   : > { %1190 = vst.msk [vmem:[%s1753_s29 + $0xd4] sm:$0xf] %vm1136_vm1, %v1453_v38  ;;  %v786_v46 = vadd.f32 %v1740_v35, %v785_v44  ;;  %v1564_v48 = vpop.f32.mrb[26].mxu1  ;;  %v842_v49 = vmax.f32 %v666_v41, 0.0  ;;  %v669_v51 = vadd.f32 %v1532_v47, %v1740_v35  ;;  %v660_v53 = vpop.f32.mrb[27].mxu0 }
 0x119   : > { %v874_v50 = vmax.f32 %v794_v42, 0.0  ;;  %v797_v52 = vadd.f32 %v1564_v48, %v1740_v35  ;;  %v788_v54 = vpop.f32.mrb[27].mxu1  ;;  %v840_v55 = vmax.f32 %v658_v45, 0.0  ;;  %v661_v57 = vadd.f32 %v1740_v35, %v660_v53 }
 0x11a   : > { %v872_v56 = vmax.f32 %v786_v46, 0.0  ;;  %v789_v58 = vadd.f32 %v1740_v35, %v788_v54  ;;  %v1426_v59 = vpack.c.bf16 %v842_v49, %v842_v49  ;;  %v843_v61 = vmax.f32 %v669_v51, 0.0 }
 0x11b   : > { %v1458_v60 = vpack.c.bf16 %v874_v50, %v874_v50  ;;  %v875_v62 = vmax.f32 %v797_v52, 0.0  ;;  %v1424_v63 = vpack.c.bf16 %v840_v55, %v840_v55  ;;  %v841_v1 = vmax.f32 %v661_v57, 0.0 }
 0x11c   : > { %v1456_v0 = vpack.c.bf16 %v872_v56, %v872_v56  ;;  %v873_v2 = vmax.f32 %v789_v58, 0.0  ;;  %1163 = vst.msk [vmem:[%s1753_s29 + $0x68] sm:$0xf] %vm1136_vm1, %v1426_v59  ;;  %v1427_v3 = vpack.c.bf16 %v843_v61, %v843_v61 }
 0x11d   : > { %1195 = vst.msk [vmem:[%s1753_s29 + $0xe8] sm:$0xf] %vm1136_vm1, %v1458_v60  ;;  %v1459_v4 = vpack.c.bf16 %v875_v62, %v875_v62  ;;  %1161 = vst.msk [vmem:[%s1753_s29 + $0x60] sm:$0xf] %vm1136_vm1, %v1424_v63  ;;  %v1425_v5 = vpack.c.bf16 %v841_v1, %v841_v1  ;;  %v1535_v7 = vpop.f32.mrb[28].mxu0 }
 0x11e   : > { %1193 = vst.msk [vmem:[%s1753_s29 + $0xe0] sm:$0xf] %vm1136_vm1, %v1456_v0  ;;  %v1457_v6 = vpack.c.bf16 %v873_v2, %v873_v2  ;;  %v1567_v8 = vpop.f32.mrb[28].mxu1  ;;  %1164 = vst.msk [vmem:[%s1753_s29 + $0x6c] sm:$0xf] %vm1136_vm1, %v1427_v3  ;;  %v682_v9 = vadd.f32 %v1535_v7, %v1740_v35  ;;  %v673_v11 = vpop.f32.mrb[29].mxu0 }
 0x11f   : > { %1196 = vst.msk [vmem:[%s1753_s29 + $0xec] sm:$0xf] %vm1136_vm1, %v1459_v4  ;;  %v810_v10 = vadd.f32 %v1567_v8, %v1740_v35  ;;  %v801_v12 = vpop.f32.mrb[29].mxu1  ;;  %1162 = vst.msk [vmem:[%s1753_s29 + $0x64] sm:$0xf] %vm1136_vm1, %v1425_v5  ;;  %v674_v13 = vadd.f32 %v1740_v35, %v673_v11  ;;  %v1536_v15 = vpop.f32.mrb[30].mxu0 }
 0x120   : > { %1194 = vst.msk [vmem:[%s1753_s29 + $0xe4] sm:$0xf] %vm1136_vm1, %v1457_v6  ;;  %v802_v14 = vadd.f32 %v1740_v35, %v801_v12  ;;  %v1568_v16 = vpop.f32.mrb[30].mxu1  ;;  %v846_v17 = vmax.f32 %v682_v9, 0.0  ;;  %v685_v19 = vadd.f32 %v1536_v15, %v1740_v35  ;;  %v676_v21 = vpop.f32.mrb[31].mxu0 }
 0x121   : > { %v878_v18 = vmax.f32 %v810_v10, 0.0  ;;  %v813_v20 = vadd.f32 %v1568_v16, %v1740_v35  ;;  %v804_v22 = vpop.f32.mrb[31].mxu1  ;;  %v844_v23 = vmax.f32 %v674_v13, 0.0  ;;  %v677_v25 = vadd.f32 %v1740_v35, %v676_v21 }
 0x122   : > { %v876_v24 = vmax.f32 %v802_v14, 0.0  ;;  %v805_v26 = vadd.f32 %v1740_v35, %v804_v22  ;;  %v1430_v27 = vpack.c.bf16 %v846_v17, %v846_v17  ;;  %v847_v29 = vmax.f32 %v685_v19, 0.0 }
 0x123   : > { %v1462_v28 = vpack.c.bf16 %v878_v18, %v878_v18  ;;  %v879_v30 = vmax.f32 %v813_v20, 0.0  ;;  %v1428_v31 = vpack.c.bf16 %v844_v23, %v844_v23  ;;  %v845_v33 = vmax.f32 %v677_v25, 0.0 }
 0x124   : > { %v1460_v32 = vpack.c.bf16 %v876_v24, %v876_v24  ;;  %v877_v34 = vmax.f32 %v805_v26, 0.0  ;;  %1167 = vst.msk [vmem:[%s1753_s29 + $0x78] sm:$0xf] %vm1136_vm1, %v1430_v27  ;;  %v1431_v36 = vpack.c.bf16 %v847_v29, %v847_v29 }
 0x125   : > { %1199 = vst.msk [vmem:[%s1753_s29 + $0xf8] sm:$0xf] %vm1136_vm1, %v1462_v28  ;;  %v1463_v37 = vpack.c.bf16 %v879_v30, %v879_v30  ;;  %1165 = vst.msk [vmem:[%s1753_s29 + $0x70] sm:$0xf] %vm1136_vm1, %v1428_v31  ;;  %v1429_v35 = vpack.c.bf16 %v845_v33, %v845_v33 }
 0x126   : > { %1197 = vst.msk [vmem:[%s1753_s29 + $0xf0] sm:$0xf] %vm1136_vm1, %v1460_v32  ;;  %v1461_v38 = vpack.c.bf16 %v877_v34, %v877_v34  ;;  %1168 = vst.msk [vmem:[%s1753_s29 + $0x7c] sm:$0xf] %vm1136_vm1, %v1431_v36 }
 0x127   : > { %1200 = vst.msk [vmem:[%s1753_s29 + $0xfc] sm:$0xf] %vm1136_vm1, %v1463_v37  ;;  %1166 = vst.msk [vmem:[%s1753_s29 + $0x74] sm:$0xf] %vm1136_vm1, %v1429_v35 }
 0x128   : > { %1198 = vst.msk [vmem:[%s1753_s29 + $0xf4] sm:$0xf] %vm1136_vm1, %v1461_v38 }
 0x129 PF: > { %s13_s12 = sadd.s32 1, %s1624_s12  }
 0x12a   : > { %p10_p4 = scmp.ge.s32.totalorder %s13_s12, 6  }
 0x12c   :  { %12 = sbr.rel (!%p10_p4) target bundleno = 1 (0x1), region = 62 }

// kernel: betavae_forward.10
= control target key start
LH: loop header
LB: loop body
LE: loop exit
PB: predicated region body
PF: predicated region fallthrough
CT: control target
= control target key end

     0   :  { %s1958_s12 = smov 0   ;;  %s2246_s0 = inlined_call_operand.vmem [shape: bf16[512,512], index: 0, kind: input, shape index: {}]   ;;  %s2247_s1 = inlined_call_operand.vmem [shape: bf16[512,32], index: 1, kind: input, shape index: {}]   ;;  %s2248_s2 = inlined_call_operand.vmem [shape: f32[1,32], index: 2, kind: input, shape index: {}]   ;;  %s2249_s3 = inlined_call_operand.vmem [shape: bf16[512,32], index: 3, kind: output, shape index: {}]  }
   0x1 LB: > { %s1396_s13 = sadd.s32 4294967295, %s1936_s12   ;;  %p1400_p0 = scmp.ge.s32.totalorder %s1936_s12, 1  ;;  %s1936_s12 = sphi %s1958_s12, %s13_s12  }
   0x2   : > { %p139_p1 = scmp.lt.s32.totalorder %s1936_s12, 3 }
   0x4   : > { %p140_p2 = pnand %p1400_p0, %p139_p1 }
   0x5   : > { %v1802_v0 = vld [vmem:[%s2247_s1 + $0x40] sm:$0xff] (!%p140_p2)   ;;  %v1806_v4 = vld [vmem:[%s2247_s1 + $0x48] sm:$0xff] (!%p140_p2)   ;;  %v1810_v8 = vld [vmem:[%s2247_s1 + $0x50] sm:$0xff] (!%p140_p2)   ;;  %s1401_s21 = sshll.u32 (!%p140_p2), %s1396_s13, 5  ;;  %vm1307_vm0 = vcmask (!%p140_p2), 257024  }
   0x6   : > { %143 = sbr.rel (%p140_p2) target bundleno = 385 (0x181), region = 32  ;;  %v1803_v1 = vld [vmem:[%s2247_s1 + $0xc0] sm:$0xff] (!%p140_p2)   ;;  %1570 = vmatprep.subr.bf16.mxu0 (!%p140_p2), %v1802_v0  ;;  %v1807_v5 = vld [vmem:[%s2247_s1 + $0xc8] sm:$0xff] (!%p140_p2)   ;;  %v1811_v9 = vld [vmem:[%s2247_s1 + $0xd0] sm:$0xff] (!%p140_p2)   ;;  %p165_p3 = scmp.lt.s32.totalorder (!%p140_p2), %s1401_s21, 63 }
   0x7   : > { %v1804_v2 = vld [vmem:[%s2247_s1] sm:$0xff] (!%p140_p2)   ;;  %1682 = vmatprep.subr.bf16.mxu1 (!%p140_p2), %v1803_v1  ;;  %v1808_v6 = vld [vmem:[%s2247_s1 + $0x8] sm:$0xff] (!%p140_p2)   ;;  %v1812_v10 = vld [vmem:[%s2247_s1 + $0x10] sm:$0xff] (!%p140_p2)  }
   0x8   : > { %v1805_v3 = vld [vmem:[%s2247_s1 + $0x80] sm:$0xff] (!%p140_p2)   ;;  %1571 = vmatpush3.bf16.msra.mxu0 (!%p140_p2), %v1804_v2  ;;  %v1809_v7 = vld [vmem:[%s2247_s1 + $0x88] sm:$0xff] (!%p140_p2)   ;;  %v1813_v11 = vld [vmem:[%s2247_s1 + $0x90] sm:$0xff] (!%p140_p2)  }
   0x9   : > { %1683 = vmatpush3.bf16.msra.mxu1 (!%p140_p2), %v1805_v3  ;;  %1572 = vmatprep.subr.bf16.mxu0 (!%p140_p2), %v1806_v4  ;;  %v1814_v12 = vld [vmem:[%s2247_s1 + $0x58] sm:$0xff] (!%p140_p2)   ;;  %v1818_v16 = vld [vmem:[%s2247_s1 + $0x60] sm:$0xff] (!%p140_p2)   ;;  %v1822_v20 = vld [vmem:[%s2247_s1 + $0x68] sm:$0xff] (!%p140_p2)  }
   0xa   : > { %1684 = vmatprep.subr.bf16.mxu1 (!%p140_p2), %v1807_v5  ;;  %v1815_v13 = vld [vmem:[%s2247_s1 + $0xd8] sm:$0xff] (!%p140_p2)   ;;  %v1819_v17 = vld [vmem:[%s2247_s1 + $0xe0] sm:$0xff] (!%p140_p2)   ;;  %v1823_v21 = vld [vmem:[%s2247_s1 + $0xe8] sm:$0xff] (!%p140_p2)  }
   0xb   : > { %v1816_v14 = vld [vmem:[%s2247_s1 + $0x18] sm:$0xff] (!%p140_p2)   ;;  %v1820_v18 = vld [vmem:[%s2247_s1 + $0x20] sm:$0xff] (!%p140_p2)   ;;  %v1824_v22 = vld [vmem:[%s2247_s1 + $0x28] sm:$0xff] (!%p140_p2)  }
   0xc   : > { %1573 = vmatpush3.bf16.msra.mxu0 (!%p140_p2), %v1808_v6  ;;  %v1817_v15 = vld [vmem:[%s2247_s1 + $0x98] sm:$0xff] (!%p140_p2)   ;;  %v1821_v19 = vld [vmem:[%s2247_s1 + $0xa0] sm:$0xff] (!%p140_p2)   ;;  %v1825_v23 = vld [vmem:[%s2247_s1 + $0xa8] sm:$0xff] (!%p140_p2)  }
   0xd   : > { %1685 = vmatpush3.bf16.msra.mxu1 %v1809_v7  ;;  %1574 = vmatprep.subr.bf16.mxu0 %v1810_v8  ;;  %s2251_s21 = smov (!%p165_p3, %s1401_s21), 63  ;;  %v1826_v24 = vld [vmem:[%s2247_s1 + $0x70] sm:$0xff]   ;;  %v1830_v28 = vld [vmem:[%s2247_s1 + $0x78] sm:$0xff]  }
   0xe   : > { %1686 = vmatprep.subr.bf16.mxu1 %v1811_v9  ;;  %v1827_v25 = vld [vmem:[%s2247_s1 + $0xf0] sm:$0xff]   ;;  %s1537_s18 = sshll.u32 %s2251_s21, 4  ;;  %v1831_v29 = vld [vmem:[%s2247_s1 + $0xf8] sm:$0xff]   ;;  %s1405_s7 = sshll.u32 %s2251_s21, 2 }
   0xf   : > { %v1828_v26 = vld [vmem:[%s2247_s1 + $0x30] sm:$0xff]   ;;  %s2064_s28 = scalar_lea.vmem %s2246_s0, %s1537_s18  ;;  %v1832_v30 = vld [vmem:[%s2247_s1 + $0x38] sm:$0xff]   ;;  %s2147_s10 = scalar_lea.vmem %s2249_s3, %s1405_s7 }
  0x10   : > { %1575 = vmatpush3.bf16.msra.mxu0 %v1812_v10  ;;  %v1829_v27 = vld [vmem:[%s2247_s1 + $0xb0] sm:$0xff]   ;;  %v1833_v31 = vld [vmem:[%s2247_s1 + $0xb8] sm:$0xff]  }
  0x11   : > { %1687 = vmatpush3.bf16.msra.mxu1 %v1813_v11  ;;  %1576 = vmatprep.subr.bf16.mxu0 %v1814_v12  ;;  %v1834_v32 = vld [vmem:[%s2064_s28] ss:$16 sps:$4 sm:$0xff]   ;;  %v1836_v33 = vld [vmem:[%s2064_s28 + $0x4] ss:$16 sps:$4 sm:$0xff]   ;;  %v1837_v34 = vld [vmem:[%s2064_s28 + $0x8] ss:$16 sps:$4 sm:$0xff]  }
  0x12   : > { %1688 = vmatprep.subr.bf16.mxu1 %v1815_v13  ;;  %v1839_v35 = vld [vmem:[%s2064_s28 + $0xc] ss:$16 sps:$4 sm:$0xff]   ;;  %857 = vmatprep.mubr.bf16.mxu0 %v1836_v33  ;;  %v1840_v36 = vld [vmem:[%s2064_s28 + $0x24] ss:$16 sps:$4 sm:$0xff]   ;;  %v1844_v38 = vld [vmem:[%s2064_s28 + $0x20] ss:$16 sps:$4 sm:$0xff]  }
  0x13   : > { %1018 = vmatprep.mubr.bf16.mxu1 %v1839_v35  ;;  %v1842_v37 = vld [vmem:[%s2064_s28 + $0x2c] ss:$16 sps:$4 sm:$0xff]   ;;  %v1845_v39 = vld [vmem:[%s2064_s28 + $0x28] ss:$16 sps:$4 sm:$0xff]   ;;  %v1846_v40 = vld [vmem:[%s2064_s28 + $0x44] ss:$16 sps:$4 sm:$0xff]  }
  0x14   : > { %1577 = vmatpush3.bf16.msra.mxu0 %v1816_v14  ;;  %v1848_v41 = vld [vmem:[%s2064_s28 + $0x4c] ss:$16 sps:$4 sm:$0xff]   ;;  %v1850_v42 = vld [vmem:[%s2064_s28 + $0x40] ss:$16 sps:$4 sm:$0xff]   ;;  %v1851_v43 = vld [vmem:[%s2064_s28 + $0x48] ss:$16 sps:$4 sm:$0xff]  }
  0x15   : > { %1689 = vmatpush3.bf16.msra.mxu1 %v1817_v15  ;;  %1578 = vmatprep.subr.bf16.mxu0 %v1818_v16  ;;  %v1852_v44 = vld [vmem:[%s2064_s28 + $0x64] ss:$16 sps:$4 sm:$0xff]   ;;  %v1854_v45 = vld [vmem:[%s2064_s28 + $0x6c] ss:$16 sps:$4 sm:$0xff]   ;;  %v1856_v46 = vld [vmem:[%s2064_s28 + $0x60] ss:$16 sps:$4 sm:$0xff]  }
  0x16   : > { %1690 = vmatprep.subr.bf16.mxu1 %v1819_v17  ;;  %v1857_v47 = vld [vmem:[%s2064_s28 + $0x68] ss:$16 sps:$4 sm:$0xff]   ;;  %v1858_v48 = vld [vmem:[%s2064_s28 + $0x84] ss:$16 sps:$4 sm:$0xff]   ;;  %v1860_v49 = vld [vmem:[%s2064_s28 + $0x8c] ss:$16 sps:$4 sm:$0xff]  }
  0x17   : > { %v1862_v50 = vld [vmem:[%s2064_s28 + $0x80] ss:$16 sps:$4 sm:$0xff]   ;;  %v1863_v51 = vld [vmem:[%s2064_s28 + $0x88] ss:$16 sps:$4 sm:$0xff]   ;;  %v1864_v52 = vld [vmem:[%s2064_s28 + $0xa4] ss:$16 sps:$4 sm:$0xff]  }
  0x18   : > { %1579 = vmatpush3.bf16.msra.mxu0 %v1820_v18  ;;  %v1866_v53 = vld [vmem:[%s2064_s28 + $0xac] ss:$16 sps:$4 sm:$0xff]   ;;  %v1868_v54 = vld [vmem:[%s2064_s28 + $0xa0] ss:$16 sps:$4 sm:$0xff]   ;;  %v1869_v55 = vld [vmem:[%s2064_s28 + $0xa8] ss:$16 sps:$4 sm:$0xff]  }
  0x19   : > { %1691 = vmatpush3.bf16.msra.mxu1 %v1821_v19  ;;  %1580 = vmatprep.subr.bf16.mxu0 %v1822_v20  ;;  %v1870_v56 = vld [vmem:[%s2064_s28 + $0xc4] ss:$16 sps:$4 sm:$0xff]   ;;  %v1872_v57 = vld [vmem:[%s2064_s28 + $0xcc] ss:$16 sps:$4 sm:$0xff]   ;;  %v1874_v58 = vld [vmem:[%s2064_s28 + $0xc0] ss:$16 sps:$4 sm:$0xff]  }
  0x1a   : > { %1692 = vmatprep.subr.bf16.mxu1 %v1823_v21  ;;  %v1875_v59 = vld [vmem:[%s2064_s28 + $0xc8] ss:$16 sps:$4 sm:$0xff]   ;;  %v1876_v60 = vld [vmem:[%s2064_s28 + $0xe4] ss:$16 sps:$4 sm:$0xff]   ;;  %v1878_v61 = vld [vmem:[%s2064_s28 + $0xec] ss:$16 sps:$4 sm:$0xff]  }
  0x1b   : > { %v1880_v62 = vld [vmem:[%s2064_s28 + $0xe0] ss:$16 sps:$4 sm:$0xff]   ;;  %v1881_v63 = vld [vmem:[%s2064_s28 + $0xe8] ss:$16 sps:$4 sm:$0xff]   ;;  %v1882_v0 = vld [vmem:[%s2064_s28 + $0x104] ss:$16 sps:$4 sm:$0xff]  }
  0x1c   : > { %1581 = vmatpush3.bf16.msra.mxu0 %v1824_v22  ;;  %v1884_v1 = vld [vmem:[%s2064_s28 + $0x10c] ss:$16 sps:$4 sm:$0xff]   ;;  %v1886_v2 = vld [vmem:[%s2064_s28 + $0x100] ss:$16 sps:$4 sm:$0xff]   ;;  %v1887_v3 = vld [vmem:[%s2064_s28 + $0x108] ss:$16 sps:$4 sm:$0xff]  }
  0x1d   : > { %1693 = vmatpush3.bf16.msra.mxu1 %v1825_v23  ;;  %1582 = vmatprep.subr.bf16.mxu0 %v1826_v24  ;;  %v1888_v4 = vld [vmem:[%s2064_s28 + $0x124] ss:$16 sps:$4 sm:$0xff]   ;;  %v1890_v5 = vld [vmem:[%s2064_s28 + $0x12c] ss:$16 sps:$4 sm:$0xff]   ;;  %v1892_v6 = vld [vmem:[%s2064_s28 + $0x120] ss:$16 sps:$4 sm:$0xff]  }
  0x1e   : > { %1694 = vmatprep.subr.bf16.mxu1 %v1827_v25  ;;  %v1893_v7 = vld [vmem:[%s2064_s28 + $0x128] ss:$16 sps:$4 sm:$0xff]   ;;  %v1894_v8 = vld [vmem:[%s2064_s28 + $0x144] ss:$16 sps:$4 sm:$0xff]   ;;  %v1896_v9 = vld [vmem:[%s2064_s28 + $0x14c] ss:$16 sps:$4 sm:$0xff]  }
  0x1f   : > { %v1898_v10 = vld [vmem:[%s2064_s28 + $0x140] ss:$16 sps:$4 sm:$0xff]   ;;  %v1899_v11 = vld [vmem:[%s2064_s28 + $0x148] ss:$16 sps:$4 sm:$0xff]   ;;  %v1900_v12 = vld [vmem:[%s2064_s28 + $0x164] ss:$16 sps:$4 sm:$0xff]  }
  0x20   : > { %1583 = vmatpush3.bf16.msra.mxu0 %v1828_v26  ;;  %v1902_v13 = vld [vmem:[%s2064_s28 + $0x16c] ss:$16 sps:$4 sm:$0xff]   ;;  %v1904_v14 = vld [vmem:[%s2064_s28 + $0x160] ss:$16 sps:$4 sm:$0xff]   ;;  %v1905_v15 = vld [vmem:[%s2064_s28 + $0x168] ss:$16 sps:$4 sm:$0xff]  }
  0x21   : > { %1695 = vmatpush3.bf16.msra.mxu1 %v1829_v27  ;;  %1584 = vmatprep.subr.bf16.mxu0 %v1830_v28  ;;  %v1906_v16 = vld [vmem:[%s2064_s28 + $0x184] ss:$16 sps:$4 sm:$0xff]   ;;  %v1908_v17 = vld [vmem:[%s2064_s28 + $0x18c] ss:$16 sps:$4 sm:$0xff]   ;;  %v1910_v18 = vld [vmem:[%s2064_s28 + $0x180] ss:$16 sps:$4 sm:$0xff]  }
  0x22   : > { %1696 = vmatprep.subr.bf16.mxu1 %v1831_v29  ;;  %v1911_v19 = vld [vmem:[%s2064_s28 + $0x188] ss:$16 sps:$4 sm:$0xff]   ;;  %v1912_v20 = vld [vmem:[%s2064_s28 + $0x1a4] ss:$16 sps:$4 sm:$0xff]   ;;  %v1914_v21 = vld [vmem:[%s2064_s28 + $0x1ac] ss:$16 sps:$4 sm:$0xff]  }
  0x23   : > { %v1916_v22 = vld [vmem:[%s2064_s28 + $0x1a0] ss:$16 sps:$4 sm:$0xff]   ;;  %v1917_v23 = vld [vmem:[%s2064_s28 + $0x1a8] ss:$16 sps:$4 sm:$0xff]   ;;  %v1918_v24 = vld [vmem:[%s2064_s28 + $0x1c4] ss:$16 sps:$4 sm:$0xff]  }
  0x24   : > { %1585 = vmatpush3.bf16.msra.mxu0 %v1832_v30  ;;  %v1920_v25 = vld [vmem:[%s2064_s28 + $0x1cc] ss:$16 sps:$4 sm:$0xff]   ;;  %v1922_v26 = vld [vmem:[%s2064_s28 + $0x1c0] ss:$16 sps:$4 sm:$0xff]   ;;  %v1923_v27 = vld [vmem:[%s2064_s28 + $0x1c8] ss:$16 sps:$4 sm:$0xff]  }
  0x25   : > { %1697 = vmatpush3.bf16.msra.mxu1 %v1833_v31  ;;  %v1924_v28 = vld [vmem:[%s2064_s28 + $0x1e4] ss:$16 sps:$4 sm:$0xff]   ;;  %v1926_v29 = vld [vmem:[%s2064_s28 + $0x1ec] ss:$16 sps:$4 sm:$0xff]   ;;  %v1928_v30 = vld [vmem:[%s2064_s28 + $0x1e0] ss:$16 sps:$4 sm:$0xff]  }
  0x26   : > { %v1929_v31 = vld [vmem:[%s2064_s28 + $0x1e8] ss:$16 sps:$4 sm:$0xff]  }
  0x27   : > { %858 = vmatmul.mubr.bf16.vlgmr.msra.gmra.mrb[0].mxu0 %v1834_v32 }
  0x28   : > { %1019 = vmatmul.mubr.bf16.vlgmr.msra.gmra.mrb[0].mxu1 %v1837_v34  ;;  %865 = vmatprep.mubr.bf16.mxu0 %v1840_v36  ;;  %v2139_v34 = vld [vmem:[%s2248_s2] ss:$0 sm:$0xff] }
  0x29   : > { %1026 = vmatprep.mubr.bf16.mxu1 %v1842_v37 }
  0x2f   : > { %866 = vmatmul.mubr.bf16.gmra.mrb[4].mxu0 %v1844_v38 }
  0x30   : > { %1027 = vmatmul.mubr.bf16.gmra.mrb[4].mxu1 %v1845_v39  ;;  %873 = vmatprep.mubr.bf16.mxu0 %v1846_v40 }
  0x31   : > { %1034 = vmatprep.mubr.bf16.mxu1 %v1848_v41 }
  0x37   : > { %874 = vmatmul.mubr.bf16.gmra.mrb[8].mxu0 %v1850_v42 }
  0x38   : > { %1035 = vmatmul.mubr.bf16.gmra.mrb[8].mxu1 %v1851_v43  ;;  %881 = vmatprep.mubr.bf16.mxu0 %v1852_v44 }
  0x39   : > { %1042 = vmatprep.mubr.bf16.mxu1 %v1854_v45 }
  0x3f   : > { %882 = vmatmul.mubr.bf16.gmra.mrb[12].mxu0 %v1856_v46 }
  0x40   : > { %1043 = vmatmul.mubr.bf16.gmra.mrb[12].mxu1 %v1857_v47  ;;  %889 = vmatprep.mubr.bf16.mxu0 %v1858_v48 }
  0x41   : > { %1050 = vmatprep.mubr.bf16.mxu1 %v1860_v49 }
  0x47   : > { %890 = vmatmul.mubr.bf16.gmra.mrb[16].mxu0 %v1862_v50 }
  0x48   : > { %1051 = vmatmul.mubr.bf16.gmra.mrb[16].mxu1 %v1863_v51  ;;  %897 = vmatprep.mubr.bf16.mxu0 %v1864_v52 }
  0x49   : > { %1058 = vmatprep.mubr.bf16.mxu1 %v1866_v53 }
  0x4f   : > { %898 = vmatmul.mubr.bf16.gmra.mrb[20].mxu0 %v1868_v54 }
  0x50   : > { %1059 = vmatmul.mubr.bf16.gmra.mrb[20].mxu1 %v1869_v55  ;;  %905 = vmatprep.mubr.bf16.mxu0 %v1870_v56 }
  0x51   : > { %1066 = vmatprep.mubr.bf16.mxu1 %v1872_v57 }
  0x57   : > { %906 = vmatmul.mubr.bf16.gmra.mrb[24].mxu0 %v1874_v58 }
  0x58   : > { %1067 = vmatmul.mubr.bf16.gmra.mrb[24].mxu1 %v1875_v59  ;;  %913 = vmatprep.mubr.bf16.mxu0 %v1876_v60 }
  0x59   : > { %1074 = vmatprep.mubr.bf16.mxu1 %v1878_v61 }
  0x5f   : > { %914 = vmatmul.mubr.bf16.gmra.mrb[28].mxu0 %v1880_v62 }
  0x60   : > { %1075 = vmatmul.mubr.bf16.gmra.mrb[28].mxu1 %v1881_v63  ;;  %921 = vmatprep.mubr.bf16.mxu0 %v1882_v0 }
  0x61   : > { %1082 = vmatprep.mubr.bf16.mxu1 %v1884_v1 }
  0x67   : > { %922 = vmatmul.mubr.bf16.gmra.mrb[32].mxu0 %v1886_v2 }
  0x68   : > { %1083 = vmatmul.mubr.bf16.gmra.mrb[32].mxu1 %v1887_v3  ;;  %929 = vmatprep.mubr.bf16.mxu0 %v1888_v4 }
  0x69   : > { %1090 = vmatprep.mubr.bf16.mxu1 %v1890_v5 }
  0x6f   : > { %930 = vmatmul.mubr.bf16.gmra.mrb[36].mxu0 %v1892_v6 }
  0x70   : > { %1091 = vmatmul.mubr.bf16.gmra.mrb[36].mxu1 %v1893_v7  ;;  %937 = vmatprep.mubr.bf16.mxu0 %v1894_v8 }
  0x71   : > { %1098 = vmatprep.mubr.bf16.mxu1 %v1896_v9 }
  0x77   : > { %938 = vmatmul.mubr.bf16.gmra.mrb[40].mxu0 %v1898_v10 }
  0x78   : > { %1099 = vmatmul.mubr.bf16.gmra.mrb[40].mxu1 %v1899_v11  ;;  %945 = vmatprep.mubr.bf16.mxu0 %v1900_v12 }
  0x79   : > { %1106 = vmatprep.mubr.bf16.mxu1 %v1902_v13 }
  0x7f   : > { %946 = vmatmul.mubr.bf16.gmra.mrb[44].mxu0 %v1904_v14 }
  0x80   : > { %1107 = vmatmul.mubr.bf16.gmra.mrb[44].mxu1 %v1905_v15  ;;  %953 = vmatprep.mubr.bf16.mxu0 %v1906_v16 }
  0x81   : > { %1114 = vmatprep.mubr.bf16.mxu1 %v1908_v17 }
  0x87   : > { %954 = vmatmul.mubr.bf16.gmra.mrb[48].mxu0 %v1910_v18 }
  0x88   : > { %1115 = vmatmul.mubr.bf16.gmra.mrb[48].mxu1 %v1911_v19  ;;  %961 = vmatprep.mubr.bf16.mxu0 %v1912_v20 }
  0x89   : > { %1122 = vmatprep.mubr.bf16.mxu1 %v1914_v21 }
  0x8f   : > { %962 = vmatmul.mubr.bf16.gmra.mrb[52].mxu0 %v1916_v22 }
  0x90   : > { %1123 = vmatmul.mubr.bf16.gmra.mrb[52].mxu1 %v1917_v23  ;;  %969 = vmatprep.mubr.bf16.mxu0 %v1918_v24 }
  0x91   : > { %1130 = vmatprep.mubr.bf16.mxu1 %v1920_v25 }
  0x97   : > { %970 = vmatmul.mubr.bf16.gmra.mrb[56].mxu0 %v1922_v26 }
  0x98   : > { %1131 = vmatmul.mubr.bf16.gmra.mrb[56].mxu1 %v1923_v27  ;;  %977 = vmatprep.mubr.bf16.mxu0 %v1924_v28 }
  0x99   : > { %1138 = vmatprep.mubr.bf16.mxu1 %v1926_v29 }
  0x9f   : > { %978 = vmatmul.mubr.bf16.gmra.mrb[60].mxu0 %v1928_v30 }
  0xa0   : > { %1139 = vmatmul.mubr.bf16.gmra.mrb[60].mxu1 %v1929_v31 }
  0xfa   : > { %v1586_v32 = vpop.f32.mrb[0].mxu0 }
  0xfb   : > { %v1698_v33 = vpop.f32.mrb[0].mxu1  ;;  %v1587_v35 = vpop.f32.mrb[1].mxu0 }
  0xfc   : > { %v1588_v36 = vadd.f32 %v1587_v35, %v1586_v32  ;;  %v1699_v37 = vpop.f32.mrb[1].mxu1  ;;  %v1589_v38 = vpop.f32.mrb[2].mxu0 }
  0xfd   : > { %v1700_v39 = vadd.f32 %v1699_v37, %v1698_v33  ;;  %v1701_v40 = vpop.f32.mrb[2].mxu1  ;;  %v1590_v41 = vpop.f32.mrb[3].mxu0 }
  0xfe   : > { %v860_v42 = vadd.f32 %v1588_v36, %v2139_v34  ;;  %v1591_v43 = vadd.f32 %v1590_v41, %v1589_v38  ;;  %v1702_v44 = vpop.f32.mrb[3].mxu1 }
  0xff   : > { %v1703_v45 = vadd.f32 %v1702_v44, %v1701_v40 }
 0x100   : > { %v1021_v46 = vadd.f32 %v1700_v39, %v860_v42  ;;  %v863_v47 = vadd.f32 %v1591_v43, %v2139_v34 }
 0x102   : > { %v1147_v48 = vmax.f32 %v1021_v46, 0.0  ;;  %v1024_v49 = vadd.f32 %v1703_v45, %v863_v47  ;;  %v1592_v50 = vpop.f32.mrb[4].mxu0 }
 0x103   : > { %v1704_v51 = vpop.f32.mrb[4].mxu1  ;;  %v1593_v52 = vpop.f32.mrb[5].mxu0 }
 0x104   : > { %v1538_v53 = vpack.c.bf16 %v1147_v48, %v1147_v48  ;;  %v1148_v54 = vmax.f32 %v1024_v49, 0.0  ;;  %v1594_v55 = vadd.f32 %v1593_v52, %v1592_v50  ;;  %v1705_v56 = vpop.f32.mrb[5].mxu1  ;;  %v1595_v57 = vpop.f32.mrb[6].mxu0 }
 0x105   : > { %v1706_v58 = vadd.f32 %v1705_v56, %v1704_v51  ;;  %v1707_v59 = vpop.f32.mrb[6].mxu1  ;;  %v1596_v60 = vpop.f32.mrb[7].mxu0 }
 0x106   : > { %1308 = vst.msk [vmem:[%s2147_s10] sm:$0xf] %vm1307_vm0, %v1538_v53  ;;  %v1539_v61 = vpack.c.bf16 %v1148_v54, %v1148_v54  ;;  %v868_v62 = vadd.f32 %v1594_v55, %v2139_v34  ;;  %v1597_v63 = vadd.f32 %v1596_v60, %v1595_v57  ;;  %v1708_v0 = vpop.f32.mrb[7].mxu1 }
 0x107   : > { %v1709_v1 = vadd.f32 %v1708_v0, %v1707_v59 }
 0x108   : > { %1309 = vst.msk [vmem:[%s2147_s10 + $0x4] sm:$0xf] %vm1307_vm0, %v1539_v61  ;;  %v1029_v2 = vadd.f32 %v1706_v58, %v868_v62  ;;  %v871_v3 = vadd.f32 %v1597_v63, %v2139_v34 }
 0x10a   : > { %v1149_v4 = vmax.f32 %v1029_v2, 0.0  ;;  %v1032_v5 = vadd.f32 %v1709_v1, %v871_v3  ;;  %v1598_v6 = vpop.f32.mrb[8].mxu0 }
 0x10b   : > { %v1710_v7 = vpop.f32.mrb[8].mxu1  ;;  %v1599_v8 = vpop.f32.mrb[9].mxu0 }
 0x10c   : > { %v1540_v9 = vpack.c.bf16 %v1149_v4, %v1149_v4  ;;  %v1150_v10 = vmax.f32 %v1032_v5, 0.0  ;;  %v1600_v11 = vadd.f32 %v1599_v8, %v1598_v6  ;;  %v1711_v12 = vpop.f32.mrb[9].mxu1  ;;  %v1601_v13 = vpop.f32.mrb[10].mxu0 }
 0x10d   : > { %v1712_v14 = vadd.f32 %v1711_v12, %v1710_v7  ;;  %v1713_v15 = vpop.f32.mrb[10].mxu1  ;;  %v1602_v16 = vpop.f32.mrb[11].mxu0 }
 0x10e   : > { %1310 = vst.msk [vmem:[%s2147_s10 + $0x8] sm:$0xf] %vm1307_vm0, %v1540_v9  ;;  %v1541_v17 = vpack.c.bf16 %v1150_v10, %v1150_v10  ;;  %v876_v18 = vadd.f32 %v1600_v11, %v2139_v34  ;;  %v1603_v19 = vadd.f32 %v1602_v16, %v1601_v13  ;;  %v1714_v20 = vpop.f32.mrb[11].mxu1 }
 0x10f   : > { %v1715_v21 = vadd.f32 %v1714_v20, %v1713_v15 }
 0x110   : > { %1311 = vst.msk [vmem:[%s2147_s10 + $0xc] sm:$0xf] %vm1307_vm0, %v1541_v17  ;;  %v1037_v22 = vadd.f32 %v1712_v14, %v876_v18  ;;  %v879_v23 = vadd.f32 %v1603_v19, %v2139_v34 }
 0x112   : > { %v1151_v24 = vmax.f32 %v1037_v22, 0.0  ;;  %v1040_v25 = vadd.f32 %v1715_v21, %v879_v23  ;;  %v1604_v26 = vpop.f32.mrb[12].mxu0 }
 0x113   : > { %v1716_v27 = vpop.f32.mrb[12].mxu1  ;;  %v1605_v28 = vpop.f32.mrb[13].mxu0 }
 0x114   : > { %v1542_v29 = vpack.c.bf16 %v1151_v24, %v1151_v24  ;;  %v1152_v30 = vmax.f32 %v1040_v25, 0.0  ;;  %v1606_v31 = vadd.f32 %v1605_v28, %v1604_v26  ;;  %v1717_v32 = vpop.f32.mrb[13].mxu1  ;;  %v1607_v33 = vpop.f32.mrb[14].mxu0 }
 0x115   : > { %v1718_v35 = vadd.f32 %v1717_v32, %v1716_v27  ;;  %v1719_v36 = vpop.f32.mrb[14].mxu1  ;;  %v1608_v37 = vpop.f32.mrb[15].mxu0 }
 0x116   : > { %1312 = vst.msk [vmem:[%s2147_s10 + $0x10] sm:$0xf] %vm1307_vm0, %v1542_v29  ;;  %v1543_v38 = vpack.c.bf16 %v1152_v30, %v1152_v30  ;;  %v884_v39 = vadd.f32 %v1606_v31, %v2139_v34  ;;  %v1609_v40 = vadd.f32 %v1608_v37, %v1607_v33  ;;  %v1720_v41 = vpop.f32.mrb[15].mxu1 }
 0x117   : > { %v1721_v42 = vadd.f32 %v1720_v41, %v1719_v36 }
 0x118   : > { %1313 = vst.msk [vmem:[%s2147_s10 + $0x14] sm:$0xf] %vm1307_vm0, %v1543_v38  ;;  %v1045_v43 = vadd.f32 %v1718_v35, %v884_v39  ;;  %v887_v44 = vadd.f32 %v1609_v40, %v2139_v34 }
 0x11a   : > { %v1153_v45 = vmax.f32 %v1045_v43, 0.0  ;;  %v1048_v46 = vadd.f32 %v1721_v42, %v887_v44  ;;  %v1610_v47 = vpop.f32.mrb[16].mxu0 }
 0x11b   : > { %v1722_v48 = vpop.f32.mrb[16].mxu1  ;;  %v1611_v49 = vpop.f32.mrb[17].mxu0 }
 0x11c   : > { %v1544_v50 = vpack.c.bf16 %v1153_v45, %v1153_v45  ;;  %v1154_v51 = vmax.f32 %v1048_v46, 0.0  ;;  %v1612_v52 = vadd.f32 %v1611_v49, %v1610_v47  ;;  %v1723_v53 = vpop.f32.mrb[17].mxu1  ;;  %v1613_v54 = vpop.f32.mrb[18].mxu0 }
 0x11d   : > { %v1724_v55 = vadd.f32 %v1723_v53, %v1722_v48  ;;  %v1725_v56 = vpop.f32.mrb[18].mxu1  ;;  %v1614_v57 = vpop.f32.mrb[19].mxu0 }
 0x11e   : > { %1314 = vst.msk [vmem:[%s2147_s10 + $0x18] sm:$0xf] %vm1307_vm0, %v1544_v50  ;;  %v1545_v58 = vpack.c.bf16 %v1154_v51, %v1154_v51  ;;  %v892_v59 = vadd.f32 %v1612_v52, %v2139_v34  ;;  %v1615_v60 = vadd.f32 %v1614_v57, %v1613_v54  ;;  %v1726_v61 = vpop.f32.mrb[19].mxu1 }
 0x11f   : > { %v1727_v62 = vadd.f32 %v1726_v61, %v1725_v56 }
 0x120   : > { %1315 = vst.msk [vmem:[%s2147_s10 + $0x1c] sm:$0xf] %vm1307_vm0, %v1545_v58  ;;  %v1053_v63 = vadd.f32 %v1724_v55, %v892_v59  ;;  %v895_v0 = vadd.f32 %v1615_v60, %v2139_v34 }
 0x122   : > { %v1155_v1 = vmax.f32 %v1053_v63, 0.0  ;;  %v1056_v2 = vadd.f32 %v1727_v62, %v895_v0  ;;  %v1616_v3 = vpop.f32.mrb[20].mxu0 }
 0x123   : > { %v1728_v4 = vpop.f32.mrb[20].mxu1  ;;  %v1617_v5 = vpop.f32.mrb[21].mxu0 }
 0x124   : > { %v1546_v6 = vpack.c.bf16 %v1155_v1, %v1155_v1  ;;  %v1156_v7 = vmax.f32 %v1056_v2, 0.0  ;;  %v1618_v8 = vadd.f32 %v1617_v5, %v1616_v3  ;;  %v1729_v9 = vpop.f32.mrb[21].mxu1  ;;  %v1619_v10 = vpop.f32.mrb[22].mxu0 }
 0x125   : > { %v1730_v11 = vadd.f32 %v1729_v9, %v1728_v4  ;;  %v1731_v12 = vpop.f32.mrb[22].mxu1  ;;  %v1620_v13 = vpop.f32.mrb[23].mxu0 }
 0x126   : > { %1316 = vst.msk [vmem:[%s2147_s10 + $0x20] sm:$0xf] %vm1307_vm0, %v1546_v6  ;;  %v1547_v14 = vpack.c.bf16 %v1156_v7, %v1156_v7  ;;  %v900_v15 = vadd.f32 %v1618_v8, %v2139_v34  ;;  %v1621_v16 = vadd.f32 %v1620_v13, %v1619_v10  ;;  %v1732_v17 = vpop.f32.mrb[23].mxu1 }
 0x127   : > { %v1733_v18 = vadd.f32 %v1732_v17, %v1731_v12 }
 0x128   : > { %1317 = vst.msk [vmem:[%s2147_s10 + $0x24] sm:$0xf] %vm1307_vm0, %v1547_v14  ;;  %v1061_v19 = vadd.f32 %v1730_v11, %v900_v15  ;;  %v903_v20 = vadd.f32 %v1621_v16, %v2139_v34 }
 0x12a   : > { %v1157_v21 = vmax.f32 %v1061_v19, 0.0  ;;  %v1064_v22 = vadd.f32 %v1733_v18, %v903_v20  ;;  %v1622_v23 = vpop.f32.mrb[24].mxu0 }
 0x12b   : > { %v1734_v24 = vpop.f32.mrb[24].mxu1  ;;  %v1623_v25 = vpop.f32.mrb[25].mxu0 }
 0x12c   : > { %v1548_v26 = vpack.c.bf16 %v1157_v21, %v1157_v21  ;;  %v1158_v27 = vmax.f32 %v1064_v22, 0.0  ;;  %v1624_v28 = vadd.f32 %v1623_v25, %v1622_v23  ;;  %v1735_v29 = vpop.f32.mrb[25].mxu1  ;;  %v1625_v30 = vpop.f32.mrb[26].mxu0 }
 0x12d   : > { %v1736_v31 = vadd.f32 %v1735_v29, %v1734_v24  ;;  %v1737_v32 = vpop.f32.mrb[26].mxu1  ;;  %v1626_v33 = vpop.f32.mrb[27].mxu0 }
 0x12e   : > { %1318 = vst.msk [vmem:[%s2147_s10 + $0x28] sm:$0xf] %vm1307_vm0, %v1548_v26  ;;  %v1549_v35 = vpack.c.bf16 %v1158_v27, %v1158_v27  ;;  %v908_v36 = vadd.f32 %v1624_v28, %v2139_v34  ;;  %v1627_v37 = vadd.f32 %v1626_v33, %v1625_v30  ;;  %v1738_v38 = vpop.f32.mrb[27].mxu1 }
 0x12f   : > { %v1739_v39 = vadd.f32 %v1738_v38, %v1737_v32 }
 0x130   : > { %1319 = vst.msk [vmem:[%s2147_s10 + $0x2c] sm:$0xf] %vm1307_vm0, %v1549_v35  ;;  %v1069_v40 = vadd.f32 %v1736_v31, %v908_v36  ;;  %v911_v41 = vadd.f32 %v1627_v37, %v2139_v34 }
 0x132   : > { %v1159_v42 = vmax.f32 %v1069_v40, 0.0  ;;  %v1072_v43 = vadd.f32 %v1739_v39, %v911_v41  ;;  %v1628_v44 = vpop.f32.mrb[28].mxu0 }
 0x133   : > { %v1740_v45 = vpop.f32.mrb[28].mxu1  ;;  %v1629_v46 = vpop.f32.mrb[29].mxu0 }
 0x134   : > { %v1550_v47 = vpack.c.bf16 %v1159_v42, %v1159_v42  ;;  %v1160_v48 = vmax.f32 %v1072_v43, 0.0  ;;  %v1630_v49 = vadd.f32 %v1629_v46, %v1628_v44  ;;  %v1741_v50 = vpop.f32.mrb[29].mxu1  ;;  %v1631_v51 = vpop.f32.mrb[30].mxu0 }
 0x135   : > { %v1742_v52 = vadd.f32 %v1741_v50, %v1740_v45  ;;  %v1743_v53 = vpop.f32.mrb[30].mxu1  ;;  %v1632_v54 = vpop.f32.mrb[31].mxu0 }
 0x136   : > { %1320 = vst.msk [vmem:[%s2147_s10 + $0x30] sm:$0xf] %vm1307_vm0, %v1550_v47  ;;  %v1551_v55 = vpack.c.bf16 %v1160_v48, %v1160_v48  ;;  %v916_v56 = vadd.f32 %v1630_v49, %v2139_v34  ;;  %v1633_v57 = vadd.f32 %v1632_v54, %v1631_v51  ;;  %v1744_v58 = vpop.f32.mrb[31].mxu1 }
 0x137   : > { %v1745_v59 = vadd.f32 %v1744_v58, %v1743_v53 }
 0x138   : > { %1321 = vst.msk [vmem:[%s2147_s10 + $0x34] sm:$0xf] %vm1307_vm0, %v1551_v55  ;;  %v1077_v60 = vadd.f32 %v1742_v52, %v916_v56  ;;  %v919_v61 = vadd.f32 %v1633_v57, %v2139_v34 }
 0x13a   : > { %v1161_v62 = vmax.f32 %v1077_v60, 0.0  ;;  %v1080_v63 = vadd.f32 %v1745_v59, %v919_v61  ;;  %v1634_v0 = vpop.f32.mrb[32].mxu0 }
 0x13b   : > { %v1746_v1 = vpop.f32.mrb[32].mxu1  ;;  %v1635_v2 = vpop.f32.mrb[33].mxu0 }
 0x13c   : > { %v1552_v3 = vpack.c.bf16 %v1161_v62, %v1161_v62  ;;  %v1162_v4 = vmax.f32 %v1080_v63, 0.0  ;;  %v1636_v5 = vadd.f32 %v1635_v2, %v1634_v0  ;;  %v1747_v6 = vpop.f32.mrb[33].mxu1  ;;  %v1637_v7 = vpop.f32.mrb[34].mxu0 }
 0x13d   : > { %v1748_v8 = vadd.f32 %v1747_v6, %v1746_v1  ;;  %v1749_v9 = vpop.f32.mrb[34].mxu1  ;;  %v1638_v10 = vpop.f32.mrb[35].mxu0 }
 0x13e   : > { %1322 = vst.msk [vmem:[%s2147_s10 + $0x38] sm:$0xf] %vm1307_vm0, %v1552_v3  ;;  %v1553_v11 = vpack.c.bf16 %v1162_v4, %v1162_v4  ;;  %v924_v12 = vadd.f32 %v1636_v5, %v2139_v34  ;;  %v1639_v13 = vadd.f32 %v1638_v10, %v1637_v7  ;;  %v1750_v14 = vpop.f32.mrb[35].mxu1 }
 0x13f   : > { %v1751_v15 = vadd.f32 %v1750_v14, %v1749_v9 }
 0x140   : > { %1323 = vst.msk [vmem:[%s2147_s10 + $0x3c] sm:$0xf] %vm1307_vm0, %v1553_v11  ;;  %v1085_v16 = vadd.f32 %v1748_v8, %v924_v12  ;;  %v927_v17 = vadd.f32 %v1639_v13, %v2139_v34 }
 0x142   : > { %v1163_v18 = vmax.f32 %v1085_v16, 0.0  ;;  %v1088_v19 = vadd.f32 %v1751_v15, %v927_v17  ;;  %v1640_v20 = vpop.f32.mrb[36].mxu0 }
 0x143   : > { %v1752_v21 = vpop.f32.mrb[36].mxu1  ;;  %v1641_v22 = vpop.f32.mrb[37].mxu0 }
 0x144   : > { %v1554_v23 = vpack.c.bf16 %v1163_v18, %v1163_v18  ;;  %v1164_v24 = vmax.f32 %v1088_v19, 0.0  ;;  %v1642_v25 = vadd.f32 %v1641_v22, %v1640_v20  ;;  %v1753_v26 = vpop.f32.mrb[37].mxu1  ;;  %v1643_v27 = vpop.f32.mrb[38].mxu0 }
 0x145   : > { %v1754_v28 = vadd.f32 %v1753_v26, %v1752_v21  ;;  %v1755_v29 = vpop.f32.mrb[38].mxu1  ;;  %v1644_v30 = vpop.f32.mrb[39].mxu0 }
 0x146   : > { %1324 = vst.msk [vmem:[%s2147_s10 + $0x40] sm:$0xf] %vm1307_vm0, %v1554_v23  ;;  %v1555_v31 = vpack.c.bf16 %v1164_v24, %v1164_v24  ;;  %v932_v32 = vadd.f32 %v1642_v25, %v2139_v34  ;;  %v1645_v33 = vadd.f32 %v1644_v30, %v1643_v27  ;;  %v1756_v35 = vpop.f32.mrb[39].mxu1 }
 0x147   : > { %v1757_v36 = vadd.f32 %v1756_v35, %v1755_v29 }
 0x148   : > { %1325 = vst.msk [vmem:[%s2147_s10 + $0x44] sm:$0xf] %vm1307_vm0, %v1555_v31  ;;  %v1093_v37 = vadd.f32 %v1754_v28, %v932_v32  ;;  %v935_v38 = vadd.f32 %v1645_v33, %v2139_v34 }
 0x14a   : > { %v1165_v39 = vmax.f32 %v1093_v37, 0.0  ;;  %v1096_v40 = vadd.f32 %v1757_v36, %v935_v38  ;;  %v1646_v41 = vpop.f32.mrb[40].mxu0 }
 0x14b   : > { %v1758_v42 = vpop.f32.mrb[40].mxu1  ;;  %v1647_v43 = vpop.f32.mrb[41].mxu0 }
 0x14c   : > { %v1556_v44 = vpack.c.bf16 %v1165_v39, %v1165_v39  ;;  %v1166_v45 = vmax.f32 %v1096_v40, 0.0  ;;  %v1648_v46 = vadd.f32 %v1647_v43, %v1646_v41  ;;  %v1759_v47 = vpop.f32.mrb[41].mxu1  ;;  %v1649_v48 = vpop.f32.mrb[42].mxu0 }
 0x14d   : > { %v1760_v49 = vadd.f32 %v1759_v47, %v1758_v42  ;;  %v1761_v50 = vpop.f32.mrb[42].mxu1  ;;  %v1650_v51 = vpop.f32.mrb[43].mxu0 }
 0x14e   : > { %1326 = vst.msk [vmem:[%s2147_s10 + $0x48] sm:$0xf] %vm1307_vm0, %v1556_v44  ;;  %v1557_v52 = vpack.c.bf16 %v1166_v45, %v1166_v45  ;;  %v940_v53 = vadd.f32 %v1648_v46, %v2139_v34  ;;  %v1651_v54 = vadd.f32 %v1650_v51, %v1649_v48  ;;  %v1762_v55 = vpop.f32.mrb[43].mxu1 }
 0x14f   : > { %v1763_v56 = vadd.f32 %v1762_v55, %v1761_v50 }
 0x150   : > { %1327 = vst.msk [vmem:[%s2147_s10 + $0x4c] sm:$0xf] %vm1307_vm0, %v1557_v52  ;;  %v1101_v57 = vadd.f32 %v1760_v49, %v940_v53  ;;  %v943_v58 = vadd.f32 %v1651_v54, %v2139_v34 }
 0x152   : > { %v1167_v59 = vmax.f32 %v1101_v57, 0.0  ;;  %v1104_v60 = vadd.f32 %v1763_v56, %v943_v58  ;;  %v1652_v61 = vpop.f32.mrb[44].mxu0 }
 0x153   : > { %v1764_v62 = vpop.f32.mrb[44].mxu1  ;;  %v1653_v63 = vpop.f32.mrb[45].mxu0 }
 0x154   : > { %v1558_v0 = vpack.c.bf16 %v1167_v59, %v1167_v59  ;;  %v1168_v1 = vmax.f32 %v1104_v60, 0.0  ;;  %v1654_v2 = vadd.f32 %v1653_v63, %v1652_v61  ;;  %v1765_v3 = vpop.f32.mrb[45].mxu1  ;;  %v1655_v4 = vpop.f32.mrb[46].mxu0 }
 0x155   : > { %v1766_v5 = vadd.f32 %v1765_v3, %v1764_v62  ;;  %v1767_v6 = vpop.f32.mrb[46].mxu1  ;;  %v1656_v7 = vpop.f32.mrb[47].mxu0 }
 0x156   : > { %1328 = vst.msk [vmem:[%s2147_s10 + $0x50] sm:$0xf] %vm1307_vm0, %v1558_v0  ;;  %v1559_v8 = vpack.c.bf16 %v1168_v1, %v1168_v1  ;;  %v948_v9 = vadd.f32 %v1654_v2, %v2139_v34  ;;  %v1657_v10 = vadd.f32 %v1656_v7, %v1655_v4  ;;  %v1768_v11 = vpop.f32.mrb[47].mxu1 }
 0x157   : > { %v1769_v12 = vadd.f32 %v1768_v11, %v1767_v6 }
 0x158   : > { %1329 = vst.msk [vmem:[%s2147_s10 + $0x54] sm:$0xf] %vm1307_vm0, %v1559_v8  ;;  %v1109_v13 = vadd.f32 %v1766_v5, %v948_v9  ;;  %v951_v14 = vadd.f32 %v1657_v10, %v2139_v34 }
 0x15a   : > { %v1169_v15 = vmax.f32 %v1109_v13, 0.0  ;;  %v1112_v16 = vadd.f32 %v1769_v12, %v951_v14  ;;  %v1658_v17 = vpop.f32.mrb[48].mxu0 }
 0x15b   : > { %v1770_v18 = vpop.f32.mrb[48].mxu1  ;;  %v1659_v19 = vpop.f32.mrb[49].mxu0 }
 0x15c   : > { %v1560_v20 = vpack.c.bf16 %v1169_v15, %v1169_v15  ;;  %v1170_v21 = vmax.f32 %v1112_v16, 0.0  ;;  %v1660_v22 = vadd.f32 %v1659_v19, %v1658_v17  ;;  %v1771_v23 = vpop.f32.mrb[49].mxu1  ;;  %v1661_v24 = vpop.f32.mrb[50].mxu0 }
 0x15d   : > { %v1772_v25 = vadd.f32 %v1771_v23, %v1770_v18  ;;  %v1773_v26 = vpop.f32.mrb[50].mxu1  ;;  %v1662_v27 = vpop.f32.mrb[51].mxu0 }
 0x15e   : > { %1330 = vst.msk [vmem:[%s2147_s10 + $0x58] sm:$0xf] %vm1307_vm0, %v1560_v20  ;;  %v1561_v28 = vpack.c.bf16 %v1170_v21, %v1170_v21  ;;  %v956_v29 = vadd.f32 %v1660_v22, %v2139_v34  ;;  %v1663_v30 = vadd.f32 %v1662_v27, %v1661_v24  ;;  %v1774_v31 = vpop.f32.mrb[51].mxu1 }
 0x15f   : > { %v1775_v32 = vadd.f32 %v1774_v31, %v1773_v26 }
 0x160   : > { %1331 = vst.msk [vmem:[%s2147_s10 + $0x5c] sm:$0xf] %vm1307_vm0, %v1561_v28  ;;  %v1117_v33 = vadd.f32 %v1772_v25, %v956_v29  ;;  %v959_v35 = vadd.f32 %v1663_v30, %v2139_v34 }
 0x162   : > { %v1171_v36 = vmax.f32 %v1117_v33, 0.0  ;;  %v1120_v37 = vadd.f32 %v1775_v32, %v959_v35  ;;  %v1664_v38 = vpop.f32.mrb[52].mxu0 }
 0x163   : > { %v1776_v39 = vpop.f32.mrb[52].mxu1  ;;  %v1665_v40 = vpop.f32.mrb[53].mxu0 }
 0x164   : > { %v1562_v41 = vpack.c.bf16 %v1171_v36, %v1171_v36  ;;  %v1172_v42 = vmax.f32 %v1120_v37, 0.0  ;;  %v1666_v43 = vadd.f32 %v1665_v40, %v1664_v38  ;;  %v1777_v44 = vpop.f32.mrb[53].mxu1  ;;  %v1667_v45 = vpop.f32.mrb[54].mxu0 }
 0x165   : > { %v1778_v46 = vadd.f32 %v1777_v44, %v1776_v39  ;;  %v1779_v47 = vpop.f32.mrb[54].mxu1  ;;  %v1668_v48 = vpop.f32.mrb[55].mxu0 }
 0x166   : > { %1332 = vst.msk [vmem:[%s2147_s10 + $0x60] sm:$0xf] %vm1307_vm0, %v1562_v41  ;;  %v1563_v49 = vpack.c.bf16 %v1172_v42, %v1172_v42  ;;  %v964_v50 = vadd.f32 %v1666_v43, %v2139_v34  ;;  %v1669_v51 = vadd.f32 %v1668_v48, %v1667_v45  ;;  %v1780_v52 = vpop.f32.mrb[55].mxu1 }
 0x167   : > { %v1781_v53 = vadd.f32 %v1780_v52, %v1779_v47 }
 0x168   : > { %1333 = vst.msk [vmem:[%s2147_s10 + $0x64] sm:$0xf] %vm1307_vm0, %v1563_v49  ;;  %v1125_v54 = vadd.f32 %v1778_v46, %v964_v50  ;;  %v967_v55 = vadd.f32 %v1669_v51, %v2139_v34 }
 0x16a   : > { %v1173_v56 = vmax.f32 %v1125_v54, 0.0  ;;  %v1128_v57 = vadd.f32 %v1781_v53, %v967_v55  ;;  %v1670_v58 = vpop.f32.mrb[56].mxu0 }
 0x16b   : > { %v1782_v59 = vpop.f32.mrb[56].mxu1  ;;  %v1671_v60 = vpop.f32.mrb[57].mxu0 }
 0x16c   : > { %v1564_v61 = vpack.c.bf16 %v1173_v56, %v1173_v56  ;;  %v1174_v62 = vmax.f32 %v1128_v57, 0.0  ;;  %v1672_v63 = vadd.f32 %v1671_v60, %v1670_v58  ;;  %v1783_v0 = vpop.f32.mrb[57].mxu1  ;;  %v1673_v1 = vpop.f32.mrb[58].mxu0 }
 0x16d   : > { %v1784_v2 = vadd.f32 %v1783_v0, %v1782_v59  ;;  %v1785_v3 = vpop.f32.mrb[58].mxu1  ;;  %v1674_v4 = vpop.f32.mrb[59].mxu0 }
 0x16e   : > { %1334 = vst.msk [vmem:[%s2147_s10 + $0x68] sm:$0xf] %vm1307_vm0, %v1564_v61  ;;  %v1565_v5 = vpack.c.bf16 %v1174_v62, %v1174_v62  ;;  %v972_v6 = vadd.f32 %v1672_v63, %v2139_v34  ;;  %v1675_v7 = vadd.f32 %v1674_v4, %v1673_v1  ;;  %v1786_v8 = vpop.f32.mrb[59].mxu1 }
 0x16f   : > { %v1787_v9 = vadd.f32 %v1786_v8, %v1785_v3 }
 0x170   : > { %1335 = vst.msk [vmem:[%s2147_s10 + $0x6c] sm:$0xf] %vm1307_vm0, %v1565_v5  ;;  %v1133_v10 = vadd.f32 %v1784_v2, %v972_v6  ;;  %v975_v11 = vadd.f32 %v1675_v7, %v2139_v34 }
 0x172   : > { %v1175_v12 = vmax.f32 %v1133_v10, 0.0  ;;  %v1136_v13 = vadd.f32 %v1787_v9, %v975_v11  ;;  %v1676_v14 = vpop.f32.mrb[60].mxu0 }
 0x173   : > { %v1788_v15 = vpop.f32.mrb[60].mxu1  ;;  %v1677_v16 = vpop.f32.mrb[61].mxu0 }
 0x174   : > { %v1566_v17 = vpack.c.bf16 %v1175_v12, %v1175_v12  ;;  %v1176_v18 = vmax.f32 %v1136_v13, 0.0  ;;  %v1678_v19 = vadd.f32 %v1677_v16, %v1676_v14  ;;  %v1789_v20 = vpop.f32.mrb[61].mxu1  ;;  %v1679_v21 = vpop.f32.mrb[62].mxu0 }
 0x175   : > { %v1790_v22 = vadd.f32 %v1789_v20, %v1788_v15  ;;  %v1791_v23 = vpop.f32.mrb[62].mxu1  ;;  %v1680_v24 = vpop.f32.mrb[63].mxu0 }
 0x176   : > { %1336 = vst.msk [vmem:[%s2147_s10 + $0x70] sm:$0xf] %vm1307_vm0, %v1566_v17  ;;  %v1567_v25 = vpack.c.bf16 %v1176_v18, %v1176_v18  ;;  %v980_v26 = vadd.f32 %v1678_v19, %v2139_v34  ;;  %v1681_v27 = vadd.f32 %v1680_v24, %v1679_v21  ;;  %v1792_v28 = vpop.f32.mrb[63].mxu1 }
 0x177   : > { %v1793_v29 = vadd.f32 %v1792_v28, %v1791_v23 }
 0x178   : > { %1337 = vst.msk [vmem:[%s2147_s10 + $0x74] sm:$0xf] %vm1307_vm0, %v1567_v25  ;;  %v1141_v30 = vadd.f32 %v1790_v22, %v980_v26  ;;  %v983_v31 = vadd.f32 %v1681_v27, %v2139_v34 }
 0x17a   : > { %v1177_v32 = vmax.f32 %v1141_v30, 0.0  ;;  %v1144_v33 = vadd.f32 %v1793_v29, %v983_v31 }
 0x17c   : > { %v1568_v35 = vpack.c.bf16 %v1177_v32, %v1177_v32  ;;  %v1178_v36 = vmax.f32 %v1144_v33, 0.0 }
 0x17e   : > { %1338 = vst.msk [vmem:[%s2147_s10 + $0x78] sm:$0xf] %vm1307_vm0, %v1568_v35  ;;  %v1569_v37 = vpack.c.bf16 %v1178_v36, %v1178_v36 }
 0x180   : > { %1339 = vst.msk [vmem:[%s2147_s10 + $0x7c] sm:$0xf] %vm1307_vm0, %v1569_v37 }
 0x181 PF: > { %s13_s12 = sadd.s32 1, %s1936_s12  }
 0x182   : > { %p10_p4 = scmp.ge.s32.totalorder %s13_s12, 4  }
 0x184   :  { %12 = sbr.rel (!%p10_p4) target bundleno = 1 (0x1), region = 62 }

// kernel: betavae_forward.11
= control target key start
LH: loop header
LB: loop body
LE: loop exit
PB: predicated region body
PF: predicated region fallthrough
CT: control target
= control target key end

     0   :  { %vm744_vm0 = vcmask 519168   ;;  %s1367_s1 = inlined_call_operand.vmem [shape: bf16[512,64], index: 1, kind: input, shape index: {}]   ;;  %s1368_s0 = inlined_call_operand.vmem [shape: bf16[128,512], index: 0, kind: input, shape index: {}]   ;;  %s1369_s2 = inlined_call_operand.vmem [shape: f32[1,64], index: 2, kind: input, shape index: {}]   ;;  %s1370_s3 = inlined_call_operand.vmem [shape: bf16[128,64], index: 3, kind: output, shape index: {}]  }
   0x1   :  { %v990_v0 = vld [vmem:[%s1367_s1 + $0x40] sm:$0xff]   ;;  %v994_v4 = vld [vmem:[%s1367_s1 + $0x48] sm:$0xff]   ;;  %v998_v8 = vld [vmem:[%s1367_s1 + $0x50] sm:$0xff]  }
   0x2   :  { %v991_v1 = vld [vmem:[%s1367_s1 + $0xc0] sm:$0xff]   ;;  %862 = vmatprep.subr.bf16.mxu0 %v990_v0  ;;  %v995_v5 = vld [vmem:[%s1367_s1 + $0xc8] sm:$0xff]   ;;  %v999_v9 = vld [vmem:[%s1367_s1 + $0xd0] sm:$0xff]  }
   0x3   :  { %v992_v2 = vld [vmem:[%s1367_s1] sm:$0xff]   ;;  %926 = vmatprep.subr.bf16.mxu1 %v991_v1  ;;  %v996_v6 = vld [vmem:[%s1367_s1 + $0x8] sm:$0xff]   ;;  %v1000_v10 = vld [vmem:[%s1367_s1 + $0x10] sm:$0xff]  }
   0x4   :  { %v993_v3 = vld [vmem:[%s1367_s1 + $0x80] sm:$0xff]   ;;  %863 = vmatpush3.bf16.msra.mxu0 %v992_v2  ;;  %v997_v7 = vld [vmem:[%s1367_s1 + $0x88] sm:$0xff]   ;;  %v1001_v11 = vld [vmem:[%s1367_s1 + $0x90] sm:$0xff]  }
   0x5   :  { %927 = vmatpush3.bf16.msra.mxu1 %v993_v3  ;;  %864 = vmatprep.subr.bf16.mxu0 %v994_v4  ;;  %v1002_v12 = vld [vmem:[%s1367_s1 + $0x58] sm:$0xff]   ;;  %v1006_v16 = vld [vmem:[%s1367_s1 + $0x60] sm:$0xff]   ;;  %v1010_v20 = vld [vmem:[%s1367_s1 + $0x68] sm:$0xff]  }
   0x6   :  { %928 = vmatprep.subr.bf16.mxu1 %v995_v5  ;;  %v1003_v13 = vld [vmem:[%s1367_s1 + $0xd8] sm:$0xff]   ;;  %v1007_v17 = vld [vmem:[%s1367_s1 + $0xe0] sm:$0xff]   ;;  %v1011_v21 = vld [vmem:[%s1367_s1 + $0xe8] sm:$0xff]  }
   0x7   :  { %v1004_v14 = vld [vmem:[%s1367_s1 + $0x18] sm:$0xff]   ;;  %v1008_v18 = vld [vmem:[%s1367_s1 + $0x20] sm:$0xff]   ;;  %v1012_v22 = vld [vmem:[%s1367_s1 + $0x28] sm:$0xff]  }
   0x8   :  { %865 = vmatpush3.bf16.msra.mxu0 %v996_v6  ;;  %v1005_v15 = vld [vmem:[%s1367_s1 + $0x98] sm:$0xff]   ;;  %v1009_v19 = vld [vmem:[%s1367_s1 + $0xa0] sm:$0xff]   ;;  %v1013_v23 = vld [vmem:[%s1367_s1 + $0xa8] sm:$0xff]  }
   0x9   :  { %929 = vmatpush3.bf16.msra.mxu1 %v997_v7  ;;  %866 = vmatprep.subr.bf16.mxu0 %v998_v8  ;;  %v1014_v24 = vld [vmem:[%s1367_s1 + $0x70] sm:$0xff]   ;;  %v1018_v28 = vld [vmem:[%s1367_s1 + $0x78] sm:$0xff]   ;;  %v1285_v2 = vld [vmem:[%s1369_s2] ss:$0 sm:$0xff] }
   0xa   :  { %930 = vmatprep.subr.bf16.mxu1 %v999_v9  ;;  %v1015_v25 = vld [vmem:[%s1367_s1 + $0xf0] sm:$0xff]   ;;  %v1019_v29 = vld [vmem:[%s1367_s1 + $0xf8] sm:$0xff]  }
   0xb   :  { %v1016_v26 = vld [vmem:[%s1367_s1 + $0x30] sm:$0xff]   ;;  %v1020_v30 = vld [vmem:[%s1367_s1 + $0x38] sm:$0xff]  }
   0xc   :  { %867 = vmatpush3.bf16.msra.mxu0 %v1000_v10  ;;  %v1017_v27 = vld [vmem:[%s1367_s1 + $0xb0] sm:$0xff]   ;;  %v1021_v31 = vld [vmem:[%s1367_s1 + $0xb8] sm:$0xff]  }
   0xd   :  { %931 = vmatpush3.bf16.msra.mxu1 %v1001_v11  ;;  %868 = vmatprep.subr.bf16.mxu0 %v1002_v12  ;;  %v1022_v32 = vld [vmem:[%s1368_s0] ss:$16 sps:$4 sm:$0xff]   ;;  %v1024_v33 = vld [vmem:[%s1368_s0 + $0x4] ss:$16 sps:$4 sm:$0xff]   ;;  %v1025_v34 = vld [vmem:[%s1368_s0 + $0x8] ss:$16 sps:$4 sm:$0xff]  }
   0xe   :  { %932 = vmatprep.subr.bf16.mxu1 %v1003_v13  ;;  %v1027_v35 = vld [vmem:[%s1368_s0 + $0xc] ss:$16 sps:$4 sm:$0xff]   ;;  %502 = vmatprep.mubr.bf16.mxu0 %v1024_v33  ;;  %v1028_v36 = vld [vmem:[%s1368_s0 + $0x24] ss:$16 sps:$4 sm:$0xff]   ;;  %v1032_v38 = vld [vmem:[%s1368_s0 + $0x20] ss:$16 sps:$4 sm:$0xff]  }
   0xf   :  { %599 = vmatprep.mubr.bf16.mxu1 %v1027_v35  ;;  %v1030_v37 = vld [vmem:[%s1368_s0 + $0x2c] ss:$16 sps:$4 sm:$0xff]   ;;  %v1033_v39 = vld [vmem:[%s1368_s0 + $0x28] ss:$16 sps:$4 sm:$0xff]   ;;  %v1034_v40 = vld [vmem:[%s1368_s0 + $0x44] ss:$16 sps:$4 sm:$0xff]  }
  0x10   :  { %869 = vmatpush3.bf16.msra.mxu0 %v1004_v14  ;;  %v1036_v41 = vld [vmem:[%s1368_s0 + $0x4c] ss:$16 sps:$4 sm:$0xff]   ;;  %v1038_v42 = vld [vmem:[%s1368_s0 + $0x40] ss:$16 sps:$4 sm:$0xff]   ;;  %v1039_v43 = vld [vmem:[%s1368_s0 + $0x48] ss:$16 sps:$4 sm:$0xff]  }
  0x11   :  { %933 = vmatpush3.bf16.msra.mxu1 %v1005_v15  ;;  %870 = vmatprep.subr.bf16.mxu0 %v1006_v16  ;;  %v1040_v44 = vld [vmem:[%s1368_s0 + $0x64] ss:$16 sps:$4 sm:$0xff]   ;;  %v1042_v45 = vld [vmem:[%s1368_s0 + $0x6c] ss:$16 sps:$4 sm:$0xff]   ;;  %v1044_v46 = vld [vmem:[%s1368_s0 + $0x60] ss:$16 sps:$4 sm:$0xff]  }
  0x12   :  { %934 = vmatprep.subr.bf16.mxu1 %v1007_v17  ;;  %v1045_v47 = vld [vmem:[%s1368_s0 + $0x68] ss:$16 sps:$4 sm:$0xff]   ;;  %v1046_v48 = vld [vmem:[%s1368_s0 + $0x84] ss:$16 sps:$4 sm:$0xff]   ;;  %v1048_v49 = vld [vmem:[%s1368_s0 + $0x8c] ss:$16 sps:$4 sm:$0xff]  }
  0x13   :  { %v1050_v50 = vld [vmem:[%s1368_s0 + $0x80] ss:$16 sps:$4 sm:$0xff]   ;;  %v1051_v51 = vld [vmem:[%s1368_s0 + $0x88] ss:$16 sps:$4 sm:$0xff]   ;;  %v1052_v52 = vld [vmem:[%s1368_s0 + $0xa4] ss:$16 sps:$4 sm:$0xff]  }
  0x14   :  { %871 = vmatpush3.bf16.msra.mxu0 %v1008_v18  ;;  %v1054_v53 = vld [vmem:[%s1368_s0 + $0xac] ss:$16 sps:$4 sm:$0xff]   ;;  %v1056_v54 = vld [vmem:[%s1368_s0 + $0xa0] ss:$16 sps:$4 sm:$0xff]   ;;  %v1057_v55 = vld [vmem:[%s1368_s0 + $0xa8] ss:$16 sps:$4 sm:$0xff]  }
  0x15   :  { %935 = vmatpush3.bf16.msra.mxu1 %v1009_v19  ;;  %872 = vmatprep.subr.bf16.mxu0 %v1010_v20  ;;  %v1058_v56 = vld [vmem:[%s1368_s0 + $0xc4] ss:$16 sps:$4 sm:$0xff]   ;;  %v1060_v57 = vld [vmem:[%s1368_s0 + $0xcc] ss:$16 sps:$4 sm:$0xff]   ;;  %v1062_v58 = vld [vmem:[%s1368_s0 + $0xc0] ss:$16 sps:$4 sm:$0xff]  }
  0x16   :  { %936 = vmatprep.subr.bf16.mxu1 %v1011_v21  ;;  %v1063_v59 = vld [vmem:[%s1368_s0 + $0xc8] ss:$16 sps:$4 sm:$0xff]   ;;  %v1064_v60 = vld [vmem:[%s1368_s0 + $0xe4] ss:$16 sps:$4 sm:$0xff]   ;;  %v1066_v61 = vld [vmem:[%s1368_s0 + $0xec] ss:$16 sps:$4 sm:$0xff]  }
  0x17   :  { %v1068_v62 = vld [vmem:[%s1368_s0 + $0xe0] ss:$16 sps:$4 sm:$0xff]   ;;  %v1069_v63 = vld [vmem:[%s1368_s0 + $0xe8] ss:$16 sps:$4 sm:$0xff]  }
  0x18   :  { %873 = vmatpush3.bf16.msra.mxu0 %v1012_v22 }
  0x19   :  { %937 = vmatpush3.bf16.msra.mxu1 %v1013_v23  ;;  %874 = vmatprep.subr.bf16.mxu0 %v1014_v24 }
  0x1a   :  { %938 = vmatprep.subr.bf16.mxu1 %v1015_v25 }
  0x1c   :  { %875 = vmatpush3.bf16.msra.mxu0 %v1016_v26 }
  0x1d   :  { %939 = vmatpush3.bf16.msra.mxu1 %v1017_v27  ;;  %876 = vmatprep.subr.bf16.mxu0 %v1018_v28 }
  0x1e   :  { %940 = vmatprep.subr.bf16.mxu1 %v1019_v29 }
  0x20   :  { %877 = vmatpush3.bf16.msra.mxu0 %v1020_v30 }
  0x21   :  { %941 = vmatpush3.bf16.msra.mxu1 %v1021_v31 }
  0x23   :  { %503 = vmatmul.mubr.bf16.vlgmr.msra.gmra.mrb[0].mxu0 %v1022_v32 }
  0x24   :  { %600 = vmatmul.mubr.bf16.vlgmr.msra.gmra.mrb[0].mxu1 %v1025_v34  ;;  %510 = vmatprep.mubr.bf16.mxu0 %v1028_v36 }
  0x25   :  { %607 = vmatprep.mubr.bf16.mxu1 %v1030_v37 }
  0x2b   :  { %511 = vmatmul.mubr.bf16.gmra.mrb[4].mxu0 %v1032_v38 }
  0x2c   :  { %608 = vmatmul.mubr.bf16.gmra.mrb[4].mxu1 %v1033_v39  ;;  %518 = vmatprep.mubr.bf16.mxu0 %v1034_v40 }
  0x2d   :  { %615 = vmatprep.mubr.bf16.mxu1 %v1036_v41 }
  0x33   :  { %519 = vmatmul.mubr.bf16.gmra.mrb[8].mxu0 %v1038_v42 }
  0x34   :  { %616 = vmatmul.mubr.bf16.gmra.mrb[8].mxu1 %v1039_v43  ;;  %526 = vmatprep.mubr.bf16.mxu0 %v1040_v44 }
  0x35   :  { %623 = vmatprep.mubr.bf16.mxu1 %v1042_v45 }
  0x3b   :  { %527 = vmatmul.mubr.bf16.gmra.mrb[12].mxu0 %v1044_v46 }
  0x3c   :  { %624 = vmatmul.mubr.bf16.gmra.mrb[12].mxu1 %v1045_v47  ;;  %534 = vmatprep.mubr.bf16.mxu0 %v1046_v48 }
  0x3d   :  { %631 = vmatprep.mubr.bf16.mxu1 %v1048_v49 }
  0x43   :  { %535 = vmatmul.mubr.bf16.gmra.mrb[16].mxu0 %v1050_v50 }
  0x44   :  { %632 = vmatmul.mubr.bf16.gmra.mrb[16].mxu1 %v1051_v51  ;;  %542 = vmatprep.mubr.bf16.mxu0 %v1052_v52 }
  0x45   :  { %639 = vmatprep.mubr.bf16.mxu1 %v1054_v53 }
  0x4b   :  { %543 = vmatmul.mubr.bf16.gmra.mrb[20].mxu0 %v1056_v54 }
  0x4c   :  { %640 = vmatmul.mubr.bf16.gmra.mrb[20].mxu1 %v1057_v55  ;;  %550 = vmatprep.mubr.bf16.mxu0 %v1058_v56 }
  0x4d   :  { %647 = vmatprep.mubr.bf16.mxu1 %v1060_v57 }
  0x53   :  { %551 = vmatmul.mubr.bf16.gmra.mrb[24].mxu0 %v1062_v58 }
  0x54   :  { %648 = vmatmul.mubr.bf16.gmra.mrb[24].mxu1 %v1063_v59  ;;  %558 = vmatprep.mubr.bf16.mxu0 %v1064_v60 }
  0x55   :  { %655 = vmatprep.mubr.bf16.mxu1 %v1066_v61 }
  0x5b   :  { %559 = vmatmul.mubr.bf16.gmra.mrb[28].mxu0 %v1068_v62 }
  0x5c   :  { %656 = vmatmul.mubr.bf16.gmra.mrb[28].mxu1 %v1069_v63 }
  0xf6   :  { %v878_v0 = vpop.f32.mrb[0].mxu0 }
  0xf7   :  { %v942_v1 = vpop.f32.mrb[0].mxu1  ;;  %v879_v3 = vpop.f32.mrb[1].mxu0 }
  0xf8   :  { %v880_v4 = vadd.f32 %v879_v3, %v878_v0  ;;  %v943_v5 = vpop.f32.mrb[1].mxu1  ;;  %v881_v6 = vpop.f32.mrb[2].mxu0 }
  0xf9   :  { %v944_v7 = vadd.f32 %v943_v5, %v942_v1  ;;  %v945_v8 = vpop.f32.mrb[2].mxu1  ;;  %v882_v9 = vpop.f32.mrb[3].mxu0 }
  0xfa   :  { %v505_v10 = vadd.f32 %v880_v4, %v1285_v2  ;;  %v883_v11 = vadd.f32 %v882_v9, %v881_v6  ;;  %v946_v12 = vpop.f32.mrb[3].mxu1 }
  0xfb   :  { %v947_v13 = vadd.f32 %v946_v12, %v945_v8 }
  0xfc   :  { %v602_v14 = vadd.f32 %v944_v7, %v505_v10  ;;  %v508_v15 = vadd.f32 %v883_v11, %v1285_v2 }
  0xfe   :  { %v664_v16 = vmax.f32 %v602_v14, 0.0  ;;  %v605_v17 = vadd.f32 %v947_v13, %v508_v15  ;;  %v884_v18 = vpop.f32.mrb[4].mxu0 }
  0xff   :  { %v948_v19 = vpop.f32.mrb[4].mxu1  ;;  %v885_v20 = vpop.f32.mrb[5].mxu0 }
 0x100   :  { %v846_v21 = vpack.c.bf16 %v664_v16, %v664_v16  ;;  %v665_v22 = vmax.f32 %v605_v17, 0.0  ;;  %v886_v23 = vadd.f32 %v885_v20, %v884_v18  ;;  %v949_v24 = vpop.f32.mrb[5].mxu1  ;;  %v887_v25 = vpop.f32.mrb[6].mxu0 }
 0x101   :  { %v950_v26 = vadd.f32 %v949_v24, %v948_v19  ;;  %v951_v27 = vpop.f32.mrb[6].mxu1  ;;  %v888_v28 = vpop.f32.mrb[7].mxu0 }
 0x102   :  { %745 = vst.msk [vmem:[%s1370_s3] sm:$0xf] %vm744_vm0, %v846_v21  ;;  %v847_v29 = vpack.c.bf16 %v665_v22, %v665_v22  ;;  %v513_v30 = vadd.f32 %v886_v23, %v1285_v2  ;;  %v889_v31 = vadd.f32 %v888_v28, %v887_v25  ;;  %v952_v32 = vpop.f32.mrb[7].mxu1 }
 0x103   :  { %v953_v33 = vadd.f32 %v952_v32, %v951_v27 }
 0x104   :  { %746 = vst.msk [vmem:[%s1370_s3 + $0x4] sm:$0xf] %vm744_vm0, %v847_v29  ;;  %v610_v34 = vadd.f32 %v950_v26, %v513_v30  ;;  %v516_v35 = vadd.f32 %v889_v31, %v1285_v2 }
 0x106   :  { %v666_v36 = vmax.f32 %v610_v34, 0.0  ;;  %v613_v37 = vadd.f32 %v953_v33, %v516_v35  ;;  %v890_v38 = vpop.f32.mrb[8].mxu0 }
 0x107   :  { %v954_v39 = vpop.f32.mrb[8].mxu1  ;;  %v891_v40 = vpop.f32.mrb[9].mxu0 }
 0x108   :  { %v848_v41 = vpack.c.bf16 %v666_v36, %v666_v36  ;;  %v667_v42 = vmax.f32 %v613_v37, 0.0  ;;  %v892_v43 = vadd.f32 %v891_v40, %v890_v38  ;;  %v955_v44 = vpop.f32.mrb[9].mxu1  ;;  %v893_v45 = vpop.f32.mrb[10].mxu0 }
 0x109   :  { %v956_v46 = vadd.f32 %v955_v44, %v954_v39  ;;  %v957_v47 = vpop.f32.mrb[10].mxu1  ;;  %v894_v48 = vpop.f32.mrb[11].mxu0 }
 0x10a   :  { %747 = vst.msk [vmem:[%s1370_s3 + $0x8] sm:$0xf] %vm744_vm0, %v848_v41  ;;  %v849_v49 = vpack.c.bf16 %v667_v42, %v667_v42  ;;  %v521_v50 = vadd.f32 %v892_v43, %v1285_v2  ;;  %v895_v51 = vadd.f32 %v894_v48, %v893_v45  ;;  %v958_v52 = vpop.f32.mrb[11].mxu1 }
 0x10b   :  { %v959_v53 = vadd.f32 %v958_v52, %v957_v47 }
 0x10c   :  { %748 = vst.msk [vmem:[%s1370_s3 + $0xc] sm:$0xf] %vm744_vm0, %v849_v49  ;;  %v618_v54 = vadd.f32 %v956_v46, %v521_v50  ;;  %v524_v55 = vadd.f32 %v895_v51, %v1285_v2 }
 0x10e   :  { %v668_v56 = vmax.f32 %v618_v54, 0.0  ;;  %v621_v57 = vadd.f32 %v959_v53, %v524_v55  ;;  %v896_v58 = vpop.f32.mrb[12].mxu0 }
 0x10f   :  { %v960_v59 = vpop.f32.mrb[12].mxu1  ;;  %v897_v60 = vpop.f32.mrb[13].mxu0 }
 0x110   :  { %v850_v61 = vpack.c.bf16 %v668_v56, %v668_v56  ;;  %v669_v62 = vmax.f32 %v621_v57, 0.0  ;;  %v898_v63 = vadd.f32 %v897_v60, %v896_v58  ;;  %v961_v0 = vpop.f32.mrb[13].mxu1  ;;  %v899_v1 = vpop.f32.mrb[14].mxu0 }
 0x111   :  { %v962_v3 = vadd.f32 %v961_v0, %v960_v59  ;;  %v963_v4 = vpop.f32.mrb[14].mxu1  ;;  %v900_v5 = vpop.f32.mrb[15].mxu0 }
 0x112   :  { %749 = vst.msk [vmem:[%s1370_s3 + $0x10] sm:$0xf] %vm744_vm0, %v850_v61  ;;  %v851_v6 = vpack.c.bf16 %v669_v62, %v669_v62  ;;  %v529_v7 = vadd.f32 %v898_v63, %v1285_v2  ;;  %v901_v8 = vadd.f32 %v900_v5, %v899_v1  ;;  %v964_v9 = vpop.f32.mrb[15].mxu1 }
 0x113   :  { %v965_v10 = vadd.f32 %v964_v9, %v963_v4 }
 0x114   :  { %750 = vst.msk [vmem:[%s1370_s3 + $0x14] sm:$0xf] %vm744_vm0, %v851_v6  ;;  %v626_v11 = vadd.f32 %v962_v3, %v529_v7  ;;  %v532_v12 = vadd.f32 %v901_v8, %v1285_v2 }
 0x116   :  { %v670_v13 = vmax.f32 %v626_v11, 0.0  ;;  %v629_v14 = vadd.f32 %v965_v10, %v532_v12  ;;  %v902_v15 = vpop.f32.mrb[16].mxu0 }
 0x117   :  { %v966_v16 = vpop.f32.mrb[16].mxu1  ;;  %v903_v17 = vpop.f32.mrb[17].mxu0 }
 0x118   :  { %v852_v18 = vpack.c.bf16 %v670_v13, %v670_v13  ;;  %v671_v19 = vmax.f32 %v629_v14, 0.0  ;;  %v904_v20 = vadd.f32 %v903_v17, %v902_v15  ;;  %v967_v21 = vpop.f32.mrb[17].mxu1  ;;  %v905_v22 = vpop.f32.mrb[18].mxu0 }
 0x119   :  { %v968_v23 = vadd.f32 %v967_v21, %v966_v16  ;;  %v969_v24 = vpop.f32.mrb[18].mxu1  ;;  %v906_v25 = vpop.f32.mrb[19].mxu0 }
 0x11a   :  { %751 = vst.msk [vmem:[%s1370_s3 + $0x18] sm:$0xf] %vm744_vm0, %v852_v18  ;;  %v853_v26 = vpack.c.bf16 %v671_v19, %v671_v19  ;;  %v537_v27 = vadd.f32 %v904_v20, %v1285_v2  ;;  %v907_v28 = vadd.f32 %v906_v25, %v905_v22  ;;  %v970_v29 = vpop.f32.mrb[19].mxu1 }
 0x11b   :  { %v971_v30 = vadd.f32 %v970_v29, %v969_v24 }
 0x11c   :  { %752 = vst.msk [vmem:[%s1370_s3 + $0x1c] sm:$0xf] %vm744_vm0, %v853_v26  ;;  %v634_v31 = vadd.f32 %v968_v23, %v537_v27  ;;  %v540_v32 = vadd.f32 %v907_v28, %v1285_v2 }
 0x11e   :  { %v672_v33 = vmax.f32 %v634_v31, 0.0  ;;  %v637_v34 = vadd.f32 %v971_v30, %v540_v32  ;;  %v908_v35 = vpop.f32.mrb[20].mxu0 }
 0x11f   :  { %v972_v36 = vpop.f32.mrb[20].mxu1  ;;  %v909_v37 = vpop.f32.mrb[21].mxu0 }
 0x120   :  { %v854_v38 = vpack.c.bf16 %v672_v33, %v672_v33  ;;  %v673_v39 = vmax.f32 %v637_v34, 0.0  ;;  %v910_v40 = vadd.f32 %v909_v37, %v908_v35  ;;  %v973_v41 = vpop.f32.mrb[21].mxu1  ;;  %v911_v42 = vpop.f32.mrb[22].mxu0 }
 0x121   :  { %v974_v43 = vadd.f32 %v973_v41, %v972_v36  ;;  %v975_v44 = vpop.f32.mrb[22].mxu1  ;;  %v912_v45 = vpop.f32.mrb[23].mxu0 }
 0x122   :  { %753 = vst.msk [vmem:[%s1370_s3 + $0x20] sm:$0xf] %vm744_vm0, %v854_v38  ;;  %v855_v46 = vpack.c.bf16 %v673_v39, %v673_v39  ;;  %v545_v47 = vadd.f32 %v910_v40, %v1285_v2  ;;  %v913_v48 = vadd.f32 %v912_v45, %v911_v42  ;;  %v976_v49 = vpop.f32.mrb[23].mxu1 }
 0x123   :  { %v977_v50 = vadd.f32 %v976_v49, %v975_v44 }
 0x124   :  { %754 = vst.msk [vmem:[%s1370_s3 + $0x24] sm:$0xf] %vm744_vm0, %v855_v46  ;;  %v642_v51 = vadd.f32 %v974_v43, %v545_v47  ;;  %v548_v52 = vadd.f32 %v913_v48, %v1285_v2 }
 0x126   :  { %v674_v53 = vmax.f32 %v642_v51, 0.0  ;;  %v645_v54 = vadd.f32 %v977_v50, %v548_v52  ;;  %v914_v55 = vpop.f32.mrb[24].mxu0 }
 0x127   :  { %v978_v56 = vpop.f32.mrb[24].mxu1  ;;  %v915_v57 = vpop.f32.mrb[25].mxu0 }
 0x128   :  { %v856_v58 = vpack.c.bf16 %v674_v53, %v674_v53  ;;  %v675_v59 = vmax.f32 %v645_v54, 0.0  ;;  %v916_v60 = vadd.f32 %v915_v57, %v914_v55  ;;  %v979_v61 = vpop.f32.mrb[25].mxu1  ;;  %v917_v62 = vpop.f32.mrb[26].mxu0 }
 0x129   :  { %v980_v63 = vadd.f32 %v979_v61, %v978_v56  ;;  %v981_v0 = vpop.f32.mrb[26].mxu1  ;;  %v918_v1 = vpop.f32.mrb[27].mxu0 }
 0x12a   :  { %755 = vst.msk [vmem:[%s1370_s3 + $0x28] sm:$0xf] %vm744_vm0, %v856_v58  ;;  %v857_v3 = vpack.c.bf16 %v675_v59, %v675_v59  ;;  %v553_v4 = vadd.f32 %v916_v60, %v1285_v2  ;;  %v919_v5 = vadd.f32 %v918_v1, %v917_v62  ;;  %v982_v6 = vpop.f32.mrb[27].mxu1 }
 0x12b   :  { %v983_v7 = vadd.f32 %v982_v6, %v981_v0 }
 0x12c   :  { %756 = vst.msk [vmem:[%s1370_s3 + $0x2c] sm:$0xf] %vm744_vm0, %v857_v3  ;;  %v650_v8 = vadd.f32 %v980_v63, %v553_v4  ;;  %v556_v9 = vadd.f32 %v919_v5, %v1285_v2 }
 0x12e   :  { %v676_v10 = vmax.f32 %v650_v8, 0.0  ;;  %v653_v11 = vadd.f32 %v983_v7, %v556_v9  ;;  %v920_v12 = vpop.f32.mrb[28].mxu0 }
 0x12f   :  { %v984_v13 = vpop.f32.mrb[28].mxu1  ;;  %v921_v14 = vpop.f32.mrb[29].mxu0 }
 0x130   :  { %v858_v15 = vpack.c.bf16 %v676_v10, %v676_v10  ;;  %v677_v16 = vmax.f32 %v653_v11, 0.0  ;;  %v922_v17 = vadd.f32 %v921_v14, %v920_v12  ;;  %v985_v18 = vpop.f32.mrb[29].mxu1  ;;  %v923_v19 = vpop.f32.mrb[30].mxu0 }
 0x131   :  { %v986_v20 = vadd.f32 %v985_v18, %v984_v13  ;;  %v987_v21 = vpop.f32.mrb[30].mxu1  ;;  %v924_v22 = vpop.f32.mrb[31].mxu0 }
 0x132   :  { %757 = vst.msk [vmem:[%s1370_s3 + $0x30] sm:$0xf] %vm744_vm0, %v858_v15  ;;  %v859_v23 = vpack.c.bf16 %v677_v16, %v677_v16  ;;  %v561_v24 = vadd.f32 %v922_v17, %v1285_v2  ;;  %v925_v25 = vadd.f32 %v924_v22, %v923_v19  ;;  %v988_v26 = vpop.f32.mrb[31].mxu1 }
 0x133   :  { %v989_v27 = vadd.f32 %v988_v26, %v987_v21 }
 0x134   :  { %758 = vst.msk [vmem:[%s1370_s3 + $0x34] sm:$0xf] %vm744_vm0, %v859_v23  ;;  %v658_v28 = vadd.f32 %v986_v20, %v561_v24  ;;  %v564_v29 = vadd.f32 %v925_v25, %v1285_v2 }
 0x136   :  { %v678_v30 = vmax.f32 %v658_v28, 0.0  ;;  %v661_v31 = vadd.f32 %v989_v27, %v564_v29 }
 0x138   :  { %v860_v32 = vpack.c.bf16 %v678_v30, %v678_v30  ;;  %v679_v33 = vmax.f32 %v661_v31, 0.0 }
 0x13a   :  { %759 = vst.msk [vmem:[%s1370_s3 + $0x38] sm:$0xf] %vm744_vm0, %v860_v32  ;;  %v861_v34 = vpack.c.bf16 %v679_v33, %v679_v33 }
 0x13c   :  { %760 = vst.msk [vmem:[%s1370_s3 + $0x3c] sm:$0xf] %vm744_vm0, %v861_v34 }

// kernel: betavae_forward.12
= control target key start
LH: loop header
LB: loop body
LE: loop exit
PB: predicated region body
PF: predicated region fallthrough
CT: control target
= control target key end

     0   :  { %vm846_vm0 = vcmask 519168   ;;  %s1399_s1 = inlined_call_operand.vmem [shape: bf16[1024,64], index: 1, kind: input, shape index: {}]   ;;  %s1400_s0 = inlined_call_operand.vmem [shape: bf16[32,1024], index: 0, kind: input, shape index: {}]   ;;  %s1401_s2 = inlined_call_operand.vmem [shape: f32[1,64], index: 2, kind: input, shape index: {}]   ;;  %s1402_s3 = inlined_call_operand.vmem [shape: bf16[32,64], index: 3, kind: output, shape index: {}]  }
   0x1   :  { %v1056_v0 = vld [vmem:[%s1399_s1 + $0x40] sm:$0xff]   ;;  %v1060_v4 = vld [vmem:[%s1399_s1 + $0x48] sm:$0xff]   ;;  %v1064_v8 = vld [vmem:[%s1399_s1 + $0x50] sm:$0xff]  }
   0x2   :  { %v1057_v1 = vld [vmem:[%s1399_s1 + $0xc0] sm:$0xff]   ;;  %944 = vmatprep.subr.bf16.mxu0 %v1056_v0  ;;  %v1061_v5 = vld [vmem:[%s1399_s1 + $0xc8] sm:$0xff]   ;;  %v1065_v9 = vld [vmem:[%s1399_s1 + $0xd0] sm:$0xff]  }
   0x3   :  { %v1058_v2 = vld [vmem:[%s1399_s1] sm:$0xff]   ;;  %972 = vmatprep.subr.bf16.mxu1 %v1057_v1  ;;  %v1062_v6 = vld [vmem:[%s1399_s1 + $0x8] sm:$0xff]   ;;  %v1066_v10 = vld [vmem:[%s1399_s1 + $0x10] sm:$0xff]  }
   0x4   :  { %v1059_v3 = vld [vmem:[%s1399_s1 + $0x80] sm:$0xff]   ;;  %945 = vmatpush3.bf16.msra.mxu0 %v1058_v2  ;;  %v1063_v7 = vld [vmem:[%s1399_s1 + $0x88] sm:$0xff]   ;;  %v1067_v11 = vld [vmem:[%s1399_s1 + $0x90] sm:$0xff]  }
   0x5   :  { %973 = vmatpush3.bf16.msra.mxu1 %v1059_v3  ;;  %946 = vmatprep.subr.bf16.mxu0 %v1060_v4  ;;  %v1068_v12 = vld [vmem:[%s1399_s1 + $0x58] sm:$0xff]   ;;  %v1072_v16 = vld [vmem:[%s1399_s1 + $0x60] sm:$0xff]   ;;  %v1076_v20 = vld [vmem:[%s1399_s1 + $0x68] sm:$0xff]  }
   0x6   :  { %974 = vmatprep.subr.bf16.mxu1 %v1061_v5  ;;  %v1069_v13 = vld [vmem:[%s1399_s1 + $0xd8] sm:$0xff]   ;;  %v1073_v17 = vld [vmem:[%s1399_s1 + $0xe0] sm:$0xff]   ;;  %v1077_v21 = vld [vmem:[%s1399_s1 + $0xe8] sm:$0xff]  }
   0x7   :  { %v1070_v14 = vld [vmem:[%s1399_s1 + $0x18] sm:$0xff]   ;;  %v1074_v18 = vld [vmem:[%s1399_s1 + $0x20] sm:$0xff]   ;;  %v1078_v22 = vld [vmem:[%s1399_s1 + $0x28] sm:$0xff]  }
   0x8   :  { %947 = vmatpush3.bf16.msra.mxu0 %v1062_v6  ;;  %v1071_v15 = vld [vmem:[%s1399_s1 + $0x98] sm:$0xff]   ;;  %v1075_v19 = vld [vmem:[%s1399_s1 + $0xa0] sm:$0xff]   ;;  %v1079_v23 = vld [vmem:[%s1399_s1 + $0xa8] sm:$0xff]  }
   0x9   :  { %975 = vmatpush3.bf16.msra.mxu1 %v1063_v7  ;;  %948 = vmatprep.subr.bf16.mxu0 %v1064_v8  ;;  %v1080_v24 = vld [vmem:[%s1399_s1 + $0x70] sm:$0xff]   ;;  %v1084_v28 = vld [vmem:[%s1399_s1 + $0x78] sm:$0xff]   ;;  %v15_v32 = vld [vmem:[%s1400_s0] sm:$0xff] }
   0xa   :  { %976 = vmatprep.subr.bf16.mxu1 %v1065_v9  ;;  %v1081_v25 = vld [vmem:[%s1399_s1 + $0xf0] sm:$0xff]   ;;  %v1085_v29 = vld [vmem:[%s1399_s1 + $0xf8] sm:$0xff]   ;;  %v19_v33 = vld [vmem:[%s1400_s0 + $0x20] sm:$0xff] }
   0xb   :  { %v1082_v26 = vld [vmem:[%s1399_s1 + $0x30] sm:$0xff]   ;;  %v1086_v30 = vld [vmem:[%s1399_s1 + $0x38] sm:$0xff]   ;;  %v16_v34 = vld [vmem:[%s1400_s0 + $0x8] sm:$0xff]  ;;  %v856_v35 = vcombine.low %v15_v32, %v19_v33  ;;  %v857_v36 = vcombine.high %v15_v32, %v19_v33 }
   0xc   :  { %949 = vmatpush3.bf16.msra.mxu0 %v1066_v10  ;;  %v1083_v27 = vld [vmem:[%s1399_s1 + $0xb0] sm:$0xff]   ;;  %v1087_v31 = vld [vmem:[%s1399_s1 + $0xb8] sm:$0xff]   ;;  %v20_v37 = vld [vmem:[%s1400_s0 + $0x28] sm:$0xff] }
   0xd   :  { %977 = vmatpush3.bf16.msra.mxu1 %v1067_v11  ;;  %950 = vmatprep.subr.bf16.mxu0 %v1068_v12  ;;  %v858_v38 = vcombine.low %v16_v34, %v20_v37  ;;  %v859_v39 = vcombine.high %v16_v34, %v20_v37  ;;  %v1088_v40 = vld [vmem:[%s1399_s1 + $0x140] sm:$0xff]   ;;  %v1092_v44 = vld [vmem:[%s1399_s1 + $0x148] sm:$0xff]   ;;  %v1096_v48 = vld [vmem:[%s1399_s1 + $0x150] sm:$0xff]  }
   0xe   :  { %978 = vmatprep.subr.bf16.mxu1 %v1069_v13  ;;  %662 = vmatprep.mubr.bf16.mxu0 %v857_v36  ;;  %v1089_v41 = vld [vmem:[%s1399_s1 + $0x1c0] sm:$0xff]   ;;  %v1093_v45 = vld [vmem:[%s1399_s1 + $0x1c8] sm:$0xff]   ;;  %v1097_v49 = vld [vmem:[%s1399_s1 + $0x1d0] sm:$0xff]  }
   0xf   :  { %711 = vmatprep.mubr.bf16.mxu1 %v859_v39  ;;  %v1090_v42 = vld [vmem:[%s1399_s1 + $0x100] sm:$0xff]   ;;  %v1094_v46 = vld [vmem:[%s1399_s1 + $0x108] sm:$0xff]   ;;  %v1098_v50 = vld [vmem:[%s1399_s1 + $0x110] sm:$0xff]  }
  0x10   :  { %951 = vmatpush3.bf16.msra.mxu0 %v1070_v14  ;;  %v1091_v43 = vld [vmem:[%s1399_s1 + $0x180] sm:$0xff]   ;;  %v1095_v47 = vld [vmem:[%s1399_s1 + $0x188] sm:$0xff]   ;;  %v1099_v51 = vld [vmem:[%s1399_s1 + $0x190] sm:$0xff]  }
  0x11   :  { %979 = vmatpush3.bf16.msra.mxu1 %v1071_v15  ;;  %952 = vmatprep.subr.bf16.mxu0 %v1072_v16  ;;  %v1100_v52 = vld [vmem:[%s1399_s1 + $0x158] sm:$0xff]   ;;  %v1104_v56 = vld [vmem:[%s1399_s1 + $0x160] sm:$0xff]   ;;  %v1108_v63 = vld [vmem:[%s1399_s1 + $0x168] sm:$0xff]  }
  0x12   :  { %980 = vmatprep.subr.bf16.mxu1 %v1073_v17  ;;  %v1101_v53 = vld [vmem:[%s1399_s1 + $0x1d8] sm:$0xff]   ;;  %v1105_v57 = vld [vmem:[%s1399_s1 + $0x1e0] sm:$0xff]   ;;  %v1109_v1 = vld [vmem:[%s1399_s1 + $0x1e8] sm:$0xff]  }
  0x13   :  { %v1102_v54 = vld [vmem:[%s1399_s1 + $0x118] sm:$0xff]   ;;  %v1106_v58 = vld [vmem:[%s1399_s1 + $0x120] sm:$0xff]   ;;  %v1110_v2 = vld [vmem:[%s1399_s1 + $0x128] sm:$0xff]  }
  0x14   :  { %953 = vmatpush3.bf16.msra.mxu0 %v1074_v18  ;;  %v1103_v55 = vld [vmem:[%s1399_s1 + $0x198] sm:$0xff]   ;;  %v1107_v59 = vld [vmem:[%s1399_s1 + $0x1a0] sm:$0xff]   ;;  %v1111_v3 = vld [vmem:[%s1399_s1 + $0x1a8] sm:$0xff]  }
  0x15   :  { %981 = vmatpush3.bf16.msra.mxu1 %v1075_v19  ;;  %954 = vmatprep.subr.bf16.mxu0 %v1076_v20  ;;  %v23_v60 = vld [vmem:[%s1400_s0 + $0x40] sm:$0xff]  ;;  %v24_v4 = vld [vmem:[%s1400_s0 + $0x48] sm:$0xff]  ;;  %v1112_v8 = vld [vmem:[%s1399_s1 + $0x170] sm:$0xff]  }
  0x16   :  { %982 = vmatprep.subr.bf16.mxu1 %v1077_v21  ;;  %v27_v61 = vld [vmem:[%s1400_s0 + $0x60] sm:$0xff]  ;;  %v28_v5 = vld [vmem:[%s1400_s0 + $0x68] sm:$0xff]  ;;  %v1113_v9 = vld [vmem:[%s1399_s1 + $0x1f0] sm:$0xff]  }
  0x17   :  { %v865_v62 = vcombine.high %v23_v60, %v27_v61  ;;  %v864_v0 = vcombine.low %v23_v60, %v27_v61  ;;  %v867_v6 = vcombine.high %v24_v4, %v28_v5  ;;  %v866_v7 = vcombine.low %v24_v4, %v28_v5  ;;  %v1114_v10 = vld [vmem:[%s1399_s1 + $0x130] sm:$0xff]   ;;  %v1116_v12 = vld [vmem:[%s1399_s1 + $0x178] sm:$0xff]   ;;  %v855_v34 = vld [vmem:[%s1401_s2] ss:$0 sm:$0xff] }
  0x18   :  { %955 = vmatpush3.bf16.msra.mxu0 %v1078_v22  ;;  %v1115_v11 = vld [vmem:[%s1399_s1 + $0x1b0] sm:$0xff]   ;;  %v1117_v13 = vld [vmem:[%s1399_s1 + $0x1f8] sm:$0xff]  }
  0x19   :  { %983 = vmatpush3.bf16.msra.mxu1 %v1079_v23  ;;  %956 = vmatprep.subr.bf16.mxu0 %v1080_v24  ;;  %v1118_v14 = vld [vmem:[%s1399_s1 + $0x138] sm:$0xff]   ;;  %v17_v16 = vld [vmem:[%s1400_s0 + $0x10] sm:$0xff] }
  0x1a   :  { %984 = vmatprep.subr.bf16.mxu1 %v1081_v25  ;;  %v1119_v15 = vld [vmem:[%s1399_s1 + $0x1b8] sm:$0xff]   ;;  %v21_v17 = vld [vmem:[%s1400_s0 + $0x30] sm:$0xff] }
  0x1b   :  { %v18_v18 = vld [vmem:[%s1400_s0 + $0x18] sm:$0xff]  ;;  %v860_v20 = vcombine.low %v17_v16, %v21_v17  ;;  %v861_v21 = vcombine.high %v17_v16, %v21_v17  ;;  %v25_v24 = vld [vmem:[%s1400_s0 + $0x50] sm:$0xff] }
  0x1c   :  { %957 = vmatpush3.bf16.msra.mxu0 %v1082_v26  ;;  %v22_v19 = vld [vmem:[%s1400_s0 + $0x38] sm:$0xff]  ;;  %v29_v25 = vld [vmem:[%s1400_s0 + $0x70] sm:$0xff] }
  0x1d   :  { %985 = vmatpush3.bf16.msra.mxu1 %v1083_v27  ;;  %958 = vmatprep.subr.bf16.mxu0 %v1084_v28  ;;  %v862_v22 = vcombine.low %v18_v18, %v22_v19  ;;  %v863_v23 = vcombine.high %v18_v18, %v22_v19  ;;  %v26_v26 = vld [vmem:[%s1400_s0 + $0x58] sm:$0xff]  ;;  %v869_v27 = vcombine.high %v25_v24, %v29_v25 }
  0x1e   :  { %986 = vmatprep.subr.bf16.mxu1 %v1085_v29  ;;  %v30_v28 = vld [vmem:[%s1400_s0 + $0x78] sm:$0xff] }
  0x1f   :  { %v871_v29 = vcombine.high %v26_v26, %v30_v28 }
  0x20   :  { %959 = vmatpush3.bf16.msra.mxu0 %v1086_v30  ;;  %v868_v30 = vcombine.low %v25_v24, %v29_v25 }
  0x21   :  { %987 = vmatpush3.bf16.msra.mxu1 %v1087_v31  ;;  %1000 = vmatprep.subr.bf16.mxu0 %v1088_v40  ;;  %v870_v31 = vcombine.low %v26_v26, %v30_v28 }
  0x22   :  { %1028 = vmatprep.subr.bf16.mxu1 %v1089_v41 }
  0x23   :  { %663 = vmatmul.mubr.bf16.vlgmr.msra.gmra.mrb[0].mxu0 %v856_v35 }
  0x24   :  { %712 = vmatmul.mubr.bf16.vlgmr.msra.gmra.mrb[0].mxu1 %v858_v38  ;;  %1001 = vmatpush3.bf16.msra.mxu0 %v1090_v42 }
  0x25   :  { %1029 = vmatpush3.bf16.msra.mxu1 %v1091_v43  ;;  %1002 = vmatprep.subr.bf16.mxu0 %v1092_v44 }
  0x26   :  { %1030 = vmatprep.subr.bf16.mxu1 %v1093_v45  ;;  %670 = vmatprep.mubr.bf16.mxu0 %v865_v62 }
  0x27   :  { %719 = vmatprep.mubr.bf16.mxu1 %v867_v6 }
  0x28   :  { %1003 = vmatpush3.bf16.msra.mxu0 %v1094_v46 }
  0x29   :  { %1031 = vmatpush3.bf16.msra.mxu1 %v1095_v47  ;;  %1004 = vmatprep.subr.bf16.mxu0 %v1096_v48 }
  0x2a   :  { %1032 = vmatprep.subr.bf16.mxu1 %v1097_v49 }
  0x2b   :  { %671 = vmatmul.mubr.bf16.gmra.mrb[4].mxu0 %v864_v0 }
  0x2c   :  { %1005 = vmatpush3.bf16.msra.mxu0 %v1098_v50  ;;  %720 = vmatmul.mubr.bf16.gmra.mrb[4].mxu1 %v866_v7 }
  0x2d   :  { %1033 = vmatpush3.bf16.msra.mxu1 %v1099_v51  ;;  %1006 = vmatprep.subr.bf16.mxu0 %v1100_v52 }
  0x2e   :  { %1034 = vmatprep.subr.bf16.mxu1 %v1101_v53  ;;  %760 = vmatprep.mubr.bf16.mxu0 %v861_v21 }
  0x2f   :  { %809 = vmatprep.mubr.bf16.mxu1 %v863_v23 }
  0x30   :  { %1007 = vmatpush3.bf16.msra.mxu0 %v1102_v54 }
  0x31   :  { %1035 = vmatpush3.bf16.msra.mxu1 %v1103_v55  ;;  %1008 = vmatprep.subr.bf16.mxu0 %v1104_v56 }
  0x32   :  { %1036 = vmatprep.subr.bf16.mxu1 %v1105_v57 }
  0x34   :  { %1009 = vmatpush3.bf16.msra.mxu0 %v1106_v58 }
  0x35   :  { %1037 = vmatpush3.bf16.msra.mxu1 %v1107_v59  ;;  %1010 = vmatprep.subr.bf16.mxu0 %v1108_v63 }
  0x36   :  { %1038 = vmatprep.subr.bf16.mxu1 %v1109_v1 }
  0x38   :  { %1011 = vmatpush3.bf16.msra.mxu0 %v1110_v2 }
  0x39   :  { %1039 = vmatpush3.bf16.msra.mxu1 %v1111_v3  ;;  %1012 = vmatprep.subr.bf16.mxu0 %v1112_v8 }
  0x3a   :  { %1040 = vmatprep.subr.bf16.mxu1 %v1113_v9 }
  0x3c   :  { %1013 = vmatpush3.bf16.msra.mxu0 %v1114_v10 }
  0x3d   :  { %1041 = vmatpush3.bf16.msra.mxu1 %v1115_v11  ;;  %1014 = vmatprep.subr.bf16.mxu0 %v1116_v12 }
  0x3e   :  { %1042 = vmatprep.subr.bf16.mxu1 %v1117_v13 }
  0x40   :  { %1015 = vmatpush3.bf16.msra.mxu0 %v1118_v14 }
  0x41   :  { %1043 = vmatpush3.bf16.msra.mxu1 %v1119_v15 }
  0x43   :  { %761 = vmatmul.mubr.bf16.vlgmr.msra.gmra.mrb[8].mxu0 %v860_v20 }
  0x44   :  { %810 = vmatmul.mubr.bf16.vlgmr.msra.gmra.mrb[8].mxu1 %v862_v22  ;;  %768 = vmatprep.mubr.bf16.mxu0 %v869_v27 }
  0x45   :  { %817 = vmatprep.mubr.bf16.mxu1 %v871_v29 }
  0x4b   :  { %769 = vmatmul.mubr.bf16.gmra.mrb[12].mxu0 %v868_v30 }
  0x4c   :  { %818 = vmatmul.mubr.bf16.gmra.mrb[12].mxu1 %v870_v31 }
  0xf6   :  { %v960_v32 = vpop.f32.mrb[0].mxu0 }
  0xf7   :  { %v988_v33 = vpop.f32.mrb[0].mxu1  ;;  %v961_v35 = vpop.f32.mrb[1].mxu0 }
  0xf8   :  { %v962_v36 = vadd.f32 %v961_v35, %v960_v32  ;;  %v989_v37 = vpop.f32.mrb[1].mxu1  ;;  %v963_v38 = vpop.f32.mrb[2].mxu0 }
  0xf9   :  { %v990_v39 = vadd.f32 %v989_v37, %v988_v33  ;;  %v991_v40 = vpop.f32.mrb[2].mxu1  ;;  %v964_v41 = vpop.f32.mrb[3].mxu0 }
  0xfa   :  { %v665_v42 = vadd.f32 %v962_v36, %v855_v34  ;;  %v965_v43 = vadd.f32 %v964_v41, %v963_v38  ;;  %v992_v44 = vpop.f32.mrb[3].mxu1 }
  0xfb   :  { %v993_v45 = vadd.f32 %v992_v44, %v991_v40 }
  0xfc   :  { %v714_v46 = vadd.f32 %v990_v39, %v665_v42  ;;  %v668_v47 = vadd.f32 %v965_v43, %v855_v34 }
  0xfe   :  { %v717_v48 = vadd.f32 %v993_v45, %v668_v47  ;;  %v966_v49 = vpop.f32.mrb[4].mxu0 }
  0xff   :  { %v967_v50 = vpop.f32.mrb[5].mxu0  ;;  %v994_v56 = vpop.f32.mrb[4].mxu1 }
 0x100   :  { %v968_v51 = vadd.f32 %v967_v50, %v966_v49  ;;  %v969_v52 = vpop.f32.mrb[6].mxu0  ;;  %v995_v57 = vpop.f32.mrb[5].mxu1 }
 0x101   :  { %v970_v53 = vpop.f32.mrb[7].mxu0  ;;  %v996_v59 = vadd.f32 %v995_v57, %v994_v56  ;;  %v997_v60 = vpop.f32.mrb[6].mxu1 }
 0x102   :  { %v971_v54 = vadd.f32 %v970_v53, %v969_v52  ;;  %v673_v55 = vadd.f32 %v968_v51, %v855_v34  ;;  %v998_v61 = vpop.f32.mrb[7].mxu1 }
 0x103   :  { %v999_v63 = vadd.f32 %v998_v61, %v997_v60 }
 0x104   :  { %v676_v58 = vadd.f32 %v971_v54, %v855_v34  ;;  %v722_v62 = vadd.f32 %v996_v59, %v673_v55 }
 0x106   :  { %v725_v0 = vadd.f32 %v999_v63, %v676_v58 }
 0x116   :  { %v1016_v1 = vpop.f32.mrb[8].mxu0 }
 0x117   :  { %v1044_v2 = vpop.f32.mrb[8].mxu1  ;;  %v1017_v3 = vpop.f32.mrb[9].mxu0 }
 0x118   :  { %v1045_v4 = vpop.f32.mrb[9].mxu1  ;;  %v1018_v5 = vadd.f32 %v1017_v3, %v1016_v1  ;;  %v1019_v7 = vpop.f32.mrb[10].mxu0 }
 0x119   :  { %v1046_v6 = vadd.f32 %v1045_v4, %v1044_v2  ;;  %v1047_v8 = vpop.f32.mrb[10].mxu1  ;;  %v1020_v9 = vpop.f32.mrb[11].mxu0 }
 0x11a   :  { %v1048_v10 = vpop.f32.mrb[11].mxu1  ;;  %v763_v11 = vadd.f32 %v1018_v5, %v714_v46  ;;  %v1021_v12 = vadd.f32 %v1020_v9, %v1019_v7 }
 0x11b   :  { %v1049_v13 = vadd.f32 %v1048_v10, %v1047_v8 }
 0x11c   :  { %v812_v14 = vadd.f32 %v1046_v6, %v763_v11  ;;  %v766_v15 = vadd.f32 %v1021_v12, %v717_v48 }
 0x11e   :  { %v826_v16 = vmax.f32 %v812_v14, 0.0  ;;  %v815_v17 = vadd.f32 %v1049_v13, %v766_v15  ;;  %v1022_v18 = vpop.f32.mrb[12].mxu0 }
 0x11f   :  { %v1050_v19 = vpop.f32.mrb[12].mxu1  ;;  %v1023_v20 = vpop.f32.mrb[13].mxu0 }
 0x120   :  { %v1051_v21 = vpop.f32.mrb[13].mxu1  ;;  %v940_v22 = vpack.c.bf16 %v826_v16, %v826_v16  ;;  %v827_v23 = vmax.f32 %v815_v17, 0.0  ;;  %v1024_v24 = vadd.f32 %v1023_v20, %v1022_v18  ;;  %v1025_v26 = vpop.f32.mrb[14].mxu0 }
 0x121   :  { %v1052_v25 = vadd.f32 %v1051_v21, %v1050_v19  ;;  %v1053_v27 = vpop.f32.mrb[14].mxu1  ;;  %v1026_v28 = vpop.f32.mrb[15].mxu0 }
 0x122   :  { %v1054_v29 = vpop.f32.mrb[15].mxu1  ;;  %847 = vst.msk [vmem:[%s1402_s3] sm:$0xf] %vm846_vm0, %v940_v22  ;;  %v941_v30 = vpack.c.bf16 %v827_v23, %v827_v23  ;;  %v771_v31 = vadd.f32 %v1024_v24, %v722_v62  ;;  %v1027_v32 = vadd.f32 %v1026_v28, %v1025_v26 }
 0x123   :  { %v1055_v33 = vadd.f32 %v1054_v29, %v1053_v27 }
 0x124   :  { %848 = vst.msk [vmem:[%s1402_s3 + $0x4] sm:$0xf] %vm846_vm0, %v941_v30  ;;  %v820_v34 = vadd.f32 %v1052_v25, %v771_v31  ;;  %v774_v35 = vadd.f32 %v1027_v32, %v725_v0 }
 0x126   :  { %v828_v36 = vmax.f32 %v820_v34, 0.0  ;;  %v823_v37 = vadd.f32 %v1055_v33, %v774_v35 }
 0x128   :  { %v942_v38 = vpack.c.bf16 %v828_v36, %v828_v36  ;;  %v829_v39 = vmax.f32 %v823_v37, 0.0 }
 0x12a   :  { %849 = vst.msk [vmem:[%s1402_s3 + $0x8] sm:$0xf] %vm846_vm0, %v942_v38  ;;  %v943_v40 = vpack.c.bf16 %v829_v39, %v829_v39 }
 0x12c   :  { %850 = vst.msk [vmem:[%s1402_s3 + $0xc] sm:$0xf] %vm846_vm0, %v943_v40 }

// kernel: betavae_forward.13
= control target key start
LH: loop header
LB: loop body
LE: loop exit
PB: predicated region body
PF: predicated region fallthrough
CT: control target
= control target key end

     0   :  { %20 = vsyncpa [#allocation3], 0  ;;  %v307_v26 = vlaneseq  ;;  %v2388_v27 = vmov 1983009808   ;;  %s4347_s0 = inlined_call_operand.vmem [shape: bf16[2,1024], index: 0, kind: input, shape index: {}]   ;;  %s4348_s1 = inlined_call_operand.vmem [shape: f32[2,10], index: 1, kind: input, shape index: {}]   ;;  %s4349_s2 = inlined_call_operand.vmem [shape: f32[1024,256], index: 2, kind: input, shape index: {}]   ;;  %s4350_s3 = inlined_call_operand.vmem [shape: f32[1,256], index: 3, kind: input, shape index: {}]   ;;  %s4351_s4 = inlined_call_operand.vmem [shape: f32[256,10], index: 4, kind: input, shape index: {}]   ;;  %s4352_s5 = inlined_call_operand.vmem [shape: f32[1,10], index: 5, kind: input, shape index: {}]   ;;  %s4353_s6 = inlined_call_operand.vmem [shape: f32[256,10], index: 6, kind: input, shape index: {}]   ;;  %s4354_s7 = inlined_call_operand.vmem [shape: f32[1,10], index: 7, kind: input, shape index: {}]   ;;  %s4355_s8 = inlined_call_operand.vmem [shape: f32[10,256], index: 8, kind: input, shape index: {}]   ;;  %s4356_s9 = inlined_call_operand.vmem [shape: f32[1,256], index: 9, kind: input, shape index: {}]   ;;  %s4357_s10 = inlined_call_operand.vmem [shape: f32[256,1024], index: 10, kind: input, shape index: {}]   ;;  %s4358_s11 = inlined_call_operand.vmem [shape: f32[1,1024], index: 11, kind: input, shape index: {}]   ;;  %s4359_s12 = inlined_call_operand.hbm [shape: f32[2,10], index: 12, kind: output, shape index: {0}]   ;;  %s4360_s13 = inlined_call_operand.hbm [shape: f32[2,10], index: 13, kind: output, shape index: {1}]   ;;  %s4361_s14 = inlined_call_operand.vmem [shape: bf16[2,1024], index: 14, kind: output, shape index: {2}]  }
   0x1   :  { %v50_v0 = vld [vmem:[%s4349_s2 + $0x8] sm:$0xff]  ;;  %v52_v1 = vld [vmem:[%s4349_s2 + $0x18] sm:$0xff]  ;;  %v49_v2 = vld [vmem:[%s4349_s2] sm:$0xff]  ;;  %v321_v28 = vunpack.c.l.s4 %v2388_v27 }
   0x2   :  { %v1742_v3 = vpack.c.bf16 %v52_v1, %v50_v0  ;;  %v51_v4 = vld [vmem:[%s4349_s2 + $0x10] sm:$0xff]  ;;  %v54_v5 = vld [vmem:[%s4349_s2 + $0x28] sm:$0xff]  ;;  %v56_v6 = vld [vmem:[%s4349_s2 + $0x38] sm:$0xff]  ;;  %v2535_v35 = vshrl.u32 %v307_v26, 7 }
   0x3   :  { %v1744_v7 = vpack.c.bf16 %v51_v4, %v49_v2  ;;  %v1746_v8 = vpack.c.bf16 %v56_v6, %v54_v5  ;;  %v53_v9 = vld [vmem:[%s4349_s2 + $0x20] sm:$0xff]  ;;  %v55_v10 = vld [vmem:[%s4349_s2 + $0x30] sm:$0xff]  ;;  %v58_v11 = vld [vmem:[%s4349_s2 + $0x48] sm:$0xff]  ;;  %v322_v36 = vunpack.c.0.s8 %v321_v28 }
   0x4   :  { %1743 = vmatprep.subr.bf16.mxu0 %v1742_v3  ;;  %v60_v12 = vld [vmem:[%s4349_s2 + $0x58] sm:$0xff]  ;;  %v1748_v13 = vpack.c.bf16 %v55_v10, %v53_v9  ;;  %v57_v15 = vld [vmem:[%s4349_s2 + $0x40] sm:$0xff]  ;;  %v59_v16 = vld [vmem:[%s4349_s2 + $0x50] sm:$0xff] }
   0x5   :  { %1745 = vmatpush1.bf16.msra.mxu0 %v1744_v7  ;;  %v1750_v14 = vpack.c.bf16 %v60_v12, %v58_v11  ;;  %v62_v17 = vld [vmem:[%s4349_s2 + $0x68] sm:$0xff]  ;;  %v64_v18 = vld [vmem:[%s4349_s2 + $0x78] sm:$0xff]  ;;  %v1752_v19 = vpack.c.bf16 %v59_v16, %v57_v15  ;;  %v61_v21 = vld [vmem:[%s4349_s2 + $0x60] sm:$0xff]  ;;  %v2550_v43 = vsub.s32 %v322_v36, %v2535_v35 }
   0x6   :  { %1747 = vmatprep.subr.bf16.mxu0 %v1746_v8  ;;  %v1754_v20 = vpack.c.bf16 %v64_v18, %v62_v17  ;;  %v63_v22 = vld [vmem:[%s4349_s2 + $0x70] sm:$0xff]  ;;  %v66_v23 = vld [vmem:[%s4349_s2 + $0x88] sm:$0xff]  ;;  %v68_v24 = vld [vmem:[%s4349_s2 + $0x98] sm:$0xff] }
   0x7   :  { %v1756_v25 = vpack.c.bf16 %v63_v22, %v61_v21  ;;  %v1758_v29 = vpack.c.bf16 %v68_v24, %v66_v23  ;;  %v65_v30 = vld [vmem:[%s4349_s2 + $0x80] sm:$0xff]  ;;  %v67_v31 = vld [vmem:[%s4349_s2 + $0x90] sm:$0xff]  ;;  %v70_v32 = vld [vmem:[%s4349_s2 + $0xa8] sm:$0xff] }
   0x8   :  { %v72_v33 = vld [vmem:[%s4349_s2 + $0xb8] sm:$0xff]  ;;  %v1760_v34 = vpack.c.bf16 %v67_v31, %v65_v30  ;;  %v69_v38 = vld [vmem:[%s4349_s2 + $0xa0] sm:$0xff]  ;;  %v71_v39 = vld [vmem:[%s4349_s2 + $0xb0] sm:$0xff] }
   0x9   :  { %1749 = vmatpush1.bf16.msra.mxu0 %v1748_v13  ;;  %v1762_v37 = vpack.c.bf16 %v72_v33, %v70_v32  ;;  %v74_v40 = vld [vmem:[%s4349_s2 + $0xc8] sm:$0xff]  ;;  %v76_v41 = vld [vmem:[%s4349_s2 + $0xd8] sm:$0xff]  ;;  %v1764_v42 = vpack.c.bf16 %v71_v39, %v69_v38  ;;  %v73_v45 = vld [vmem:[%s4349_s2 + $0xc0] sm:$0xff] }
   0xa   :  { %1751 = vmatprep.subr.bf16.mxu0 %v1750_v14  ;;  %v1766_v44 = vpack.c.bf16 %v76_v41, %v74_v40  ;;  %v75_v46 = vld [vmem:[%s4349_s2 + $0xd0] sm:$0xff]  ;;  %v2561_v47 = vld [vmem:[%s4347_s0] sm:$0xff]  ;;  %v78_v48 = vld [vmem:[%s4349_s2 + $0xe8] sm:$0xff] }
   0xb   :  { %v80_v49 = vld [vmem:[%s4349_s2 + $0xf8] sm:$0xff]  ;;  %v2570_v50 = vunpack.c.l.bf16 %v2561_v47  ;;  %v1768_v51 = vpack.c.bf16 %v75_v46, %v73_v45  ;;  %v77_v54 = vld [vmem:[%s4349_s2 + $0xe0] sm:$0xff]  ;;  %v79_v55 = vld [vmem:[%s4349_s2 + $0xf0] sm:$0xff] }
   0xc   :  { %v1770_v53 = vpack.c.bf16 %v80_v49, %v78_v48  ;;  %v82_v56 = vld [vmem:[%s4349_s2 + $0x108] sm:$0xff]  ;;  %v84_v57 = vld [vmem:[%s4349_s2 + $0x118] sm:$0xff]  ;;  %v1772_v59 = vpack.c.bf16 %v79_v55, %v77_v54  ;;  %v81_v61 = vld [vmem:[%s4349_s2 + $0x100] sm:$0xff] }
   0xd   :  { %1753 = vmatpush1.bf16.msra.mxu0 %v1752_v19  ;;  %v2574_v52 = vrot.slane %v2570_v50, %v2550_v43  ;;  %v1774_v60 = vpack.c.bf16 %v84_v57, %v82_v56  ;;  %v83_v62 = vld [vmem:[%s4349_s2 + $0x110] sm:$0xff]  ;;  %v86_v63 = vld [vmem:[%s4349_s2 + $0x128] sm:$0xff]  ;;  %v88_v0 = vld [vmem:[%s4349_s2 + $0x138] sm:$0xff]  ;;  %v319_v39 = vcombine.high %v2570_v50, %v2570_v50 }
   0xe   :  { %1755 = vmatprep.subr.bf16.mxu0 %v1754_v20  ;;  %v1776_v1 = vpack.c.bf16 %v83_v62, %v81_v61  ;;  %v1778_v2 = vpack.c.bf16 %v88_v0, %v86_v63  ;;  %v85_v3 = vld [vmem:[%s4349_s2 + $0x120] sm:$0xff]  ;;  %v87_v4 = vld [vmem:[%s4349_s2 + $0x130] sm:$0xff]  ;;  %v90_v5 = vld [vmem:[%s4349_s2 + $0x148] sm:$0xff] }
   0xf   :  { %v334_v58 = vcombine.high %v2574_v52, %v2574_v52  ;;  %v92_v6 = vld [vmem:[%s4349_s2 + $0x158] sm:$0xff]  ;;  %v1780_v7 = vpack.c.bf16 %v87_v4, %v85_v3  ;;  %v89_v9 = vld [vmem:[%s4349_s2 + $0x140] sm:$0xff]  ;;  %v91_v10 = vld [vmem:[%s4349_s2 + $0x150] sm:$0xff]  ;;  %v2689_v48 = vrot.slane %v319_v39, %v2550_v43 }
  0x10   :  { %v1782_v8 = vpack.c.bf16 %v92_v6, %v90_v5  ;;  %v94_v11 = vld [vmem:[%s4349_s2 + $0x168] sm:$0xff]  ;;  %v96_v12 = vld [vmem:[%s4349_s2 + $0x178] sm:$0xff]  ;;  %v1784_v13 = vpack.c.bf16 %v91_v10, %v89_v9  ;;  %v93_v15 = vld [vmem:[%s4349_s2 + $0x160] sm:$0xff] }
  0x11   :  { %1757 = vmatpush1.bf16.msra.mxu0 %v1756_v25  ;;  %425 = vmatprep.mubr.f32.mxu0 %v334_v58  ;;  %v1786_v14 = vpack.c.bf16 %v96_v12, %v94_v11  ;;  %v95_v16 = vld [vmem:[%s4349_s2 + $0x170] sm:$0xff]  ;;  %v98_v17 = vld [vmem:[%s4349_s2 + $0x188] sm:$0xff]  ;;  %v100_v18 = vld [vmem:[%s4349_s2 + $0x198] sm:$0xff]  ;;  %v335_v56 = vcombine.high %v2689_v48, %v2689_v48 }
  0x12   :  { %1759 = vmatprep.subr.bf16.mxu0 %v1758_v29  ;;  %v1788_v19 = vpack.c.bf16 %v95_v16, %v93_v15  ;;  %v1790_v20 = vpack.c.bf16 %v100_v18, %v98_v17  ;;  %v97_v21 = vld [vmem:[%s4349_s2 + $0x180] sm:$0xff]  ;;  %v99_v22 = vld [vmem:[%s4349_s2 + $0x190] sm:$0xff]  ;;  %v102_v23 = vld [vmem:[%s4349_s2 + $0x1a8] sm:$0xff] }
  0x13   :  { %v104_v24 = vld [vmem:[%s4349_s2 + $0x1b8] sm:$0xff]  ;;  %v1792_v25 = vpack.c.bf16 %v99_v22, %v97_v21  ;;  %v101_v27 = vld [vmem:[%s4349_s2 + $0x1a0] sm:$0xff]  ;;  %v103_v28 = vld [vmem:[%s4349_s2 + $0x1b0] sm:$0xff] }
  0x14   :  { %v1794_v26 = vpack.c.bf16 %v104_v24, %v102_v23  ;;  %v106_v29 = vld [vmem:[%s4349_s2 + $0x1c8] sm:$0xff]  ;;  %v108_v30 = vld [vmem:[%s4349_s2 + $0x1d8] sm:$0xff]  ;;  %v1796_v31 = vpack.c.bf16 %v103_v28, %v101_v27  ;;  %v105_v33 = vld [vmem:[%s4349_s2 + $0x1c0] sm:$0xff] }
  0x15   :  { %1761 = vmatpush1.bf16.msra.mxu0 %v1760_v34  ;;  %v1798_v32 = vpack.c.bf16 %v108_v30, %v106_v29  ;;  %v107_v34 = vld [vmem:[%s4349_s2 + $0x1d0] sm:$0xff]  ;;  %v110_v36 = vld [vmem:[%s4349_s2 + $0x1e8] sm:$0xff]  ;;  %v109_v41 = vld [vmem:[%s4349_s2 + $0x1e0] sm:$0xff] }
  0x16   :  { %1763 = vmatprep.subr.bf16.mxu0 %v1762_v37  ;;  %v112_v37 = vld [vmem:[%s4349_s2 + $0x1f8] sm:$0xff]  ;;  %v1800_v38 = vpack.c.bf16 %v107_v34, %v105_v33  ;;  %v113_v50 = vld [vmem:[%s4349_s2 + $0x200] sm:$0xff] }
  0x17   :  { %v1802_v40 = vpack.c.bf16 %v112_v37, %v110_v36  ;;  %v116_v45 = vld [vmem:[%s4349_s2 + $0x218] sm:$0xff]  ;;  %v117_v58 = vld [vmem:[%s4349_s2 + $0x220] sm:$0xff] }
  0x18   :  { %v120_v54 = vld [vmem:[%s4349_s2 + $0x238] sm:$0xff] }
  0x19   :  { %1765 = vmatpush1.bf16.msra.mxu0 %v1764_v42  ;;  %v111_v42 = vld [vmem:[%s4349_s2 + $0x1f0] sm:$0xff] }
  0x1a   :  { %1767 = vmatprep.subr.bf16.mxu0 %v1766_v44  ;;  %v114_v44 = vld [vmem:[%s4349_s2 + $0x208] sm:$0xff]  ;;  %v1804_v46 = vpack.c.bf16 %v111_v42, %v109_v41 }
  0x1b   :  { %v1806_v49 = vpack.c.bf16 %v116_v45, %v114_v44 }
  0x1d   :  { %1769 = vmatpush1.bf16.msra.mxu0 %v1768_v51  ;;  %v115_v51 = vld [vmem:[%s4349_s2 + $0x210] sm:$0xff] }
  0x1e   :  { %1771 = vmatprep.subr.bf16.mxu0 %v1770_v53  ;;  %v118_v53 = vld [vmem:[%s4349_s2 + $0x228] sm:$0xff]  ;;  %v1808_v55 = vpack.c.bf16 %v115_v51, %v113_v50 }
  0x1f   :  { %v1810_v57 = vpack.c.bf16 %v120_v54, %v118_v53 }
  0x21   :  { %1773 = vmatpush1.bf16.msra.mxu0 %v1772_v59  ;;  %v119_v59 = vld [vmem:[%s4349_s2 + $0x230] sm:$0xff] }
  0x22   :  { %1775 = vmatprep.subr.bf16.mxu0 %v1774_v60 }
  0x25   :  { %1777 = vmatpush1.bf16.msra.mxu0 %v1776_v1 }
  0x26   :  { %1779 = vmatprep.subr.bf16.mxu0 %v1778_v2 }
  0x29   :  { %1781 = vmatpush1.bf16.msra.mxu0 %v1780_v7 }
  0x2a   :  { %1783 = vmatprep.subr.bf16.mxu0 %v1782_v8 }
  0x2d   :  { %1785 = vmatpush1.bf16.msra.mxu0 %v1784_v13 }
  0x2e   :  { %1787 = vmatprep.subr.bf16.mxu0 %v1786_v14 }
  0x31   :  { %1789 = vmatpush1.bf16.msra.mxu0 %v1788_v19 }
  0x32   :  { %1791 = vmatprep.subr.bf16.mxu0 %v1790_v20 }
  0x35   :  { %1793 = vmatpush1.bf16.msra.mxu0 %v1792_v25 }
  0x36   :  { %1795 = vmatprep.subr.bf16.mxu0 %v1794_v26 }
  0x39   :  { %1797 = vmatpush1.bf16.msra.mxu0 %v1796_v31 }
  0x3a   :  { %1799 = vmatprep.subr.bf16.mxu0 %v1798_v32 }
  0x3d   :  { %1801 = vmatpush1.bf16.msra.mxu0 %v1800_v38 }
  0x3e   :  { %1803 = vmatprep.subr.bf16.mxu0 %v1802_v40 }
  0x41   :  { %1805 = vmatpush1.bf16.msra.mxu0 %v1804_v46 }
  0x42   :  { %1807 = vmatprep.subr.bf16.mxu0 %v1806_v49 }
  0x43   :  { %21 = vsyncpa [#allocation5], 0  ;;  %v122_v60 = vld [vmem:[%s4349_s2 + $0x248] sm:$0xff]  ;;  %v124_v61 = vld [vmem:[%s4349_s2 + $0x258] sm:$0xff]  ;;  %v1812_v62 = vpack.c.bf16 %v119_v59, %v117_v58  ;;  %vm891_vm0 = vcmask 1041408   ;;  %vm2389_vm1 = vmmov 1  }
  0x44   :  { %426 = vmatmul.mubr.f32.vlgmr.msra.gmra.mrb[0].mxu0 %v2574_v52  ;;  %v1814_v63 = vpack.c.bf16 %v124_v61, %v122_v60  ;;  %v121_v0 = vld [vmem:[%s4349_s2 + $0x240] sm:$0xff]  ;;  %v123_v1 = vld [vmem:[%s4349_s2 + $0x250] sm:$0xff]  ;;  %v126_v2 = vld [vmem:[%s4349_s2 + $0x268] sm:$0xff]  ;;  %vm1561_vm3 = vcmask 74752   ;;  %vm887_vm4 = vcmask 80896   ;;  %s2392_s27 = smov [#allocation4]  }
  0x45   :  { %1809 = vmatpush1.bf16.msra.mxu0 %v1808_v55  ;;  %496 = vmatprep.mubr.f32.mxu0 %v335_v56  ;;  %v128_v52 = vld [vmem:[%s4349_s2 + $0x278] sm:$0xff]  ;;  %v1816_v3 = vpack.c.bf16 %v123_v1, %v121_v0  ;;  %v125_v5 = vld [vmem:[%s4349_s2 + $0x260] sm:$0xff]  ;;  %v127_v6 = vld [vmem:[%s4349_s2 + $0x270] sm:$0xff]  ;;  %s1647_s28 = sshll.u32 %s2392_s27, 4  ;;  %s1648_s28 = int_to_ptr.vmem [resolvable:$true] %s1647_s28 }
  0x46   :  { %1811 = vmatprep.subr.bf16.mxu0 %v1810_v57  ;;  %v1818_v4 = vpack.c.bf16 %v128_v52, %v126_v2  ;;  %v130_v7 = vld [vmem:[%s4349_s2 + $0x288] sm:$0xff]  ;;  %v132_v8 = vld [vmem:[%s4349_s2 + $0x298] sm:$0xff]  ;;  %v1820_v9 = vpack.c.bf16 %v127_v6, %v125_v5  ;;  %v129_v11 = vld [vmem:[%s4349_s2 + $0x280] sm:$0xff] }
  0x47   :  { %v1822_v10 = vpack.c.bf16 %v132_v8, %v130_v7  ;;  %v131_v12 = vld [vmem:[%s4349_s2 + $0x290] sm:$0xff]  ;;  %v134_v13 = vld [vmem:[%s4349_s2 + $0x2a8] sm:$0xff]  ;;  %v136_v14 = vld [vmem:[%s4349_s2 + $0x2b8] sm:$0xff] }
  0x48   :  { %v1824_v15 = vpack.c.bf16 %v131_v12, %v129_v11  ;;  %v1826_v16 = vpack.c.bf16 %v136_v14, %v134_v13  ;;  %v133_v17 = vld [vmem:[%s4349_s2 + $0x2a0] sm:$0xff]  ;;  %v135_v18 = vld [vmem:[%s4349_s2 + $0x2b0] sm:$0xff]  ;;  %v138_v19 = vld [vmem:[%s4349_s2 + $0x2c8] sm:$0xff] }
  0x49   :  { %1813 = vmatpush1.bf16.msra.mxu0 %v1812_v62  ;;  %v140_v20 = vld [vmem:[%s4349_s2 + $0x2d8] sm:$0xff]  ;;  %v1828_v21 = vpack.c.bf16 %v135_v18, %v133_v17  ;;  %v137_v23 = vld [vmem:[%s4349_s2 + $0x2c0] sm:$0xff]  ;;  %v139_v24 = vld [vmem:[%s4349_s2 + $0x2d0] sm:$0xff] }
  0x4a   :  { %1815 = vmatprep.subr.bf16.mxu0 %v1814_v63  ;;  %v1830_v22 = vpack.c.bf16 %v140_v20, %v138_v19  ;;  %v142_v25 = vld [vmem:[%s4349_s2 + $0x2e8] sm:$0xff]  ;;  %v144_v26 = vld [vmem:[%s4349_s2 + $0x2f8] sm:$0xff]  ;;  %v1832_v27 = vpack.c.bf16 %v139_v24, %v137_v23  ;;  %v141_v29 = vld [vmem:[%s4349_s2 + $0x2e0] sm:$0xff] }
  0x4b   :  { %v1834_v28 = vpack.c.bf16 %v144_v26, %v142_v25  ;;  %v143_v30 = vld [vmem:[%s4349_s2 + $0x2f0] sm:$0xff]  ;;  %v146_v31 = vld [vmem:[%s4349_s2 + $0x308] sm:$0xff]  ;;  %v148_v32 = vld [vmem:[%s4349_s2 + $0x318] sm:$0xff] }
  0x4c   :  { %v1836_v33 = vpack.c.bf16 %v143_v30, %v141_v29  ;;  %v1838_v34 = vpack.c.bf16 %v148_v32, %v146_v31  ;;  %v145_v36 = vld [vmem:[%s4349_s2 + $0x300] sm:$0xff]  ;;  %v147_v37 = vld [vmem:[%s4349_s2 + $0x310] sm:$0xff]  ;;  %v150_v38 = vld [vmem:[%s4349_s2 + $0x328] sm:$0xff] }
  0x4d   :  { %1817 = vmatpush1.bf16.msra.mxu0 %v1816_v3  ;;  %v152_v39 = vld [vmem:[%s4349_s2 + $0x338] sm:$0xff]  ;;  %v1840_v40 = vpack.c.bf16 %v147_v37, %v145_v36  ;;  %v149_v42 = vld [vmem:[%s4349_s2 + $0x320] sm:$0xff]  ;;  %v151_v44 = vld [vmem:[%s4349_s2 + $0x330] sm:$0xff] }
  0x4e   :  { %1819 = vmatprep.subr.bf16.mxu0 %v1818_v4  ;;  %v1842_v41 = vpack.c.bf16 %v152_v39, %v150_v38  ;;  %v154_v45 = vld [vmem:[%s4349_s2 + $0x348] sm:$0xff]  ;;  %v156_v46 = vld [vmem:[%s4349_s2 + $0x358] sm:$0xff]  ;;  %v1844_v49 = vpack.c.bf16 %v151_v44, %v149_v42  ;;  %v153_v51 = vld [vmem:[%s4349_s2 + $0x340] sm:$0xff] }
  0x4f   :  { %v1846_v50 = vpack.c.bf16 %v156_v46, %v154_v45  ;;  %v155_v53 = vld [vmem:[%s4349_s2 + $0x350] sm:$0xff]  ;;  %v158_v54 = vld [vmem:[%s4349_s2 + $0x368] sm:$0xff]  ;;  %v160_v55 = vld [vmem:[%s4349_s2 + $0x378] sm:$0xff] }
  0x50   :  { %v1848_v56 = vpack.c.bf16 %v155_v53, %v153_v51  ;;  %v1850_v57 = vpack.c.bf16 %v160_v55, %v158_v54  ;;  %v157_v58 = vld [vmem:[%s4349_s2 + $0x360] sm:$0xff]  ;;  %v159_v59 = vld [vmem:[%s4349_s2 + $0x370] sm:$0xff]  ;;  %v162_v60 = vld [vmem:[%s4349_s2 + $0x388] sm:$0xff] }
  0x51   :  { %1821 = vmatpush1.bf16.msra.mxu0 %v1820_v9  ;;  %v164_v61 = vld [vmem:[%s4349_s2 + $0x398] sm:$0xff]  ;;  %v1852_v62 = vpack.c.bf16 %v159_v59, %v157_v58  ;;  %v161_v0 = vld [vmem:[%s4349_s2 + $0x380] sm:$0xff]  ;;  %v163_v1 = vld [vmem:[%s4349_s2 + $0x390] sm:$0xff] }
  0x52   :  { %1823 = vmatprep.subr.bf16.mxu0 %v1822_v10  ;;  %v1854_v63 = vpack.c.bf16 %v164_v61, %v162_v60  ;;  %v166_v2 = vld [vmem:[%s4349_s2 + $0x3a8] sm:$0xff]  ;;  %v168_v52 = vld [vmem:[%s4349_s2 + $0x3b8] sm:$0xff]  ;;  %v1856_v3 = vpack.c.bf16 %v163_v1, %v161_v0  ;;  %v165_v5 = vld [vmem:[%s4349_s2 + $0x3a0] sm:$0xff] }
  0x53   :  { %v1858_v4 = vpack.c.bf16 %v168_v52, %v166_v2  ;;  %v167_v6 = vld [vmem:[%s4349_s2 + $0x3b0] sm:$0xff]  ;;  %v170_v7 = vld [vmem:[%s4349_s2 + $0x3c8] sm:$0xff]  ;;  %v172_v8 = vld [vmem:[%s4349_s2 + $0x3d8] sm:$0xff] }
  0x54   :  { %v1860_v9 = vpack.c.bf16 %v167_v6, %v165_v5  ;;  %v1862_v10 = vpack.c.bf16 %v172_v8, %v170_v7  ;;  %v169_v11 = vld [vmem:[%s4349_s2 + $0x3c0] sm:$0xff]  ;;  %v171_v12 = vld [vmem:[%s4349_s2 + $0x3d0] sm:$0xff]  ;;  %v174_v13 = vld [vmem:[%s4349_s2 + $0x3e8] sm:$0xff] }
  0x55   :  { %1825 = vmatpush1.bf16.msra.mxu0 %v1824_v15  ;;  %v176_v14 = vld [vmem:[%s4349_s2 + $0x3f8] sm:$0xff]  ;;  %v2875_v15 = vunpack.c.h.bf16 %v2561_v47  ;;  %v173_v18 = vld [vmem:[%s4349_s2 + $0x3e0] sm:$0xff]  ;;  %v175_v19 = vld [vmem:[%s4349_s2 + $0x3f0] sm:$0xff] }
  0x56   :  { %1827 = vmatprep.subr.bf16.mxu0 %v1826_v16  ;;  %v1864_v16 = vpack.c.bf16 %v171_v12, %v169_v11  ;;  %v1866_v17 = vpack.c.bf16 %v176_v14, %v174_v13  ;;  %v178_v20 = vld [vmem:[%s4349_s2 + $0x408] sm:$0xff]  ;;  %v180_v47 = vld [vmem:[%s4349_s2 + $0x418] sm:$0xff]  ;;  %v177_v24 = vld [vmem:[%s4349_s2 + $0x400] sm:$0xff] }
  0x57   :  { %v1870_v23 = vpack.c.bf16 %v180_v47, %v178_v20  ;;  %v179_v25 = vld [vmem:[%s4349_s2 + $0x410] sm:$0xff]  ;;  %v182_v26 = vld [vmem:[%s4349_s2 + $0x428] sm:$0xff]  ;;  %v181_v31 = vld [vmem:[%s4349_s2 + $0x420] sm:$0xff] }
  0x58   :  { %v183_v32 = vld [vmem:[%s4349_s2 + $0x430] sm:$0xff]  ;;  %v185_v36 = vld [vmem:[%s4349_s2 + $0x440] sm:$0xff]  ;;  %v664_v39 = vld [vmem:[%s4351_s4 + $0x88] sm:$0xff] }
  0x59   :  { %1829 = vmatpush1.bf16.msra.mxu0 %v1828_v21  ;;  %v1868_v21 = vpack.c.bf16 %v175_v19, %v173_v18  ;;  %v187_v37 = vld [vmem:[%s4349_s2 + $0x450] sm:$0xff]  ;;  %v663_v38 = vld [vmem:[%s4351_s4 + $0x80] sm:$0xff]  ;;  %v648_v42 = vld [vmem:[%s4351_s4 + $0x8] sm:$0xff] }
  0x5a   :  { %1831 = vmatprep.subr.bf16.mxu0 %v1830_v22  ;;  %v2891_v22 = vrot.slane %v2875_v15, %v2550_v43  ;;  %v665_v44 = vld [vmem:[%s4351_s4 + $0x90] sm:$0xff]  ;;  %v666_v45 = vld [vmem:[%s4351_s4 + $0x98] sm:$0xff]  ;;  %v667_v54 = vld [vmem:[%s4351_s4 + $0xa0] sm:$0xff]  ;;  %v1880_v59 = vpack.c.bf16 %v187_v37, %v185_v36 }
  0x5b   :  { %v649_v51 = vld [vmem:[%s4351_s4 + $0x10] sm:$0xff]  ;;  %v650_v53 = vld [vmem:[%s4351_s4 + $0x18] sm:$0xff]  ;;  %v190_v55 = vld [vmem:[%s4349_s2 + $0x468] sm:$0xff] }
  0x5c   :  { %v351_v29 = vcombine.high %v2891_v22, %v2891_v22  ;;  %v2004_v58 = vpack.c.bf16 %v650_v53, %v649_v51  ;;  %v189_v60 = vld [vmem:[%s4349_s2 + $0x460] sm:$0xff]  ;;  %v191_v1 = vld [vmem:[%s4349_s2 + $0x470] sm:$0xff]  ;;  %v670_v52 = vld [vmem:[%s4351_s4 + $0xb8] sm:$0xff] }
  0x5d   :  { %1833 = vmatpush1.bf16.msra.mxu0 %v1832_v27  ;;  %v184_v27 = vld [vmem:[%s4349_s2 + $0x438] sm:$0xff]  ;;  %v669_v2 = vld [vmem:[%s4351_s4 + $0xb0] sm:$0xff]  ;;  %v1884_v6 = vpack.c.bf16 %v191_v1, %v189_v60  ;;  %v193_v7 = vld [vmem:[%s4349_s2 + $0x480] sm:$0xff] }
  0x5e   :  { %1835 = vmatprep.subr.bf16.mxu0 %v1834_v28  ;;  %v1872_v28 = vpack.c.bf16 %v179_v25, %v177_v24  ;;  %v1874_v30 = vpack.c.bf16 %v184_v27, %v182_v26  ;;  %v2010_v8 = vpack.c.bf16 %v670_v52, %v669_v2  ;;  %v195_v12 = vld [vmem:[%s4349_s2 + $0x490] sm:$0xff]  ;;  %v671_v13 = vld [vmem:[%s4351_s4 + $0xc0] sm:$0xff]  ;;  %v672_v14 = vld [vmem:[%s4351_s4 + $0xc8] sm:$0xff] }
  0x5f   :  { %v1888_v19 = vpack.c.bf16 %v195_v12, %v193_v7  ;;  %v197_v20 = vld [vmem:[%s4349_s2 + $0x4a0] sm:$0xff]  ;;  %v2014_v47 = vpack.c.bf16 %v672_v14, %v671_v13  ;;  %v199_v25 = vld [vmem:[%s4349_s2 + $0x4b0] sm:$0xff]  ;;  %v674_v27 = vld [vmem:[%s4351_s4 + $0xd8] sm:$0xff] }
  0x60   :  { %v673_v26 = vld [vmem:[%s4351_s4 + $0xd0] sm:$0xff]  ;;  %v658_v36 = vld [vmem:[%s4351_s4 + $0x58] sm:$0xff]  ;;  %v205_v51 = vld [vmem:[%s4349_s2 + $0x4e0] sm:$0xff] }
  0x61   :  { %1837 = vmatpush1.bf16.msra.mxu0 %v1836_v33  ;;  %v186_v33 = vld [vmem:[%s4349_s2 + $0x448] sm:$0xff]  ;;  %v207_v53 = vld [vmem:[%s4349_s2 + $0x4f0] sm:$0xff]  ;;  %v213_v1 = vld [vmem:[%s4349_s2 + $0x520] sm:$0xff] }
  0x62   :  { %1839 = vmatprep.subr.bf16.mxu0 %v1838_v34  ;;  %v188_v34 = vld [vmem:[%s4349_s2 + $0x458] sm:$0xff]  ;;  %v211_v60 = vld [vmem:[%s4349_s2 + $0x510] sm:$0xff]  ;;  %v218_v52 = vld [vmem:[%s4349_s2 + $0x548] sm:$0xff] }
  0x63   :  { %v1878_v46 = vpack.c.bf16 %v188_v34, %v186_v33  ;;  %v2018_v33 = vpack.c.bf16 %v674_v27, %v673_v26  ;;  %v657_v34 = vld [vmem:[%s4351_s4 + $0x50] sm:$0xff]  ;;  %v221_v12 = vld [vmem:[%s4349_s2 + $0x560] sm:$0xff]  ;;  %v226_v14 = vld [vmem:[%s4349_s2 + $0x588] sm:$0xff] }
  0x64   :  { %v215_v2 = vld [vmem:[%s4349_s2 + $0x530] sm:$0xff]  ;;  %v234_v27 = vld [vmem:[%s4349_s2 + $0x5c8] sm:$0xff]  ;;  %vm2063_vm2 = vmpackc.low %vm891_vm0, %vm2389_vm1 }
  0x65   :  { %1841 = vmatpush1.bf16.msra.mxu0 %v1840_v40  ;;  %v1876_v40 = vpack.c.bf16 %v183_v32, %v181_v31  ;;  %v1892_v31 = vpack.c.bf16 %v199_v25, %v197_v20  ;;  %v201_v32 = vld [vmem:[%s4349_s2 + $0x4c0] sm:$0xff]  ;;  %v219_v7 = vld [vmem:[%s4349_s2 + $0x550] sm:$0xff] }
  0x66   :  { %1843 = vmatprep.subr.bf16.mxu0 %v1842_v41  ;;  %v1998_v41 = vpack.c.bf16 %v664_v39, %v663_v38  ;;  %v203_v38 = vld [vmem:[%s4349_s2 + $0x4d0] sm:$0xff]  ;;  %v675_v39 = vld [vmem:[%s4351_s4 + $0xe0] sm:$0xff] }
  0x67   :  { %v223_v13 = vld [vmem:[%s4349_s2 + $0x570] sm:$0xff]  ;;  %v229_v25 = vld [vmem:[%s4349_s2 + $0x5a0] sm:$0xff] }
  0x68   :  { %1999 = vmatprep.subr.bf16.mxu1 %v1998_v41  ;;  %v208_v41 = vld [vmem:[%s4349_s2 + $0x4f8] sm:$0xff]  ;;  %v227_v20 = vld [vmem:[%s4349_s2 + $0x590] sm:$0xff] }
  0x69   :  { %1845 = vmatpush1.bf16.msra.mxu0 %v1844_v49  ;;  %v231_v26 = vld [vmem:[%s4349_s2 + $0x5b0] sm:$0xff] }
  0x6a   :  { %1847 = vmatprep.subr.bf16.mxu0 %v1846_v50  ;;  %v2002_v50 = vpack.c.bf16 %v666_v45, %v665_v44  ;;  %v1896_v44 = vpack.c.bf16 %v203_v38, %v201_v32  ;;  %v235_v32 = vld [vmem:[%s4349_s2 + $0x5d0] sm:$0xff] }
  0x6d   :  { %1849 = vmatpush1.bf16.msra.mxu0 %v1848_v56  ;;  %v192_v56 = vld [vmem:[%s4349_s2 + $0x478] sm:$0xff] }
  0x6e   :  { %1851 = vmatprep.subr.bf16.mxu0 %v1850_v57  ;;  %v668_v57 = vld [vmem:[%s4351_s4 + $0xa8] sm:$0xff]  ;;  %v1882_v0 = vpack.c.bf16 %v192_v56, %v190_v55  ;;  %v212_v55 = vld [vmem:[%s4349_s2 + $0x518] sm:$0xff] }
  0x6f   :  { %v2006_v61 = vpack.c.bf16 %v668_v57, %v667_v54  ;;  %v210_v54 = vld [vmem:[%s4349_s2 + $0x508] sm:$0xff]  ;;  %v1900_v57 = vpack.c.bf16 %v207_v53, %v205_v51 }
  0x71   :  { %1853 = vmatpush1.bf16.msra.mxu0 %v1852_v62  ;;  %v651_v62 = vld [vmem:[%s4351_s4 + $0x20] sm:$0xff] }
  0x72   :  { %1855 = vmatprep.subr.bf16.mxu0 %v1854_v63  ;;  %v652_v63 = vld [vmem:[%s4351_s4 + $0x28] sm:$0xff] }
  0x73   :  { %v2008_v5 = vpack.c.bf16 %v652_v63, %v651_v62  ;;  %v216_v62 = vld [vmem:[%s4349_s2 + $0x538] sm:$0xff] }
  0x75   :  { %1857 = vmatpush1.bf16.msra.mxu0 %v1856_v3  ;;  %v194_v3 = vld [vmem:[%s4349_s2 + $0x488] sm:$0xff] }
  0x76   :  { %1859 = vmatprep.subr.bf16.mxu0 %v1858_v4  ;;  %v196_v4 = vld [vmem:[%s4349_s2 + $0x498] sm:$0xff] }
  0x77   :  { %v1886_v11 = vpack.c.bf16 %v196_v4, %v194_v3  ;;  %v220_v3 = vld [vmem:[%s4349_s2 + $0x558] sm:$0xff]  ;;  %v1908_v4 = vpack.c.bf16 %v215_v2, %v213_v1  ;;  %v253_v1 = vld [vmem:[%s4349_s2 + $0x660] sm:$0xff]  ;;  %v255_v2 = vld [vmem:[%s4349_s2 + $0x670] sm:$0xff] }
  0x79   :  { %1861 = vmatpush1.bf16.msra.mxu0 %v1860_v9  ;;  %v653_v9 = vld [vmem:[%s4351_s4 + $0x30] sm:$0xff] }
  0x7a   :  { %1863 = vmatprep.subr.bf16.mxu0 %v1862_v10  ;;  %v654_v10 = vld [vmem:[%s4351_s4 + $0x38] sm:$0xff] }
  0x7b   :  { %v2012_v18 = vpack.c.bf16 %v654_v10, %v653_v9  ;;  %v224_v9 = vld [vmem:[%s4349_s2 + $0x578] sm:$0xff] }
  0x7d   :  { %1865 = vmatpush1.bf16.msra.mxu0 %v1864_v16  ;;  %v198_v16 = vld [vmem:[%s4349_s2 + $0x4a8] sm:$0xff] }
  0x7e   :  { %1867 = vmatprep.subr.bf16.mxu0 %v1866_v17  ;;  %v200_v17 = vld [vmem:[%s4349_s2 + $0x4b8] sm:$0xff] }
  0x7f   :  { %v1890_v24 = vpack.c.bf16 %v200_v17, %v198_v16  ;;  %v228_v16 = vld [vmem:[%s4349_s2 + $0x598] sm:$0xff]  ;;  %v1916_v17 = vpack.c.bf16 %v223_v13, %v221_v12  ;;  %v261_v12 = vld [vmem:[%s4349_s2 + $0x6a0] sm:$0xff]  ;;  %v263_v13 = vld [vmem:[%s4349_s2 + $0x6b0] sm:$0xff] }
  0x81   :  { %1869 = vmatpush1.bf16.msra.mxu0 %v1868_v21  ;;  %v655_v21 = vld [vmem:[%s4351_s4 + $0x40] sm:$0xff] }
  0x82   :  { %1871 = vmatprep.subr.bf16.mxu0 %v1870_v23  ;;  %v656_v23 = vld [vmem:[%s4351_s4 + $0x48] sm:$0xff] }
  0x84   :  { %497 = vmatmul.mubr.f32.vlgmr.msra.gmra.mrb[0].mxu0 %v2689_v48  ;;  %v647_v48 = vld [vmem:[%s4351_s4] sm:$0xff] }
  0x85   :  { %1873 = vmatpush1.bf16.msra.mxu0 %v1872_v28  ;;  %567 = vmatprep.mubr.f32.mxu0 %v351_v29  ;;  %v2000_v49 = vpack.c.bf16 %v648_v42, %v647_v48  ;;  %v202_v28 = vld [vmem:[%s4349_s2 + $0x4c8] sm:$0xff]  ;;  %v204_v29 = vld [vmem:[%s4349_s2 + $0x4d8] sm:$0xff]  ;;  %v2020_v42 = vpack.c.bf16 %v658_v36, %v657_v34 }
  0x86   :  { %1875 = vmatprep.subr.bf16.mxu0 %v1874_v30  ;;  %v2016_v30 = vpack.c.bf16 %v656_v23, %v655_v21  ;;  %v1894_v37 = vpack.c.bf16 %v204_v29, %v202_v28  ;;  %v676_v48 = vld [vmem:[%s4351_s4 + $0xe8] sm:$0xff]  ;;  %v232_v21 = vld [vmem:[%s4349_s2 + $0x5b8] sm:$0xff]  ;;  %v1924_v29 = vpack.c.bf16 %v231_v26, %v229_v25  ;;  %v269_v25 = vld [vmem:[%s4349_s2 + $0x6e0] sm:$0xff] }
  0x87   :  { %2001 = vmatpush3.bf16.msra.mxu1 %v2000_v49  ;;  %v2022_v45 = vpack.c.bf16 %v676_v48, %v675_v39  ;;  %v660_v49 = vld [vmem:[%s4351_s4 + $0x68] sm:$0xff]  ;;  %v236_v28 = vld [vmem:[%s4349_s2 + $0x5d8] sm:$0xff]  ;;  %v237_v39 = vld [vmem:[%s4349_s2 + $0x5e0] sm:$0xff] }
  0x88   :  { %2003 = vmatprep.subr.bf16.mxu1 %v2002_v50  ;;  %v240_v34 = vld [vmem:[%s4349_s2 + $0x5f8] sm:$0xff]  ;;  %v239_v48 = vld [vmem:[%s4349_s2 + $0x5f0] sm:$0xff] }
  0x89   :  { %1877 = vmatpush1.bf16.msra.mxu0 %v1876_v40  ;;  %v206_v40 = vld [vmem:[%s4349_s2 + $0x4e8] sm:$0xff]  ;;  %v271_v26 = vld [vmem:[%s4349_s2 + $0x6f0] sm:$0xff] }
  0x8a   :  { %1879 = vmatprep.subr.bf16.mxu0 %v1878_v46  ;;  %v659_v46 = vld [vmem:[%s4351_s4 + $0x60] sm:$0xff]  ;;  %v1898_v50 = vpack.c.bf16 %v208_v41, %v206_v40  ;;  %v242_v40 = vld [vmem:[%s4349_s2 + $0x608] sm:$0xff]  ;;  %v244_v41 = vld [vmem:[%s4349_s2 + $0x618] sm:$0xff] }
  0x8b   :  { %2005 = vmatpush3.bf16.msra.mxu1 %v2004_v58  ;;  %v2024_v56 = vpack.c.bf16 %v660_v49, %v659_v46  ;;  %v1902_v58 = vpack.c.bf16 %v212_v55, %v210_v54  ;;  %v243_v46 = vld [vmem:[%s4349_s2 + $0x610] sm:$0xff]  ;;  %v246_v49 = vld [vmem:[%s4349_s2 + $0x628] sm:$0xff]  ;;  %v245_v54 = vld [vmem:[%s4349_s2 + $0x620] sm:$0xff] }
  0x8c   :  { %2007 = vmatprep.subr.bf16.mxu1 %v2006_v61  ;;  %v214_v61 = vld [vmem:[%s4349_s2 + $0x528] sm:$0xff]  ;;  %v247_v55 = vld [vmem:[%s4349_s2 + $0x630] sm:$0xff] }
  0x8d   :  { %1881 = vmatpush1.bf16.msra.mxu0 %v1880_v59  ;;  %v209_v59 = vld [vmem:[%s4349_s2 + $0x500] sm:$0xff] }
  0x8e   :  { %1883 = vmatprep.subr.bf16.mxu0 %v1882_v0  ;;  %v1904_v63 = vpack.c.bf16 %v211_v60, %v209_v59  ;;  %v1906_v0 = vpack.c.bf16 %v216_v62, %v214_v61  ;;  %v249_v60 = vld [vmem:[%s4349_s2 + $0x640] sm:$0xff]  ;;  %v251_v61 = vld [vmem:[%s4349_s2 + $0x650] sm:$0xff]  ;;  %v254_v62 = vld [vmem:[%s4349_s2 + $0x668] sm:$0xff] }
  0x8f   :  { %2009 = vmatpush3.bf16.msra.mxu1 %v2008_v5  ;;  %v1910_v5 = vpack.c.bf16 %v220_v3, %v218_v52  ;;  %v258_v52 = vld [vmem:[%s4349_s2 + $0x688] sm:$0xff]  ;;  %v260_v3 = vld [vmem:[%s4349_s2 + $0x698] sm:$0xff] }
  0x90   :  { %2011 = vmatprep.subr.bf16.mxu1 %v2010_v8  ;;  %v222_v8 = vld [vmem:[%s4349_s2 + $0x568] sm:$0xff] }
  0x91   :  { %1885 = vmatpush1.bf16.msra.mxu0 %v1884_v6  ;;  %v217_v6 = vld [vmem:[%s4349_s2 + $0x540] sm:$0xff] }
  0x92   :  { %1887 = vmatprep.subr.bf16.mxu0 %v1886_v11  ;;  %v1912_v10 = vpack.c.bf16 %v219_v7, %v217_v6  ;;  %v1914_v11 = vpack.c.bf16 %v224_v9, %v222_v8  ;;  %v257_v6 = vld [vmem:[%s4349_s2 + $0x680] sm:$0xff]  ;;  %v259_v7 = vld [vmem:[%s4349_s2 + $0x690] sm:$0xff]  ;;  %v262_v8 = vld [vmem:[%s4349_s2 + $0x6a8] sm:$0xff] }
  0x93   :  { %2013 = vmatpush3.bf16.msra.mxu1 %v2012_v18  ;;  %v1918_v18 = vpack.c.bf16 %v228_v16, %v226_v14  ;;  %v264_v9 = vld [vmem:[%s4349_s2 + $0x6b8] sm:$0xff]  ;;  %v266_v14 = vld [vmem:[%s4349_s2 + $0x6c8] sm:$0xff] }
  0x94   :  { %2015 = vmatprep.subr.bf16.mxu1 %v2014_v47  ;;  %v230_v47 = vld [vmem:[%s4349_s2 + $0x5a8] sm:$0xff]  ;;  %v268_v16 = vld [vmem:[%s4349_s2 + $0x6d8] sm:$0xff] }
  0x95   :  { %1889 = vmatpush1.bf16.msra.mxu0 %v1888_v19  ;;  %v225_v19 = vld [vmem:[%s4349_s2 + $0x580] sm:$0xff] }
  0x96   :  { %1891 = vmatprep.subr.bf16.mxu0 %v1890_v24  ;;  %v1920_v23 = vpack.c.bf16 %v227_v20, %v225_v19  ;;  %v1922_v24 = vpack.c.bf16 %v232_v21, %v230_v47  ;;  %v265_v19 = vld [vmem:[%s4349_s2 + $0x6c0] sm:$0xff]  ;;  %v267_v20 = vld [vmem:[%s4349_s2 + $0x6d0] sm:$0xff]  ;;  %v270_v47 = vld [vmem:[%s4349_s2 + $0x6e8] sm:$0xff] }
  0x97   :  { %2017 = vmatpush3.bf16.msra.mxu1 %v2016_v30  ;;  %v1926_v30 = vpack.c.bf16 %v236_v28, %v234_v27  ;;  %v272_v21 = vld [vmem:[%s4349_s2 + $0x6f8] sm:$0xff]  ;;  %v274_v27 = vld [vmem:[%s4349_s2 + $0x708] sm:$0xff] }
  0x98   :  { %2019 = vmatprep.subr.bf16.mxu1 %v2018_v33  ;;  %v238_v33 = vld [vmem:[%s4349_s2 + $0x5e8] sm:$0xff]  ;;  %v276_v28 = vld [vmem:[%s4349_s2 + $0x718] sm:$0xff] }
  0x99   :  { %1893 = vmatpush1.bf16.msra.mxu0 %v1892_v31  ;;  %v233_v31 = vld [vmem:[%s4349_s2 + $0x5c0] sm:$0xff]  ;;  %v1930_v38 = vpack.c.bf16 %v240_v34, %v238_v33  ;;  %v278_v33 = vld [vmem:[%s4349_s2 + $0x728] sm:$0xff]  ;;  %v280_v34 = vld [vmem:[%s4349_s2 + $0x738] sm:$0xff] }
  0x9a   :  { %1895 = vmatprep.subr.bf16.mxu0 %v1894_v37  ;;  %v1928_v36 = vpack.c.bf16 %v235_v32, %v233_v31  ;;  %v336_v37 = vcombine.high %v2875_v15, %v2875_v15  ;;  %v1932_v15 = vpack.c.bf16 %v239_v48, %v237_v39  ;;  %v273_v31 = vld [vmem:[%s4349_s2 + $0x700] sm:$0xff]  ;;  %v275_v32 = vld [vmem:[%s4349_s2 + $0x710] sm:$0xff]  ;;  %v282_v48 = vld [vmem:[%s4349_s2 + $0x748] sm:$0xff] }
  0x9b   :  { %2021 = vmatpush3.bf16.msra.mxu1 %v2020_v42  ;;  %v279_v39 = vld [vmem:[%s4349_s2 + $0x730] sm:$0xff] }
  0x9c   :  { %2023 = vmatprep.subr.bf16.mxu1 %v2022_v45  ;;  %v3175_v42 = vrot.slane %v336_v37, %v2550_v43  ;;  %v241_v45 = vld [vmem:[%s4349_s2 + $0x600] sm:$0xff]  ;;  %v1970_v37 = vpack.c.bf16 %v280_v34, %v278_v33  ;;  %v774_v33 = vld [vmem:[%s4353_s6 + $0x90] sm:$0xff]  ;;  %v775_v34 = vld [vmem:[%s4353_s6 + $0x98] sm:$0xff] }
  0x9d   :  { %1897 = vmatpush1.bf16.msra.mxu0 %v1896_v44  ;;  %v1934_v44 = vpack.c.bf16 %v244_v41, %v242_v40  ;;  %v1936_v43 = vpack.c.bf16 %v243_v46, %v241_v45  ;;  %v284_v40 = vld [vmem:[%s4349_s2 + $0x758] sm:$0xff]  ;;  %v283_v45 = vld [vmem:[%s4349_s2 + $0x750] sm:$0xff]  ;;  %v286_v46 = vld [vmem:[%s4349_s2 + $0x768] sm:$0xff] }
  0x9e   :  { %1899 = vmatprep.subr.bf16.mxu0 %v1898_v50  ;;  %v248_v50 = vld [vmem:[%s4349_s2 + $0x638] sm:$0xff]  ;;  %v352_v51 = vcombine.high %v3175_v42, %v3175_v42 }
  0x9f   :  { %2025 = vmatpush3.bf16.msra.mxu1 %v2024_v56  ;;  %v1938_v53 = vpack.c.bf16 %v248_v50, %v246_v49  ;;  %v250_v56 = vld [vmem:[%s4349_s2 + $0x648] sm:$0xff]  ;;  %v288_v49 = vld [vmem:[%s4349_s2 + $0x778] sm:$0xff] }
  0xa1   :  { %1901 = vmatpush1.bf16.msra.mxu0 %v1900_v57  ;;  %v252_v57 = vld [vmem:[%s4349_s2 + $0x658] sm:$0xff] }
  0xa2   :  { %1903 = vmatprep.subr.bf16.mxu0 %v1902_v58  ;;  %v1940_v58 = vpack.c.bf16 %v247_v55, %v245_v54  ;;  %v1942_v59 = vpack.c.bf16 %v252_v57, %v250_v56  ;;  %v290_v54 = vld [vmem:[%s4349_s2 + $0x788] sm:$0xff]  ;;  %v292_v55 = vld [vmem:[%s4349_s2 + $0x798] sm:$0xff] }
  0xa3   :  { %v1982_v57 = vpack.c.bf16 %v292_v55, %v290_v54  ;;  %v762_v54 = vld [vmem:[%s4353_s6 + $0x30] sm:$0xff]  ;;  %v763_v55 = vld [vmem:[%s4353_s6 + $0x38] sm:$0xff] }
  0xa5   :  { %1905 = vmatpush1.bf16.msra.mxu0 %v1904_v63  ;;  %v1944_v63 = vpack.c.bf16 %v251_v61, %v249_v60  ;;  %v294_v60 = vld [vmem:[%s4349_s2 + $0x7a8] sm:$0xff]  ;;  %v296_v61 = vld [vmem:[%s4349_s2 + $0x7b8] sm:$0xff] }
  0xa6   :  { %1907 = vmatprep.subr.bf16.mxu0 %v1906_v0 }
  0xa9   :  { %1909 = vmatpush1.bf16.msra.mxu0 %v1908_v4  ;;  %v1948_v4 = vpack.c.bf16 %v255_v2, %v253_v1  ;;  %v298_v1 = vld [vmem:[%s4349_s2 + $0x7c8] sm:$0xff]  ;;  %v300_v2 = vld [vmem:[%s4349_s2 + $0x7d8] sm:$0xff] }
  0xaa   :  { %1911 = vmatprep.subr.bf16.mxu0 %v1910_v5  ;;  %v1950_v5 = vpack.c.bf16 %v260_v3, %v258_v52  ;;  %v1990_v3 = vpack.c.bf16 %v300_v2, %v298_v1  ;;  %v766_v1 = vld [vmem:[%s4353_s6 + $0x50] sm:$0xff]  ;;  %v767_v2 = vld [vmem:[%s4353_s6 + $0x58] sm:$0xff] }
  0xad   :  { %1913 = vmatpush1.bf16.msra.mxu0 %v1912_v10  ;;  %v1952_v10 = vpack.c.bf16 %v259_v7, %v257_v6  ;;  %v302_v6 = vld [vmem:[%s4349_s2 + $0x7e8] sm:$0xff]  ;;  %v304_v7 = vld [vmem:[%s4349_s2 + $0x7f8] sm:$0xff] }
  0xae   :  { %1915 = vmatprep.subr.bf16.mxu0 %v1914_v11  ;;  %v1954_v11 = vpack.c.bf16 %v264_v9, %v262_v8  ;;  %v1994_v9 = vpack.c.bf16 %v304_v7, %v302_v6  ;;  %v768_v6 = vld [vmem:[%s4353_s6 + $0x60] sm:$0xff]  ;;  %v769_v7 = vld [vmem:[%s4353_s6 + $0x68] sm:$0xff] }
  0xb1   :  { %1917 = vmatpush1.bf16.msra.mxu0 %v1916_v17  ;;  %v1956_v17 = vpack.c.bf16 %v263_v13, %v261_v12  ;;  %v677_v13 = vld [vmem:[%s4351_s4 + $0xf0] sm:$0xff] }
  0xb2   :  { %1919 = vmatprep.subr.bf16.mxu0 %v1918_v18  ;;  %v1958_v18 = vpack.c.bf16 %v268_v16, %v266_v14  ;;  %v678_v14 = vld [vmem:[%s4351_s4 + $0xf8] sm:$0xff] }
  0xb3   :  { %v2026_v16 = vpack.c.bf16 %v678_v14, %v677_v13  ;;  %v771_v13 = vld [vmem:[%s4353_s6 + $0x78] sm:$0xff] }
  0xb5   :  { %1921 = vmatpush1.bf16.msra.mxu0 %v1920_v23  ;;  %v1960_v23 = vpack.c.bf16 %v267_v20, %v265_v19  ;;  %2027 = vmatprep.subr.bf16.mxu1 %v2026_v16  ;;  %v773_v20 = vld [vmem:[%s4353_s6 + $0x88] sm:$0xff] }
  0xb6   :  { %1923 = vmatprep.subr.bf16.mxu0 %v1922_v24  ;;  %v1962_v24 = vpack.c.bf16 %v272_v21, %v270_v47  ;;  %v3386_v21 = vsub.s32 0, %v2535_v35  ;;  %v872_v16 = vld [vmem:[%s4355_s8 + $0x8] sm:$0xff] }
  0xb9   :  { %1925 = vmatpush1.bf16.msra.mxu0 %v1924_v29  ;;  %v1964_v29 = vpack.c.bf16 %v271_v26, %v269_v25 }
  0xba   :  { %1927 = vmatprep.subr.bf16.mxu0 %v1926_v30  ;;  %v1966_v30 = vpack.c.bf16 %v276_v28, %v274_v27 }
  0xbd   :  { %1929 = vmatpush1.bf16.msra.mxu0 %v1928_v36  ;;  %v1968_v36 = vpack.c.bf16 %v275_v32, %v273_v31  ;;  %v757_v31 = vld [vmem:[%s4353_s6 + $0x8] sm:$0xff] }
  0xbe   :  { %1931 = vmatprep.subr.bf16.mxu0 %v1930_v38  ;;  %v277_v38 = vld [vmem:[%s4349_s2 + $0x720] sm:$0xff] }
  0xbf   :  { %v1972_v41 = vpack.c.bf16 %v279_v39, %v277_v38  ;;  %v2034_v39 = vpack.c.bf16 %v775_v34, %v774_v33  ;;  %v994_v33 = vld [vmem:[%s4357_s10 + $0xb8] sm:$0xff] }
  0xc0   :  { %v1002_v34 = vld [vmem:[%s4357_s10 + $0xf8] sm:$0xff] }
  0xc1   :  { %1933 = vmatpush1.bf16.msra.mxu0 %v1932_v15  ;;  %v1974_v15 = vpack.c.bf16 %v284_v40, %v282_v48  ;;  %v758_v48 = vld [vmem:[%s4353_s6 + $0x10] sm:$0xff]  ;;  %v759_v40 = vld [vmem:[%s4353_s6 + $0x18] sm:$0xff] }
  0xc2   :  { %1935 = vmatprep.subr.bf16.mxu0 %v1934_v44  ;;  %v281_v44 = vld [vmem:[%s4349_s2 + $0x740] sm:$0xff] }
  0xc3   :  { %v1976_v50 = vpack.c.bf16 %v283_v45, %v281_v44  ;;  %v2036_v44 = vpack.c.bf16 %v759_v40, %v758_v48  ;;  %v1010_v48 = vld [vmem:[%s4357_s10 + $0x138] sm:$0xff] }
  0xc4   :  { %568 = vmatmul.mubr.f32.vlgmr.msra.gmra.mrb[0].mxu0 %v2891_v22  ;;  %v256_v22 = vld [vmem:[%s4349_s2 + $0x678] sm:$0xff] }
  0xc5   :  { %1937 = vmatpush1.bf16.msra.mxu0 %v1936_v43  ;;  %638 = vmatprep.mubr.f32.mxu0 %v352_v51  ;;  %v1946_v0 = vpack.c.bf16 %v256_v22, %v254_v62  ;;  %v1978_v43 = vpack.c.bf16 %v288_v49, %v286_v46  ;;  %v285_v51 = vld [vmem:[%s4349_s2 + $0x760] sm:$0xff]  ;;  %v1986_v22 = vpack.c.bf16 %v296_v61, %v294_v60  ;;  %v761_v49 = vld [vmem:[%s4353_s6 + $0x28] sm:$0xff]  ;;  %v1018_v40 = vld [vmem:[%s4357_s10 + $0x178] sm:$0xff] }
  0xc6   :  { %1939 = vmatprep.subr.bf16.mxu0 %v1938_v53  ;;  %v287_v53 = vld [vmem:[%s4349_s2 + $0x770] sm:$0xff]  ;;  %v760_v46 = vld [vmem:[%s4353_s6 + $0x20] sm:$0xff]  ;;  %v765_v61 = vld [vmem:[%s4353_s6 + $0x48] sm:$0xff] }
  0xc7   :  { %v1980_v56 = vpack.c.bf16 %v287_v53, %v285_v51  ;;  %v2040_v51 = vpack.c.bf16 %v761_v49, %v760_v46  ;;  %v764_v60 = vld [vmem:[%s4353_s6 + $0x40] sm:$0xff]  ;;  %v1026_v46 = vld [vmem:[%s4357_s10 + $0x1b8] sm:$0xff] }
  0xc8   :  { %v1034_v49 = vld [vmem:[%s4357_s10 + $0x1f8] sm:$0xff] }
  0xc9   :  { %1941 = vmatpush1.bf16.msra.mxu0 %v1940_v58  ;;  %v289_v58 = vld [vmem:[%s4349_s2 + $0x780] sm:$0xff] }
  0xca   :  { %1943 = vmatprep.subr.bf16.mxu0 %v1942_v59  ;;  %v291_v59 = vld [vmem:[%s4349_s2 + $0x790] sm:$0xff] }
  0xcb   :  { %v1984_v62 = vpack.c.bf16 %v291_v59, %v289_v58  ;;  %v2044_v58 = vpack.c.bf16 %v763_v55, %v762_v54  ;;  %v1042_v54 = vld [vmem:[%s4357_s10 + $0x238] sm:$0xff] }
  0xcc   :  { %v1050_v55 = vld [vmem:[%s4357_s10 + $0x278] sm:$0xff] }
  0xcd   :  { %1945 = vmatpush1.bf16.msra.mxu0 %v1944_v63  ;;  %v293_v63 = vld [vmem:[%s4349_s2 + $0x7a0] sm:$0xff] }
  0xce   :  { %1947 = vmatprep.subr.bf16.mxu0 %v1946_v0  ;;  %v295_v0 = vld [vmem:[%s4349_s2 + $0x7b0] sm:$0xff] }
  0xcf   :  { %v1988_v52 = vpack.c.bf16 %v295_v0, %v293_v63  ;;  %v2048_v63 = vpack.c.bf16 %v765_v61, %v764_v60  ;;  %v1058_v60 = vld [vmem:[%s4357_s10 + $0x2b8] sm:$0xff] }
  0xd0   :  { %v1066_v61 = vld [vmem:[%s4357_s10 + $0x2f8] sm:$0xff] }
  0xd1   :  { %1949 = vmatpush1.bf16.msra.mxu0 %v1948_v4  ;;  %v297_v4 = vld [vmem:[%s4349_s2 + $0x7c0] sm:$0xff] }
  0xd2   :  { %1951 = vmatprep.subr.bf16.mxu0 %v1950_v5  ;;  %v299_v5 = vld [vmem:[%s4349_s2 + $0x7d0] sm:$0xff] }
  0xd3   :  { %v1992_v8 = vpack.c.bf16 %v299_v5, %v297_v4  ;;  %v2052_v4 = vpack.c.bf16 %v767_v2, %v766_v1  ;;  %v1074_v1 = vld [vmem:[%s4357_s10 + $0x338] sm:$0xff] }
  0xd4   :  { %v1082_v2 = vld [vmem:[%s4357_s10 + $0x378] sm:$0xff] }
  0xd5   :  { %1953 = vmatpush1.bf16.msra.mxu0 %v1952_v10  ;;  %v301_v10 = vld [vmem:[%s4349_s2 + $0x7e0] sm:$0xff] }
  0xd6   :  { %1955 = vmatprep.subr.bf16.mxu0 %v1954_v11  ;;  %v303_v11 = vld [vmem:[%s4349_s2 + $0x7f0] sm:$0xff] }
  0xd7   :  { %v1996_v12 = vpack.c.bf16 %v303_v11, %v301_v10  ;;  %v2056_v10 = vpack.c.bf16 %v769_v7, %v768_v6  ;;  %v1090_v6 = vld [vmem:[%s4357_s10 + $0x3b8] sm:$0xff] }
  0xd8   :  { %v1098_v7 = vld [vmem:[%s4357_s10 + $0x3f8] sm:$0xff] }
  0xd9   :  { %1957 = vmatpush1.bf16.msra.mxu0 %v1956_v17  ;;  %v661_v17 = vld [vmem:[%s4351_s4 + $0x70] sm:$0xff] }
  0xda   :  { %1959 = vmatprep.subr.bf16.mxu0 %v1958_v18  ;;  %v662_v18 = vld [vmem:[%s4351_s4 + $0x78] sm:$0xff] }
  0xdb   :  { %v2028_v19 = vpack.c.bf16 %v662_v18, %v661_v17  ;;  %v874_v17 = vld [vmem:[%s4355_s8 + $0x18] sm:$0x3]  ;;  %v871_v18 = vld [vmem:[%s4355_s8] sm:$0xff] }
  0xdd   :  { %1961 = vmatpush1.bf16.msra.mxu0 %v1960_v23  ;;  %2029 = vmatpush3.bf16.msra.mxu1 %v2028_v19  ;;  %v305_v23 = vld [vmem:[%s4350_s3] sm:$0x3]  ;;  %v2062_v19 = vpack.c.bf16 %v874_v17, %v872_v16  ;;  %v1113_v17 = vld [vmem:[%s4357_s10 + $0x470] sm:$0xff] }
  0xde   :  { %1963 = vmatprep.subr.bf16.mxu0 %v1962_v24  ;;  %v3392_v24 = vsub.s32 1, %v2535_v35  ;;  %v310_v25 = vrot.slane %v305_v23, %v3386_v21 }
  0xe0   :  { %v314_v26 = vrot.slane %v305_v23, %v3392_v24  ;;  %v972_v23 = vld [vmem:[%s4357_s10 + $0x8] sm:$0xff] }
  0xe1   :  { %1965 = vmatpush1.bf16.msra.mxu0 %v1964_v29 }
  0xe2   :  { %1967 = vmatprep.subr.bf16.mxu0 %v1966_v30  ;;  %v756_v30 = vld [vmem:[%s4353_s6] sm:$0xff] }
  0xe5   :  { %1969 = vmatpush1.bf16.msra.mxu0 %v1968_v36 }
  0xe6   :  { %1971 = vmatprep.subr.bf16.mxu0 %v1970_v37  ;;  %v2032_v37 = vpack.c.bf16 %v757_v31, %v756_v30  ;;  %v977_v30 = vld [vmem:[%s4357_s10 + $0x30] sm:$0xff] }
  0xe7   :  { %v985_v31 = vld [vmem:[%s4357_s10 + $0x70] sm:$0xff] }
  0xe9   :  { %1973 = vmatpush1.bf16.msra.mxu0 %v1972_v41  ;;  %v776_v41 = vld [vmem:[%s4353_s6 + $0xa0] sm:$0xff] }
  0xea   :  { %1975 = vmatprep.subr.bf16.mxu0 %v1974_v15  ;;  %v777_v15 = vld [vmem:[%s4353_s6 + $0xa8] sm:$0xff] }
  0xeb   :  { %v2038_v45 = vpack.c.bf16 %v777_v15, %v776_v41  ;;  %v1009_v41 = vld [vmem:[%s4357_s10 + $0x130] sm:$0xff]  ;;  %v2268_v15 = vpack.c.bf16 %v1018_v40, %v1010_v48  ;;  %v1178_v48 = vld [vmem:[%s4357_s10 + $0x678] sm:$0xff] }
  0xec   :  { %v1169_v40 = vld [vmem:[%s4357_s10 + $0x630] sm:$0xff] }
  0xed   :  { %1977 = vmatpush1.bf16.msra.mxu0 %v1976_v50  ;;  %v778_v50 = vld [vmem:[%s4353_s6 + $0xb0] sm:$0xff] }
  0xee   :  { %1979 = vmatprep.subr.bf16.mxu0 %v1978_v43  ;;  %v779_v43 = vld [vmem:[%s4353_s6 + $0xb8] sm:$0xff] }
  0xef   :  { %v2042_v53 = vpack.c.bf16 %v779_v43, %v778_v50  ;;  %v1025_v50 = vld [vmem:[%s4357_s10 + $0x1b0] sm:$0xff]  ;;  %v2272_v43 = vpack.c.bf16 %v1034_v49, %v1026_v46  ;;  %v1194_v46 = vld [vmem:[%s4357_s10 + $0x6f8] sm:$0xff] }
  0xf0   :  { %v1185_v49 = vld [vmem:[%s4357_s10 + $0x6b0] sm:$0xff] }
  0xf1   :  { %1981 = vmatpush1.bf16.msra.mxu0 %v1980_v56  ;;  %v780_v56 = vld [vmem:[%s4353_s6 + $0xc0] sm:$0xff] }
  0xf2   :  { %1983 = vmatprep.subr.bf16.mxu0 %v1982_v57  ;;  %v781_v57 = vld [vmem:[%s4353_s6 + $0xc8] sm:$0xff] }
  0xf3   :  { %v2046_v59 = vpack.c.bf16 %v781_v57, %v780_v56  ;;  %v1041_v56 = vld [vmem:[%s4357_s10 + $0x230] sm:$0xff]  ;;  %v2276_v57 = vpack.c.bf16 %v1050_v55, %v1042_v54  ;;  %v1210_v54 = vld [vmem:[%s4357_s10 + $0x778] sm:$0xff] }
  0xf5   :  { %1985 = vmatpush1.bf16.msra.mxu0 %v1984_v62  ;;  %v782_v62 = vld [vmem:[%s4353_s6 + $0xd0] sm:$0xff] }
  0xf6   :  { %1987 = vmatprep.subr.bf16.mxu0 %v1986_v22  ;;  %v783_v22 = vld [vmem:[%s4353_s6 + $0xd8] sm:$0xff] }
  0xf7   :  { %v2050_v0 = vpack.c.bf16 %v783_v22, %v782_v62  ;;  %v1057_v62 = vld [vmem:[%s4357_s10 + $0x2b0] sm:$0xff]  ;;  %v2280_v22 = vpack.c.bf16 %v1066_v61, %v1058_v60 }
  0xf9   :  { %1989 = vmatpush1.bf16.msra.mxu0 %v1988_v52  ;;  %v784_v52 = vld [vmem:[%s4353_s6 + $0xe0] sm:$0xff] }
  0xfa   :  { %1991 = vmatprep.subr.bf16.mxu0 %v1990_v3  ;;  %v785_v3 = vld [vmem:[%s4353_s6 + $0xe8] sm:$0xff] }
  0xfb   :  { %v2054_v5 = vpack.c.bf16 %v785_v3, %v784_v52  ;;  %v1073_v52 = vld [vmem:[%s4357_s10 + $0x330] sm:$0xff]  ;;  %v2284_v3 = vpack.c.bf16 %v1082_v2, %v1074_v1 }
  0xfd   :  { %1993 = vmatpush1.bf16.msra.mxu0 %v1992_v8  ;;  %v786_v8 = vld [vmem:[%s4353_s6 + $0xf0] sm:$0xff] }
  0xfe   :  { %1995 = vmatprep.subr.bf16.mxu0 %v1994_v9  ;;  %v787_v9 = vld [vmem:[%s4353_s6 + $0xf8] sm:$0xff] }
  0xff   :  { %v2058_v11 = vpack.c.bf16 %v787_v9, %v786_v8  ;;  %v1089_v8 = vld [vmem:[%s4357_s10 + $0x3b0] sm:$0xff]  ;;  %v2288_v9 = vpack.c.bf16 %v1098_v7, %v1090_v6  ;;  %v988_v6 = vld [vmem:[%s4357_s10 + $0x88] sm:$0xff] }
 0x100   :  { %v996_v7 = vld [vmem:[%s4357_s10 + $0xc8] sm:$0xff] }
 0x101   :  { %1997 = vmatpush1.bf16.msra.mxu0 %v1996_v12  ;;  %v770_v12 = vld [vmem:[%s4353_s6 + $0x70] sm:$0xff] }
 0x102   :  { %v2060_v14 = vpack.c.bf16 %v771_v13, %v770_v12  ;;  %v1106_v12 = vld [vmem:[%s4357_s10 + $0x438] sm:$0xff] }
 0x103   :  { %v1114_v13 = vld [vmem:[%s4357_s10 + $0x478] sm:$0xff] }
 0x104   :  { %639 = vmatmul.mubr.f32.vlgmr.msra.gmra.mrb[0].mxu0 %v3175_v42  ;;  %v772_v42 = vld [vmem:[%s4353_s6 + $0x80] sm:$0xff]  ;;  %v2292_v16 = vpack.c.bf16 %v1114_v13, %v1106_v12 }
 0x105   :  { %v2030_v47 = vpack.c.bf16 %v773_v20, %v772_v42  ;;  %v873_v42 = vld [vmem:[%s4355_s8 + $0x10] sm:$0x3]  ;;  %v987_v12 = vld [vmem:[%s4357_s10 + $0x80] sm:$0xff] }
 0x106   :  { %v2065_v20 = vpack.c.bf16 %v873_v42, %v871_v18  ;;  %v1130_v42 = vld [vmem:[%s4357_s10 + $0x4f8] sm:$0xff]  ;;  %v995_v13 = vld [vmem:[%s4357_s10 + $0xc0] sm:$0xff] }
 0x107   :  { %2031 = vmatprep.subr.bf16.mxu1 %v2030_v47  ;;  %v2390_v47 = vmov 0.0  }
 0x1d7   :  { %v640_v27 = vpop.f32.mrb[0].mxu0 }
 0x1d8   :  { %v3396_v28 = vadd.f32 %v640_v27, %v310_v25  ;;  %v642_v29 = vpop.f32.mrb[1].mxu0  ;;  %v980_v25 = vld [vmem:[%s4357_s10 + $0x48] sm:$0xff]  ;;  %v978_v27 = vld [vmem:[%s4357_s10 + $0x38] sm:$0xff] }
 0x1d9   :  { %v2325_v32 = vadd.f32 %v642_v29, %v314_v26  ;;  %v2068_v26 = vpack.c.bf16 %v980_v25, %v972_v23  ;;  %v1129_v23 = vld [vmem:[%s4357_s10 + $0x4f0] sm:$0xff] }
 0x1da   :  { %v645_v38 = vmax.f32 %v3396_v28, 0.0  ;;  %v986_v28 = vld [vmem:[%s4357_s10 + $0x78] sm:$0xff] }
 0x1db   :  { %v646_v36 = vmax.f32 %v2325_v32, 0.0  ;;  %v2260_v29 = vpack.c.bf16 %v986_v28, %v978_v27  ;;  %v2262_v32 = vpack.c.bf16 %v985_v31, %v977_v30  ;;  %v1146_v27 = vld [vmem:[%s4357_s10 + $0x578] sm:$0xff]  ;;  %v1137_v28 = vld [vmem:[%s4357_s10 + $0x530] sm:$0xff] }
 0x1dc   :  { %v1145_v30 = vld [vmem:[%s4357_s10 + $0x570] sm:$0xff] }
 0x1dd   :  { %750 = vmatprep.mubr.f32.mxu1 %v646_v36  ;;  %2261 = vmatprep.subr.bf16.mxu0 %v2260_v29  ;;  %v2302_v31 = vpack.c.bf16 %v1145_v30, %v1137_v28  ;;  %v1036_v28 = vld [vmem:[%s4357_s10 + $0x208] sm:$0xff] }
 0x1de   :  { %751 = vmatmul.mubr.f32.vlgmr.msra.gmra.mrb[0].mxu1 %v645_v38  ;;  %2263 = vmatpush1.bf16.msra.mxu0 %v2262_v32  ;;  %v1154_v32 = vld [vmem:[%s4357_s10 + $0x5b8] sm:$0xff] }
 0x1df   :  { %2033 = vmatpush3.bf16.msra.mxu1 %v2032_v37  ;;  %859 = vmatprep.mubr.f32.mxu1 %v646_v36  ;;  %v993_v36 = vld [vmem:[%s4357_s10 + $0xb0] sm:$0xff]  ;;  %v2264_v37 = vpack.c.bf16 %v1002_v34, %v994_v33  ;;  %v1162_v33 = vld [vmem:[%s4357_s10 + $0x5f8] sm:$0xff] }
 0x1e0   :  { %2035 = vmatprep.subr.bf16.mxu1 %v2034_v39  ;;  %v1153_v34 = vld [vmem:[%s4357_s10 + $0x5b0] sm:$0xff] }
 0x1e1   :  { %2265 = vmatprep.subr.bf16.mxu0 %v2264_v37  ;;  %v1161_v37 = vld [vmem:[%s4357_s10 + $0x5f0] sm:$0xff] }
 0x1e3   :  { %2037 = vmatpush3.bf16.msra.mxu1 %v2036_v44  ;;  %v1017_v44 = vld [vmem:[%s4357_s10 + $0x170] sm:$0xff] }
 0x1e4   :  { %2039 = vmatprep.subr.bf16.mxu1 %v2038_v45  ;;  %v2270_v45 = vpack.c.bf16 %v1017_v44, %v1009_v41 }
 0x1e7   :  { %2041 = vmatpush3.bf16.msra.mxu1 %v2040_v51  ;;  %v1033_v51 = vld [vmem:[%s4357_s10 + $0x1f0] sm:$0xff] }
 0x1e8   :  { %2043 = vmatprep.subr.bf16.mxu1 %v2042_v53  ;;  %v2274_v53 = vpack.c.bf16 %v1033_v51, %v1025_v50 }
 0x1eb   :  { %2045 = vmatpush3.bf16.msra.mxu1 %v2044_v58  ;;  %v1049_v58 = vld [vmem:[%s4357_s10 + $0x270] sm:$0xff] }
 0x1ec   :  { %2047 = vmatprep.subr.bf16.mxu1 %v2046_v59  ;;  %v2278_v59 = vpack.c.bf16 %v1049_v58, %v1041_v56 }
 0x1ef   :  { %2049 = vmatpush3.bf16.msra.mxu1 %v2048_v63  ;;  %v1065_v63 = vld [vmem:[%s4357_s10 + $0x2f0] sm:$0xff] }
 0x1f0   :  { %2051 = vmatprep.subr.bf16.mxu1 %v2050_v0  ;;  %v2282_v0 = vpack.c.bf16 %v1065_v63, %v1057_v62  ;;  %v1664_v62 = vld [vmem:[%s4354_s7] ss:$0 sm:$0xff] }
 0x1f3   :  { %2053 = vmatpush3.bf16.msra.mxu1 %v2052_v4  ;;  %v1081_v4 = vld [vmem:[%s4357_s10 + $0x370] sm:$0xff] }
 0x1f4   :  { %2055 = vmatprep.subr.bf16.mxu1 %v2054_v5  ;;  %v2286_v5 = vpack.c.bf16 %v1081_v4, %v1073_v52  ;;  %v868_v52 = vld [vmem:[%s4348_s1] sm:$0x3] }
 0x1f5   :  { %v979_v4 = vld [vmem:[%s4357_s10 + $0x40] sm:$0xff] }
 0x1f7   :  { %2057 = vmatpush3.bf16.msra.mxu1 %v2056_v10  ;;  %v1097_v10 = vld [vmem:[%s4357_s10 + $0x3f0] sm:$0xff] }
 0x1f8   :  { %2059 = vmatprep.subr.bf16.mxu1 %v2058_v11  ;;  %v2290_v11 = vpack.c.bf16 %v1097_v10, %v1089_v8 }
 0x1fb   :  { %2061 = vmatpush3.bf16.msra.mxu1 %v2060_v14  ;;  %v1105_v14 = vld [vmem:[%s4357_s10 + $0x430] sm:$0xff] }
 0x1fc   :  { %2064 = vmatprep.subr.msk.bf16.mxu1 %vm2063_vm2, %v2062_v19  ;;  %v2294_v18 = vpack.c.bf16 %v1113_v17, %v1105_v14  ;;  %v1122_v19 = vld [vmem:[%s4357_s10 + $0x4b8] sm:$0xff]  ;;  %v1004_v14 = vld [vmem:[%s4357_s10 + $0x108] sm:$0xff]  ;;  %v2074_v17 = vpack.c.bf16 %v995_v13, %v987_v12  ;;  %v1155_v12 = vld [vmem:[%s4357_s10 + $0x5c0] sm:$0xff] }
 0x1fd   :  { %v1164_v13 = vld [vmem:[%s4357_s10 + $0x608] sm:$0xff] }
 0x1fe   :  { %860 = vmatmul.mubr.f32.vlgmr.msra.gmra.mrb[2].mxu1 %v645_v38  ;;  %v1001_v38 = vld [vmem:[%s4357_s10 + $0xf0] sm:$0xff] }
 0x1ff   :  { %962 = vmatprep.mubr.f32.mxu1 %v2390_v47  ;;  %2067 = vmatpush1.bf16.msk.msra.mxu1 %vm2063_vm2, %v2065_v20  ;;  %v2266_v39 = vpack.c.bf16 %v1001_v38, %v993_v36  ;;  %v1121_v20 = vld [vmem:[%s4357_s10 + $0x4b0] sm:$0xff]  ;;  %v2296_v47 = vpack.c.bf16 %v1130_v42, %v1122_v19  ;;  %v2304_v36 = vpack.c.bf16 %v1162_v33, %v1154_v32  ;;  %v1003_v19 = vld [vmem:[%s4357_s10 + $0x100] sm:$0xff] }
 0x200   :  { %2069 = vmatprep.subr.bf16.mxu1 %v2068_v26  ;;  %v2298_v25 = vpack.c.bf16 %v1129_v23, %v1121_v20  ;;  %v1138_v26 = vld [vmem:[%s4357_s10 + $0x538] sm:$0xff]  ;;  %v2306_v38 = vpack.c.bf16 %v1161_v37, %v1153_v34  ;;  %v1011_v42 = vld [vmem:[%s4357_s10 + $0x140] sm:$0xff]  ;;  %v1020_v20 = vld [vmem:[%s4357_s10 + $0x188] sm:$0xff] }
 0x201   :  { %2267 = vmatpush1.bf16.msra.mxu0 %v2266_v39  ;;  %v2300_v29 = vpack.c.bf16 %v1146_v27, %v1138_v26  ;;  %v1170_v39 = vld [vmem:[%s4357_s10 + $0x638] sm:$0xff]  ;;  %v2078_v23 = vpack.c.bf16 %v1011_v42, %v1003_v19  ;;  %v1019_v26 = vld [vmem:[%s4357_s10 + $0x180] sm:$0xff]  ;;  %v1052_v34 = vld [vmem:[%s4357_s10 + $0x288] sm:$0xff] }
 0x202   :  { %2269 = vmatprep.subr.bf16.mxu0 %v2268_v15  ;;  %v2308_v41 = vpack.c.bf16 %v1178_v48, %v1170_v39  ;;  %v1177_v15 = vld [vmem:[%s4357_s10 + $0x670] sm:$0xff]  ;;  %v1027_v27 = vld [vmem:[%s4357_s10 + $0x1c0] sm:$0xff]  ;;  %v1180_v42 = vld [vmem:[%s4357_s10 + $0x688] sm:$0xff] }
 0x203   :  { %v2310_v44 = vpack.c.bf16 %v1177_v15, %v1169_v40  ;;  %v2082_v30 = vpack.c.bf16 %v1027_v27, %v1019_v26  ;;  %v1035_v32 = vld [vmem:[%s4357_s10 + $0x200] sm:$0xff]  ;;  %v1068_v40 = vld [vmem:[%s4357_s10 + $0x308] sm:$0xff] }
 0x204   :  { %v1043_v33 = vld [vmem:[%s4357_s10 + $0x240] sm:$0xff]  ;;  %v1196_v27 = vld [vmem:[%s4357_s10 + $0x708] sm:$0xff] }
 0x205   :  { %2271 = vmatpush1.bf16.msra.mxu0 %v2270_v45  ;;  %v1186_v45 = vld [vmem:[%s4357_s10 + $0x6b8] sm:$0xff]  ;;  %v2086_v37 = vpack.c.bf16 %v1043_v33, %v1035_v32  ;;  %v1051_v39 = vld [vmem:[%s4357_s10 + $0x280] sm:$0xff] }
 0x206   :  { %2273 = vmatprep.subr.bf16.mxu0 %v2272_v43  ;;  %v2312_v50 = vpack.c.bf16 %v1194_v46, %v1186_v45  ;;  %v1193_v43 = vld [vmem:[%s4357_s10 + $0x6f0] sm:$0xff]  ;;  %v1059_v48 = vld [vmem:[%s4357_s10 + $0x2c0] sm:$0xff] }
 0x207   :  { %v2314_v51 = vpack.c.bf16 %v1193_v43, %v1185_v49  ;;  %v2090_v15 = vpack.c.bf16 %v1059_v48, %v1051_v39  ;;  %v1067_v45 = vld [vmem:[%s4357_s10 + $0x300] sm:$0xff]  ;;  %v1084_v49 = vld [vmem:[%s4357_s10 + $0x388] sm:$0xff] }
 0x208   :  { %v1075_v46 = vld [vmem:[%s4357_s10 + $0x340] sm:$0xff]  ;;  %v1220_v39 = vld [vmem:[%s4357_s10 + $0x7c8] sm:$0xff] }
 0x209   :  { %2275 = vmatpush1.bf16.msra.mxu0 %v2274_v53  ;;  %v1202_v53 = vld [vmem:[%s4357_s10 + $0x738] sm:$0xff]  ;;  %v2094_v43 = vpack.c.bf16 %v1075_v46, %v1067_v45  ;;  %v1171_v19 = vld [vmem:[%s4357_s10 + $0x640] sm:$0xff]  ;;  %v1217_v46 = vld [vmem:[%s4357_s10 + $0x7b0] sm:$0xff] }
 0x20a   :  { %2277 = vmatprep.subr.bf16.mxu0 %v2276_v57  ;;  %v2316_v55 = vpack.c.bf16 %v1210_v54, %v1202_v53  ;;  %v1663_v57 = vld [vmem:[%s4352_s5] ss:$0 sm:$0xff]  ;;  %v1226_v45 = vld [vmem:[%s4357_s10 + $0x7f8] sm:$0xff] }
 0x20b   :  { %v1083_v53 = vld [vmem:[%s4357_s10 + $0x380] sm:$0xff] }
 0x20c   :  { %v1091_v54 = vld [vmem:[%s4357_s10 + $0x3c0] sm:$0xff] }
 0x20d   :  { %2279 = vmatpush1.bf16.msra.mxu0 %v2278_v59  ;;  %v1187_v26 = vld [vmem:[%s4357_s10 + $0x6c0] sm:$0xff] }
 0x20e   :  { %2281 = vmatprep.subr.bf16.mxu0 %v2280_v22  ;;  %v1203_v32 = vld [vmem:[%s4357_s10 + $0x740] sm:$0xff] }
 0x211   :  { %2283 = vmatpush1.bf16.msra.mxu0 %v2282_v0 }
 0x212   :  { %2285 = vmatprep.subr.bf16.mxu0 %v2284_v3  ;;  %v971_v3 = vld [vmem:[%s4357_s10] sm:$0xff] }
 0x215   :  { %2287 = vmatpush1.bf16.msra.mxu0 %v2286_v5 }
 0x216   :  { %2289 = vmatprep.subr.bf16.mxu0 %v2288_v9  ;;  %v2070_v9 = vpack.c.bf16 %v979_v4, %v971_v3 }
 0x219   :  { %2291 = vmatpush1.bf16.msra.mxu0 %v2290_v11  ;;  %v2072_v11 = vpack.c.bf16 %v996_v7, %v988_v6  ;;  %v1139_v6 = vld [vmem:[%s4357_s10 + $0x540] sm:$0xff]  ;;  %v1148_v7 = vld [vmem:[%s4357_s10 + $0x588] sm:$0xff] }
 0x21a   :  { %2293 = vmatprep.subr.bf16.mxu0 %v2292_v16  ;;  %v1012_v16 = vld [vmem:[%s4357_s10 + $0x148] sm:$0xff] }
 0x21d   :  { %2295 = vmatpush1.bf16.msra.mxu0 %v2294_v18  ;;  %v2076_v18 = vpack.c.bf16 %v1012_v16, %v1004_v14  ;;  %v1172_v14 = vld [vmem:[%s4357_s10 + $0x648] sm:$0xff] }
 0x21e   :  { %2297 = vmatprep.subr.bf16.mxu0 %v2296_v47  ;;  %v1028_v47 = vld [vmem:[%s4357_s10 + $0x1c8] sm:$0xff] }
 0x221   :  { %2299 = vmatpush1.bf16.msra.mxu0 %v2298_v25  ;;  %v2080_v25 = vpack.c.bf16 %v1028_v47, %v1020_v20  ;;  %v1188_v20 = vld [vmem:[%s4357_s10 + $0x6c8] sm:$0xff] }
 0x222   :  { %2301 = vmatprep.subr.bf16.mxu0 %v2300_v29  ;;  %v1044_v29 = vld [vmem:[%s4357_s10 + $0x248] sm:$0xff] }
 0x225   :  { %2303 = vmatpush1.bf16.msra.mxu0 %v2302_v31  ;;  %v2084_v31 = vpack.c.bf16 %v1044_v29, %v1036_v28  ;;  %v1204_v28 = vld [vmem:[%s4357_s10 + $0x748] sm:$0xff] }
 0x226   :  { %2305 = vmatprep.subr.bf16.mxu0 %v2304_v36  ;;  %v1060_v36 = vld [vmem:[%s4357_s10 + $0x2c8] sm:$0xff] }
 0x229   :  { %2307 = vmatpush1.bf16.msra.mxu0 %v2306_v38  ;;  %v2088_v38 = vpack.c.bf16 %v1060_v36, %v1052_v34  ;;  %v1201_v34 = vld [vmem:[%s4357_s10 + $0x730] sm:$0xff] }
 0x22a   :  { %2309 = vmatprep.subr.bf16.mxu0 %v2308_v41  ;;  %v1076_v41 = vld [vmem:[%s4357_s10 + $0x348] sm:$0xff]  ;;  %v1209_v36 = vld [vmem:[%s4357_s10 + $0x770] sm:$0xff] }
 0x22d   :  { %2311 = vmatpush1.bf16.msra.mxu0 %v2310_v44  ;;  %v2092_v44 = vpack.c.bf16 %v1076_v41, %v1068_v40  ;;  %v1211_v40 = vld [vmem:[%s4357_s10 + $0x780] sm:$0xff] }
 0x22e   :  { %2313 = vmatprep.subr.bf16.mxu0 %v2312_v50  ;;  %v1092_v50 = vld [vmem:[%s4357_s10 + $0x3c8] sm:$0xff]  ;;  %v1219_v41 = vld [vmem:[%s4357_s10 + $0x7c0] sm:$0xff] }
 0x231   :  { %2315 = vmatpush1.bf16.msra.mxu0 %v2314_v51  ;;  %v2096_v51 = vpack.c.bf16 %v1092_v50, %v1084_v49  ;;  %v1225_v49 = vld [vmem:[%s4357_s10 + $0x7f0] sm:$0xff] }
 0x232   :  { %2317 = vmatprep.subr.bf16.mxu0 %v2316_v55  ;;  %v1100_v55 = vld [vmem:[%s4357_s10 + $0x408] sm:$0xff] }
 0x2b1   :  { %v1704_v56 = vpop.f32.mrb[0].mxu1 }
 0x2b2   :  { %v1705_v58 = vpop.f32.mrb[1].mxu1 }
 0x2b3   :  { %v1706_v59 = vadd.f32 %v1705_v58, %v1704_v56  ;;  %v1108_v56 = vld [vmem:[%s4357_s10 + $0x448] sm:$0xff] }
 0x2b4   :  { %v2100_v58 = vpack.c.bf16 %v1108_v56, %v1100_v55  ;;  %v875_v55 = vld [vmem:[%s4356_s9] sm:$0x3] }
 0x2b5   :  { %v753_v60 = vadd.f32 %v1706_v59, %v1663_v57  ;;  %v2098_v57 = vpack.c.bf16 %v1091_v54, %v1083_v53  ;;  %v1099_v59 = vld [vmem:[%s4357_s10 + $0x400] sm:$0xff]  ;;  %v982_v53 = vld [vmem:[%s4357_s10 + $0x58] sm:$0xff]  ;;  %v880_v56 = vrot.slane %v875_v55, %v3386_v21 }
 0x2b7   :  { %1562 = vst.msk [vmem:[#allocation2] sm:$0x3] %vm1561_vm3, %v753_v60 }
 0x2d1   :  { %v1739_v61 = vpop.f32.mrb[2].mxu1 }
 0x2d2   :  { %v1740_v22 = vpop.f32.mrb[3].mxu1 }
 0x2d3   :  { %v1741_v63 = vadd.f32 %v1740_v22, %v1739_v61  ;;  %v1116_v61 = vld [vmem:[%s4357_s10 + $0x488] sm:$0xff] }
 0x2d5   :  { %v862_v0 = vadd.f32 %v1741_v63, %v1664_v62  ;;  %v1124_v62 = vld [vmem:[%s4357_s10 + $0x4c8] sm:$0xff] }
 0x2d6   :  { %v2104_v63 = vpack.c.bf16 %v1124_v62, %v1116_v61  ;;  %v973_v61 = vld [vmem:[%s4357_s10 + $0x10] sm:$0xff] }
 0x2d7   :  { %v865_v1 = vmul.f32 0.5, %v862_v0  ;;  %1563 = vst.msk [vmem:[#allocation4] sm:$0x3] %vm1561_vm3, %v862_v0  ;;  %v1115_v0 = vld [vmem:[%s4357_s10 + $0x480] sm:$0xff]  ;;  %v981_v62 = vld [vmem:[%s4357_s10 + $0x50] sm:$0xff] }
 0x2d9   :  { %v866_v2 = vmul.f32 1.442695, %v865_v1  ;;  %v1123_v1 = vld [vmem:[%s4357_s10 + $0x4c0] sm:$0xff] }
 0x2da   :  { %v2106_v3 = vpack.c.bf16 %v1123_v1, %v1115_v0  ;;  %v998_v0 = vld [vmem:[%s4357_s10 + $0xd8] sm:$0xff] }
 0x2db   :  { %2338 = vpow2.f32 %v866_v2  ;;  %v1132_v2 = vld [vmem:[%s4357_s10 + $0x508] sm:$0xff] }
 0x2e5   :  { %v2339_v5 = vpop.eup %2338 }
 0x2e6   :  { %v869_v8 = vmul.f32 %v2339_v5, %v868_v52  ;;  %v1140_v52 = vld [vmem:[%s4357_s10 + $0x548] sm:$0xff]  ;;  %v1131_v5 = vld [vmem:[%s4357_s10 + $0x500] sm:$0xff] }
 0x2e7   :  { %v2108_v4 = vpack.c.bf16 %v1140_v52, %v1132_v2  ;;  %v2134_v2 = vpack.c.bf16 %v981_v62, %v973_v61 }
 0x2e8   :  { %v870_v10 = vadd.f32 %v869_v8, %v753_v60  ;;  %v1107_v60 = vld [vmem:[%s4357_s10 + $0x440] sm:$0xff]  ;;  %v1156_v8 = vld [vmem:[%s4357_s10 + $0x5c8] sm:$0xff] }
 0x2e9   :  { %v2102_v22 = vpack.c.bf16 %v1107_v60, %v1099_v59 }
 0x2ea   :  { %1667 = vmatmul.mubr.msk.f32.vlgmr.msra.gmra.mrb[4].mxu1 %vm887_vm4, %v870_v10  ;;  %v2112_v10 = vpack.c.bf16 %v1156_v8, %v1148_v7  ;;  %v1014_v7 = vld [vmem:[%s4357_s10 + $0x158] sm:$0xff] }
 0x2eb   :  { %2071 = vmatpush1.bf16.msra.mxu1 %v2070_v9  ;;  %v2110_v9 = vpack.c.bf16 %v1139_v6, %v1131_v5  ;;  %v997_v5 = vld [vmem:[%s4357_s10 + $0xd0] sm:$0xff]  ;;  %v1006_v6 = vld [vmem:[%s4357_s10 + $0x118] sm:$0xff] }
 0x2ec   :  { %2073 = vmatprep.subr.bf16.mxu1 %v2072_v11  ;;  %v1147_v11 = vld [vmem:[%s4357_s10 + $0x580] sm:$0xff] }
 0x2ed   :  { %v2114_v16 = vpack.c.bf16 %v1155_v12, %v1147_v11  ;;  %v1013_v11 = vld [vmem:[%s4357_s10 + $0x150] sm:$0xff]  ;;  %v1022_v12 = vld [vmem:[%s4357_s10 + $0x198] sm:$0xff] }
 0x2ef   :  { %2075 = vmatpush1.bf16.msra.mxu1 %v2074_v17  ;;  %v2116_v17 = vpack.c.bf16 %v1172_v14, %v1164_v13  ;;  %v1030_v13 = vld [vmem:[%s4357_s10 + $0x1d8] sm:$0xff] }
 0x2f0   :  { %2077 = vmatprep.subr.bf16.mxu1 %v2076_v18  ;;  %v1163_v18 = vld [vmem:[%s4357_s10 + $0x600] sm:$0xff] }
 0x2f1   :  { %v2118_v47 = vpack.c.bf16 %v1171_v19, %v1163_v18  ;;  %v1029_v18 = vld [vmem:[%s4357_s10 + $0x1d0] sm:$0xff]  ;;  %v1038_v19 = vld [vmem:[%s4357_s10 + $0x218] sm:$0xff] }
 0x2f3   :  { %2079 = vmatpush1.bf16.msra.mxu1 %v2078_v23  ;;  %v2120_v23 = vpack.c.bf16 %v1188_v20, %v1180_v42  ;;  %v1046_v42 = vld [vmem:[%s4357_s10 + $0x258] sm:$0xff] }
 0x2f4   :  { %2081 = vmatprep.subr.bf16.mxu1 %v2080_v25  ;;  %v1179_v25 = vld [vmem:[%s4357_s10 + $0x680] sm:$0xff] }
 0x2f5   :  { %v2122_v29 = vpack.c.bf16 %v1187_v26, %v1179_v25  ;;  %v1045_v25 = vld [vmem:[%s4357_s10 + $0x250] sm:$0xff]  ;;  %v1054_v26 = vld [vmem:[%s4357_s10 + $0x298] sm:$0xff] }
 0x2f7   :  { %2083 = vmatpush1.bf16.msra.mxu1 %v2082_v30  ;;  %v2124_v30 = vpack.c.bf16 %v1204_v28, %v1196_v27  ;;  %v1062_v27 = vld [vmem:[%s4357_s10 + $0x2d8] sm:$0xff] }
 0x2f8   :  { %2085 = vmatprep.subr.bf16.mxu1 %v2084_v31  ;;  %v1195_v31 = vld [vmem:[%s4357_s10 + $0x700] sm:$0xff] }
 0x2f9   :  { %v2126_v33 = vpack.c.bf16 %v1203_v32, %v1195_v31  ;;  %v1061_v31 = vld [vmem:[%s4357_s10 + $0x2d0] sm:$0xff]  ;;  %v1070_v32 = vld [vmem:[%s4357_s10 + $0x318] sm:$0xff] }
 0x2fb   :  { %2087 = vmatpush1.bf16.msra.mxu1 %v2086_v37  ;;  %v2318_v37 = vpack.c.bf16 %v1209_v36, %v1201_v34 }
 0x2fc   :  { %2089 = vmatprep.subr.bf16.mxu1 %v2088_v38  ;;  %v1212_v38 = vld [vmem:[%s4357_s10 + $0x788] sm:$0xff] }
 0x2fd   :  { %2319 = vmatpush1.bf16.msra.mxu0 %v2318_v37  ;;  %v2128_v48 = vpack.c.bf16 %v1220_v39, %v1212_v38  ;;  %v1069_v37 = vld [vmem:[%s4357_s10 + $0x310] sm:$0xff]  ;;  %v1086_v39 = vld [vmem:[%s4357_s10 + $0x398] sm:$0xff] }
 0x2fe   :  { %v1077_v38 = vld [vmem:[%s4357_s10 + $0x350] sm:$0xff] }
 0x2ff   :  { %2091 = vmatpush1.bf16.msra.mxu1 %v2090_v15  ;;  %v1218_v15 = vld [vmem:[%s4357_s10 + $0x7b8] sm:$0xff] }
 0x300   :  { %2093 = vmatprep.subr.bf16.mxu1 %v2092_v44  ;;  %v2130_v44 = vpack.c.bf16 %v1219_v41, %v1211_v40  ;;  %v2320_v50 = vpack.c.bf16 %v1226_v45, %v1218_v15  ;;  %v2158_v40 = vpack.c.bf16 %v1077_v38, %v1069_v37  ;;  %v1085_v15 = vld [vmem:[%s4357_s10 + $0x390] sm:$0xff]  ;;  %v1102_v45 = vld [vmem:[%s4357_s10 + $0x418] sm:$0xff]  ;;  %v975_v38 = vld [vmem:[%s4357_s10 + $0x20] sm:$0xff] }
 0x302   :  { %2321 = vmatprep.subr.bf16.mxu0 %v2320_v50 }
 0x303   :  { %2095 = vmatpush1.bf16.msra.mxu1 %v2094_v43  ;;  %v2322_v43 = vpack.c.bf16 %v1225_v49, %v1217_v46  ;;  %v1110_v46 = vld [vmem:[%s4357_s10 + $0x458] sm:$0xff] }
 0x304   :  { %2097 = vmatprep.subr.bf16.mxu1 %v2096_v51  ;;  %v974_v51 = vld [vmem:[%s4357_s10 + $0x18] sm:$0xff]  ;;  %v2164_v50 = vpack.c.bf16 %v1110_v46, %v1102_v45  ;;  %v999_v45 = vld [vmem:[%s4357_s10 + $0xe0] sm:$0xff]  ;;  %v1008_v46 = vld [vmem:[%s4357_s10 + $0x128] sm:$0xff] }
 0x305   :  { %v2132_v54 = vpack.c.bf16 %v982_v53, %v974_v51  ;;  %2323 = vmatpush1.bf16.msra.mxu0 %v2322_v43  ;;  %v1101_v43 = vld [vmem:[%s4357_s10 + $0x410] sm:$0xff]  ;;  %v1118_v53 = vld [vmem:[%s4357_s10 + $0x498] sm:$0xff] }
 0x306   :  { %v1109_v51 = vld [vmem:[%s4357_s10 + $0x450] sm:$0xff] }
 0x307   :  { %2099 = vmatpush1.bf16.msra.mxu1 %v2098_v57  ;;  %v884_v57 = vrot.slane %v875_v55, %v3392_v24  ;;  %v2166_v55 = vpack.c.bf16 %v1109_v51, %v1101_v43  ;;  %v1007_v51 = vld [vmem:[%s4357_s10 + $0x120] sm:$0xff] }
 0x308   :  { %2101 = vmatprep.subr.bf16.mxu1 %v2100_v58 }
 0x30b   :  { %2103 = vmatpush1.bf16.msra.mxu1 %v2102_v22 }
 0x30c   :  { %2105 = vmatprep.subr.bf16.mxu1 %v2104_v63  ;;  %v990_v63 = vld [vmem:[%s4357_s10 + $0x98] sm:$0xff] }
 0x30f   :  { %2107 = vmatpush1.bf16.msra.mxu1 %v2106_v3  ;;  %v2136_v3 = vpack.c.bf16 %v998_v0, %v990_v63  ;;  %v1141_v63 = vld [vmem:[%s4357_s10 + $0x550] sm:$0xff]  ;;  %v1150_v0 = vld [vmem:[%s4357_s10 + $0x598] sm:$0xff] }
 0x310   :  { %2109 = vmatprep.subr.bf16.mxu1 %v2108_v4  ;;  %v989_v4 = vld [vmem:[%s4357_s10 + $0x90] sm:$0xff] }
 0x311   :  { %v2138_v8 = vpack.c.bf16 %v997_v5, %v989_v4  ;;  %v1149_v5 = vld [vmem:[%s4357_s10 + $0x590] sm:$0xff] }
 0x313   :  { %2111 = vmatpush1.bf16.msra.mxu1 %v2110_v9  ;;  %v2140_v9 = vpack.c.bf16 %v1014_v7, %v1006_v6  ;;  %v1157_v6 = vld [vmem:[%s4357_s10 + $0x5d0] sm:$0xff]  ;;  %v1166_v7 = vld [vmem:[%s4357_s10 + $0x618] sm:$0xff] }
 0x314   :  { %2113 = vmatprep.subr.bf16.mxu1 %v2112_v10  ;;  %v1005_v10 = vld [vmem:[%s4357_s10 + $0x110] sm:$0xff] }
 0x315   :  { %v2142_v14 = vpack.c.bf16 %v1013_v11, %v1005_v10  ;;  %v1165_v11 = vld [vmem:[%s4357_s10 + $0x610] sm:$0xff] }
 0x317   :  { %2115 = vmatpush1.bf16.msra.mxu1 %v2114_v16  ;;  %v2144_v16 = vpack.c.bf16 %v1030_v13, %v1022_v12  ;;  %v1173_v12 = vld [vmem:[%s4357_s10 + $0x650] sm:$0xff]  ;;  %v1182_v13 = vld [vmem:[%s4357_s10 + $0x698] sm:$0xff] }
 0x318   :  { %2117 = vmatprep.subr.bf16.mxu1 %v2116_v17  ;;  %v1021_v17 = vld [vmem:[%s4357_s10 + $0x190] sm:$0xff] }
 0x319   :  { %v2146_v20 = vpack.c.bf16 %v1029_v18, %v1021_v17  ;;  %v1181_v18 = vld [vmem:[%s4357_s10 + $0x690] sm:$0xff] }
 0x31b   :  { %2119 = vmatpush1.bf16.msra.mxu1 %v2118_v47  ;;  %v2148_v47 = vpack.c.bf16 %v1046_v42, %v1038_v19  ;;  %v1189_v19 = vld [vmem:[%s4357_s10 + $0x6d0] sm:$0xff]  ;;  %v1198_v42 = vld [vmem:[%s4357_s10 + $0x718] sm:$0xff] }
 0x31c   :  { %2121 = vmatprep.subr.bf16.mxu1 %v2120_v23  ;;  %v1037_v23 = vld [vmem:[%s4357_s10 + $0x210] sm:$0xff] }
 0x31d   :  { %v2150_v28 = vpack.c.bf16 %v1045_v25, %v1037_v23  ;;  %v1197_v25 = vld [vmem:[%s4357_s10 + $0x710] sm:$0xff] }
 0x31f   :  { %2123 = vmatpush1.bf16.msra.mxu1 %v2122_v29  ;;  %v2152_v29 = vpack.c.bf16 %v1062_v27, %v1054_v26  ;;  %v1205_v26 = vld [vmem:[%s4357_s10 + $0x750] sm:$0xff]  ;;  %v1214_v27 = vld [vmem:[%s4357_s10 + $0x798] sm:$0xff] }
 0x320   :  { %2125 = vmatprep.subr.bf16.mxu1 %v2124_v30  ;;  %v1053_v30 = vld [vmem:[%s4357_s10 + $0x290] sm:$0xff] }
 0x321   :  { %v2154_v34 = vpack.c.bf16 %v1061_v31, %v1053_v30  ;;  %v1213_v31 = vld [vmem:[%s4357_s10 + $0x790] sm:$0xff] }
 0x323   :  { %2127 = vmatpush1.bf16.msra.mxu1 %v2126_v33  ;;  %v1078_v33 = vld [vmem:[%s4357_s10 + $0x358] sm:$0xff] }
 0x324   :  { %2129 = vmatprep.subr.bf16.mxu1 %v2128_v48  ;;  %v2156_v36 = vpack.c.bf16 %v1078_v33, %v1070_v32  ;;  %v1094_v48 = vld [vmem:[%s4357_s10 + $0x3d8] sm:$0xff]  ;;  %v1221_v32 = vld [vmem:[%s4357_s10 + $0x7d0] sm:$0xff]  ;;  %v976_v33 = vld [vmem:[%s4357_s10 + $0x28] sm:$0xff] }
 0x325   :  { %v2160_v41 = vpack.c.bf16 %v1094_v48, %v1086_v39  ;;  %v983_v39 = vld [vmem:[%s4357_s10 + $0x60] sm:$0xff]  ;;  %v992_v48 = vld [vmem:[%s4357_s10 + $0xa8] sm:$0xff] }
 0x327   :  { %2131 = vmatpush1.bf16.msra.mxu1 %v2130_v44  ;;  %v1093_v44 = vld [vmem:[%s4357_s10 + $0x3d0] sm:$0xff] }
 0x328   :  { %2133 = vmatprep.subr.bf16.mxu1 %v2132_v54  ;;  %v2162_v49 = vpack.c.bf16 %v1093_v44, %v1085_v15  ;;  %v1126_v54 = vld [vmem:[%s4357_s10 + $0x4d8] sm:$0xff]  ;;  %v991_v44 = vld [vmem:[%s4357_s10 + $0xa0] sm:$0xff] }
 0x3bd   :  { %v964_v58 = vpop.f32.mrb[4].mxu1 }
 0x3be   :  { %v965_v59 = vadd.f32 %v964_v58, %v880_v56  ;;  %v966_v60 = vpop.f32.mrb[5].mxu1  ;;  %v2168_v56 = vpack.c.bf16 %v1126_v54, %v1118_v53  ;;  %v1125_v58 = vld [vmem:[%s4357_s10 + $0x4d0] sm:$0xff]  ;;  %v1015_v53 = vld [vmem:[%s4357_s10 + $0x160] sm:$0xff]  ;;  %v1024_v54 = vld [vmem:[%s4357_s10 + $0x1a8] sm:$0xff] }
 0x3bf   :  { %v967_v22 = vadd.f32 %v966_v60, %v884_v57  ;;  %v1117_v57 = vld [vmem:[%s4357_s10 + $0x490] sm:$0xff]  ;;  %v1142_v60 = vld [vmem:[%s4357_s10 + $0x558] sm:$0xff] }
 0x3c0   :  { %v3919_v52 = vmax.f32 %v965_v59, 0.0  ;;  %v1134_v59 = vld [vmem:[%s4357_s10 + $0x518] sm:$0xff]  ;;  %v2170_v61 = vpack.c.bf16 %v1125_v58, %v1117_v57  ;;  %v1023_v57 = vld [vmem:[%s4357_s10 + $0x1a0] sm:$0xff] }
 0x3c1   :  { %v3917_v1 = vmax.f32 %v967_v22, 0.0  ;;  %v2172_v62 = vpack.c.bf16 %v1142_v60, %v1134_v59  ;;  %v1133_v22 = vld [vmem:[%s4357_s10 + $0x510] sm:$0xff]  ;;  %v1031_v58 = vld [vmem:[%s4357_s10 + $0x1e0] sm:$0xff]  ;;  %v1040_v59 = vld [vmem:[%s4357_s10 + $0x228] sm:$0xff] }
 0x3c2   :  { %v1048_v60 = vld [vmem:[%s4357_s10 + $0x268] sm:$0xff] }
 0x3c3   :  { %1333 = vmatprep.mubr.f32.mxu1 %v3917_v1  ;;  %1546 = vmatprep.mubr.f32.mxu0 %v3917_v1 }
 0x3c4   :  { %1334 = vmatmul.mubr.f32.vlgmr.msra.gmra.mrb[6].mxu1 %v3919_v52  ;;  %1547 = vmatmul.mubr.f32.vlgmr.msra.gmra.mrb[2].mxu0 %v3919_v52 }
 0x3c5   :  { %2135 = vmatpush1.bf16.msra.mxu1 %v2134_v2  ;;  %1404 = vmatprep.mubr.f32.mxu1 %v3917_v1  ;;  %v1158_v2 = vld [vmem:[%s4357_s10 + $0x5d8] sm:$0xff] }
 0x3c6   :  { %2137 = vmatprep.subr.bf16.mxu1 %v2136_v3  ;;  %v2174_v3 = vpack.c.bf16 %v1141_v63, %v1133_v22  ;;  %v2176_v4 = vpack.c.bf16 %v1158_v2, %v1150_v0  ;;  %v1039_v22 = vld [vmem:[%s4357_s10 + $0x220] sm:$0xff]  ;;  %v1056_v0 = vld [vmem:[%s4357_s10 + $0x2a8] sm:$0xff] }
 0x3c7   :  { %v1047_v63 = vld [vmem:[%s4357_s10 + $0x260] sm:$0xff]  ;;  %v1064_v2 = vld [vmem:[%s4357_s10 + $0x2e8] sm:$0xff] }
 0x3c9   :  { %2139 = vmatpush1.bf16.msra.mxu1 %v2138_v8  ;;  %v1174_v8 = vld [vmem:[%s4357_s10 + $0x658] sm:$0xff] }
 0x3ca   :  { %2141 = vmatprep.subr.bf16.mxu1 %v2140_v9  ;;  %v2178_v9 = vpack.c.bf16 %v1157_v6, %v1149_v5  ;;  %v2180_v10 = vpack.c.bf16 %v1174_v8, %v1166_v7  ;;  %v1055_v5 = vld [vmem:[%s4357_s10 + $0x2a0] sm:$0xff]  ;;  %v1072_v7 = vld [vmem:[%s4357_s10 + $0x328] sm:$0xff] }
 0x3cb   :  { %v1063_v6 = vld [vmem:[%s4357_s10 + $0x2e0] sm:$0xff]  ;;  %v1080_v8 = vld [vmem:[%s4357_s10 + $0x368] sm:$0xff] }
 0x3cd   :  { %2143 = vmatpush1.bf16.msra.mxu1 %v2142_v14  ;;  %v1190_v14 = vld [vmem:[%s4357_s10 + $0x6d8] sm:$0xff] }
 0x3ce   :  { %2145 = vmatprep.subr.bf16.mxu1 %v2144_v16  ;;  %v2182_v16 = vpack.c.bf16 %v1173_v12, %v1165_v11  ;;  %v2184_v17 = vpack.c.bf16 %v1190_v14, %v1182_v13  ;;  %v1071_v11 = vld [vmem:[%s4357_s10 + $0x320] sm:$0xff]  ;;  %v1088_v13 = vld [vmem:[%s4357_s10 + $0x3a8] sm:$0xff] }
 0x3cf   :  { %v1079_v12 = vld [vmem:[%s4357_s10 + $0x360] sm:$0xff]  ;;  %v1096_v14 = vld [vmem:[%s4357_s10 + $0x3e8] sm:$0xff] }
 0x3d1   :  { %2147 = vmatpush1.bf16.msra.mxu1 %v2146_v20  ;;  %v1206_v20 = vld [vmem:[%s4357_s10 + $0x758] sm:$0xff] }
 0x3d2   :  { %2149 = vmatprep.subr.bf16.mxu1 %v2148_v47  ;;  %v2186_v47 = vpack.c.bf16 %v1189_v19, %v1181_v18  ;;  %v2188_v23 = vpack.c.bf16 %v1206_v20, %v1198_v42  ;;  %v1087_v18 = vld [vmem:[%s4357_s10 + $0x3a0] sm:$0xff]  ;;  %v1104_v42 = vld [vmem:[%s4357_s10 + $0x428] sm:$0xff] }
 0x3d3   :  { %v1095_v19 = vld [vmem:[%s4357_s10 + $0x3e0] sm:$0xff]  ;;  %v1112_v20 = vld [vmem:[%s4357_s10 + $0x468] sm:$0xff] }
 0x3d5   :  { %2151 = vmatpush1.bf16.msra.mxu1 %v2150_v28  ;;  %v1222_v28 = vld [vmem:[%s4357_s10 + $0x7d8] sm:$0xff] }
 0x3d6   :  { %2153 = vmatprep.subr.bf16.mxu1 %v2152_v29  ;;  %v2190_v29 = vpack.c.bf16 %v1205_v26, %v1197_v25  ;;  %v2192_v30 = vpack.c.bf16 %v1222_v28, %v1214_v27  ;;  %v1103_v25 = vld [vmem:[%s4357_s10 + $0x420] sm:$0xff]  ;;  %v1120_v27 = vld [vmem:[%s4357_s10 + $0x4a8] sm:$0xff] }
 0x3d7   :  { %v1111_v26 = vld [vmem:[%s4357_s10 + $0x460] sm:$0xff]  ;;  %v1128_v28 = vld [vmem:[%s4357_s10 + $0x4e8] sm:$0xff] }
 0x3d9   :  { %2155 = vmatpush1.bf16.msra.mxu1 %v2154_v34  ;;  %v984_v34 = vld [vmem:[%s4357_s10 + $0x68] sm:$0xff] }
 0x3da   :  { %2157 = vmatprep.subr.bf16.mxu1 %v2156_v36  ;;  %v2194_v36 = vpack.c.bf16 %v1221_v32, %v1213_v31  ;;  %v2196_v37 = vpack.c.bf16 %v984_v34, %v976_v33  ;;  %v1119_v31 = vld [vmem:[%s4357_s10 + $0x4a0] sm:$0xff]  ;;  %v1136_v33 = vld [vmem:[%s4357_s10 + $0x528] sm:$0xff] }
 0x3db   :  { %v1127_v32 = vld [vmem:[%s4357_s10 + $0x4e0] sm:$0xff]  ;;  %v1144_v34 = vld [vmem:[%s4357_s10 + $0x568] sm:$0xff] }
 0x3dd   :  { %2159 = vmatpush1.bf16.msra.mxu1 %v2158_v40  ;;  %v1000_v40 = vld [vmem:[%s4357_s10 + $0xe8] sm:$0xff] }
 0x3de   :  { %2161 = vmatprep.subr.bf16.mxu1 %v2160_v41  ;;  %v2198_v41 = vpack.c.bf16 %v983_v39, %v975_v38  ;;  %v2200_v15 = vpack.c.bf16 %v1000_v40, %v992_v48  ;;  %v1135_v38 = vld [vmem:[%s4357_s10 + $0x520] sm:$0xff]  ;;  %v1152_v48 = vld [vmem:[%s4357_s10 + $0x5a8] sm:$0xff] }
 0x3df   :  { %v1143_v39 = vld [vmem:[%s4357_s10 + $0x560] sm:$0xff]  ;;  %v1160_v40 = vld [vmem:[%s4357_s10 + $0x5e8] sm:$0xff] }
 0x3e1   :  { %2163 = vmatpush1.bf16.msra.mxu1 %v2162_v49  ;;  %v1016_v49 = vld [vmem:[%s4357_s10 + $0x168] sm:$0xff] }
 0x3e2   :  { %2165 = vmatprep.subr.bf16.mxu1 %v2164_v50  ;;  %v2202_v50 = vpack.c.bf16 %v999_v45, %v991_v44  ;;  %v2204_v43 = vpack.c.bf16 %v1016_v49, %v1008_v46  ;;  %v1151_v44 = vld [vmem:[%s4357_s10 + $0x5a0] sm:$0xff]  ;;  %v1168_v46 = vld [vmem:[%s4357_s10 + $0x628] sm:$0xff] }
 0x3e3   :  { %v1159_v45 = vld [vmem:[%s4357_s10 + $0x5e0] sm:$0xff]  ;;  %v1176_v49 = vld [vmem:[%s4357_s10 + $0x668] sm:$0xff] }
 0x3e5   :  { %2167 = vmatpush1.bf16.msra.mxu1 %v2166_v55  ;;  %v1032_v55 = vld [vmem:[%s4357_s10 + $0x1e8] sm:$0xff] }
 0x3e6   :  { %2169 = vmatprep.subr.bf16.mxu1 %v2168_v56  ;;  %v2208_v56 = vpack.c.bf16 %v1032_v55, %v1024_v54  ;;  %v1184_v54 = vld [vmem:[%s4357_s10 + $0x6a8] sm:$0xff] }
 0x3e7   :  { %v1192_v55 = vld [vmem:[%s4357_s10 + $0x6e8] sm:$0xff] }
 0x3e9   :  { %2171 = vmatpush1.bf16.msra.mxu1 %v2170_v61  ;;  %v2210_v61 = vpack.c.bf16 %v1031_v58, %v1023_v57  ;;  %v1183_v57 = vld [vmem:[%s4357_s10 + $0x6a0] sm:$0xff] }
 0x3ea   :  { %2173 = vmatprep.subr.bf16.mxu1 %v2172_v62  ;;  %v2212_v62 = vpack.c.bf16 %v1048_v60, %v1040_v59  ;;  %v1191_v58 = vld [vmem:[%s4357_s10 + $0x6e0] sm:$0xff]  ;;  %v1200_v59 = vld [vmem:[%s4357_s10 + $0x728] sm:$0xff] }
 0x3eb   :  { %v1208_v60 = vld [vmem:[%s4357_s10 + $0x768] sm:$0xff] }
 0x3ed   :  { %2175 = vmatpush1.bf16.msra.mxu1 %v2174_v3  ;;  %v2214_v3 = vpack.c.bf16 %v1047_v63, %v1039_v22  ;;  %v1199_v22 = vld [vmem:[%s4357_s10 + $0x720] sm:$0xff] }
 0x3ee   :  { %2177 = vmatprep.subr.bf16.mxu1 %v2176_v4  ;;  %v2216_v4 = vpack.c.bf16 %v1064_v2, %v1056_v0  ;;  %v1207_v63 = vld [vmem:[%s4357_s10 + $0x760] sm:$0xff]  ;;  %v1216_v0 = vld [vmem:[%s4357_s10 + $0x7a8] sm:$0xff] }
 0x3ef   :  { %v1224_v2 = vld [vmem:[%s4357_s10 + $0x7e8] sm:$0xff] }
 0x3f1   :  { %2179 = vmatpush1.bf16.msra.mxu1 %v2178_v9  ;;  %v2218_v9 = vpack.c.bf16 %v1063_v6, %v1055_v5  ;;  %v1215_v5 = vld [vmem:[%s4357_s10 + $0x7a0] sm:$0xff] }
 0x3f2   :  { %2181 = vmatprep.subr.bf16.mxu1 %v2180_v10  ;;  %v2220_v10 = vpack.c.bf16 %v1080_v8, %v1072_v7  ;;  %v1223_v6 = vld [vmem:[%s4357_s10 + $0x7e0] sm:$0xff]  ;;  %v1255_v8 = vsub.s32 6, %v2535_v35 }
 0x3f3   :  { %v2258_v7 = vpack.c.bf16 %v1223_v6, %v1215_v5 }
 0x3f5   :  { %2183 = vmatpush1.bf16.msra.mxu1 %v2182_v16  ;;  %v2222_v16 = vpack.c.bf16 %v1079_v12, %v1071_v11 }
 0x3f6   :  { %2185 = vmatprep.subr.bf16.mxu1 %v2184_v17  ;;  %v2224_v17 = vpack.c.bf16 %v1096_v14, %v1088_v13 }
 0x3f9   :  { %2187 = vmatpush1.bf16.msra.mxu1 %v2186_v47  ;;  %v2226_v47 = vpack.c.bf16 %v1095_v19, %v1087_v18 }
 0x3fa   :  { %2189 = vmatprep.subr.bf16.mxu1 %v2188_v23  ;;  %v2228_v23 = vpack.c.bf16 %v1112_v20, %v1104_v42 }
 0x3fd   :  { %2191 = vmatpush1.bf16.msra.mxu1 %v2190_v29  ;;  %v2230_v29 = vpack.c.bf16 %v1111_v26, %v1103_v25 }
 0x3fe   :  { %2193 = vmatprep.subr.bf16.mxu1 %v2192_v30  ;;  %v2232_v30 = vpack.c.bf16 %v1128_v28, %v1120_v27 }
 0x401   :  { %2195 = vmatpush1.bf16.msra.mxu1 %v2194_v36  ;;  %v2234_v36 = vpack.c.bf16 %v1127_v32, %v1119_v31 }
 0x402   :  { %2197 = vmatprep.subr.bf16.mxu1 %v2196_v37  ;;  %v2236_v37 = vpack.c.bf16 %v1144_v34, %v1136_v33 }
 0x404   :  { %1405 = vmatmul.mubr.f32.vlgmr.msra.gmra.mrb[8].mxu1 %v3919_v52 }
 0x405   :  { %2199 = vmatpush1.bf16.msra.mxu1 %v2198_v41  ;;  %1475 = vmatprep.mubr.f32.mxu1 %v3917_v1  ;;  %v2206_v1 = vpack.c.bf16 %v1015_v53, %v1007_v51  ;;  %v2238_v41 = vpack.c.bf16 %v1143_v39, %v1135_v38  ;;  %v1167_v51 = vld [vmem:[%s4357_s10 + $0x620] sm:$0xff] }
 0x406   :  { %2201 = vmatprep.subr.bf16.mxu1 %v2200_v15  ;;  %v2240_v15 = vpack.c.bf16 %v1160_v40, %v1152_v48  ;;  %v1175_v53 = vld [vmem:[%s4357_s10 + $0x660] sm:$0xff]  ;;  %s2391_s10 = smov [#allocation2]  }
 0x409   :  { %2203 = vmatpush1.bf16.msra.mxu1 %v2202_v50  ;;  %v2242_v50 = vpack.c.bf16 %v1159_v45, %v1151_v44 }
 0x40a   :  { %2205 = vmatprep.subr.bf16.mxu1 %v2204_v43  ;;  %v2244_v43 = vpack.c.bf16 %v1176_v49, %v1168_v46 }
 0x40d   :  { %2207 = vmatpush1.bf16.msra.mxu1 %v2206_v1  ;;  %v2246_v1 = vpack.c.bf16 %v1175_v53, %v1167_v51 }
 0x40e   :  { %2209 = vmatprep.subr.bf16.mxu1 %v2208_v56  ;;  %v2248_v56 = vpack.c.bf16 %v1192_v55, %v1184_v54 }
 0x411   :  { %2211 = vmatpush1.bf16.msra.mxu1 %v2210_v61  ;;  %v2250_v61 = vpack.c.bf16 %v1191_v58, %v1183_v57 }
 0x412   :  { %2213 = vmatprep.subr.bf16.mxu1 %v2212_v62  ;;  %v2252_v62 = vpack.c.bf16 %v1208_v60, %v1200_v59 }
 0x415   :  { %2215 = vmatpush1.bf16.msra.mxu1 %v2214_v3  ;;  %v2254_v3 = vpack.c.bf16 %v1207_v63, %v1199_v22 }
 0x416   :  { %2217 = vmatprep.subr.bf16.mxu1 %v2216_v4  ;;  %v2256_v4 = vpack.c.bf16 %v1224_v2, %v1216_v0 }
 0x419   :  { %2219 = vmatpush1.bf16.msra.mxu1 %v2218_v9  ;;  %v4299_v9 = vld [vmem:[%s4358_s11] sm:$0xff]  ;;  %s1637_s11 = sshll.u32 %s2391_s10, 4  ;;  %s1638_s11 = int_to_ptr.vmem [resolvable:$true] %s1637_s11 }
 0x41a   :  { %2221 = vmatprep.subr.bf16.mxu1 %v2220_v10  ;;  %v1259_v10 = vsub.s32 7, %v2535_v35  ;;  %v1232_v11 = vrot.slane %v4299_v9, %v3386_v21  ;;  %v1256_v12 = vrot.slane %v4299_v9, %v1255_v8  ;;  %v1236_v13 = vrot.slane %v4299_v9, %v3392_v24  ;;  %s2340_s29 = scalar_lea.vmem %s1638_s11, 32  ;;  %p2345_p1 = scmp.lt.s32.totalorder %s1638_s11, %s1638_s11 }
 0x41b   :  { %p2341_p0 = scmp.ne.s32.totalorder %s1638_s11, %s2340_s29  ;;  %p2346_p2 = scmp.lt.s32.totalorder %s2340_s29, %s2340_s29 }
 0x41c   :  { %v1260_v14 = vrot.slane %v4299_v9, %v1259_v10 }
 0x41d   :  { %2223 = vmatpush1.bf16.msra.mxu1 %v2222_v16  ;;  %p2347_p3 = por %p2346_p2, %p2345_p1 }
 0x41e   :  { %2225 = vmatprep.subr.bf16.mxu1 %v2224_v17 }
 0x41f   :  { %p2348_p4 = pnand %p2347_p3, %p2341_p0 }
 0x421   :  { %2227 = vmatpush1.bf16.msra.mxu1 %v2226_v47 }
 0x422   :  { %2229 = vmatprep.subr.bf16.mxu1 %v2228_v23 }
 0x425   :  { %2231 = vmatpush1.bf16.msra.mxu1 %v2230_v29 }
 0x426   :  { %2233 = vmatprep.subr.bf16.mxu1 %v2232_v30 }
 0x429   :  { %2235 = vmatpush1.bf16.msra.mxu1 %v2234_v36 }
 0x42a   :  { %2237 = vmatprep.subr.bf16.mxu1 %v2236_v37 }
 0x42d   :  { %2239 = vmatpush1.bf16.msra.mxu1 %v2238_v41 }
 0x42e   :  { %2241 = vmatprep.subr.bf16.mxu1 %v2240_v15 }
 0x431   :  { %2243 = vmatpush1.bf16.msra.mxu1 %v2242_v50 }
 0x432   :  { %2245 = vmatprep.subr.bf16.mxu1 %v2244_v43 }
 0x435   :  { %2247 = vmatpush1.bf16.msra.mxu1 %v2246_v1 }
 0x436   :  { %2249 = vmatprep.subr.bf16.mxu1 %v2248_v56 }
 0x439   :  { %2251 = vmatpush1.bf16.msra.mxu1 %v2250_v61 }
 0x43a   :  { %2253 = vmatprep.subr.bf16.mxu1 %v2252_v62 }
 0x43d   :  { %2255 = vmatpush1.bf16.msra.mxu1 %v2254_v3 }
 0x43e   :  { %2257 = vmatprep.subr.bf16.mxu1 %v2256_v4 }
 0x441   :  { %2259 = vmatpush1.bf16.msra.mxu1 %v2258_v7 }
 0x444   :  { %1476 = vmatmul.mubr.f32.vlgmr.msra.gmra.mrb[10].mxu1 %v3919_v52 }
 0x497   :  { %v1335_v52 = vpop.f32.mrb[6].mxu1  ;;  %v1548_v16 = vpop.f32.mrb[2].mxu0 }
 0x498   :  { %v1336_v17 = vadd.f32 %v1335_v52, %v1232_v11  ;;  %v1549_v18 = vadd.f32 %v1548_v16, %v1256_v12  ;;  %v1337_v19 = vpop.f32.mrb[7].mxu1  ;;  %v1550_v42 = vpop.f32.mrb[3].mxu0 }
 0x499   :  { %v1338_v20 = vadd.f32 %v1337_v19, %v1236_v13  ;;  %v1551_v47 = vadd.f32 %v1550_v42, %v1260_v14 }
 0x49a   :  { %v1553_v23 = vmax.f32 %v1336_v17, 0.0  ;;  %v1559_v25 = vmax.f32 %v1549_v18, 0.0 }
 0x49b   :  { %v1554_v26 = vmax.f32 %v1338_v20, 0.0  ;;  %v1560_v27 = vmax.f32 %v1551_v47, 0.0 }
 0x49d   :  { %v1668_v21 = vpack.c.bf16 %v1554_v26, %v1553_v23  ;;  %v4308_v28 = vpack.c.bf16 %v1560_v27, %v1559_v25 }
 0x49e   :  { %2351 = shalt.err (!%p2348_p4)
}
 0x49f   :  { %s2352_s8 = scalar_lea.hbm %s4359_s12, 32 }
 0x4a0   :  { %p2353_p5 = scmp.ne.s32.totalorder %s4359_s12, %s2352_s8  ;;  %p2356_p6 = scmp.lt.u32.totalorder %s2352_s8, %s4359_s12 }
 0x4a2   :  { %p2358_p7 = pnand %p2356_p6, %p2353_p5 }
 0x4a4   :  { %2361 = shalt.err (!%p2358_p7)
}
 0x4a5   :  { %1640 = dma.vmem_to_hbm [thread:$0]  %s1638_s11, 32, %s4359_s12, [#allocation3]  }
 0x4a6   :  { %s2362_s9 = scalar_lea.vmem %s1648_s28, 32  ;;  %p2367_p9 = scmp.lt.s32.totalorder %s1648_s28, %s1648_s28 }
 0x4a7   :  { %p2363_p8 = scmp.ne.s32.totalorder %s1648_s28, %s2362_s9  ;;  %p2368_p10 = scmp.lt.s32.totalorder %s2362_s9, %s2362_s9 }
 0x4a9   :  { %p2369_p11 = por %p2368_p10, %p2367_p9 }
 0x4ab   :  { %p2370_p12 = pnand %p2369_p11, %p2363_p8 }
 0x4ad   :  { %2373 = shalt.err (!%p2370_p12)
}
 0x4ae   :  { %s2374_s5 = scalar_lea.hbm %s4360_s13, 32 }
 0x4af   :  { %p2375_p13 = scmp.ne.s32.totalorder %s4360_s13, %s2374_s5  ;;  %p2378_p0 = scmp.lt.u32.totalorder %s2374_s5, %s4360_s13 }
 0x4b1   :  { %p2380_p1 = pnand %p2378_p0, %p2375_p13 }
 0x4b3   :  { %2383 = shalt.err (!%p2380_p1)
}
 0x4b4   :  { %1650 = dma.vmem_to_hbm [thread:$0]  %s1648_s28, 32, %s4360_s13, [#allocation5]   ;;  %v1239_v24 = vsub.s32 2, %v2535_v35  ;;  %v1243_v29 = vsub.s32 3, %v2535_v35  ;;  %v2393_v30 = vmov 1966171168  }
 0x4b5   :  { %v1585_v31 = vunpack.c.l.s4 %v2393_v30  ;;  %v1247_v49 = vsub.s32 4, %v2535_v35  ;;  %v1251_v50 = vsub.s32 5, %v2535_v35 }
 0x4b6   :  { %v1240_v32 = vrot.slane %v4299_v9, %v1239_v24  ;;  %v1244_v33 = vrot.slane %v4299_v9, %v1243_v29 }
 0x4b7   :  { %v1586_v34 = vunpack.c.0.s8 %v1585_v31  ;;  %v1248_v43 = vrot.slane %v4299_v9, %v1247_v49  ;;  %v1252_v51 = vrot.slane %v4299_v9, %v1251_v50 }
 0x4b9   :  { %v1589_v40 = vsub.s32 %v1586_v34, %v2535_v35 }
 0x4bb   :  { %v1590_v44 = vrot.slane %v1668_v21, %v1589_v40  ;;  %v1611_v59 = vrot.slane %v4308_v28, %v1589_v40 }
 0x4d7   :  { %v1406_v36 = vpop.f32.mrb[8].mxu1 }
 0x4d8   :  { %v1407_v37 = vadd.f32 %v1406_v36, %v1240_v32  ;;  %v1408_v38 = vpop.f32.mrb[9].mxu1 }
 0x4d9   :  { %v1409_v39 = vadd.f32 %v1408_v38, %v1244_v33 }
 0x4da   :  { %v1555_v48 = vmax.f32 %v1407_v37, 0.0 }
 0x4db   :  { %v1556_v41 = vmax.f32 %v1409_v39, 0.0 }
 0x4dd   :  { %v1669_v15 = vpack.c.bf16 %v1556_v41, %v1555_v48 }
 0x4df   :  { %v1597_v45 = vrot.slane %v1669_v15, %v1589_v40 }
 0x4e1   :  { %v1612_v46 = vcombine.low %v1590_v44, %v1597_v45 }
 0x4e3   :  { %v1620_v62 = vrot.slane %v1612_v46, %v1589_v40 }
 0x517   :  { %v1477_v53 = vpop.f32.mrb[10].mxu1 }
 0x518   :  { %v1478_v54 = vadd.f32 %v1477_v53, %v1248_v43  ;;  %v1479_v55 = vpop.f32.mrb[11].mxu1 }
 0x519   :  { %v1480_v1 = vadd.f32 %v1479_v55, %v1252_v51 }
 0x51a   :  { %v1557_v56 = vmax.f32 %v1478_v54, 0.0 }
 0x51b   :  { %v1558_v57 = vmax.f32 %v1480_v1, 0.0 }
 0x51d   :  { %v1670_v58 = vpack.c.bf16 %v1558_v57, %v1557_v56 }
 0x51f   :  { %v1604_v60 = vrot.slane %v1670_v58, %v1589_v40 }
 0x521   :  { %v1613_v61 = vcombine.low %v1604_v60, %v1611_v59 }
 0x523   :  { %v1627_v22 = vrot.slane %v1613_v61, %v1589_v40 }
 0x525   :  { %v1628_v63 = vcombine.low %v1620_v62, %v1627_v22 }
 0x527   :  { %1630 = vst [vmem:[%s4361_s14] sm:$0xff] %v1628_v63 }
 0x528   :  { %2384 = dma.done.wait [#allocation3], 32  }
 0x529   :  { %2385 = vsyncadd [#allocation3], 4294967264 }
 0x52a   :  { %2386 = dma.done.wait [#allocation5], 32  }
 0x52b   :  { %2387 = vsyncadd [#allocation5], 4294967264 }
 0x52c   :  { %1661 = vsyncpa [#allocation3], 1 }
 0x52d   :  { %1662 = vsyncpa [#allocation5], 1 }

// kernel: betavae_forward.14
= control target key start
LH: loop header
LB: loop body
LE: loop exit
PB: predicated region body
PF: predicated region fallthrough
CT: control target
= control target key end

     0   :  { %vm521_vm0 = vcmask 523264   ;;  %s1256_s1 = inlined_call_operand.vmem [shape: bf16[576,256], index: 1, kind: input, shape index: {}]   ;;  %s1257_s0 = inlined_call_operand.vmem [shape: bf16[32,576], index: 0, kind: input, shape index: {}]   ;;  %s1258_s2 = inlined_call_operand.vmem [shape: f32[1,256], index: 2, kind: input, shape index: {}]   ;;  %s1259_s3 = inlined_call_operand.vmem [shape: bf16[32,256], index: 3, kind: output, shape index: {}]  }
   0x1   :  { %v852_v0 = vld [vmem:[%s1256_s1 + $0x4] ss:$8 sps:$4 sm:$0xff]   ;;  %v856_v2 = vld [vmem:[%s1256_s1] ss:$8 sps:$4 sm:$0xff]   ;;  %v858_v4 = vld [vmem:[%s1256_s1 + $0x14] ss:$8 sps:$4 sm:$0xff]  }
   0x2   :  { %v854_v1 = vld [vmem:[%s1256_s1 + $0x104] ss:$8 sps:$4 sm:$0xff]   ;;  %528 = vmatprep.subr.bf16.mxu1 %v852_v0  ;;  %v857_v3 = vld [vmem:[%s1256_s1 + $0x100] ss:$8 sps:$4 sm:$0xff]   ;;  %v860_v5 = vld [vmem:[%s1256_s1 + $0x114] ss:$8 sps:$4 sm:$0xff]  }
   0x3   :  { %581 = vmatprep.subr.bf16.mxu0 %v854_v1  ;;  %529 = vmatpush1.bf16.msra.mxu1 %v856_v2  ;;  %v862_v6 = vld [vmem:[%s1256_s1 + $0x10] ss:$8 sps:$4 sm:$0xff]   ;;  %v864_v8 = vld [vmem:[%s1256_s1 + $0x24] ss:$8 sps:$4 sm:$0xff]   ;;  %v868_v10 = vld [vmem:[%s1256_s1 + $0x20] ss:$8 sps:$4 sm:$0xff]  }
   0x4   :  { %582 = vmatpush1.bf16.msra.mxu0 %v857_v3  ;;  %530 = vmatprep.subr.bf16.mxu1 %v858_v4  ;;  %v863_v7 = vld [vmem:[%s1256_s1 + $0x110] ss:$8 sps:$4 sm:$0xff]   ;;  %v866_v9 = vld [vmem:[%s1256_s1 + $0x124] ss:$8 sps:$4 sm:$0xff]   ;;  %v869_v11 = vld [vmem:[%s1256_s1 + $0x120] ss:$8 sps:$4 sm:$0xff]  }
   0x5   :  { %583 = vmatprep.subr.bf16.mxu0 %v860_v5  ;;  %v870_v12 = vld [vmem:[%s1256_s1 + $0x34] ss:$8 sps:$4 sm:$0xff]   ;;  %v874_v14 = vld [vmem:[%s1256_s1 + $0x30] ss:$8 sps:$4 sm:$0xff]   ;;  %v876_v16 = vld [vmem:[%s1256_s1 + $0x44] ss:$8 sps:$4 sm:$0xff]  }
   0x6   :  { %v872_v13 = vld [vmem:[%s1256_s1 + $0x134] ss:$8 sps:$4 sm:$0xff]   ;;  %v875_v15 = vld [vmem:[%s1256_s1 + $0x130] ss:$8 sps:$4 sm:$0xff]   ;;  %v878_v17 = vld [vmem:[%s1256_s1 + $0x144] ss:$8 sps:$4 sm:$0xff]  }
   0x7   :  { %531 = vmatpush1.bf16.msra.mxu1 %v862_v6  ;;  %v880_v18 = vld [vmem:[%s1256_s1 + $0x40] ss:$8 sps:$4 sm:$0xff]   ;;  %v882_v20 = vld [vmem:[%s1256_s1 + $0x54] ss:$8 sps:$4 sm:$0xff]   ;;  %v886_v22 = vld [vmem:[%s1256_s1 + $0x50] ss:$8 sps:$4 sm:$0xff]  }
   0x8   :  { %584 = vmatpush1.bf16.msra.mxu0 %v863_v7  ;;  %532 = vmatprep.subr.bf16.mxu1 %v864_v8  ;;  %v881_v19 = vld [vmem:[%s1256_s1 + $0x140] ss:$8 sps:$4 sm:$0xff]   ;;  %v884_v21 = vld [vmem:[%s1256_s1 + $0x154] ss:$8 sps:$4 sm:$0xff]   ;;  %v887_v23 = vld [vmem:[%s1256_s1 + $0x150] ss:$8 sps:$4 sm:$0xff]  }
   0x9   :  { %585 = vmatprep.subr.bf16.mxu0 %v866_v9  ;;  %v888_v24 = vld [vmem:[%s1256_s1 + $0x64] ss:$8 sps:$4 sm:$0xff]   ;;  %v892_v26 = vld [vmem:[%s1256_s1 + $0x60] ss:$8 sps:$4 sm:$0xff]   ;;  %v894_v28 = vld [vmem:[%s1256_s1 + $0x74] ss:$8 sps:$4 sm:$0xff]  }
   0xa   :  { %v890_v25 = vld [vmem:[%s1256_s1 + $0x164] ss:$8 sps:$4 sm:$0xff]   ;;  %v893_v27 = vld [vmem:[%s1256_s1 + $0x160] ss:$8 sps:$4 sm:$0xff]   ;;  %v896_v29 = vld [vmem:[%s1256_s1 + $0x174] ss:$8 sps:$4 sm:$0xff]  }
   0xb   :  { %533 = vmatpush1.bf16.msra.mxu1 %v868_v10  ;;  %v898_v30 = vld [vmem:[%s1256_s1 + $0x70] ss:$8 sps:$4 sm:$0xff]   ;;  %v900_v32 = vld [vmem:[%s1256_s1 + $0x84] ss:$8 sps:$4 sm:$0xff]   ;;  %v904_v34 = vld [vmem:[%s1256_s1 + $0x80] ss:$8 sps:$4 sm:$0xff]  }
   0xc   :  { %586 = vmatpush1.bf16.msra.mxu0 %v869_v11  ;;  %534 = vmatprep.subr.bf16.mxu1 %v870_v12  ;;  %v899_v31 = vld [vmem:[%s1256_s1 + $0x170] ss:$8 sps:$4 sm:$0xff]   ;;  %v902_v33 = vld [vmem:[%s1256_s1 + $0x184] ss:$8 sps:$4 sm:$0xff]   ;;  %v905_v35 = vld [vmem:[%s1256_s1 + $0x180] ss:$8 sps:$4 sm:$0xff]  }
   0xd   :  { %587 = vmatprep.subr.bf16.mxu0 %v872_v13  ;;  %v906_v36 = vld [vmem:[%s1256_s1 + $0x94] ss:$8 sps:$4 sm:$0xff]   ;;  %v910_v38 = vld [vmem:[%s1256_s1 + $0x90] ss:$8 sps:$4 sm:$0xff]   ;;  %v912_v40 = vld [vmem:[%s1256_s1 + $0xa4] ss:$8 sps:$4 sm:$0xff]  }
   0xe   :  { %v908_v37 = vld [vmem:[%s1256_s1 + $0x194] ss:$8 sps:$4 sm:$0xff]   ;;  %v911_v39 = vld [vmem:[%s1256_s1 + $0x190] ss:$8 sps:$4 sm:$0xff]   ;;  %v914_v41 = vld [vmem:[%s1256_s1 + $0x1a4] ss:$8 sps:$4 sm:$0xff]  }
   0xf   :  { %535 = vmatpush1.bf16.msra.mxu1 %v874_v14  ;;  %v916_v42 = vld [vmem:[%s1256_s1 + $0xa0] ss:$8 sps:$4 sm:$0xff]   ;;  %v918_v44 = vld [vmem:[%s1256_s1 + $0xb4] ss:$8 sps:$4 sm:$0xff]   ;;  %v922_v46 = vld [vmem:[%s1256_s1 + $0xb0] ss:$8 sps:$4 sm:$0xff]  }
  0x10   :  { %588 = vmatpush1.bf16.msra.mxu0 %v875_v15  ;;  %536 = vmatprep.subr.bf16.mxu1 %v876_v16  ;;  %v917_v43 = vld [vmem:[%s1256_s1 + $0x1a0] ss:$8 sps:$4 sm:$0xff]   ;;  %v920_v45 = vld [vmem:[%s1256_s1 + $0x1b4] ss:$8 sps:$4 sm:$0xff]   ;;  %v923_v47 = vld [vmem:[%s1256_s1 + $0x1b0] ss:$8 sps:$4 sm:$0xff]  }
  0x11   :  { %589 = vmatprep.subr.bf16.mxu0 %v878_v17  ;;  %v924_v48 = vld [vmem:[%s1256_s1 + $0xc4] ss:$8 sps:$4 sm:$0xff]   ;;  %v928_v52 = vld [vmem:[%s1256_s1 + $0xc0] ss:$8 sps:$4 sm:$0xff]   ;;  %v930_v54 = vld [vmem:[%s1256_s1 + $0xd4] ss:$8 sps:$4 sm:$0xff]  }
  0x12   :  { %v950_v49 = vld [vmem:[%s1257_s0 + $0x4] ss:$20 sps:$4 sm:$0xff]   ;;  %v953_v51 = vld [vmem:[%s1257_s0 + $0xc] ss:$20 sps:$4 sm:$0xff]   ;;  %v932_v55 = vld [vmem:[%s1256_s1 + $0x1d4] ss:$8 sps:$4 sm:$0xff]  }
  0x13   :  { %537 = vmatpush1.bf16.msra.mxu1 %v880_v18  ;;  %v926_v50 = vld [vmem:[%s1256_s1 + $0x1c4] ss:$8 sps:$4 sm:$0xff]   ;;  %560 = vmatprep.mubr.bf16.mxu1 %v950_v49  ;;  %v929_v53 = vld [vmem:[%s1256_s1 + $0x1c0] ss:$8 sps:$4 sm:$0xff]   ;;  %v934_v56 = vld [vmem:[%s1256_s1 + $0xd0] ss:$8 sps:$4 sm:$0xff]  }
  0x14   :  { %590 = vmatpush1.bf16.msra.mxu0 %v881_v19  ;;  %538 = vmatprep.subr.bf16.mxu1 %v882_v20  ;;  %v935_v57 = vld [vmem:[%s1256_s1 + $0x1d0] ss:$8 sps:$4 sm:$0xff]   ;;  %v936_v58 = vld [vmem:[%s1256_s1 + $0xe4] ss:$8 sps:$4 sm:$0xff]   ;;  %v940_v60 = vld [vmem:[%s1256_s1 + $0xe0] ss:$8 sps:$4 sm:$0xff]   ;;  %v101_v19 = vlaneseq }
  0x15   :  { %591 = vmatprep.subr.bf16.mxu0 %v884_v21  ;;  %613 = vmatprep.mubr.bf16.mxu0 %v953_v51  ;;  %v938_v59 = vld [vmem:[%s1256_s1 + $0x1e4] ss:$8 sps:$4 sm:$0xff]   ;;  %v941_v61 = vld [vmem:[%s1256_s1 + $0x1e0] ss:$8 sps:$4 sm:$0xff]   ;;  %v942_v62 = vld [vmem:[%s1256_s1 + $0xf4] ss:$8 sps:$4 sm:$0xff]  }
  0x16   :  { %v944_v63 = vld [vmem:[%s1256_s1 + $0x1f4] ss:$8 sps:$4 sm:$0xff]   ;;  %v946_v0 = vld [vmem:[%s1256_s1 + $0xf0] ss:$8 sps:$4 sm:$0xff]   ;;  %v956_v2 = vld [vmem:[%s1256_s1 + $0x204] ss:$8 sps:$4 sm:$0xff]  }
  0x17   :  { %539 = vmatpush1.bf16.msra.mxu1 %v886_v22  ;;  %v947_v1 = vld [vmem:[%s1256_s1 + $0x1f0] ss:$8 sps:$4 sm:$0xff]   ;;  %v948_v3 = vld [vmem:[%s1257_s0] ss:$20 sps:$4 sm:$0xff]   ;;  %v951_v4 = vld [vmem:[%s1257_s0 + $0x8] ss:$20 sps:$4 sm:$0xff]  }
  0x18   :  { %592 = vmatpush1.bf16.msra.mxu0 %v887_v23  ;;  %540 = vmatprep.subr.bf16.mxu1 %v888_v24  ;;  %v954_v5 = vld [vmem:[%s1256_s1 + $0x200] ss:$8 sps:$4 sm:$0xff]   ;;  %v959_v6 = vld [vmem:[%s1256_s1 + $0x214] ss:$8 sps:$4 sm:$0xff]   ;;  %v957_v9 = vld [vmem:[%s1256_s1 + $0x210] ss:$8 sps:$4 sm:$0xff]  }
  0x19   :  { %593 = vmatprep.subr.bf16.mxu0 %v890_v25  ;;  %v960_v7 = vld [vmem:[%s1257_s0 + $0x2c] ss:$20 sps:$4 sm:$0xff]   ;;  %v962_v8 = vld [vmem:[%s1257_s0 + $0x34] ss:$20 sps:$4 sm:$0xff]   ;;  %v965_v12 = vld [vmem:[%s1257_s0 + $0x30] ss:$20 sps:$4 sm:$0xff]  }
  0x1a   :  { %v968_v10 = vld [vmem:[%s1256_s1 + $0x224] ss:$8 sps:$4 sm:$0xff]   ;;  %v964_v11 = vld [vmem:[%s1257_s0 + $0x28] ss:$20 sps:$4 sm:$0xff]   ;;  %v969_v15 = vld [vmem:[%s1256_s1 + $0x230] ss:$8 sps:$4 sm:$0xff]  }
  0x1b   :  { %541 = vmatpush1.bf16.msra.mxu1 %v892_v26  ;;  %v966_v13 = vld [vmem:[%s1256_s1 + $0x220] ss:$8 sps:$4 sm:$0xff]   ;;  %v971_v14 = vld [vmem:[%s1256_s1 + $0x234] ss:$8 sps:$4 sm:$0xff]   ;;  %v974_v16 = vmov 0   ;;  %v102_v20 = vshrl.u32 %v101_v19, 7 }
  0x1c   :  { %594 = vmatpush1.bf16.msra.mxu0 %v893_v27  ;;  %542 = vmatprep.subr.bf16.mxu1 %v894_v28  ;;  %v972_v17 = vld [vmem:[%s1257_s0 + $0x10] ss:$20 sps:$4 sm:$0xff]   ;;  %v973_v18 = vld [vmem:[%s1257_s0 + $0x38] ss:$20 sps:$4 sm:$0xff]   ;;  %v99_v26 = vld [vmem:[%s1258_s2] sm:$0x3] }
  0x1d   :  { %595 = vmatprep.subr.bf16.mxu0 %v896_v29  ;;  %v103_v24 = vsub.s32 0, %v102_v20  ;;  %v107_v27 = vsub.s32 1, %v102_v20 }
  0x1f   :  { %543 = vmatpush1.bf16.msra.mxu1 %v898_v30  ;;  %v104_v28 = vrot.slane %v99_v26, %v103_v24  ;;  %v108_v29 = vrot.slane %v99_v26, %v107_v27 }
  0x20   :  { %596 = vmatpush1.bf16.msra.mxu0 %v899_v31  ;;  %544 = vmatprep.subr.bf16.mxu1 %v900_v32 }
  0x21   :  { %597 = vmatprep.subr.bf16.mxu0 %v902_v33 }
  0x23   :  { %545 = vmatpush1.bf16.msra.mxu1 %v904_v34 }
  0x24   :  { %598 = vmatpush1.bf16.msra.mxu0 %v905_v35  ;;  %546 = vmatprep.subr.bf16.mxu1 %v906_v36 }
  0x25   :  { %599 = vmatprep.subr.bf16.mxu0 %v908_v37 }
  0x27   :  { %547 = vmatpush1.bf16.msra.mxu1 %v910_v38 }
  0x28   :  { %600 = vmatpush1.bf16.msra.mxu0 %v911_v39  ;;  %548 = vmatprep.subr.bf16.mxu1 %v912_v40 }
  0x29   :  { %601 = vmatprep.subr.bf16.mxu0 %v914_v41 }
  0x2b   :  { %549 = vmatpush1.bf16.msra.mxu1 %v916_v42 }
  0x2c   :  { %602 = vmatpush1.bf16.msra.mxu0 %v917_v43  ;;  %550 = vmatprep.subr.bf16.mxu1 %v918_v44 }
  0x2d   :  { %603 = vmatprep.subr.bf16.mxu0 %v920_v45 }
  0x2f   :  { %551 = vmatpush1.bf16.msra.mxu1 %v922_v46 }
  0x30   :  { %604 = vmatpush1.bf16.msra.mxu0 %v923_v47  ;;  %552 = vmatprep.subr.bf16.mxu1 %v924_v48 }
  0x31   :  { %605 = vmatprep.subr.bf16.mxu0 %v926_v50 }
  0x33   :  { %553 = vmatpush1.bf16.msra.mxu1 %v928_v52 }
  0x34   :  { %606 = vmatpush1.bf16.msra.mxu0 %v929_v53  ;;  %554 = vmatprep.subr.bf16.mxu1 %v930_v54 }
  0x35   :  { %607 = vmatprep.subr.bf16.mxu0 %v932_v55 }
  0x37   :  { %555 = vmatpush1.bf16.msra.mxu1 %v934_v56 }
  0x38   :  { %608 = vmatpush1.bf16.msra.mxu0 %v935_v57  ;;  %556 = vmatprep.subr.bf16.mxu1 %v936_v58 }
  0x39   :  { %609 = vmatprep.subr.bf16.mxu0 %v938_v59 }
  0x3b   :  { %557 = vmatpush1.bf16.msra.mxu1 %v940_v60 }
  0x3c   :  { %610 = vmatpush1.bf16.msra.mxu0 %v941_v61  ;;  %558 = vmatprep.subr.bf16.mxu1 %v942_v62 }
  0x3d   :  { %611 = vmatprep.subr.bf16.mxu0 %v944_v63 }
  0x3f   :  { %559 = vmatpush1.bf16.msra.mxu1 %v946_v0 }
  0x40   :  { %612 = vmatpush1.bf16.msra.mxu0 %v947_v1  ;;  %819 = vmatprep.subr.bf16.mxu1 %v956_v2 }
  0x41   :  { %634 = vmatprep.subr.bf16.mxu0 %v956_v2 }
  0x42   :  { %561 = vmatmul.mubr.bf16.vlgmr.msra.gmra.mrb[0].mxu1 %v948_v3 }
  0x43   :  { %614 = vmatmul.mubr.bf16.vlgmr.msra.gmra.mrb[0].mxu0 %v951_v4  ;;  %823 = vmatpush1.bf16.msra.mxu1 %v954_v5 }
  0x44   :  { %635 = vmatpush1.bf16.msra.mxu0 %v954_v5  ;;  %820 = vmatprep.subr.bf16.mxu1 %v959_v6 }
  0x45   :  { %636 = vmatprep.subr.bf16.mxu0 %v959_v6  ;;  %570 = vmatprep.mubr.bf16.mxu1 %v960_v7 }
  0x46   :  { %623 = vmatprep.mubr.bf16.mxu0 %v962_v8 }
  0x47   :  { %824 = vmatpush1.bf16.msra.mxu1 %v957_v9 }
  0x48   :  { %637 = vmatpush1.bf16.msra.mxu0 %v957_v9  ;;  %821 = vmatprep.subr.bf16.mxu1 %v968_v10 }
  0x49   :  { %638 = vmatprep.subr.bf16.mxu0 %v968_v10 }
  0x4a   :  { %571 = vmatmul.mubr.bf16.gmra.mrb[4].mxu1 %v964_v11 }
  0x4b   :  { %624 = vmatmul.mubr.bf16.gmra.mrb[4].mxu0 %v965_v12  ;;  %825 = vmatpush1.bf16.msra.mxu1 %v966_v13 }
  0x4c   :  { %639 = vmatpush1.bf16.msra.mxu0 %v966_v13  ;;  %822 = vmatprep.subr.bf16.mxu1 %v971_v14 }
  0x4d   :  { %640 = vmatprep.subr.bf16.mxu0 %v971_v14  ;;  %666 = vmatprep.mubr.bf16.mxu0 %v974_v16 }
  0x4e   :  { %676 = vmatprep.mubr.bf16.mxu1 %v974_v16 }
  0x4f   :  { %826 = vmatpush1.bf16.msra.mxu1 %v969_v15 }
  0x50   :  { %641 = vmatpush1.bf16.msra.mxu0 %v969_v15 }
  0x52   :  { %810 = vmatmul.mubr.msk.bf16.vlgmr.msra.gmra.mrb[8].mxu1 %vm521_vm0, %v973_v18 }
  0x53   :  { %809 = vmatmul.mubr.msk.bf16.vlgmr.msra.gmra.mrb[0].mxu0 %vm521_vm0, %v972_v17 }
 0x115   :  { %v562_v21 = vpop.f32.mrb[0].mxu1 }
 0x116   :  { %v564_v22 = vpop.f32.mrb[1].mxu1  ;;  %v563_v46 = vadd.f32 %v562_v21, %v104_v28 }
 0x117   :  { %v566_v23 = vpop.f32.mrb[2].mxu1  ;;  %v565_v47 = vadd.f32 %v564_v22, %v108_v29 }
 0x118   :  { %v568_v25 = vpop.f32.mrb[3].mxu1  ;;  %v567_v50 = vadd.f32 %v566_v23, %v104_v28 }
 0x119   :  { %v569_v55 = vadd.f32 %v568_v25, %v108_v29 }
 0x11d   :  { %v572_v30 = vpop.f32.mrb[4].mxu1 }
 0x11e   :  { %v625_v31 = vpop.f32.mrb[4].mxu0  ;;  %v573_v32 = vadd.f32 %v572_v30, %v104_v28  ;;  %v574_v33 = vpop.f32.mrb[5].mxu1 }
 0x11f   :  { %v627_v34 = vpop.f32.mrb[5].mxu0  ;;  %v575_v35 = vadd.f32 %v574_v33, %v108_v29  ;;  %v576_v36 = vpop.f32.mrb[6].mxu1 }
 0x120   :  { %v629_v37 = vpop.f32.mrb[6].mxu0  ;;  %v626_v38 = vadd.f32 %v625_v31, %v573_v32  ;;  %v577_v39 = vadd.f32 %v576_v36, %v104_v28  ;;  %v578_v40 = vpop.f32.mrb[7].mxu1 }
 0x121   :  { %v631_v41 = vpop.f32.mrb[7].mxu0  ;;  %v628_v42 = vadd.f32 %v627_v34, %v575_v35  ;;  %v579_v43 = vadd.f32 %v578_v40, %v108_v29 }
 0x122   :  { %v630_v44 = vadd.f32 %v629_v37, %v577_v39 }
 0x123   :  { %v632_v45 = vadd.f32 %v631_v41, %v579_v43 }
 0x125   :  { %v678_v49 = vpop.f32.mrb[8].mxu1 }
 0x126   :  { %v668_v48 = vpop.f32.mrb[0].mxu0  ;;  %v679_v52 = vadd.f32 %v678_v49, %v626_v38  ;;  %v680_v54 = vpop.f32.mrb[9].mxu1 }
 0x127   :  { %v828_v51 = vadd.f32 %v668_v48, %v563_v46  ;;  %v670_v53 = vpop.f32.mrb[1].mxu0  ;;  %v681_v57 = vadd.f32 %v680_v54, %v628_v42  ;;  %v682_v59 = vpop.f32.mrb[10].mxu1 }
 0x128   :  { %v830_v56 = vadd.f32 %v670_v53, %v565_v47  ;;  %v672_v58 = vpop.f32.mrb[2].mxu0  ;;  %v691_v61 = vmax.f32 %v679_v52, 0.0  ;;  %v683_v63 = vadd.f32 %v682_v59, %v630_v44  ;;  %v684_v1 = vpop.f32.mrb[11].mxu1 }
 0x129   :  { %v687_v60 = vmax.f32 %v828_v51, 0.0  ;;  %v832_v62 = vadd.f32 %v672_v58, %v567_v50  ;;  %v674_v0 = vpop.f32.mrb[3].mxu0  ;;  %v692_v3 = vmax.f32 %v681_v57, 0.0  ;;  %v685_v5 = vadd.f32 %v684_v1, %v632_v45 }
 0x12a   :  { %v688_v2 = vmax.f32 %v830_v56, 0.0  ;;  %v834_v4 = vadd.f32 %v674_v0, %v569_v55  ;;  %v693_v7 = vmax.f32 %v683_v63, 0.0 }
 0x12b   :  { %v689_v6 = vmax.f32 %v832_v62, 0.0  ;;  %v817_v9 = vpack.c.bf16 %v692_v3, %v691_v61  ;;  %v694_v11 = vmax.f32 %v685_v5, 0.0 }
 0x12c   :  { %v815_v8 = vpack.c.bf16 %v688_v2, %v687_v60  ;;  %v690_v10 = vmax.f32 %v834_v4, 0.0 }
 0x12d   :  { %721 = vst [vmem:[%s1259_s3 + $0x10] sm:$0xff] %v817_v9  ;;  %v818_v13 = vpack.c.bf16 %v694_v11, %v693_v7 }
 0x12e   :  { %719 = vst [vmem:[%s1259_s3] sm:$0xff] %v815_v8  ;;  %v816_v12 = vpack.c.bf16 %v690_v10, %v689_v6 }
 0x12f   :  { %722 = vst [vmem:[%s1259_s3 + $0x18] sm:$0xff] %v818_v13 }
 0x130   :  { %720 = vst [vmem:[%s1259_s3 + $0x8] sm:$0xff] %v816_v12 }

// kernel: betavae_forward.15
= control target key start
LH: loop header
LB: loop body
LE: loop exit
PB: predicated region body
PF: predicated region fallthrough
CT: control target
= control target key end

     0   :  { %vm558_vm0 = vcmask 523264   ;;  %s1733_s1 = inlined_call_operand.vmem [shape: bf16[576,128], index: 1, kind: input, shape index: {}]   ;;  %s1734_s0 = inlined_call_operand.vmem [shape: bf16[128,576], index: 0, kind: input, shape index: {}]   ;;  %s1735_s2 = inlined_call_operand.vmem [shape: f32[1,128], index: 2, kind: input, shape index: {}]   ;;  %s1736_s3 = inlined_call_operand.vmem [shape: bf16[128,128], index: 3, kind: output, shape index: {}]  }
   0x1   :  { %v1310_v0 = vld [vmem:[%s1733_s1 + $0x40] sm:$0xff]   ;;  %v1314_v4 = vld [vmem:[%s1733_s1 + $0x48] sm:$0xff]   ;;  %v1318_v8 = vld [vmem:[%s1733_s1 + $0x50] sm:$0xff]  }
   0x2   :  { %v1311_v1 = vld [vmem:[%s1733_s1 + $0xc0] sm:$0xff]   ;;  %1138 = vmatprep.subr.bf16.mxu0 %v1310_v0  ;;  %v1315_v5 = vld [vmem:[%s1733_s1 + $0xc8] sm:$0xff]   ;;  %v1319_v9 = vld [vmem:[%s1733_s1 + $0xd0] sm:$0xff]  }
   0x3   :  { %v1312_v2 = vld [vmem:[%s1733_s1] sm:$0xff]   ;;  %1202 = vmatprep.subr.bf16.mxu1 %v1311_v1  ;;  %v1316_v6 = vld [vmem:[%s1733_s1 + $0x8] sm:$0xff]   ;;  %v1320_v10 = vld [vmem:[%s1733_s1 + $0x10] sm:$0xff]  }
   0x4   :  { %v1313_v3 = vld [vmem:[%s1733_s1 + $0x80] sm:$0xff]   ;;  %1139 = vmatpush3.bf16.msra.mxu0 %v1312_v2  ;;  %v1317_v7 = vld [vmem:[%s1733_s1 + $0x88] sm:$0xff]   ;;  %v1321_v11 = vld [vmem:[%s1733_s1 + $0x90] sm:$0xff]  }
   0x5   :  { %1203 = vmatpush3.bf16.msra.mxu1 %v1313_v3  ;;  %1140 = vmatprep.subr.bf16.mxu0 %v1314_v4  ;;  %v1322_v12 = vld [vmem:[%s1733_s1 + $0x58] sm:$0xff]   ;;  %v1326_v16 = vld [vmem:[%s1733_s1 + $0x60] sm:$0xff]   ;;  %v1330_v20 = vld [vmem:[%s1733_s1 + $0x68] sm:$0xff]  }
   0x6   :  { %1204 = vmatprep.subr.bf16.mxu1 %v1315_v5  ;;  %v1323_v13 = vld [vmem:[%s1733_s1 + $0xd8] sm:$0xff]   ;;  %v1327_v17 = vld [vmem:[%s1733_s1 + $0xe0] sm:$0xff]   ;;  %v1331_v21 = vld [vmem:[%s1733_s1 + $0xe8] sm:$0xff]  }
   0x7   :  { %v1324_v14 = vld [vmem:[%s1733_s1 + $0x18] sm:$0xff]   ;;  %v1328_v18 = vld [vmem:[%s1733_s1 + $0x20] sm:$0xff]   ;;  %v1332_v22 = vld [vmem:[%s1733_s1 + $0x28] sm:$0xff]  }
   0x8   :  { %1141 = vmatpush3.bf16.msra.mxu0 %v1316_v6  ;;  %v1325_v15 = vld [vmem:[%s1733_s1 + $0x98] sm:$0xff]   ;;  %v1329_v19 = vld [vmem:[%s1733_s1 + $0xa0] sm:$0xff]   ;;  %v1333_v23 = vld [vmem:[%s1733_s1 + $0xa8] sm:$0xff]  }
   0x9   :  { %1205 = vmatpush3.bf16.msra.mxu1 %v1317_v7  ;;  %1142 = vmatprep.subr.bf16.mxu0 %v1318_v8  ;;  %v1334_v24 = vld [vmem:[%s1733_s1 + $0x70] sm:$0xff]   ;;  %v1338_v28 = vld [vmem:[%s1733_s1 + $0x78] sm:$0xff]   ;;  %v1347_v35 = vld [vmem:[%s1734_s0 + $0xc] ss:$20 sps:$4 sm:$0xff]  }
   0xa   :  { %1206 = vmatprep.subr.bf16.mxu1 %v1319_v9  ;;  %v1335_v25 = vld [vmem:[%s1733_s1 + $0xf0] sm:$0xff]   ;;  %v1339_v29 = vld [vmem:[%s1733_s1 + $0xf8] sm:$0xff]   ;;  %v1348_v36 = vld [vmem:[%s1733_s1 + $0x100] sm:$0xff]   ;;  %712 = vmatprep.mubr.bf16.mxu1 %v1347_v35 }
   0xb   :  { %v1336_v26 = vld [vmem:[%s1733_s1 + $0x30] sm:$0xff]   ;;  %v1340_v30 = vld [vmem:[%s1733_s1 + $0x38] sm:$0xff]   ;;  %v1349_v37 = vld [vmem:[%s1734_s0 + $0x2c] ss:$20 sps:$4 sm:$0xff]  }
   0xc   :  { %1143 = vmatpush3.bf16.msra.mxu0 %v1320_v10  ;;  %v1337_v27 = vld [vmem:[%s1733_s1 + $0xb0] sm:$0xff]   ;;  %v1341_v31 = vld [vmem:[%s1733_s1 + $0xb8] sm:$0xff]   ;;  %v1361_v42 = vld [vmem:[%s1733_s1 + $0x108] sm:$0xff]  }
   0xd   :  { %1207 = vmatpush3.bf16.msra.mxu1 %v1321_v11  ;;  %1144 = vmatprep.subr.bf16.mxu0 %v1322_v12  ;;  %v1342_v32 = vld [vmem:[%s1734_s0] ss:$20 sps:$4 sm:$0xff]   ;;  %v1344_v33 = vld [vmem:[%s1734_s0 + $0x4] ss:$20 sps:$4 sm:$0xff]   ;;  %v1345_v34 = vld [vmem:[%s1734_s0 + $0x8] ss:$20 sps:$4 sm:$0xff]  }
   0xe   :  { %1208 = vmatprep.subr.bf16.mxu1 %v1323_v13  ;;  %615 = vmatprep.mubr.bf16.mxu0 %v1344_v33  ;;  %v1351_v38 = vld [vmem:[%s1734_s0 + $0x34] ss:$20 sps:$4 sm:$0xff]   ;;  %v1354_v40 = vld [vmem:[%s1734_s0 + $0x30] ss:$20 sps:$4 sm:$0xff]   ;;  %v1360_v45 = vld [vmem:[%s1734_s0 + $0x58] ss:$20 sps:$4 sm:$0xff]  }
   0xf   :  { %v1353_v39 = vld [vmem:[%s1734_s0 + $0x28] ss:$20 sps:$4 sm:$0xff]   ;;  %v1359_v44 = vld [vmem:[%s1734_s0 + $0x50] ss:$20 sps:$4 sm:$0xff]   ;;  %v1366_v50 = vld [vmem:[%s1734_s0 + $0x78] ss:$20 sps:$4 sm:$0xff]  }
  0x10   :  { %1145 = vmatpush3.bf16.msra.mxu0 %v1324_v14  ;;  %v1355_v41 = vld [vmem:[%s1734_s0 + $0x54] ss:$20 sps:$4 sm:$0xff]   ;;  %v1357_v43 = vld [vmem:[%s1734_s0 + $0x5c] ss:$20 sps:$4 sm:$0xff]   ;;  %v1364_v48 = vld [vmem:[%s1734_s0 + $0x84] ss:$20 sps:$4 sm:$0xff]  }
  0x11   :  { %1209 = vmatpush3.bf16.msra.mxu1 %v1325_v15  ;;  %1146 = vmatprep.subr.bf16.mxu0 %v1326_v16  ;;  %v1374_v46 = vld [vmem:[%s1733_s1 + $0x110] sm:$0xff]   ;;  %v1387_v49 = vld [vmem:[%s1733_s1 + $0x118] sm:$0xff]   ;;  %v1370_v53 = vld [vmem:[%s1734_s0 + $0xac] ss:$20 sps:$4 sm:$0xff]  }
  0x12   :  { %1210 = vmatprep.subr.bf16.mxu1 %v1327_v17  ;;  %v1362_v47 = vld [vmem:[%s1734_s0 + $0x7c] ss:$20 sps:$4 sm:$0xff]   ;;  %v1367_v51 = vld [vmem:[%s1734_s0 + $0x80] ss:$20 sps:$4 sm:$0xff]   ;;  %v1368_v52 = vld [vmem:[%s1734_s0 + $0xa4] ss:$20 sps:$4 sm:$0xff]  }
  0x13   :  { %v1372_v54 = vld [vmem:[%s1734_s0 + $0xa0] ss:$20 sps:$4 sm:$0xff]   ;;  %v1373_v55 = vld [vmem:[%s1734_s0 + $0xa8] ss:$20 sps:$4 sm:$0xff]   ;;  %v1380_v59 = vld [vmem:[%s1734_s0 + $0xd0] ss:$20 sps:$4 sm:$0xff]  }
  0x14   :  { %1147 = vmatpush3.bf16.msra.mxu0 %v1328_v18  ;;  %v1375_v56 = vld [vmem:[%s1734_s0 + $0xcc] ss:$20 sps:$4 sm:$0xff]   ;;  %v1377_v57 = vld [vmem:[%s1734_s0 + $0xd4] ss:$20 sps:$4 sm:$0xff]   ;;  %v1383_v61 = vld [vmem:[%s1734_s0 + $0xfc] ss:$20 sps:$4 sm:$0xff]  }
  0x15   :  { %1211 = vmatpush3.bf16.msra.mxu1 %v1329_v19  ;;  %1148 = vmatprep.subr.bf16.mxu0 %v1330_v20  ;;  %v1379_v58 = vld [vmem:[%s1734_s0 + $0xc8] ss:$20 sps:$4 sm:$0xff]   ;;  %v1385_v62 = vld [vmem:[%s1734_s0 + $0xf0] ss:$20 sps:$4 sm:$0xff]   ;;  %v1386_v63 = vld [vmem:[%s1734_s0 + $0xf8] ss:$20 sps:$4 sm:$0xff]  }
  0x16   :  { %1212 = vmatprep.subr.bf16.mxu1 %v1331_v21  ;;  %v1381_v60 = vld [vmem:[%s1734_s0 + $0xf4] ss:$20 sps:$4 sm:$0xff]   ;;  %v1388_v0 = vld [vmem:[%s1734_s0 + $0x11c] ss:$20 sps:$4 sm:$0xff]   ;;  %v1390_v1 = vld [vmem:[%s1734_s0 + $0x124] ss:$20 sps:$4 sm:$0xff]  }
  0x17   :  { %v1392_v2 = vld [vmem:[%s1734_s0 + $0x118] ss:$20 sps:$4 sm:$0xff]   ;;  %v1393_v3 = vld [vmem:[%s1734_s0 + $0x120] ss:$20 sps:$4 sm:$0xff]   ;;  %v1394_v4 = vld [vmem:[%s1734_s0 + $0x10] ss:$20 sps:$4 sm:$0xff]  }
  0x18   :  { %1149 = vmatpush3.bf16.msra.mxu0 %v1332_v22  ;;  %v1395_v5 = vld [vmem:[%s1734_s0 + $0xb0] ss:$20 sps:$4 sm:$0xff]   ;;  %v1396_v6 = vld [vmem:[%s1734_s0 + $0x38] ss:$20 sps:$4 sm:$0xff]   ;;  %v1398_v8 = vld [vmem:[%s1734_s0 + $0x60] ss:$20 sps:$4 sm:$0xff]  }
  0x19   :  { %1213 = vmatpush3.bf16.msra.mxu1 %v1333_v23  ;;  %1150 = vmatprep.subr.bf16.mxu0 %v1334_v24  ;;  %v1397_v7 = vld [vmem:[%s1734_s0 + $0xd8] ss:$20 sps:$4 sm:$0xff]   ;;  %v1399_v9 = vld [vmem:[%s1734_s0 + $0x100] ss:$20 sps:$4 sm:$0xff]   ;;  %v1400_v10 = vld [vmem:[%s1734_s0 + $0x88] ss:$20 sps:$4 sm:$0xff]  }
  0x1a   :  { %1214 = vmatprep.subr.bf16.mxu1 %v1335_v25  ;;  %v1401_v11 = vld [vmem:[%s1734_s0 + $0x128] ss:$20 sps:$4 sm:$0xff]   ;;  %v1661_v14 = vld [vmem:[%s1735_s2] ss:$0 sm:$0xff] }
  0x1c   :  { %1151 = vmatpush3.bf16.msra.mxu0 %v1336_v26 }
  0x1d   :  { %1215 = vmatpush3.bf16.msra.mxu1 %v1337_v27  ;;  %1152 = vmatprep.subr.bf16.mxu0 %v1338_v28 }
  0x1e   :  { %1216 = vmatprep.subr.bf16.mxu1 %v1339_v29 }
  0x20   :  { %1153 = vmatpush3.bf16.msra.mxu0 %v1340_v30 }
  0x21   :  { %1217 = vmatpush3.bf16.msra.mxu1 %v1341_v31  ;;  %1278 = vmatprep.subr.bf16.mxu0 %v1348_v36 }
  0x22   :  { %1302 = vmatprep.subr.bf16.mxu1 %v1348_v36 }
  0x23   :  { %616 = vmatmul.mubr.bf16.vlgmr.msra.gmra.mrb[0].mxu0 %v1342_v32 }
  0x24   :  { %713 = vmatmul.mubr.bf16.vlgmr.msra.gmra.mrb[0].mxu1 %v1345_v34  ;;  %1279 = vmatpush3.bf16.msra.mxu0 %v1348_v36 }
  0x25   :  { %1306 = vmatpush3.bf16.msra.mxu1 %v1348_v36  ;;  %623 = vmatprep.mubr.bf16.mxu0 %v1349_v37 }
  0x26   :  { %720 = vmatprep.mubr.bf16.mxu1 %v1351_v38  ;;  %1280 = vmatprep.subr.bf16.mxu0 %v1361_v42 }
  0x27   :  { %1303 = vmatprep.subr.bf16.mxu1 %v1361_v42 }
  0x28   :  { %1281 = vmatpush3.bf16.msra.mxu0 %v1361_v42 }
  0x29   :  { %1307 = vmatpush3.bf16.msra.mxu1 %v1361_v42  ;;  %1282 = vmatprep.subr.bf16.mxu0 %v1374_v46 }
  0x2a   :  { %1304 = vmatprep.subr.bf16.mxu1 %v1374_v46 }
  0x2b   :  { %624 = vmatmul.mubr.bf16.gmra.mrb[4].mxu0 %v1353_v39 }
  0x2c   :  { %721 = vmatmul.mubr.bf16.gmra.mrb[4].mxu1 %v1354_v40  ;;  %631 = vmatprep.mubr.bf16.mxu0 %v1355_v41 }
  0x2d   :  { %728 = vmatprep.mubr.bf16.mxu1 %v1357_v43  ;;  %1283 = vmatpush3.bf16.msra.mxu0 %v1374_v46 }
  0x2e   :  { %1308 = vmatpush3.bf16.msra.mxu1 %v1374_v46  ;;  %1284 = vmatprep.subr.bf16.mxu0 %v1387_v49 }
  0x2f   :  { %1305 = vmatprep.subr.bf16.mxu1 %v1387_v49 }
  0x31   :  { %1285 = vmatpush3.bf16.msra.mxu0 %v1387_v49 }
  0x32   :  { %1309 = vmatpush3.bf16.msra.mxu1 %v1387_v49 }
  0x33   :  { %632 = vmatmul.mubr.bf16.gmra.mrb[8].mxu0 %v1359_v44 }
  0x34   :  { %729 = vmatmul.mubr.bf16.gmra.mrb[8].mxu1 %v1360_v45  ;;  %639 = vmatprep.mubr.bf16.mxu0 %v1362_v47 }
  0x35   :  { %736 = vmatprep.mubr.bf16.mxu1 %v1364_v48 }
  0x3b   :  { %640 = vmatmul.mubr.bf16.gmra.mrb[12].mxu0 %v1366_v50 }
  0x3c   :  { %737 = vmatmul.mubr.bf16.gmra.mrb[12].mxu1 %v1367_v51  ;;  %647 = vmatprep.mubr.bf16.mxu0 %v1368_v52 }
  0x3d   :  { %744 = vmatprep.mubr.bf16.mxu1 %v1370_v53 }
  0x43   :  { %648 = vmatmul.mubr.bf16.gmra.mrb[16].mxu0 %v1372_v54 }
  0x44   :  { %745 = vmatmul.mubr.bf16.gmra.mrb[16].mxu1 %v1373_v55  ;;  %655 = vmatprep.mubr.bf16.mxu0 %v1375_v56 }
  0x45   :  { %752 = vmatprep.mubr.bf16.mxu1 %v1377_v57 }
  0x4b   :  { %656 = vmatmul.mubr.bf16.gmra.mrb[20].mxu0 %v1379_v58 }
  0x4c   :  { %753 = vmatmul.mubr.bf16.gmra.mrb[20].mxu1 %v1380_v59  ;;  %663 = vmatprep.mubr.bf16.mxu0 %v1381_v60 }
  0x4d   :  { %760 = vmatprep.mubr.bf16.mxu1 %v1383_v61 }
  0x53   :  { %664 = vmatmul.mubr.bf16.gmra.mrb[24].mxu0 %v1385_v62 }
  0x54   :  { %761 = vmatmul.mubr.bf16.gmra.mrb[24].mxu1 %v1386_v63  ;;  %671 = vmatprep.mubr.bf16.mxu0 %v1388_v0 }
  0x55   :  { %768 = vmatprep.mubr.bf16.mxu1 %v1390_v1 }
  0x5b   :  { %672 = vmatmul.mubr.bf16.gmra.mrb[28].mxu0 %v1392_v2 }
  0x5c   :  { %769 = vmatmul.mubr.bf16.gmra.mrb[28].mxu1 %v1393_v3  ;;  %1286 = vmatprep.mubr.msk.bf16.mxu0 %vm558_vm0, %v1394_v4 }
  0x5d   :  { %1294 = vmatprep.mubr.msk.bf16.mxu1 %vm558_vm0, %v1395_v5 }
  0x63   :  { %1287 = vmatmul.mubr.msk.bf16.vlgmr.msra.gmra.mrb[32].mxu0 %vm558_vm0, %v1396_v6 }
  0x64   :  { %1295 = vmatmul.mubr.msk.bf16.vlgmr.msra.gmra.mrb[32].mxu1 %vm558_vm0, %v1397_v7  ;;  %1290 = vmatprep.mubr.msk.bf16.mxu0 %vm558_vm0, %v1398_v8 }
  0x65   :  { %1298 = vmatprep.mubr.msk.bf16.mxu1 %vm558_vm0, %v1399_v9 }
  0x6b   :  { %1291 = vmatmul.mubr.msk.bf16.gmra.mrb[36].mxu0 %vm558_vm0, %v1400_v10 }
  0x6c   :  { %1299 = vmatmul.mubr.msk.bf16.gmra.mrb[36].mxu1 %vm558_vm0, %v1401_v11 }
  0xf6   :  { %v1154_v12 = vpop.f32.mrb[0].mxu0 }
  0xf7   :  { %v1218_v13 = vpop.f32.mrb[0].mxu1  ;;  %v1155_v15 = vpop.f32.mrb[1].mxu0 }
  0xf8   :  { %v1156_v16 = vadd.f32 %v1155_v15, %v1154_v12  ;;  %v1219_v17 = vpop.f32.mrb[1].mxu1  ;;  %v1157_v18 = vpop.f32.mrb[2].mxu0 }
  0xf9   :  { %v1220_v19 = vadd.f32 %v1219_v17, %v1218_v13  ;;  %v1221_v20 = vpop.f32.mrb[2].mxu1  ;;  %v1158_v21 = vpop.f32.mrb[3].mxu0 }
  0xfa   :  { %v618_v22 = vadd.f32 %v1156_v16, %v1661_v14  ;;  %v1159_v23 = vadd.f32 %v1158_v21, %v1157_v18  ;;  %v1222_v24 = vpop.f32.mrb[3].mxu1 }
  0xfb   :  { %v1223_v25 = vadd.f32 %v1222_v24, %v1221_v20 }
  0xfc   :  { %v621_v26 = vadd.f32 %v1159_v23, %v1661_v14  ;;  %v1665_v27 = vadd.f32 %v1220_v19, %v618_v22 }
  0xfe   :  { %v1160_v28 = vpop.f32.mrb[4].mxu0  ;;  %v1667_v29 = vadd.f32 %v1223_v25, %v621_v26 }
  0xff   :  { %v1224_v30 = vpop.f32.mrb[4].mxu1  ;;  %v1161_v31 = vpop.f32.mrb[5].mxu0 }
 0x100   :  { %v1162_v32 = vadd.f32 %v1161_v31, %v1160_v28  ;;  %v1225_v33 = vpop.f32.mrb[5].mxu1  ;;  %v1163_v34 = vpop.f32.mrb[6].mxu0 }
 0x101   :  { %v1226_v35 = vadd.f32 %v1225_v33, %v1224_v30  ;;  %v1227_v36 = vpop.f32.mrb[6].mxu1  ;;  %v1164_v37 = vpop.f32.mrb[7].mxu0 }
 0x102   :  { %v626_v38 = vadd.f32 %v1162_v32, %v1661_v14  ;;  %v1165_v39 = vadd.f32 %v1164_v37, %v1163_v34  ;;  %v1228_v40 = vpop.f32.mrb[7].mxu1 }
 0x103   :  { %v1229_v41 = vadd.f32 %v1228_v40, %v1227_v36 }
 0x104   :  { %v629_v42 = vadd.f32 %v1165_v39, %v1661_v14  ;;  %v1671_v43 = vadd.f32 %v1226_v35, %v626_v38 }
 0x106   :  { %v1166_v44 = vpop.f32.mrb[8].mxu0  ;;  %v1673_v45 = vadd.f32 %v1229_v41, %v629_v42 }
 0x107   :  { %v1230_v46 = vpop.f32.mrb[8].mxu1  ;;  %v1167_v47 = vpop.f32.mrb[9].mxu0 }
 0x108   :  { %v1168_v48 = vadd.f32 %v1167_v47, %v1166_v44  ;;  %v1231_v49 = vpop.f32.mrb[9].mxu1  ;;  %v1169_v50 = vpop.f32.mrb[10].mxu0 }
 0x109   :  { %v1232_v51 = vadd.f32 %v1231_v49, %v1230_v46  ;;  %v1233_v52 = vpop.f32.mrb[10].mxu1  ;;  %v1170_v53 = vpop.f32.mrb[11].mxu0 }
 0x10a   :  { %v634_v54 = vadd.f32 %v1168_v48, %v1661_v14  ;;  %v1171_v55 = vadd.f32 %v1170_v53, %v1169_v50  ;;  %v1234_v56 = vpop.f32.mrb[11].mxu1 }
 0x10b   :  { %v1235_v57 = vadd.f32 %v1234_v56, %v1233_v52 }
 0x10c   :  { %v637_v58 = vadd.f32 %v1171_v55, %v1661_v14  ;;  %v1677_v59 = vadd.f32 %v1232_v51, %v634_v54 }
 0x10e   :  { %v1172_v60 = vpop.f32.mrb[12].mxu0  ;;  %v1679_v61 = vadd.f32 %v1235_v57, %v637_v58 }
 0x10f   :  { %v1236_v62 = vpop.f32.mrb[12].mxu1  ;;  %v1173_v63 = vpop.f32.mrb[13].mxu0 }
 0x110   :  { %v1174_v0 = vadd.f32 %v1173_v63, %v1172_v60  ;;  %v1237_v1 = vpop.f32.mrb[13].mxu1  ;;  %v1175_v2 = vpop.f32.mrb[14].mxu0 }
 0x111   :  { %v1238_v3 = vadd.f32 %v1237_v1, %v1236_v62  ;;  %v1239_v4 = vpop.f32.mrb[14].mxu1  ;;  %v1176_v5 = vpop.f32.mrb[15].mxu0 }
 0x112   :  { %v642_v6 = vadd.f32 %v1174_v0, %v1661_v14  ;;  %v1177_v7 = vadd.f32 %v1176_v5, %v1175_v2  ;;  %v1240_v8 = vpop.f32.mrb[15].mxu1 }
 0x113   :  { %v1241_v9 = vadd.f32 %v1240_v8, %v1239_v4 }
 0x114   :  { %v645_v10 = vadd.f32 %v1177_v7, %v1661_v14  ;;  %v1683_v11 = vadd.f32 %v1238_v3, %v642_v6 }
 0x116   :  { %v1178_v12 = vpop.f32.mrb[16].mxu0  ;;  %v1685_v13 = vadd.f32 %v1241_v9, %v645_v10 }
 0x117   :  { %v1242_v15 = vpop.f32.mrb[16].mxu1  ;;  %v1179_v16 = vpop.f32.mrb[17].mxu0 }
 0x118   :  { %v1180_v17 = vadd.f32 %v1179_v16, %v1178_v12  ;;  %v1243_v18 = vpop.f32.mrb[17].mxu1  ;;  %v1181_v19 = vpop.f32.mrb[18].mxu0 }
 0x119   :  { %v1244_v20 = vadd.f32 %v1243_v18, %v1242_v15  ;;  %v1245_v21 = vpop.f32.mrb[18].mxu1  ;;  %v1182_v22 = vpop.f32.mrb[19].mxu0 }
 0x11a   :  { %v650_v23 = vadd.f32 %v1180_v17, %v1661_v14  ;;  %v1183_v24 = vadd.f32 %v1182_v22, %v1181_v19  ;;  %v1246_v25 = vpop.f32.mrb[19].mxu1 }
 0x11b   :  { %v1247_v26 = vadd.f32 %v1246_v25, %v1245_v21 }
 0x11c   :  { %v653_v28 = vadd.f32 %v1183_v24, %v1661_v14  ;;  %v747_v30 = vadd.f32 %v1244_v20, %v650_v23 }
 0x11e   :  { %v1184_v31 = vpop.f32.mrb[20].mxu0  ;;  %v1689_v32 = vadd.f32 %v1247_v26, %v653_v28 }
 0x11f   :  { %v1248_v33 = vpop.f32.mrb[20].mxu1  ;;  %v1185_v34 = vpop.f32.mrb[21].mxu0 }
 0x120   :  { %v1186_v35 = vadd.f32 %v1185_v34, %v1184_v31  ;;  %v1249_v36 = vpop.f32.mrb[21].mxu1  ;;  %v1187_v37 = vpop.f32.mrb[22].mxu0 }
 0x121   :  { %v1250_v38 = vadd.f32 %v1249_v36, %v1248_v33  ;;  %v1251_v39 = vpop.f32.mrb[22].mxu1  ;;  %v1188_v40 = vpop.f32.mrb[23].mxu0 }
 0x122   :  { %v658_v41 = vadd.f32 %v1186_v35, %v1661_v14  ;;  %v1189_v42 = vadd.f32 %v1188_v40, %v1187_v37  ;;  %v1252_v44 = vpop.f32.mrb[23].mxu1 }
 0x123   :  { %v1253_v46 = vadd.f32 %v1252_v44, %v1251_v39 }
 0x124   :  { %v661_v47 = vadd.f32 %v1189_v42, %v1661_v14  ;;  %v755_v48 = vadd.f32 %v1250_v38, %v658_v41 }
 0x126   :  { %v1190_v49 = vpop.f32.mrb[24].mxu0  ;;  %v758_v50 = vadd.f32 %v1253_v46, %v661_v47 }
 0x127   :  { %v1254_v51 = vpop.f32.mrb[24].mxu1  ;;  %v1191_v52 = vpop.f32.mrb[25].mxu0 }
 0x128   :  { %v1192_v53 = vadd.f32 %v1191_v52, %v1190_v49  ;;  %v1255_v54 = vpop.f32.mrb[25].mxu1  ;;  %v1193_v55 = vpop.f32.mrb[26].mxu0 }
 0x129   :  { %v1256_v56 = vadd.f32 %v1255_v54, %v1254_v51  ;;  %v1257_v57 = vpop.f32.mrb[26].mxu1  ;;  %v1194_v58 = vpop.f32.mrb[27].mxu0 }
 0x12a   :  { %v666_v60 = vadd.f32 %v1192_v53, %v1661_v14  ;;  %v1195_v62 = vadd.f32 %v1194_v58, %v1193_v55  ;;  %v1258_v63 = vpop.f32.mrb[27].mxu1 }
 0x12b   :  { %v1259_v0 = vadd.f32 %v1258_v63, %v1257_v57 }
 0x12c   :  { %v669_v1 = vadd.f32 %v1195_v62, %v1661_v14  ;;  %v763_v2 = vadd.f32 %v1256_v56, %v666_v60 }
 0x12e   :  { %v1196_v3 = vpop.f32.mrb[28].mxu0  ;;  %v1695_v4 = vadd.f32 %v1259_v0, %v669_v1 }
 0x12f   :  { %v1260_v5 = vpop.f32.mrb[28].mxu1  ;;  %v1197_v6 = vpop.f32.mrb[29].mxu0 }
 0x130   :  { %v1198_v7 = vadd.f32 %v1197_v6, %v1196_v3  ;;  %v1261_v8 = vpop.f32.mrb[29].mxu1  ;;  %v1199_v9 = vpop.f32.mrb[30].mxu0 }
 0x131   :  { %v1262_v10 = vadd.f32 %v1261_v8, %v1260_v5  ;;  %v1263_v12 = vpop.f32.mrb[30].mxu1  ;;  %v1200_v15 = vpop.f32.mrb[31].mxu0 }
 0x132   :  { %v674_v16 = vadd.f32 %v1198_v7, %v1661_v14  ;;  %v1201_v17 = vadd.f32 %v1200_v15, %v1199_v9  ;;  %v1264_v18 = vpop.f32.mrb[31].mxu1 }
 0x133   :  { %v1265_v19 = vadd.f32 %v1264_v18, %v1263_v12 }
 0x134   :  { %v677_v20 = vadd.f32 %v1201_v17, %v1661_v14  ;;  %v771_v21 = vadd.f32 %v1262_v10, %v674_v16 }
 0x136   :  { %v1288_v22 = vpop.f32.mrb[32].mxu0  ;;  %v774_v23 = vadd.f32 %v1265_v19, %v677_v20 }
 0x137   :  { %v820_v24 = vadd.f32 %v1288_v22, %v1671_v43  ;;  %v1296_v25 = vpop.f32.mrb[32].mxu1  ;;  %v811_v26 = vpop.f32.mrb[33].mxu0 }
 0x138   :  { %v852_v28 = vadd.f32 %v1296_v25, %v755_v48  ;;  %v812_v31 = vadd.f32 %v811_v26, %v1665_v27  ;;  %v843_v33 = vpop.f32.mrb[33].mxu1  ;;  %v1289_v34 = vpop.f32.mrb[34].mxu0 }
 0x139   :  { %v844_v35 = vadd.f32 %v843_v33, %v747_v30  ;;  %v823_v36 = vadd.f32 %v1289_v34, %v1673_v45  ;;  %v1297_v37 = vpop.f32.mrb[34].mxu1  ;;  %v814_v38 = vpop.f32.mrb[35].mxu0  ;;  %v876_v41 = vmax.f32 %v820_v24, 0.0 }
 0x13a   :  { %v855_v39 = vadd.f32 %v1297_v37, %v758_v50  ;;  %v815_v14 = vadd.f32 %v814_v38, %v1667_v29  ;;  %v846_v40 = vpop.f32.mrb[35].mxu1  ;;  %v884_v44 = vmax.f32 %v852_v28, 0.0  ;;  %v874_v46 = vmax.f32 %v812_v31, 0.0 }
 0x13b   :  { %v877_v42 = vmax.f32 %v823_v36, 0.0  ;;  %v847_v43 = vadd.f32 %v846_v40, %v1689_v32  ;;  %v882_v27 = vmax.f32 %v844_v35, 0.0 }
 0x13c   :  { %v885_v47 = vmax.f32 %v855_v39, 0.0  ;;  %v875_v48 = vmax.f32 %v815_v14, 0.0 }
 0x13d   :  { %v1099_v49 = vpack.c.bf16 %v877_v42, %v876_v41  ;;  %v883_v51 = vmax.f32 %v847_v43, 0.0 }
 0x13e   :  { %v1119_v30 = vpack.c.bf16 %v885_v47, %v884_v44  ;;  %v1094_v52 = vpack.c.bf16 %v875_v48, %v874_v46  ;;  %v1292_v45 = vpop.f32.mrb[36].mxu0 }
 0x13f   :  { %1131 = vst [vmem:[%s1736_s3 + $0x8] sm:$0xff] %v1099_v49   ;;  %v1114_v29 = vpack.c.bf16 %v883_v51, %v882_v27  ;;  %v836_v50 = vadd.f32 %v1292_v45, %v1683_v11  ;;  %v1300_v53 = vpop.f32.mrb[36].mxu1  ;;  %v827_v54 = vpop.f32.mrb[37].mxu0 }
 0x140   :  { %1135 = vst [vmem:[%s1736_s3 + $0x28] sm:$0xff] %v1119_v30   ;;  %1095 = vst [vmem:[%s1736_s3] sm:$0xff] %v1094_v52   ;;  %v868_v32 = vadd.f32 %v1300_v53, %v771_v21  ;;  %v828_v55 = vadd.f32 %v827_v54, %v1677_v59  ;;  %v859_v56 = vpop.f32.mrb[37].mxu1  ;;  %v1293_v57 = vpop.f32.mrb[38].mxu0 }
 0x141   :  { %1134 = vst [vmem:[%s1736_s3 + $0x20] sm:$0xff] %v1114_v29   ;;  %v860_v11 = vadd.f32 %v859_v56, %v763_v2  ;;  %v839_v58 = vadd.f32 %v1293_v57, %v1685_v13  ;;  %v1301_v60 = vpop.f32.mrb[38].mxu1  ;;  %v830_v62 = vpop.f32.mrb[39].mxu0  ;;  %v880_v3 = vmax.f32 %v836_v50, 0.0 }
 0x142   :  { %v871_v63 = vadd.f32 %v1301_v60, %v774_v23  ;;  %v831_v0 = vadd.f32 %v830_v62, %v1679_v61  ;;  %v862_v1 = vpop.f32.mrb[39].mxu1  ;;  %v888_v59 = vmax.f32 %v868_v32, 0.0  ;;  %v878_v7 = vmax.f32 %v828_v55, 0.0 }
 0x143   :  { %v881_v5 = vmax.f32 %v839_v58, 0.0  ;;  %v863_v6 = vadd.f32 %v862_v1, %v1695_v4  ;;  %v886_v10 = vmax.f32 %v860_v11, 0.0 }
 0x144   :  { %v889_v8 = vmax.f32 %v871_v63, 0.0  ;;  %v879_v9 = vmax.f32 %v831_v0, 0.0 }
 0x145   :  { %v1109_v12 = vpack.c.bf16 %v881_v5, %v880_v3  ;;  %v887_v15 = vmax.f32 %v863_v6, 0.0 }
 0x146   :  { %v1129_v2 = vpack.c.bf16 %v889_v8, %v888_v59  ;;  %v1104_v16 = vpack.c.bf16 %v879_v9, %v878_v7 }
 0x147   :  { %1133 = vst [vmem:[%s1736_s3 + $0x18] sm:$0xff] %v1109_v12   ;;  %v1124_v13 = vpack.c.bf16 %v887_v15, %v886_v10 }
 0x148   :  { %1137 = vst [vmem:[%s1736_s3 + $0x38] sm:$0xff] %v1129_v2   ;;  %1132 = vst [vmem:[%s1736_s3 + $0x10] sm:$0xff] %v1104_v16  }
 0x149   :  { %1136 = vst [vmem:[%s1736_s3 + $0x30] sm:$0xff] %v1124_v13  }

// kernel: betavae_forward.16
= control target key start
LH: loop header
LB: loop body
LE: loop exit
PB: predicated region body
PF: predicated region fallthrough
CT: control target
= control target key end

     0   :  { %s1806_s12 = smov 0   ;;  %s2032_s0 = inlined_call_operand.vmem [shape: bf16[512,288], index: 0, kind: input, shape index: {}]   ;;  %s2033_s1 = inlined_call_operand.vmem [shape: bf16[288,128], index: 1, kind: input, shape index: {}]   ;;  %s2034_s2 = inlined_call_operand.vmem [shape: f32[1,128], index: 2, kind: input, shape index: {}]   ;;  %s2035_s3 = inlined_call_operand.vmem [shape: bf16[512,128], index: 3, kind: output, shape index: {}]  }
   0x1 LB: > { %s1252_s13 = sadd.s32 4294967295, %s1784_s12   ;;  %p1256_p0 = scmp.ge.s32.totalorder %s1784_s12, 1  ;;  %s1784_s12 = sphi %s1806_s12, %s13_s12  }
   0x2   : > { %p139_p1 = scmp.lt.s32.totalorder %s1784_s12, 3 }
   0x4   : > { %p140_p2 = pnand %p1256_p0, %p139_p1 }
   0x5   : > { %v1696_v0 = vld [vmem:[%s2033_s1 + $0x40] sm:$0xff] (!%p140_p2)   ;;  %s1257_s16 = sshll.u32 (!%p140_p2), %s1252_s13, 5  ;;  %v1698_v2 = vld [vmem:[%s2033_s1 + $0x48] sm:$0xff] (!%p140_p2)   ;;  %v1700_v4 = vld [vmem:[%s2033_s1 + $0x50] sm:$0xff] (!%p140_p2)   ;;  %vm633_vm0 = vcmask (!%p140_p2), 261120  }
   0x6   : > { %143 = sbr.rel (%p140_p2) target bundleno = 352 (0x160), region = 32  ;;  %v1697_v1 = vld [vmem:[%s2033_s1] sm:$0xff] (!%p140_p2)   ;;  %1505 = vmatprep.subr.bf16.mxu0 (!%p140_p2), %v1696_v0  ;;  %1671 = vmatprep.subr.bf16.mxu1 (!%p140_p2), %v1696_v0  ;;  %p165_p3 = scmp.lt.s32.totalorder (!%p140_p2), %s1257_s16, 63  ;;  %v1699_v3 = vld [vmem:[%s2033_s1 + $0x8] sm:$0xff] (!%p140_p2)   ;;  %v1701_v5 = vld [vmem:[%s2033_s1 + $0x10] sm:$0xff] (!%p140_p2)  }
   0x7   : > { %1506 = vmatpush3.bf16.msra.mxu0 (!%p140_p2), %v1697_v1  ;;  %1679 = vmatpush3.bf16.msra.mxu1 (!%p140_p2), %v1697_v1  ;;  %v1702_v6 = vld [vmem:[%s2033_s1 + $0x58] sm:$0xff] (!%p140_p2)   ;;  %v1704_v8 = vld [vmem:[%s2033_s1 + $0x60] sm:$0xff] (!%p140_p2)   ;;  %v1706_v10 = vld [vmem:[%s2033_s1 + $0x68] sm:$0xff] (!%p140_p2)  }
   0x8   : > { %1507 = vmatprep.subr.bf16.mxu0 (!%p140_p2), %v1698_v2  ;;  %1672 = vmatprep.subr.bf16.mxu1 (!%p140_p2), %v1698_v2  ;;  %v1703_v7 = vld [vmem:[%s2033_s1 + $0x18] sm:$0xff] (!%p140_p2)   ;;  %v1705_v9 = vld [vmem:[%s2033_s1 + $0x20] sm:$0xff] (!%p140_p2)   ;;  %v1707_v13 = vld [vmem:[%s2033_s1 + $0x28] sm:$0xff] (!%p140_p2)  }
   0x9   : > { %v1708_v14 = vld [vmem:[%s2033_s1 + $0x70] sm:$0xff] (!%p140_p2)   ;;  %v1710_v16 = vld [vmem:[%s2033_s1 + $0x78] sm:$0xff] (!%p140_p2)   ;;  %v1718_v18 = vld [vmem:[%s2033_s1 + $0x80] sm:$0xff] (!%p140_p2)  }
   0xa   : > { %v1709_v15 = vld [vmem:[%s2033_s1 + $0x30] sm:$0xff] (!%p140_p2)   ;;  %v1711_v17 = vld [vmem:[%s2033_s1 + $0x38] sm:$0xff] (!%p140_p2)   ;;  %v1731_v23 = vld [vmem:[%s2033_s1 + $0x88] sm:$0xff] (!%p140_p2)  }
   0xb   : > { %1508 = vmatpush3.bf16.msra.mxu0 (!%p140_p2), %v1699_v3  ;;  %1680 = vmatpush3.bf16.msra.mxu1 (!%p140_p2), %v1699_v3 }
   0xc   : > { %1509 = vmatprep.subr.bf16.mxu0 (!%p140_p2), %v1700_v4  ;;  %1673 = vmatprep.subr.bf16.mxu1 (!%p140_p2), %v1700_v4 }
   0xd   : > { %s2037_s16 = smov (!%p165_p3, %s1257_s16), 63 }
   0xe   : > { %s1687_s29 = smul.u32 12, %s2037_s16  ;;  %s1260_s5 = sshll.u32 %s2037_s16, 2 }
   0xf   : > { %1510 = vmatpush3.bf16.msra.mxu0 %v1701_v5  ;;  %1681 = vmatpush3.bf16.msra.mxu1 %v1701_v5  ;;  %s1969_s8 = scalar_lea.vmem %s2035_s3, %s1260_s5 }
  0x10   : > { %1511 = vmatprep.subr.bf16.mxu0 %v1702_v6  ;;  %1674 = vmatprep.subr.bf16.mxu1 %v1702_v6  ;;  %s1847_s9 = scalar_lea.vmem %s2032_s0, %s1687_s29 }
  0x11   : > { %v1714_v11 = vld [vmem:[%s1847_s9 + $0x4] ss:$12 sps:$4 sm:$0xff]   ;;  %v1712_v19 = vld [vmem:[%s1847_s9] ss:$12 sps:$4 sm:$0xff]   ;;  %v1719_v21 = vld [vmem:[%s1847_s9 + $0x1c] ss:$12 sps:$4 sm:$0xff]  }
  0x12   : > { %v1717_v12 = vld [vmem:[%s1847_s9 + $0x124] ss:$12 sps:$4 sm:$0xff]   ;;  %714 = vmatprep.mubr.bf16.mxu0 %v1714_v11  ;;  %v1715_v20 = vld [vmem:[%s1847_s9 + $0x120] ss:$12 sps:$4 sm:$0xff]   ;;  %v1721_v22 = vld [vmem:[%s1847_s9 + $0x13c] ss:$12 sps:$4 sm:$0xff]  }
  0x13   : > { %1512 = vmatpush3.bf16.msra.mxu0 %v1703_v7  ;;  %1682 = vmatpush3.bf16.msra.mxu1 %v1703_v7  ;;  %v1723_v24 = vld [vmem:[%s1847_s9 + $0x18] ss:$12 sps:$4 sm:$0xff]   ;;  %v1725_v26 = vld [vmem:[%s1847_s9 + $0x34] ss:$12 sps:$4 sm:$0xff]   ;;  %v1729_v28 = vld [vmem:[%s1847_s9 + $0x30] ss:$12 sps:$4 sm:$0xff]  }
  0x14   : > { %1513 = vmatprep.subr.bf16.mxu0 %v1704_v8  ;;  %1675 = vmatprep.subr.bf16.mxu1 %v1704_v8  ;;  %v1724_v25 = vld [vmem:[%s1847_s9 + $0x138] ss:$12 sps:$4 sm:$0xff]   ;;  %v1727_v27 = vld [vmem:[%s1847_s9 + $0x154] ss:$12 sps:$4 sm:$0xff]   ;;  %v1730_v29 = vld [vmem:[%s1847_s9 + $0x150] ss:$12 sps:$4 sm:$0xff]  }
  0x15   : > { %810 = vmatprep.mubr.bf16.mxu1 %v1717_v12  ;;  %v1732_v30 = vld [vmem:[%s1847_s9 + $0x4c] ss:$12 sps:$4 sm:$0xff]   ;;  %v1736_v32 = vld [vmem:[%s1847_s9 + $0x48] ss:$12 sps:$4 sm:$0xff]   ;;  %v1738_v34 = vld [vmem:[%s1847_s9 + $0x64] ss:$12 sps:$4 sm:$0xff]  }
  0x16   : > { %v1734_v31 = vld [vmem:[%s1847_s9 + $0x16c] ss:$12 sps:$4 sm:$0xff]   ;;  %v1737_v33 = vld [vmem:[%s1847_s9 + $0x168] ss:$12 sps:$4 sm:$0xff]   ;;  %v1747_v41 = vld [vmem:[%s1847_s9 + $0x50] ss:$12 sps:$4 sm:$0xff]  }
  0x17   : > { %1514 = vmatpush3.bf16.msra.mxu0 %v1705_v9  ;;  %1683 = vmatpush3.bf16.msra.mxu1 %v1705_v9  ;;  %v1740_v35 = vld [vmem:[%s1847_s9 + $0x8] ss:$12 sps:$4 sm:$0xff]   ;;  %v1741_v36 = vld [vmem:[%s1847_s9 + $0x60] ss:$12 sps:$4 sm:$0xff]   ;;  %v1745_v39 = vld [vmem:[%s1847_s9 + $0x38] ss:$12 sps:$4 sm:$0xff]  }
  0x18   : > { %1515 = vmatprep.subr.bf16.mxu0 %v1706_v10  ;;  %1676 = vmatprep.subr.bf16.mxu1 %v1706_v10  ;;  %v1742_v37 = vld [vmem:[%s1847_s9 + $0x20] ss:$12 sps:$4 sm:$0xff]   ;;  %v1743_v38 = vld [vmem:[%s1847_s9 + $0x7c] ss:$12 sps:$4 sm:$0xff]   ;;  %v1746_v40 = vld [vmem:[%s1847_s9 + $0x78] ss:$12 sps:$4 sm:$0xff]  }
  0x19   : > { %v1748_v42 = vld [vmem:[%s1847_s9 + $0x94] ss:$12 sps:$4 sm:$0xff]   ;;  %v1751_v44 = vld [vmem:[%s1847_s9 + $0x90] ss:$12 sps:$4 sm:$0xff]   ;;  %v1753_v46 = vld [vmem:[%s1847_s9 + $0xac] ss:$12 sps:$4 sm:$0xff]  }
  0x1a   : > { %v1750_v43 = vld [vmem:[%s1847_s9 + $0x68] ss:$12 sps:$4 sm:$0xff]   ;;  %v1752_v45 = vld [vmem:[%s1847_s9 + $0x80] ss:$12 sps:$4 sm:$0xff]   ;;  %v1755_v47 = vld [vmem:[%s1847_s9 + $0x98] ss:$12 sps:$4 sm:$0xff]  }
  0x1b   : > { %1516 = vmatpush3.bf16.msra.mxu0 %v1707_v13  ;;  %1684 = vmatpush3.bf16.msra.mxu1 %v1707_v13  ;;  %v1756_v48 = vld [vmem:[%s1847_s9 + $0xa8] ss:$12 sps:$4 sm:$0xff]   ;;  %v1757_v49 = vld [vmem:[%s1847_s9 + $0xb0] ss:$12 sps:$4 sm:$0xff]   ;;  %v1761_v52 = vld [vmem:[%s1847_s9 + $0xc0] ss:$12 sps:$4 sm:$0xff]  }
  0x1c   : > { %1517 = vmatprep.subr.bf16.mxu0 %v1708_v14  ;;  %1677 = vmatprep.subr.bf16.mxu1 %v1708_v14  ;;  %v1758_v50 = vld [vmem:[%s1847_s9 + $0xc4] ss:$12 sps:$4 sm:$0xff]   ;;  %v1760_v51 = vld [vmem:[%s1847_s9 + $0xc8] ss:$12 sps:$4 sm:$0xff]   ;;  %v1762_v53 = vld [vmem:[%s1847_s9 + $0xe0] ss:$12 sps:$4 sm:$0xff]  }
  0x1d   : > { %v1763_v54 = vld [vmem:[%s1847_s9 + $0xdc] ss:$12 sps:$4 sm:$0xff]   ;;  %v1765_v55 = vld [vmem:[%s1847_s9 + $0xf8] ss:$12 sps:$4 sm:$0xff]   ;;  %v1768_v58 = vld [vmem:[%s1847_s9 + $0xf4] ss:$12 sps:$4 sm:$0xff]  }
  0x1e   : > { %v1766_v56 = vld [vmem:[%s1847_s9 + $0xd8] ss:$12 sps:$4 sm:$0xff]   ;;  %v1767_v57 = vld [vmem:[%s1847_s9 + $0x110] ss:$12 sps:$4 sm:$0xff]   ;;  %v1770_v59 = vld [vmem:[%s1847_s9 + $0x128] ss:$12 sps:$4 sm:$0xff]  }
  0x1f   : > { %1518 = vmatpush3.bf16.msra.mxu0 %v1709_v15  ;;  %1685 = vmatpush3.bf16.msra.mxu1 %v1709_v15  ;;  %v1771_v60 = vld [vmem:[%s1847_s9 + $0xf0] ss:$12 sps:$4 sm:$0xff]   ;;  %v1772_v61 = vld [vmem:[%s1847_s9 + $0x140] ss:$12 sps:$4 sm:$0xff]   ;;  %v1775_v63 = vld [vmem:[%s1847_s9 + $0x158] ss:$12 sps:$4 sm:$0xff]  }
  0x20   : > { %1519 = vmatprep.subr.bf16.mxu0 %v1710_v16  ;;  %1678 = vmatprep.subr.bf16.mxu1 %v1710_v16  ;;  %v1773_v62 = vld [vmem:[%s1847_s9 + $0x10c] ss:$12 sps:$4 sm:$0xff]   ;;  %v1776_v0 = vld [vmem:[%s1847_s9 + $0x108] ss:$12 sps:$4 sm:$0xff]   ;;  %v1777_v1 = vld [vmem:[%s1847_s9 + $0x170] ss:$12 sps:$4 sm:$0xff]  }
  0x23   : > { %1520 = vmatpush3.bf16.msra.mxu0 %v1711_v17  ;;  %1686 = vmatpush3.bf16.msra.mxu1 %v1711_v17 }
  0x24   : > { %1635 = vmatprep.subr.bf16.mxu1 %v1718_v18 }
  0x26   : > { %715 = vmatmul.mubr.bf16.vlgmr.msra.gmra.mrb[0].mxu0 %v1712_v19  ;;  %811 = vmatmul.mubr.bf16.vlgmr.msra.gmra.mrb[0].mxu1 %v1715_v20 }
  0x27   : > { %1636 = vmatpush3.bf16.msra.mxu1 %v1718_v18  ;;  %722 = vmatprep.mubr.bf16.mxu0 %v1719_v21 }
  0x28   : > { %818 = vmatprep.mubr.bf16.mxu1 %v1721_v22  ;;  %1637 = vmatprep.subr.bf16.mxu1 %v1731_v23 }
  0x2b   : > { %1638 = vmatpush3.bf16.msra.mxu1 %v1731_v23 }
  0x2e   : > { %723 = vmatmul.mubr.bf16.gmra.mrb[4].mxu0 %v1723_v24  ;;  %819 = vmatmul.mubr.bf16.gmra.mrb[4].mxu1 %v1724_v25 }
  0x2f   : > { %730 = vmatprep.mubr.bf16.mxu0 %v1725_v26  ;;  %826 = vmatprep.mubr.bf16.mxu1 %v1727_v27 }
  0x36   : > { %731 = vmatmul.mubr.bf16.gmra.mrb[8].mxu0 %v1729_v28  ;;  %827 = vmatmul.mubr.bf16.gmra.mrb[8].mxu1 %v1730_v29 }
  0x37   : > { %738 = vmatprep.mubr.bf16.mxu0 %v1732_v30  ;;  %834 = vmatprep.mubr.bf16.mxu1 %v1734_v31 }
  0x3e   : > { %739 = vmatmul.mubr.bf16.gmra.mrb[12].mxu0 %v1736_v32  ;;  %835 = vmatmul.mubr.bf16.gmra.mrb[12].mxu1 %v1737_v33 }
  0x3f   : > { %746 = vmatprep.mubr.bf16.mxu0 %v1738_v34  ;;  %1639 = vmatprep.mubr.msk.bf16.mxu1 %vm633_vm0, %v1740_v35 }
  0x46   : > { %747 = vmatmul.mubr.bf16.gmra.mrb[16].mxu0 %v1741_v36  ;;  %1640 = vmatmul.mubr.msk.bf16.vlgmr.msra.gmra.mrb[16].mxu1 %vm633_vm0, %v1742_v37 }
  0x47   : > { %754 = vmatprep.mubr.bf16.mxu0 %v1743_v38  ;;  %1643 = vmatprep.mubr.msk.bf16.mxu1 %vm633_vm0, %v1745_v39 }
  0x4e   : > { %755 = vmatmul.mubr.bf16.gmra.mrb[20].mxu0 %v1746_v40  ;;  %1644 = vmatmul.mubr.msk.bf16.gmra.mrb[20].mxu1 %vm633_vm0, %v1747_v41 }
  0x4f   : > { %762 = vmatprep.mubr.bf16.mxu0 %v1748_v42  ;;  %1647 = vmatprep.mubr.msk.bf16.mxu1 %vm633_vm0, %v1750_v43 }
  0x56   : > { %763 = vmatmul.mubr.bf16.gmra.mrb[24].mxu0 %v1751_v44  ;;  %1648 = vmatmul.mubr.msk.bf16.gmra.mrb[24].mxu1 %vm633_vm0, %v1752_v45 }
  0x57   : > { %770 = vmatprep.mubr.bf16.mxu0 %v1753_v46  ;;  %1651 = vmatprep.mubr.msk.bf16.mxu1 %vm633_vm0, %v1755_v47 }
  0x5e   : > { %771 = vmatmul.mubr.bf16.gmra.mrb[28].mxu0 %v1756_v48  ;;  %1652 = vmatmul.mubr.msk.bf16.gmra.mrb[28].mxu1 %vm633_vm0, %v1757_v49 }
  0x5f   : > { %778 = vmatprep.mubr.bf16.mxu0 %v1758_v50  ;;  %1655 = vmatprep.mubr.msk.bf16.mxu1 %vm633_vm0, %v1760_v51  ;;  %v1959_v50 = vld [vmem:[%s2034_s2] ss:$0 sm:$0xff] }
  0x66   : > { %779 = vmatmul.mubr.bf16.gmra.mrb[32].mxu0 %v1761_v52  ;;  %1656 = vmatmul.mubr.msk.bf16.gmra.mrb[32].mxu1 %vm633_vm0, %v1762_v53 }
  0x67   : > { %786 = vmatprep.mubr.bf16.mxu0 %v1763_v54  ;;  %1659 = vmatprep.mubr.msk.bf16.mxu1 %vm633_vm0, %v1765_v55 }
  0x6e   : > { %787 = vmatmul.mubr.bf16.gmra.mrb[36].mxu0 %v1766_v56  ;;  %1660 = vmatmul.mubr.msk.bf16.gmra.mrb[36].mxu1 %vm633_vm0, %v1767_v57 }
  0x6f   : > { %794 = vmatprep.mubr.bf16.mxu0 %v1768_v58  ;;  %1663 = vmatprep.mubr.msk.bf16.mxu1 %vm633_vm0, %v1770_v59 }
  0x76   : > { %795 = vmatmul.mubr.bf16.gmra.mrb[40].mxu0 %v1771_v60  ;;  %1664 = vmatmul.mubr.msk.bf16.gmra.mrb[40].mxu1 %vm633_vm0, %v1772_v61 }
  0x77   : > { %802 = vmatprep.mubr.bf16.mxu0 %v1773_v62  ;;  %1667 = vmatprep.mubr.msk.bf16.mxu1 %vm633_vm0, %v1775_v63 }
  0x7e   : > { %803 = vmatmul.mubr.bf16.gmra.mrb[44].mxu0 %v1776_v0  ;;  %1668 = vmatmul.mubr.msk.bf16.gmra.mrb[44].mxu1 %vm633_vm0, %v1777_v1 }
  0xf9   : > { %v1521_v2 = vpop.f32.mrb[0].mxu0  ;;  %v1593_v3 = vpop.f32.mrb[0].mxu1 }
  0xfa   : > { %v1522_v4 = vpop.f32.mrb[1].mxu0  ;;  %v1594_v5 = vpop.f32.mrb[1].mxu1 }
  0xfb   : > { %v1523_v6 = vadd.f32 %v1522_v4, %v1521_v2  ;;  %v1524_v7 = vpop.f32.mrb[2].mxu0  ;;  %v1940_v8 = vadd.f32 %v1594_v5, %v1593_v3  ;;  %v1596_v9 = vpop.f32.mrb[2].mxu1 }
  0xfc   : > { %v1525_v10 = vpop.f32.mrb[3].mxu0  ;;  %v1597_v11 = vpop.f32.mrb[3].mxu1 }
  0xfd   : > { %v1526_v12 = vadd.f32 %v1525_v10, %v1524_v7  ;;  %v1942_v13 = vadd.f32 %v1597_v11, %v1596_v9  ;;  %v717_v54 = vadd.f32 %v1523_v6, %v1959_v50 }
  0xff   : > { %v720_v63 = vadd.f32 %v1526_v12, %v1959_v50 }
 0x101   : > { %v1527_v14 = vpop.f32.mrb[4].mxu0  ;;  %v1599_v15 = vpop.f32.mrb[4].mxu1 }
 0x102   : > { %v1528_v16 = vpop.f32.mrb[5].mxu0  ;;  %v1600_v17 = vpop.f32.mrb[5].mxu1 }
 0x103   : > { %v1529_v18 = vadd.f32 %v1528_v16, %v1527_v14  ;;  %v1530_v19 = vpop.f32.mrb[6].mxu0  ;;  %v1944_v20 = vadd.f32 %v1600_v17, %v1599_v15  ;;  %v1602_v21 = vpop.f32.mrb[6].mxu1 }
 0x104   : > { %v1531_v22 = vpop.f32.mrb[7].mxu0  ;;  %v1603_v23 = vpop.f32.mrb[7].mxu1 }
 0x105   : > { %v1532_v24 = vadd.f32 %v1531_v22, %v1530_v19  ;;  %v1946_v25 = vadd.f32 %v1603_v23, %v1602_v21  ;;  %v725_v51 = vadd.f32 %v1529_v18, %v1959_v50 }
 0x107   : > { %v728_v58 = vadd.f32 %v1532_v24, %v1959_v50 }
 0x109   : > { %v1533_v26 = vpop.f32.mrb[8].mxu0  ;;  %v1605_v27 = vpop.f32.mrb[8].mxu1 }
 0x10a   : > { %v1534_v28 = vpop.f32.mrb[9].mxu0  ;;  %v1606_v29 = vpop.f32.mrb[9].mxu1 }
 0x10b   : > { %v1535_v30 = vadd.f32 %v1534_v28, %v1533_v26  ;;  %v1536_v31 = vpop.f32.mrb[10].mxu0  ;;  %v1948_v32 = vadd.f32 %v1606_v29, %v1605_v27  ;;  %v1608_v33 = vpop.f32.mrb[10].mxu1 }
 0x10c   : > { %v1537_v34 = vpop.f32.mrb[11].mxu0  ;;  %v1609_v35 = vpop.f32.mrb[11].mxu1 }
 0x10d   : > { %v1538_v36 = vadd.f32 %v1537_v34, %v1536_v31  ;;  %v1950_v37 = vadd.f32 %v1609_v35, %v1608_v33  ;;  %v733_v16 = vadd.f32 %v1535_v30, %v1959_v50 }
 0x10f   : > { %v736_v27 = vadd.f32 %v1538_v36, %v1959_v50 }
 0x111   : > { %v1539_v38 = vpop.f32.mrb[12].mxu0  ;;  %v1611_v39 = vpop.f32.mrb[12].mxu1 }
 0x112   : > { %v1540_v40 = vpop.f32.mrb[13].mxu0  ;;  %v1612_v41 = vpop.f32.mrb[13].mxu1 }
 0x113   : > { %v1541_v42 = vadd.f32 %v1540_v40, %v1539_v38  ;;  %v1542_v43 = vpop.f32.mrb[14].mxu0  ;;  %v1952_v44 = vadd.f32 %v1612_v41, %v1611_v39  ;;  %v1614_v45 = vpop.f32.mrb[14].mxu1 }
 0x114   : > { %v1543_v46 = vpop.f32.mrb[15].mxu0  ;;  %v1615_v47 = vpop.f32.mrb[15].mxu1 }
 0x115   : > { %v1544_v48 = vadd.f32 %v1543_v46, %v1542_v43  ;;  %v1954_v49 = vadd.f32 %v1615_v47, %v1614_v45  ;;  %v741_v11 = vadd.f32 %v1541_v42, %v1959_v50 }
 0x117   : > { %v744_v21 = vadd.f32 %v1544_v48, %v1959_v50 }
 0x119   : > { %v1545_v52 = vpop.f32.mrb[16].mxu0  ;;  %v1641_v53 = vpop.f32.mrb[16].mxu1 }
 0x11a   : > { %v886_v55 = vadd.f32 %v1641_v53, %v725_v51  ;;  %v1546_v56 = vpop.f32.mrb[17].mxu0  ;;  %v877_v57 = vpop.f32.mrb[17].mxu1 }
 0x11b   : > { %v1547_v59 = vadd.f32 %v1546_v56, %v1545_v52  ;;  %v878_v60 = vadd.f32 %v877_v57, %v717_v54  ;;  %v1548_v61 = vpop.f32.mrb[18].mxu0  ;;  %v1642_v62 = vpop.f32.mrb[18].mxu1 }
 0x11c   : > { %v889_v0 = vadd.f32 %v1642_v62, %v728_v58  ;;  %v1549_v1 = vpop.f32.mrb[19].mxu0  ;;  %v880_v2 = vpop.f32.mrb[19].mxu1  ;;  %v1006_v5 = vmax.f32 %v886_v55, 0.0 }
 0x11d   : > { %v1550_v3 = vadd.f32 %v1549_v1, %v1548_v61  ;;  %v881_v4 = vadd.f32 %v880_v2, %v720_v63  ;;  %v1004_v6 = vmax.f32 %v878_v60, 0.0  ;;  %v749_v46 = vadd.f32 %v1547_v59, %v1959_v50 }
 0x11e   : > { %v1007_v7 = vmax.f32 %v889_v0, 0.0 }
 0x11f   : > { %v1005_v9 = vmax.f32 %v881_v4, 0.0  ;;  %v752_v56 = vadd.f32 %v1550_v3, %v1959_v50 }
 0x120   : > { %v1418_v10 = vpack.c.bf16 %v1007_v7, %v1006_v5 }
 0x121   : > { %v1413_v12 = vpack.c.bf16 %v1005_v9, %v1004_v6  ;;  %v1551_v14 = vpop.f32.mrb[20].mxu0  ;;  %v1645_v15 = vpop.f32.mrb[20].mxu1 }
 0x122   : > { %1490 = vst [vmem:[%s1969_s8 + $0x8] sm:$0xff] %v1418_v10   ;;  %v902_v17 = vadd.f32 %v1645_v15, %v741_v11  ;;  %v1552_v18 = vpop.f32.mrb[21].mxu0  ;;  %v893_v19 = vpop.f32.mrb[21].mxu1 }
 0x123   : > { %1414 = vst [vmem:[%s1969_s8] sm:$0xff] %v1413_v12   ;;  %v1553_v22 = vadd.f32 %v1552_v18, %v1551_v14  ;;  %v894_v23 = vadd.f32 %v893_v19, %v733_v16  ;;  %v1554_v24 = vpop.f32.mrb[22].mxu0  ;;  %v1646_v26 = vpop.f32.mrb[22].mxu1 }
 0x124   : > { %v905_v28 = vadd.f32 %v1646_v26, %v744_v21  ;;  %v1555_v29 = vpop.f32.mrb[23].mxu0  ;;  %v896_v31 = vpop.f32.mrb[23].mxu1  ;;  %v1010_v30 = vmax.f32 %v902_v17, 0.0 }
 0x125   : > { %v1556_v33 = vadd.f32 %v1555_v29, %v1554_v24  ;;  %v897_v34 = vadd.f32 %v896_v31, %v736_v27  ;;  %v1008_v38 = vmax.f32 %v894_v23, 0.0  ;;  %v757_v41 = vadd.f32 %v1553_v22, %v1959_v50 }
 0x126   : > { %v1011_v35 = vmax.f32 %v905_v28, 0.0 }
 0x127   : > { %v1009_v39 = vmax.f32 %v897_v34, 0.0  ;;  %v760_v51 = vadd.f32 %v1556_v33, %v1959_v50 }
 0x128   : > { %v1428_v40 = vpack.c.bf16 %v1011_v35, %v1010_v30 }
 0x129   : > { %v1423_v42 = vpack.c.bf16 %v1009_v39, %v1008_v38  ;;  %v1557_v43 = vpop.f32.mrb[24].mxu0  ;;  %v1649_v45 = vpop.f32.mrb[24].mxu1 }
 0x12a   : > { %1492 = vst [vmem:[%s1969_s8 + $0x18] sm:$0xff] %v1428_v40   ;;  %v918_v36 = vadd.f32 %v1649_v45, %v757_v41  ;;  %v1558_v47 = vpop.f32.mrb[25].mxu0  ;;  %v909_v48 = vpop.f32.mrb[25].mxu1 }
 0x12b   : > { %1491 = vst [vmem:[%s1969_s8 + $0x10] sm:$0xff] %v1423_v42   ;;  %v1559_v52 = vadd.f32 %v1558_v47, %v1557_v43  ;;  %v910_v53 = vadd.f32 %v909_v48, %v749_v46  ;;  %v1560_v54 = vpop.f32.mrb[26].mxu0  ;;  %v1650_v55 = vpop.f32.mrb[26].mxu1 }
 0x12c   : > { %v921_v57 = vadd.f32 %v1650_v55, %v760_v51  ;;  %v1561_v58 = vpop.f32.mrb[27].mxu0  ;;  %v912_v60 = vpop.f32.mrb[27].mxu1  ;;  %v1014_v62 = vmax.f32 %v918_v36, 0.0 }
 0x12d   : > { %v1562_v61 = vadd.f32 %v1561_v58, %v1560_v54  ;;  %v913_v59 = vadd.f32 %v912_v60, %v752_v56  ;;  %v1012_v0 = vmax.f32 %v910_v53, 0.0  ;;  %v765_v6 = vadd.f32 %v1559_v52, %v1959_v50 }
 0x12e   : > { %v1015_v63 = vmax.f32 %v921_v57, 0.0 }
 0x12f   : > { %v1013_v1 = vmax.f32 %v913_v59, 0.0  ;;  %v768_v15 = vadd.f32 %v1562_v61, %v1959_v50 }
 0x130   : > { %v1438_v2 = vpack.c.bf16 %v1015_v63, %v1014_v62 }
 0x131   : > { %v1433_v4 = vpack.c.bf16 %v1013_v1, %v1012_v0  ;;  %v1563_v5 = vpop.f32.mrb[28].mxu0  ;;  %v1653_v7 = vpop.f32.mrb[28].mxu1 }
 0x132   : > { %1494 = vst [vmem:[%s1969_s8 + $0x28] sm:$0xff] %v1438_v2   ;;  %v1564_v9 = vpop.f32.mrb[29].mxu0  ;;  %v925_v10 = vpop.f32.mrb[29].mxu1 }
 0x133   : > { %1493 = vst [vmem:[%s1969_s8 + $0x20] sm:$0xff] %v1433_v4   ;;  %v1565_v3 = vadd.f32 %v1564_v9, %v1563_v5  ;;  %v926_v11 = vadd.f32 %v925_v10, %v765_v6  ;;  %v1566_v12 = vpop.f32.mrb[30].mxu0  ;;  %v1654_v14 = vpop.f32.mrb[30].mxu1  ;;  %v821_v4 = vadd.f32 %v1944_v20, %v1959_v50  ;;  %v813_v9 = vadd.f32 %v1940_v8, %v1959_v50 }
 0x134   : > { %v1567_v16 = vpop.f32.mrb[31].mxu0  ;;  %v928_v17 = vpop.f32.mrb[31].mxu1 }
 0x135   : > { %v773_v18 = vadd.f32 %v1565_v3, %v1959_v50  ;;  %v1568_v19 = vadd.f32 %v1567_v16, %v1566_v12  ;;  %v929_v21 = vadd.f32 %v928_v17, %v768_v15  ;;  %v1016_v23 = vmax.f32 %v926_v11, 0.0 }
 0x136   : > { %v824_v12 = vadd.f32 %v1946_v25, %v1959_v50 }
 0x137   : > { %v934_v22 = vadd.f32 %v1653_v7, %v773_v18  ;;  %v776_v24 = vadd.f32 %v1568_v19, %v1959_v50  ;;  %v1017_v26 = vmax.f32 %v929_v21, 0.0 }
 0x139   : > { %v937_v27 = vadd.f32 %v1654_v14, %v776_v24  ;;  %v1443_v28 = vpack.c.bf16 %v1017_v26, %v1016_v23  ;;  %v1569_v29 = vpop.f32.mrb[32].mxu0  ;;  %v1657_v31 = vpop.f32.mrb[32].mxu1  ;;  %v1018_v30 = vmax.f32 %v934_v22, 0.0  ;;  %v816_v22 = vadd.f32 %v1942_v13, %v1959_v50 }
 0x13a   : > { %v1570_v33 = vpop.f32.mrb[33].mxu0  ;;  %v941_v34 = vpop.f32.mrb[33].mxu1 }
 0x13b   : > { %v1019_v35 = vmax.f32 %v937_v27, 0.0  ;;  %1495 = vst [vmem:[%s1969_s8 + $0x30] sm:$0xff] %v1443_v28   ;;  %v1571_v38 = vadd.f32 %v1570_v33, %v1569_v29  ;;  %v1572_v39 = vpop.f32.mrb[34].mxu0  ;;  %v1658_v40 = vpop.f32.mrb[34].mxu1 }
 0x13c   : > { %v1573_v41 = vpop.f32.mrb[35].mxu0  ;;  %v944_v42 = vpop.f32.mrb[35].mxu1 }
 0x13d   : > { %v1448_v43 = vpack.c.bf16 %v1019_v35, %v1018_v30  ;;  %v781_v45 = vadd.f32 %v1571_v38, %v1959_v50  ;;  %v1574_v46 = vadd.f32 %v1573_v41, %v1572_v39  ;;  %v837_v35 = vadd.f32 %v1952_v44, %v1959_v50 }
 0x13f   : > { %1496 = vst [vmem:[%s1969_s8 + $0x38] sm:$0xff] %v1448_v43   ;;  %v942_v36 = vadd.f32 %v941_v34, %v781_v45  ;;  %v784_v47 = vadd.f32 %v1574_v46, %v1959_v50  ;;  %v840_v46 = vadd.f32 %v1954_v49, %v1959_v50 }
 0x141   : > { %v945_v48 = vadd.f32 %v944_v42, %v784_v47  ;;  %v1575_v51 = vpop.f32.mrb[36].mxu0  ;;  %v1993_v52 = vpop.f32.mrb[36].mxu1  ;;  %v1020_v55 = vmax.f32 %v942_v36, 0.0 }
 0x142   : > { %v1576_v53 = vpop.f32.mrb[37].mxu0  ;;  %v957_v54 = vpop.f32.mrb[37].mxu1 }
 0x143   : > { %v1021_v56 = vmax.f32 %v945_v48, 0.0  ;;  %v1577_v57 = vadd.f32 %v1576_v53, %v1575_v51  ;;  %v1578_v58 = vpop.f32.mrb[38].mxu0  ;;  %v1995_v60 = vpop.f32.mrb[38].mxu1 }
 0x144   : > { %v1579_v61 = vpop.f32.mrb[39].mxu0  ;;  %v960_v59 = vpop.f32.mrb[39].mxu1 }
 0x145   : > { %v1453_v62 = vpack.c.bf16 %v1021_v56, %v1020_v55  ;;  %v789_v63 = vadd.f32 %v1577_v57, %v1959_v50  ;;  %v1580_v0 = vadd.f32 %v1579_v61, %v1578_v58 }
 0x147   : > { %1497 = vst [vmem:[%s1969_s8 + $0x40] sm:$0xff] %v1453_v62   ;;  %v950_v1 = vadd.f32 %v1657_v31, %v789_v63  ;;  %v792_v2 = vadd.f32 %v1580_v0, %v1959_v50 }
 0x149   : > { %v953_v5 = vadd.f32 %v1658_v40, %v792_v2  ;;  %v1581_v7 = vpop.f32.mrb[40].mxu0  ;;  %v1665_v6 = vpop.f32.mrb[40].mxu1  ;;  %v1022_v14 = vmax.f32 %v950_v1, 0.0  ;;  %v829_v40 = vadd.f32 %v1948_v32, %v1959_v50  ;;  %v832_v32 = vadd.f32 %v1950_v37, %v1959_v50 }
 0x14a   : > { %v982_v10 = vadd.f32 %v1665_v6, %v821_v4  ;;  %v1582_v3 = vpop.f32.mrb[41].mxu0  ;;  %v973_v11 = vpop.f32.mrb[41].mxu1 }
 0x14b   : > { %v1023_v15 = vmax.f32 %v953_v5, 0.0  ;;  %v1583_v16 = vadd.f32 %v1582_v3, %v1581_v7  ;;  %v974_v17 = vadd.f32 %v973_v11, %v813_v9  ;;  %v1584_v18 = vpop.f32.mrb[42].mxu0  ;;  %v1666_v19 = vpop.f32.mrb[42].mxu1 }
 0x14c   : > { %v985_v20 = vadd.f32 %v1666_v19, %v824_v12  ;;  %v1585_v21 = vpop.f32.mrb[43].mxu0  ;;  %v976_v23 = vpop.f32.mrb[43].mxu1  ;;  %v1030_v27 = vmax.f32 %v982_v10, 0.0 }
 0x14d   : > { %v1458_v8 = vpack.c.bf16 %v1023_v15, %v1022_v14  ;;  %v797_v24 = vadd.f32 %v1583_v16, %v1959_v50  ;;  %v1586_v26 = vadd.f32 %v1585_v21, %v1584_v18  ;;  %v977_v28 = vadd.f32 %v976_v23, %v816_v22 }
 0x14e   : > { %v1031_v25 = vmax.f32 %v985_v20, 0.0  ;;  %v1028_v33 = vmax.f32 %v974_v17, 0.0 }
 0x14f   : > { %1498 = vst [vmem:[%s1969_s8 + $0x48] sm:$0xff] %v1458_v8   ;;  %v958_v29 = vadd.f32 %v957_v54, %v797_v24  ;;  %v800_v31 = vadd.f32 %v1586_v26, %v1959_v50  ;;  %v1029_v30 = vmax.f32 %v977_v28, 0.0 }
 0x150   : > { %v1478_v34 = vpack.c.bf16 %v1031_v25, %v1030_v27 }
 0x151   : > { %v961_v13 = vadd.f32 %v960_v59, %v800_v31  ;;  %v1587_v38 = vpop.f32.mrb[44].mxu0  ;;  %v1669_v39 = vpop.f32.mrb[44].mxu1  ;;  %v1473_v41 = vpack.c.bf16 %v1029_v30, %v1028_v33  ;;  %v1024_v36 = vmax.f32 %v958_v29, 0.0 }
 0x152   : > { %1502 = vst [vmem:[%s1969_s8 + $0x68] sm:$0xff] %v1478_v34   ;;  %v998_v42 = vadd.f32 %v1669_v39, %v837_v35  ;;  %v1588_v43 = vpop.f32.mrb[45].mxu0  ;;  %v989_v45 = vpop.f32.mrb[45].mxu1 }
 0x153   : > { %v1025_v47 = vmax.f32 %v961_v13, 0.0  ;;  %v1589_v48 = vadd.f32 %v1588_v43, %v1587_v38  ;;  %v990_v44 = vadd.f32 %v989_v45, %v829_v40  ;;  %v1590_v51 = vpop.f32.mrb[46].mxu0  ;;  %v1670_v53 = vpop.f32.mrb[46].mxu1  ;;  %1501 = vst [vmem:[%s1969_s8 + $0x60] sm:$0xff] %v1473_v41  }
 0x154   : > { %v1001_v54 = vadd.f32 %v1670_v53, %v840_v46  ;;  %v1591_v55 = vpop.f32.mrb[47].mxu0  ;;  %v992_v56 = vpop.f32.mrb[47].mxu1  ;;  %v1034_v61 = vmax.f32 %v998_v42, 0.0 }
 0x155   : > { %v1463_v57 = vpack.c.bf16 %v1025_v47, %v1024_v36  ;;  %v805_v58 = vadd.f32 %v1589_v48, %v1959_v50  ;;  %v1592_v49 = vadd.f32 %v1591_v55, %v1590_v51  ;;  %v993_v62 = vadd.f32 %v992_v56, %v832_v32 }
 0x156   : > { %v1035_v59 = vmax.f32 %v1001_v54, 0.0  ;;  %v1032_v1 = vmax.f32 %v990_v44, 0.0 }
 0x157   : > { %1499 = vst [vmem:[%s1969_s8 + $0x50] sm:$0xff] %v1463_v57   ;;  %v966_v63 = vadd.f32 %v1993_v52, %v805_v58  ;;  %v808_v0 = vadd.f32 %v1592_v49, %v1959_v50  ;;  %v1033_v4 = vmax.f32 %v993_v62, 0.0 }
 0x158   : > { %v1488_v2 = vpack.c.bf16 %v1035_v59, %v1034_v61 }
 0x159   : > { %v969_v37 = vadd.f32 %v1995_v60, %v808_v0  ;;  %v1483_v5 = vpack.c.bf16 %v1033_v4, %v1032_v1  ;;  %v1026_v7 = vmax.f32 %v966_v63, 0.0 }
 0x15a   : > { %1504 = vst [vmem:[%s1969_s8 + $0x78] sm:$0xff] %v1488_v2  }
 0x15b   : > { %v1027_v6 = vmax.f32 %v969_v37, 0.0  ;;  %1503 = vst [vmem:[%s1969_s8 + $0x70] sm:$0xff] %v1483_v5  }
 0x15d   : > { %v1468_v9 = vpack.c.bf16 %v1027_v6, %v1026_v7 }
 0x15f   : > { %1500 = vst [vmem:[%s1969_s8 + $0x58] sm:$0xff] %v1468_v9  }
 0x160 PF: > { %s13_s12 = sadd.s32 1, %s1784_s12  }
 0x161   : > { %p10_p4 = scmp.ge.s32.totalorder %s13_s12, 4  }
 0x163   :  { %12 = sbr.rel (!%p10_p4) target bundleno = 1 (0x1), region = 62 }

// kernel: betavae_forward.17
= control target key start
LH: loop header
LB: loop body
LE: loop exit
PB: predicated region body
PF: predicated region fallthrough
CT: control target
= control target key end

     0   :  { %s2210_s12 = smov 0   ;;  %s2760_s0 = inlined_call_operand.vmem [shape: bf16[2048,288], index: 0, kind: input, shape index: {}]   ;;  %s2761_s1 = inlined_call_operand.vmem [shape: bf16[288,12], index: 1, kind: input, shape index: {}]   ;;  %s2762_s2 = inlined_call_operand.vmem [shape: f32[1,12], index: 2, kind: input, shape index: {}]   ;;  %s2763_s3 = inlined_call_operand.vmem [shape: f32[2048,12], index: 3, kind: output, shape index: {}]  }
   0x1 LB: > { %s1733_s13 = sadd.s32 4294967295, %s2187_s12   ;;  %p1737_p0 = scmp.ge.s32.totalorder %s2187_s12, 1  ;;  %s2187_s12 = sphi %s2210_s12, %s13_s12  }
   0x2   : > { %p139_p1 = scmp.lt.s32.totalorder %s2187_s12, 5 }
   0x4   : > { %p140_p2 = pnand %p1737_p0, %p139_p1 }
   0x5   : > { %v2035_v0 = vld [vmem:[%s2761_s1] sm:$0xff] (!%p140_p2)   ;;  %v2189_v1 = vmov (!%p140_p2), 0   ;;  %s1738_s16 = sshll.u32 (!%p140_p2), %s1733_s13, 6  ;;  %v2036_v2 = vld [vmem:[%s2761_s1 + $0x8] sm:$0xff] (!%p140_p2)   ;;  %v2037_v3 = vld [vmem:[%s2761_s1 + $0x10] sm:$0xff] (!%p140_p2)   ;;  %vm937_vm0 = vcmask (!%p140_p2), 261120  }
   0x6   : > { %143 = sbr.rel (%p140_p2) target bundleno = 473 (0x1d9), region = 32  ;;  %1034 = vmatprep.subr.bf16.mxu0 (!%p140_p2), %v2189_v1  ;;  %1993 = vmatprep.subr.bf16.mxu1 (!%p140_p2), %v2189_v1  ;;  %p165_p3 = scmp.lt.s32.totalorder (!%p140_p2), %s1738_s16, 255  ;;  %v2038_v4 = vld [vmem:[%s2761_s1 + $0x18] sm:$0xff] (!%p140_p2)   ;;  %v2039_v5 = vld [vmem:[%s2761_s1 + $0x20] sm:$0xff] (!%p140_p2)   ;;  %v2040_v7 = vld [vmem:[%s2761_s1 + $0x28] sm:$0xff] (!%p140_p2)   ;;  %vm1612_vm1 = vcmask (!%p140_p2), 97280  }
   0x7   : > { %1035 = vmatpush1.bf16.msra.mxu0 (!%p140_p2), %v2035_v0  ;;  %2009 = vmatpush1.bf16.msra.mxu1 (!%p140_p2), %v2035_v0  ;;  %v2041_v9 = vld [vmem:[%s2761_s1 + $0x30] sm:$0xff] (!%p140_p2)   ;;  %v2042_v10 = vld [vmem:[%s2761_s1 + $0x38] sm:$0xff] (!%p140_p2)   ;;  %v2043_v11 = vld [vmem:[%s2761_s1 + $0x40] sm:$0xff] (!%p140_p2)  }
   0x8   : > { %1036 = vmatprep.subr.bf16.mxu0 (!%p140_p2), %v2189_v1  ;;  %1994 = vmatprep.subr.bf16.mxu1 (!%p140_p2), %v2189_v1  ;;  %v2044_v12 = vld [vmem:[%s2761_s1 + $0x48] sm:$0xff] (!%p140_p2)   ;;  %v2045_v13 = vld [vmem:[%s2761_s1 + $0x50] sm:$0xff] (!%p140_p2)   ;;  %v2046_v14 = vld [vmem:[%s2761_s1 + $0x58] sm:$0xff] (!%p140_p2)  }
   0x9   : > { %v2047_v15 = vld [vmem:[%s2761_s1 + $0x60] sm:$0xff] (!%p140_p2)   ;;  %v2048_v16 = vld [vmem:[%s2761_s1 + $0x68] sm:$0xff] (!%p140_p2)   ;;  %v2049_v17 = vld [vmem:[%s2761_s1 + $0x70] sm:$0xff] (!%p140_p2)  }
   0xa   : > { %v2050_v18 = vld [vmem:[%s2761_s1 + $0x78] sm:$0xff] (!%p140_p2)   ;;  %v2057_v19 = vld [vmem:[%s2761_s1 + $0x80] sm:$0xff] (!%p140_p2)   ;;  %v2082_v24 = vld [vmem:[%s2761_s1 + $0x88] sm:$0xff] (!%p140_p2)  }
   0xb   : > { %1037 = vmatpush1.bf16.msra.mxu0 (!%p140_p2), %v2036_v2  ;;  %2010 = vmatpush1.bf16.msra.mxu1 (!%p140_p2), %v2036_v2 }
   0xc   : > { %1038 = vmatprep.subr.bf16.mxu0 (!%p140_p2), %v2189_v1  ;;  %1995 = vmatprep.subr.bf16.mxu1 (!%p140_p2), %v2189_v1 }
   0xd   : > { %s2765_s16 = smov (!%p165_p3, %s1738_s16), 255 }
   0xe   : > { %s2025_s23 = smul.u32 12, %s2765_s16  ;;  %s1741_s5 = sshll.u32 %s2765_s16, 3 }
   0xf   : > { %1039 = vmatpush1.bf16.msra.mxu0 %v2037_v3  ;;  %2011 = vmatpush1.bf16.msra.mxu1 %v2037_v3  ;;  %s2514_s8 = scalar_lea.vmem %s2763_s3, %s1741_s5 }
  0x10   : > { %1040 = vmatprep.subr.bf16.mxu0 %v2189_v1  ;;  %1996 = vmatprep.subr.bf16.mxu1 %v2189_v1  ;;  %s2247_s28 = scalar_lea.vmem %s2760_s0, %s2025_s23 }
  0x11   : > { %v2053_v6 = vld [vmem:[%s2247_s28 + $0x4] ss:$12 sps:$4 sm:$0xff]   ;;  %v2051_v20 = vld [vmem:[%s2247_s28] ss:$12 sps:$4 sm:$0xff]   ;;  %v2058_v22 = vld [vmem:[%s2247_s28 + $0x1c] ss:$12 sps:$4 sm:$0xff]  }
  0x12   : > { %v2056_v8 = vld [vmem:[%s2247_s28 + $0x244] ss:$12 sps:$4 sm:$0xff]   ;;  %1066 = vmatprep.mubr.bf16.mxu0 %v2053_v6  ;;  %v2054_v21 = vld [vmem:[%s2247_s28 + $0x240] ss:$12 sps:$4 sm:$0xff]   ;;  %v2060_v23 = vld [vmem:[%s2247_s28 + $0x25c] ss:$12 sps:$4 sm:$0xff]  }
  0x13   : > { %1041 = vmatpush1.bf16.msra.mxu0 %v2038_v4  ;;  %2012 = vmatpush1.bf16.msra.mxu1 %v2038_v4  ;;  %v2062_v25 = vld [vmem:[%s2247_s28 + $0x18] ss:$12 sps:$4 sm:$0xff]   ;;  %v2064_v27 = vld [vmem:[%s2247_s28 + $0x34] ss:$12 sps:$4 sm:$0xff]   ;;  %v2068_v29 = vld [vmem:[%s2247_s28 + $0x30] ss:$12 sps:$4 sm:$0xff]  }
  0x14   : > { %1042 = vmatprep.subr.bf16.mxu0 %v2189_v1  ;;  %1997 = vmatprep.subr.bf16.mxu1 %v2189_v1  ;;  %v2063_v26 = vld [vmem:[%s2247_s28 + $0x258] ss:$12 sps:$4 sm:$0xff]   ;;  %v2066_v28 = vld [vmem:[%s2247_s28 + $0x274] ss:$12 sps:$4 sm:$0xff]   ;;  %v2069_v30 = vld [vmem:[%s2247_s28 + $0x270] ss:$12 sps:$4 sm:$0xff]  }
  0x15   : > { %1258 = vmatprep.mubr.bf16.mxu1 %v2056_v8  ;;  %v2070_v31 = vld [vmem:[%s2247_s28 + $0x4c] ss:$12 sps:$4 sm:$0xff]   ;;  %v2074_v33 = vld [vmem:[%s2247_s28 + $0x48] ss:$12 sps:$4 sm:$0xff]   ;;  %v2076_v35 = vld [vmem:[%s2247_s28 + $0x64] ss:$12 sps:$4 sm:$0xff]  }
  0x16   : > { %v2072_v32 = vld [vmem:[%s2247_s28 + $0x28c] ss:$12 sps:$4 sm:$0xff]   ;;  %v2075_v34 = vld [vmem:[%s2247_s28 + $0x288] ss:$12 sps:$4 sm:$0xff]   ;;  %v2078_v36 = vld [vmem:[%s2247_s28 + $0x2a4] ss:$12 sps:$4 sm:$0xff]  }
  0x17   : > { %1043 = vmatpush1.bf16.msra.mxu0 %v2039_v5  ;;  %2013 = vmatpush1.bf16.msra.mxu1 %v2039_v5  ;;  %v2080_v37 = vld [vmem:[%s2247_s28 + $0x60] ss:$12 sps:$4 sm:$0xff]   ;;  %v2083_v39 = vld [vmem:[%s2247_s28 + $0x7c] ss:$12 sps:$4 sm:$0xff]   ;;  %v2087_v41 = vld [vmem:[%s2247_s28 + $0x78] ss:$12 sps:$4 sm:$0xff]  }
  0x18   : > { %1044 = vmatprep.subr.bf16.mxu0 %v2189_v1  ;;  %1998 = vmatprep.subr.bf16.mxu1 %v2189_v1  ;;  %v2081_v38 = vld [vmem:[%s2247_s28 + $0x2a0] ss:$12 sps:$4 sm:$0xff]   ;;  %v2085_v40 = vld [vmem:[%s2247_s28 + $0x2bc] ss:$12 sps:$4 sm:$0xff]   ;;  %v2088_v42 = vld [vmem:[%s2247_s28 + $0x2b8] ss:$12 sps:$4 sm:$0xff]  }
  0x19   : > { %v2089_v43 = vld [vmem:[%s2247_s28 + $0x94] ss:$12 sps:$4 sm:$0xff]   ;;  %v2093_v45 = vld [vmem:[%s2247_s28 + $0x90] ss:$12 sps:$4 sm:$0xff]   ;;  %v2095_v47 = vld [vmem:[%s2247_s28 + $0xac] ss:$12 sps:$4 sm:$0xff]  }
  0x1a   : > { %v2091_v44 = vld [vmem:[%s2247_s28 + $0x2d4] ss:$12 sps:$4 sm:$0xff]   ;;  %v2094_v46 = vld [vmem:[%s2247_s28 + $0x2d0] ss:$12 sps:$4 sm:$0xff]   ;;  %v2097_v48 = vld [vmem:[%s2247_s28 + $0x2ec] ss:$12 sps:$4 sm:$0xff]  }
  0x1b   : > { %1045 = vmatpush1.bf16.msra.mxu0 %v2040_v7  ;;  %2014 = vmatpush1.bf16.msra.mxu1 %v2040_v7  ;;  %v2099_v49 = vld [vmem:[%s2247_s28 + $0xa8] ss:$12 sps:$4 sm:$0xff]   ;;  %v2101_v51 = vld [vmem:[%s2247_s28 + $0xc4] ss:$12 sps:$4 sm:$0xff]   ;;  %v2104_v53 = vld [vmem:[%s2247_s28 + $0xc0] ss:$12 sps:$4 sm:$0xff]  }
  0x1c   : > { %1046 = vmatprep.subr.bf16.mxu0 %v2189_v1  ;;  %1999 = vmatprep.subr.bf16.mxu1 %v2189_v1  ;;  %v2100_v50 = vld [vmem:[%s2247_s28 + $0x2e8] ss:$12 sps:$4 sm:$0xff]   ;;  %v2105_v54 = vld [vmem:[%s2247_s28 + $0x20] ss:$12 sps:$4 sm:$0xff]   ;;  %v2108_v56 = vld [vmem:[%s2247_s28 + $0x38] ss:$12 sps:$4 sm:$0xff]  }
  0x1d   : > { %v2103_v52 = vld [vmem:[%s2247_s28 + $0x8] ss:$12 sps:$4 sm:$0xff]   ;;  %v2109_v57 = vld [vmem:[%s2247_s28 + $0xd8] ss:$12 sps:$4 sm:$0xff]   ;;  %v2110_v58 = vld [vmem:[%s2247_s28 + $0x50] ss:$12 sps:$4 sm:$0xff]  }
  0x1e   : > { %v2106_v55 = vld [vmem:[%s2247_s28 + $0xdc] ss:$12 sps:$4 sm:$0xff]   ;;  %v2111_v59 = vld [vmem:[%s2247_s28 + $0xf4] ss:$12 sps:$4 sm:$0xff]   ;;  %v2116_v63 = vld [vmem:[%s2247_s28 + $0x10c] ss:$12 sps:$4 sm:$0xff]  }
  0x1f   : > { %1047 = vmatpush1.bf16.msra.mxu0 %v2041_v9  ;;  %2015 = vmatpush1.bf16.msra.mxu1 %v2041_v9  ;;  %v2113_v60 = vld [vmem:[%s2247_s28 + $0x68] ss:$12 sps:$4 sm:$0xff]   ;;  %v2114_v61 = vld [vmem:[%s2247_s28 + $0xf0] ss:$12 sps:$4 sm:$0xff]   ;;  %v2115_v62 = vld [vmem:[%s2247_s28 + $0x80] ss:$12 sps:$4 sm:$0xff]  }
  0x20   : > { %1048 = vmatprep.subr.bf16.mxu0 %v2189_v1  ;;  %2000 = vmatprep.subr.bf16.mxu1 %v2189_v1  ;;  %v2118_v0 = vld [vmem:[%s2247_s28 + $0x98] ss:$12 sps:$4 sm:$0xff]   ;;  %v2120_v2 = vld [vmem:[%s2247_s28 + $0xb0] ss:$12 sps:$4 sm:$0xff]   ;;  %v2123_v4 = vld [vmem:[%s2247_s28 + $0xc8] ss:$12 sps:$4 sm:$0xff]  }
  0x21   : > { %v2121_v3 = vld [vmem:[%s2247_s28 + $0x124] ss:$12 sps:$4 sm:$0xff]   ;;  %v2124_v5 = vld [vmem:[%s2247_s28 + $0x120] ss:$12 sps:$4 sm:$0xff]   ;;  %v2126_v7 = vld [vmem:[%s2247_s28 + $0x13c] ss:$12 sps:$4 sm:$0xff]  }
  0x22   : > { %v2125_v6 = vld [vmem:[%s2247_s28 + $0xe0] ss:$12 sps:$4 sm:$0xff]   ;;  %v2128_v8 = vld [vmem:[%s2247_s28 + $0xf8] ss:$12 sps:$4 sm:$0xff]  }
  0x23   : > { %1049 = vmatpush1.bf16.msra.mxu0 %v2042_v10  ;;  %2016 = vmatpush1.bf16.msra.mxu1 %v2042_v10  ;;  %v2129_v9 = vld [vmem:[%s2247_s28 + $0x138] ss:$12 sps:$4 sm:$0xff]   ;;  %v2130_v10 = vld [vmem:[%s2247_s28 + $0x110] ss:$12 sps:$4 sm:$0xff]  }
  0x24   : > { %1050 = vmatprep.subr.bf16.mxu0 %v2189_v1  ;;  %2001 = vmatprep.subr.bf16.mxu1 %v2189_v1 }
  0x27   : > { %1051 = vmatpush1.bf16.msra.mxu0 %v2043_v11  ;;  %2017 = vmatpush1.bf16.msra.mxu1 %v2043_v11  ;;  %v2131_v11 = vld [vmem:[%s2247_s28 + $0x154] ss:$12 sps:$4 sm:$0xff]  }
  0x28   : > { %1052 = vmatprep.subr.bf16.mxu0 %v2189_v1  ;;  %2002 = vmatprep.subr.bf16.mxu1 %v2189_v1 }
  0x2b   : > { %1053 = vmatpush1.bf16.msra.mxu0 %v2044_v12  ;;  %2018 = vmatpush1.bf16.msra.mxu1 %v2044_v12  ;;  %v2133_v12 = vld [vmem:[%s2247_s28 + $0x128] ss:$12 sps:$4 sm:$0xff]  }
  0x2c   : > { %1054 = vmatprep.subr.bf16.mxu0 %v2189_v1  ;;  %2003 = vmatprep.subr.bf16.mxu1 %v2189_v1 }
  0x2f   : > { %1055 = vmatpush1.bf16.msra.mxu0 %v2045_v13  ;;  %2019 = vmatpush1.bf16.msra.mxu1 %v2045_v13  ;;  %v2134_v13 = vld [vmem:[%s2247_s28 + $0x150] ss:$12 sps:$4 sm:$0xff]  }
  0x30   : > { %1056 = vmatprep.subr.bf16.mxu0 %v2189_v1  ;;  %2004 = vmatprep.subr.bf16.mxu1 %v2189_v1 }
  0x33   : > { %1057 = vmatpush1.bf16.msra.mxu0 %v2046_v14  ;;  %2020 = vmatpush1.bf16.msra.mxu1 %v2046_v14  ;;  %v2135_v14 = vld [vmem:[%s2247_s28 + $0x140] ss:$12 sps:$4 sm:$0xff]  }
  0x34   : > { %1058 = vmatprep.subr.bf16.mxu0 %v2189_v1  ;;  %2005 = vmatprep.subr.bf16.mxu1 %v2189_v1 }
  0x37   : > { %1059 = vmatpush1.bf16.msra.mxu0 %v2047_v15  ;;  %2021 = vmatpush1.bf16.msra.mxu1 %v2047_v15  ;;  %v2136_v15 = vld [vmem:[%s2247_s28 + $0x16c] ss:$12 sps:$4 sm:$0xff]  }
  0x38   : > { %1060 = vmatprep.subr.bf16.mxu0 %v2189_v1  ;;  %2006 = vmatprep.subr.bf16.mxu1 %v2189_v1 }
  0x3b   : > { %1061 = vmatpush1.bf16.msra.mxu0 %v2048_v16  ;;  %2022 = vmatpush1.bf16.msra.mxu1 %v2048_v16  ;;  %v2138_v16 = vld [vmem:[%s2247_s28 + $0x158] ss:$12 sps:$4 sm:$0xff]  }
  0x3c   : > { %1062 = vmatprep.subr.bf16.mxu0 %v2189_v1  ;;  %2007 = vmatprep.subr.bf16.mxu1 %v2189_v1 }
  0x3f   : > { %1063 = vmatpush1.bf16.msra.mxu0 %v2049_v17  ;;  %2023 = vmatpush1.bf16.msra.mxu1 %v2049_v17  ;;  %v2139_v17 = vld [vmem:[%s2247_s28 + $0x168] ss:$12 sps:$4 sm:$0xff]  }
  0x40   : > { %1064 = vmatprep.subr.bf16.mxu0 %v2189_v1  ;;  %2008 = vmatprep.subr.bf16.mxu1 %v2189_v1  ;;  %v2119_v1 = vld [vmem:[%s2247_s28 + $0x108] ss:$12 sps:$4 sm:$0xff]  }
  0x43   : > { %1065 = vmatpush1.bf16.msra.mxu0 %v2050_v18  ;;  %2024 = vmatpush1.bf16.msra.mxu1 %v2050_v18  ;;  %v2140_v18 = vld [vmem:[%s2247_s28 + $0x170] ss:$12 sps:$4 sm:$0xff]  }
  0x44   : > { %1925 = vmatprep.subr.bf16.mxu1 %v2057_v19 }
  0x46   : > { %1067 = vmatmul.mubr.bf16.vlgmr.msra.gmra.mrb[0].mxu0 %v2051_v20  ;;  %1259 = vmatmul.mubr.bf16.vlgmr.msra.gmra.mrb[0].mxu1 %v2054_v21  ;;  %v2143_v20 = vld [vmem:[%s2247_s28 + $0x188] ss:$12 sps:$4 sm:$0xff]   ;;  %v2144_v21 = vld [vmem:[%s2247_s28 + $0x180] ss:$12 sps:$4 sm:$0xff]  }
  0x47   : > { %1926 = vmatpush3.bf16.msra.mxu1 %v2057_v19  ;;  %1074 = vmatprep.mubr.bf16.mxu0 %v2058_v22  ;;  %v2141_v19 = vld [vmem:[%s2247_s28 + $0x184] ss:$12 sps:$4 sm:$0xff]   ;;  %v2145_v22 = vld [vmem:[%s2247_s28 + $0x1a0] ss:$12 sps:$4 sm:$0xff]  }
  0x48   : > { %1266 = vmatprep.mubr.bf16.mxu1 %v2060_v23  ;;  %1927 = vmatprep.subr.bf16.mxu1 %v2082_v24  ;;  %v2146_v23 = vld [vmem:[%s2247_s28 + $0x19c] ss:$12 sps:$4 sm:$0xff]  }
  0x4b   : > { %1928 = vmatpush3.bf16.msra.mxu1 %v2082_v24  ;;  %v2148_v24 = vld [vmem:[%s2247_s28 + $0x1b8] ss:$12 sps:$4 sm:$0xff]  }
  0x4e   : > { %1075 = vmatmul.mubr.bf16.gmra.mrb[4].mxu0 %v2062_v25  ;;  %1267 = vmatmul.mubr.bf16.gmra.mrb[4].mxu1 %v2063_v26  ;;  %v2149_v25 = vld [vmem:[%s2247_s28 + $0x198] ss:$12 sps:$4 sm:$0xff]   ;;  %v2150_v26 = vld [vmem:[%s2247_s28 + $0x1d0] ss:$12 sps:$4 sm:$0xff]  }
  0x4f   : > { %1082 = vmatprep.mubr.bf16.mxu0 %v2064_v27  ;;  %1274 = vmatprep.mubr.bf16.mxu1 %v2066_v28  ;;  %v2151_v27 = vld [vmem:[%s2247_s28 + $0x1b4] ss:$12 sps:$4 sm:$0xff]  }
  0x50   : > { %v2153_v28 = vld [vmem:[%s2247_s28 + $0x1e8] ss:$12 sps:$4 sm:$0xff]  }
  0x56   : > { %1083 = vmatmul.mubr.bf16.gmra.mrb[8].mxu0 %v2068_v29  ;;  %1275 = vmatmul.mubr.bf16.gmra.mrb[8].mxu1 %v2069_v30  ;;  %v2154_v29 = vld [vmem:[%s2247_s28 + $0x1b0] ss:$12 sps:$4 sm:$0xff]   ;;  %v2155_v30 = vld [vmem:[%s2247_s28 + $0x200] ss:$12 sps:$4 sm:$0xff]  }
  0x57   : > { %1090 = vmatprep.mubr.bf16.mxu0 %v2070_v31  ;;  %1282 = vmatprep.mubr.bf16.mxu1 %v2072_v32  ;;  %v2156_v31 = vld [vmem:[%s2247_s28 + $0x1cc] ss:$12 sps:$4 sm:$0xff]  }
  0x58   : > { %v2158_v32 = vld [vmem:[%s2247_s28 + $0x218] ss:$12 sps:$4 sm:$0xff]  }
  0x5e   : > { %1091 = vmatmul.mubr.bf16.gmra.mrb[12].mxu0 %v2074_v33  ;;  %1283 = vmatmul.mubr.bf16.gmra.mrb[12].mxu1 %v2075_v34  ;;  %v2159_v33 = vld [vmem:[%s2247_s28 + $0x1c8] ss:$12 sps:$4 sm:$0xff]   ;;  %v2160_v34 = vld [vmem:[%s2247_s28 + $0x230] ss:$12 sps:$4 sm:$0xff]  }
  0x5f   : > { %1098 = vmatprep.mubr.bf16.mxu0 %v2076_v35  ;;  %1290 = vmatprep.mubr.bf16.mxu1 %v2078_v36  ;;  %v2161_v35 = vld [vmem:[%s2247_s28 + $0x1e4] ss:$12 sps:$4 sm:$0xff]   ;;  %v2163_v36 = vld [vmem:[%s2247_s28 + $0x248] ss:$12 sps:$4 sm:$0xff]  }
  0x66   : > { %1099 = vmatmul.mubr.bf16.gmra.mrb[16].mxu0 %v2080_v37  ;;  %1291 = vmatmul.mubr.bf16.gmra.mrb[16].mxu1 %v2081_v38  ;;  %v2164_v37 = vld [vmem:[%s2247_s28 + $0x1e0] ss:$12 sps:$4 sm:$0xff]  }
  0x67   : > { %1106 = vmatprep.mubr.bf16.mxu0 %v2083_v39  ;;  %1298 = vmatprep.mubr.bf16.mxu1 %v2085_v40  ;;  %v2165_v38 = vld [vmem:[%s2247_s28 + $0x260] ss:$12 sps:$4 sm:$0xff]   ;;  %v2166_v39 = vld [vmem:[%s2247_s28 + $0x1fc] ss:$12 sps:$4 sm:$0xff]   ;;  %v2168_v40 = vld [vmem:[%s2247_s28 + $0x278] ss:$12 sps:$4 sm:$0xff]  }
  0x6e   : > { %1107 = vmatmul.mubr.bf16.gmra.mrb[20].mxu0 %v2087_v41  ;;  %1299 = vmatmul.mubr.bf16.gmra.mrb[20].mxu1 %v2088_v42  ;;  %v2169_v41 = vld [vmem:[%s2247_s28 + $0x1f8] ss:$12 sps:$4 sm:$0xff]   ;;  %v2170_v42 = vld [vmem:[%s2247_s28 + $0x290] ss:$12 sps:$4 sm:$0xff]  }
  0x6f   : > { %1114 = vmatprep.mubr.bf16.mxu0 %v2089_v43  ;;  %1306 = vmatprep.mubr.bf16.mxu1 %v2091_v44  ;;  %v2171_v43 = vld [vmem:[%s2247_s28 + $0x214] ss:$12 sps:$4 sm:$0xff]  }
  0x70   : > { %v2173_v44 = vld [vmem:[%s2247_s28 + $0x2a8] ss:$12 sps:$4 sm:$0xff]  }
  0x76   : > { %1115 = vmatmul.mubr.bf16.gmra.mrb[24].mxu0 %v2093_v45  ;;  %1307 = vmatmul.mubr.bf16.gmra.mrb[24].mxu1 %v2094_v46  ;;  %v2174_v45 = vld [vmem:[%s2247_s28 + $0x210] ss:$12 sps:$4 sm:$0xff]   ;;  %v2175_v46 = vld [vmem:[%s2247_s28 + $0x2c0] ss:$12 sps:$4 sm:$0xff]  }
  0x77   : > { %1122 = vmatprep.mubr.bf16.mxu0 %v2095_v47  ;;  %1314 = vmatprep.mubr.bf16.mxu1 %v2097_v48  ;;  %v2176_v47 = vld [vmem:[%s2247_s28 + $0x22c] ss:$12 sps:$4 sm:$0xff]  }
  0x78   : > { %v2178_v48 = vld [vmem:[%s2247_s28 + $0x2d8] ss:$12 sps:$4 sm:$0xff]  }
  0x7e   : > { %1123 = vmatmul.mubr.bf16.gmra.mrb[28].mxu0 %v2099_v49  ;;  %1315 = vmatmul.mubr.bf16.gmra.mrb[28].mxu1 %v2100_v50  ;;  %v2179_v49 = vld [vmem:[%s2247_s28 + $0x228] ss:$12 sps:$4 sm:$0xff]   ;;  %v2180_v50 = vld [vmem:[%s2247_s28 + $0x2f0] ss:$12 sps:$4 sm:$0xff]  }
  0x7f   : > { %1130 = vmatprep.mubr.bf16.mxu0 %v2101_v51  ;;  %1929 = vmatprep.mubr.msk.bf16.mxu1 %vm937_vm0, %v2103_v52 }
  0x86   : > { %1131 = vmatmul.mubr.bf16.gmra.mrb[32].mxu0 %v2104_v53  ;;  %1930 = vmatmul.mubr.msk.bf16.vlgmr.msra.gmra.mrb[32].mxu1 %vm937_vm0, %v2105_v54 }
  0x87   : > { %1138 = vmatprep.mubr.bf16.mxu0 %v2106_v55  ;;  %1933 = vmatprep.mubr.msk.bf16.mxu1 %vm937_vm0, %v2108_v56 }
  0x8e   : > { %1139 = vmatmul.mubr.bf16.gmra.mrb[36].mxu0 %v2109_v57  ;;  %1934 = vmatmul.mubr.msk.bf16.gmra.mrb[36].mxu1 %vm937_vm0, %v2110_v58 }
  0x8f   : > { %1146 = vmatprep.mubr.bf16.mxu0 %v2111_v59  ;;  %1937 = vmatprep.mubr.msk.bf16.mxu1 %vm937_vm0, %v2113_v60 }
  0x96   : > { %1147 = vmatmul.mubr.bf16.gmra.mrb[40].mxu0 %v2114_v61  ;;  %1938 = vmatmul.mubr.msk.bf16.gmra.mrb[40].mxu1 %vm937_vm0, %v2115_v62 }
  0x97   : > { %1154 = vmatprep.mubr.bf16.mxu0 %v2116_v63  ;;  %1941 = vmatprep.mubr.msk.bf16.mxu1 %vm937_vm0, %v2118_v0 }
  0x9e   : > { %1155 = vmatmul.mubr.bf16.gmra.mrb[44].mxu0 %v2119_v1  ;;  %1942 = vmatmul.mubr.msk.bf16.gmra.mrb[44].mxu1 %vm937_vm0, %v2120_v2 }
  0x9f   : > { %1162 = vmatprep.mubr.bf16.mxu0 %v2121_v3  ;;  %1945 = vmatprep.mubr.msk.bf16.mxu1 %vm937_vm0, %v2123_v4 }
  0xa6   : > { %1163 = vmatmul.mubr.bf16.gmra.mrb[48].mxu0 %v2124_v5  ;;  %1946 = vmatmul.mubr.msk.bf16.gmra.mrb[48].mxu1 %vm937_vm0, %v2125_v6 }
  0xa7   : > { %1170 = vmatprep.mubr.bf16.mxu0 %v2126_v7  ;;  %1949 = vmatprep.mubr.msk.bf16.mxu1 %vm937_vm0, %v2128_v8 }
  0xae   : > { %1171 = vmatmul.mubr.bf16.gmra.mrb[52].mxu0 %v2129_v9  ;;  %1950 = vmatmul.mubr.msk.bf16.gmra.mrb[52].mxu1 %vm937_vm0, %v2130_v10 }
  0xaf   : > { %1178 = vmatprep.mubr.bf16.mxu0 %v2131_v11  ;;  %1953 = vmatprep.mubr.msk.bf16.mxu1 %vm937_vm0, %v2133_v12 }
  0xb6   : > { %1179 = vmatmul.mubr.bf16.gmra.mrb[56].mxu0 %v2134_v13  ;;  %1954 = vmatmul.mubr.msk.bf16.gmra.mrb[56].mxu1 %vm937_vm0, %v2135_v14 }
  0xb7   : > { %1186 = vmatprep.mubr.bf16.mxu0 %v2136_v15  ;;  %1957 = vmatprep.mubr.msk.bf16.mxu1 %vm937_vm0, %v2138_v16 }
  0xbe   : > { %1187 = vmatmul.mubr.bf16.gmra.mrb[60].mxu0 %v2139_v17  ;;  %1958 = vmatmul.mubr.msk.bf16.gmra.mrb[60].mxu1 %vm937_vm0, %v2140_v18 }
  0xbf   : > { %1194 = vmatprep.mubr.bf16.mxu0 %v2141_v19  ;;  %1961 = vmatprep.mubr.msk.bf16.mxu1 %vm937_vm0, %v2143_v20 }
  0xc6   : > { %1195 = vmatmul.mubr.bf16.gmra.mrb[64].mxu0 %v2144_v21  ;;  %1962 = vmatmul.mubr.msk.bf16.gmra.mrb[64].mxu1 %vm937_vm0, %v2145_v22 }
  0xc7   : > { %1202 = vmatprep.mubr.bf16.mxu0 %v2146_v23  ;;  %1965 = vmatprep.mubr.msk.bf16.mxu1 %vm937_vm0, %v2148_v24 }
  0xce   : > { %1203 = vmatmul.mubr.bf16.gmra.mrb[68].mxu0 %v2149_v25  ;;  %1966 = vmatmul.mubr.msk.bf16.gmra.mrb[68].mxu1 %vm937_vm0, %v2150_v26 }
  0xcf   : > { %1210 = vmatprep.mubr.bf16.mxu0 %v2151_v27  ;;  %1969 = vmatprep.mubr.msk.bf16.mxu1 %vm937_vm0, %v2153_v28 }
  0xd6   : > { %1211 = vmatmul.mubr.bf16.gmra.mrb[72].mxu0 %v2154_v29  ;;  %1970 = vmatmul.mubr.msk.bf16.gmra.mrb[72].mxu1 %vm937_vm0, %v2155_v30 }
  0xd7   : > { %1218 = vmatprep.mubr.bf16.mxu0 %v2156_v31  ;;  %1973 = vmatprep.mubr.msk.bf16.mxu1 %vm937_vm0, %v2158_v32 }
  0xde   : > { %1219 = vmatmul.mubr.bf16.gmra.mrb[76].mxu0 %v2159_v33  ;;  %1974 = vmatmul.mubr.msk.bf16.gmra.mrb[76].mxu1 %vm937_vm0, %v2160_v34 }
  0xdf   : > { %1226 = vmatprep.mubr.bf16.mxu0 %v2161_v35  ;;  %1977 = vmatprep.mubr.msk.bf16.mxu1 %vm937_vm0, %v2163_v36 }
  0xe6   : > { %1227 = vmatmul.mubr.bf16.gmra.mrb[80].mxu0 %v2164_v37  ;;  %1978 = vmatmul.mubr.msk.bf16.gmra.mrb[80].mxu1 %vm937_vm0, %v2165_v38 }
  0xe7   : > { %1234 = vmatprep.mubr.bf16.mxu0 %v2166_v39  ;;  %1981 = vmatprep.mubr.msk.bf16.mxu1 %vm937_vm0, %v2168_v40 }
  0xee   : > { %1235 = vmatmul.mubr.bf16.gmra.mrb[84].mxu0 %v2169_v41  ;;  %1982 = vmatmul.mubr.msk.bf16.gmra.mrb[84].mxu1 %vm937_vm0, %v2170_v42 }
  0xef   : > { %1242 = vmatprep.mubr.bf16.mxu0 %v2171_v43  ;;  %1985 = vmatprep.mubr.msk.bf16.mxu1 %vm937_vm0, %v2173_v44 }
  0xf6   : > { %1243 = vmatmul.mubr.bf16.gmra.mrb[88].mxu0 %v2174_v45  ;;  %1986 = vmatmul.mubr.msk.bf16.gmra.mrb[88].mxu1 %vm937_vm0, %v2175_v46 }
  0xf7   : > { %1250 = vmatprep.mubr.bf16.mxu0 %v2176_v47  ;;  %1989 = vmatprep.mubr.msk.bf16.mxu1 %vm937_vm0, %v2178_v48 }
  0xfe   : > { %1251 = vmatmul.mubr.bf16.gmra.mrb[92].mxu0 %v2179_v49  ;;  %1990 = vmatmul.mubr.msk.bf16.gmra.mrb[92].mxu1 %vm937_vm0, %v2180_v50 }
 0x119   : > { %v2440_v51 = vpop.f32.mrb[0].mxu0  ;;  %v2442_v52 = vpop.f32.mrb[0].mxu1 }
 0x11a   : > { %v1070_v53 = vpop.f32.mrb[1].mxu0  ;;  %v1262_v54 = vpop.f32.mrb[1].mxu1 }
 0x11b   : > { %v2444_v55 = vpop.f32.mrb[2].mxu0  ;;  %v2446_v56 = vpop.f32.mrb[2].mxu1  ;;  %v2503_v53 = vld [vmem:[%s2762_s2] ss:$0 sm:$0xff] }
 0x11c   : > { %v1073_v57 = vpop.f32.mrb[3].mxu0  ;;  %v1265_v58 = vpop.f32.mrb[3].mxu1 }
 0x11d   : > { %v1069_v57 = vadd.f32 %v2503_v53, %v2440_v51  ;;  %v1072_v51 = vadd.f32 %v2503_v53, %v2444_v55 }
 0x121   : > { %v1076_v59 = vpop.f32.mrb[4].mxu0  ;;  %v2448_v60 = vpop.f32.mrb[4].mxu1 }
 0x122   : > { %v1078_v61 = vpop.f32.mrb[5].mxu0  ;;  %v1270_v62 = vpop.f32.mrb[5].mxu1  ;;  %v1077_v54 = vadd.f32 %v2503_v53, %v1076_v59 }
 0x123   : > { %v1079_v63 = vpop.f32.mrb[6].mxu0  ;;  %v2450_v0 = vpop.f32.mrb[6].mxu1 }
 0x124   : > { %v1081_v1 = vpop.f32.mrb[7].mxu0  ;;  %v1273_v2 = vpop.f32.mrb[7].mxu1  ;;  %v1080_v62 = vadd.f32 %v2503_v53, %v1079_v63 }
 0x129   : > { %v2452_v3 = vpop.f32.mrb[8].mxu0  ;;  %v2454_v4 = vpop.f32.mrb[8].mxu1 }
 0x12a   : > { %v1086_v5 = vpop.f32.mrb[9].mxu0  ;;  %v1278_v6 = vpop.f32.mrb[9].mxu1  ;;  %v1085_v63 = vadd.f32 %v2503_v53, %v2452_v3 }
 0x12b   : > { %v2456_v7 = vpop.f32.mrb[10].mxu0  ;;  %v2458_v8 = vpop.f32.mrb[10].mxu1 }
 0x12c   : > { %v1089_v9 = vpop.f32.mrb[11].mxu0  ;;  %v1281_v10 = vpop.f32.mrb[11].mxu1 }
 0x131   : > { %v2460_v11 = vpop.f32.mrb[12].mxu0  ;;  %v2462_v12 = vpop.f32.mrb[12].mxu1 }
 0x132   : > { %v1094_v13 = vpop.f32.mrb[13].mxu0  ;;  %v1286_v14 = vpop.f32.mrb[13].mxu1  ;;  %v1093_v55 = vadd.f32 %v2503_v53, %v2460_v11 }
 0x133   : > { %v2464_v15 = vpop.f32.mrb[14].mxu0  ;;  %v2466_v16 = vpop.f32.mrb[14].mxu1 }
 0x134   : > { %v1097_v17 = vpop.f32.mrb[15].mxu0  ;;  %v1289_v18 = vpop.f32.mrb[15].mxu1 }
 0x139   : > { %v2468_v19 = vpop.f32.mrb[16].mxu0  ;;  %v2470_v20 = vpop.f32.mrb[16].mxu1 }
 0x13a   : > { %v1102_v21 = vpop.f32.mrb[17].mxu0  ;;  %v1294_v22 = vpop.f32.mrb[17].mxu1 }
 0x13b   : > { %v2472_v23 = vpop.f32.mrb[18].mxu0  ;;  %v2474_v24 = vpop.f32.mrb[18].mxu1  ;;  %v1096_v22 = vadd.f32 %v2503_v53, %v2464_v15 }
 0x13c   : > { %v1105_v25 = vpop.f32.mrb[19].mxu0  ;;  %v1297_v26 = vpop.f32.mrb[19].mxu1 }
 0x141   : > { %v2476_v27 = vpop.f32.mrb[20].mxu0  ;;  %v2478_v28 = vpop.f32.mrb[20].mxu1 }
 0x142   : > { %v1110_v29 = vpop.f32.mrb[21].mxu0  ;;  %v1302_v30 = vpop.f32.mrb[21].mxu1  ;;  %v1109_v15 = vadd.f32 %v2503_v53, %v2476_v27 }
 0x143   : > { %v2480_v31 = vpop.f32.mrb[22].mxu0  ;;  %v2482_v32 = vpop.f32.mrb[22].mxu1  ;;  %v1088_v30 = vadd.f32 %v2503_v53, %v2456_v7  ;;  %v1101_v7 = vadd.f32 %v2503_v53, %v2468_v19 }
 0x144   : > { %v1113_v33 = vpop.f32.mrb[23].mxu0  ;;  %v1305_v34 = vpop.f32.mrb[23].mxu1 }
 0x149   : > { %v2484_v35 = vpop.f32.mrb[24].mxu0  ;;  %v2486_v36 = vpop.f32.mrb[24].mxu1 }
 0x14a   : > { %v1118_v37 = vpop.f32.mrb[25].mxu0  ;;  %v1310_v38 = vpop.f32.mrb[25].mxu1 }
 0x14b   : > { %v2488_v39 = vpop.f32.mrb[26].mxu0  ;;  %v2490_v40 = vpop.f32.mrb[26].mxu1 }
 0x14c   : > { %v1121_v41 = vpop.f32.mrb[27].mxu0  ;;  %v1313_v42 = vpop.f32.mrb[27].mxu1 }
 0x151   : > { %v2492_v43 = vpop.f32.mrb[28].mxu0  ;;  %v2494_v44 = vpop.f32.mrb[28].mxu1 }
 0x152   : > { %v1126_v45 = vpop.f32.mrb[29].mxu0  ;;  %v1318_v46 = vpop.f32.mrb[29].mxu1 }
 0x153   : > { %v2496_v47 = vpop.f32.mrb[30].mxu0  ;;  %v2498_v48 = vpop.f32.mrb[30].mxu1  ;;  %v1112_v46 = vadd.f32 %v2503_v53, %v2480_v31  ;;  %v1125_v31 = vadd.f32 %v2503_v53, %v2492_v43 }
 0x154   : > { %v1129_v49 = vpop.f32.mrb[31].mxu0  ;;  %v1321_v50 = vpop.f32.mrb[31].mxu1 }
 0x159   : > { %v2509_v58 = vpop.f32.mrb[32].mxu0  ;;  %v1931_v61 = vpop.f32.mrb[32].mxu1 }
 0x15a   : > { %v1366_v1 = vadd.f32 %v1931_v61, %v1077_v54  ;;  %v1134_v59 = vpop.f32.mrb[33].mxu0  ;;  %v1357_v2 = vpop.f32.mrb[33].mxu1 }
 0x15b   : > { %v1358_v5 = vadd.f32 %v1357_v2, %v1069_v57  ;;  %v2519_v6 = vpop.f32.mrb[34].mxu0  ;;  %v1932_v9 = vpop.f32.mrb[34].mxu1  ;;  %v1104_v57 = vadd.f32 %v2503_v53, %v2472_v23  ;;  %v1117_v23 = vadd.f32 %v2503_v53, %v2484_v35 }
 0x15c   : > { %1615 = vst.msk [vmem:[%s2514_s8 + $0x10] sm:$0xff] %vm1612_vm1, %v1366_v1  ;;  %v1369_v10 = vadd.f32 %v1932_v9, %v1080_v62  ;;  %v1137_v13 = vpop.f32.mrb[35].mxu0  ;;  %v1360_v14 = vpop.f32.mrb[35].mxu1  ;;  %v1128_v9 = vadd.f32 %v2503_v53, %v2496_v47 }
 0x15d   : > { %1613 = vst.msk [vmem:[%s2514_s8] sm:$0xff] %vm1612_vm1, %v1358_v5  ;;  %v1361_v17 = vadd.f32 %v1360_v14, %v1072_v51 }
 0x15e   : > { %1616 = vst.msk [vmem:[%s2514_s8 + $0x18] sm:$0xff] %vm1612_vm1, %v1369_v10 }
 0x15f   : > { %1614 = vst.msk [vmem:[%s2514_s8 + $0x8] sm:$0xff] %vm1612_vm1, %v1361_v17  ;;  %v1120_v17 = vadd.f32 %v2503_v53, %v2488_v39  ;;  %v1133_v39 = vadd.f32 %v2503_v53, %v2509_v58 }
 0x161   : > { %v1140_v18 = vpop.f32.mrb[36].mxu0  ;;  %v1935_v21 = vpop.f32.mrb[36].mxu1 }
 0x162   : > { %v1382_v25 = vadd.f32 %v1935_v21, %v1093_v55  ;;  %v1142_v26 = vpop.f32.mrb[37].mxu0  ;;  %v1373_v29 = vpop.f32.mrb[37].mxu1  ;;  %v1141_v47 = vadd.f32 %v2503_v53, %v1140_v18 }
 0x163   : > { %v1374_v33 = vadd.f32 %v1373_v29, %v1085_v63  ;;  %v1143_v34 = vpop.f32.mrb[38].mxu0  ;;  %v1936_v11 = vpop.f32.mrb[38].mxu1 }
 0x164   : > { %1619 = vst.msk [vmem:[%s2514_s8 + $0x30] sm:$0xff] %vm1612_vm1, %v1382_v25  ;;  %v1385_v37 = vadd.f32 %v1936_v11, %v1096_v22  ;;  %v1145_v3 = vpop.f32.mrb[39].mxu0  ;;  %v1376_v38 = vpop.f32.mrb[39].mxu1 }
 0x165   : > { %1617 = vst.msk [vmem:[%s2514_s8 + $0x20] sm:$0xff] %vm1612_vm1, %v1374_v33  ;;  %v1377_v41 = vadd.f32 %v1376_v38, %v1088_v30  ;;  %v1144_v30 = vadd.f32 %v2503_v53, %v1143_v34  ;;  %v1136_v3 = vadd.f32 %v2503_v53, %v2519_v6 }
 0x166   : > { %1620 = vst.msk [vmem:[%s2514_s8 + $0x38] sm:$0xff] %vm1612_vm1, %v1385_v37 }
 0x167   : > { %1618 = vst.msk [vmem:[%s2514_s8 + $0x28] sm:$0xff] %vm1612_vm1, %v1377_v41 }
 0x169   : > { %v1148_v42 = vpop.f32.mrb[40].mxu0  ;;  %v1939_v45 = vpop.f32.mrb[40].mxu1 }
 0x16a   : > { %v1398_v49 = vadd.f32 %v1939_v45, %v1109_v15  ;;  %v1150_v50 = vpop.f32.mrb[41].mxu0  ;;  %v1389_v54 = vpop.f32.mrb[41].mxu1  ;;  %v1149_v6 = vadd.f32 %v2503_v53, %v1148_v42 }
 0x16b   : > { %v1390_v61 = vadd.f32 %v1389_v54, %v1101_v7  ;;  %v1151_v62 = vpop.f32.mrb[42].mxu0  ;;  %v1940_v27 = vpop.f32.mrb[42].mxu1 }
 0x16c   : > { %1623 = vst.msk [vmem:[%s2514_s8 + $0x50] sm:$0xff] %vm1612_vm1, %v1398_v49  ;;  %v1401_v1 = vadd.f32 %v1940_v27, %v1112_v46  ;;  %v1153_v19 = vpop.f32.mrb[43].mxu0  ;;  %v1392_v59 = vpop.f32.mrb[43].mxu1  ;;  %v1152_v27 = vadd.f32 %v2503_v53, %v1151_v62 }
 0x16d   : > { %1621 = vst.msk [vmem:[%s2514_s8 + $0x40] sm:$0xff] %vm1612_vm1, %v1390_v61  ;;  %v1393_v2 = vadd.f32 %v1392_v59, %v1104_v57 }
 0x16e   : > { %1624 = vst.msk [vmem:[%s2514_s8 + $0x58] sm:$0xff] %vm1612_vm1, %v1401_v1 }
 0x16f   : > { %1622 = vst.msk [vmem:[%s2514_s8 + $0x48] sm:$0xff] %vm1612_vm1, %v1393_v2 }
 0x171   : > { %v1156_v51 = vpop.f32.mrb[44].mxu0  ;;  %v1943_v5 = vpop.f32.mrb[44].mxu1 }
 0x172   : > { %v1414_v10 = vadd.f32 %v1943_v5, %v1125_v31  ;;  %v1158_v13 = vpop.f32.mrb[45].mxu0  ;;  %v1405_v14 = vpop.f32.mrb[45].mxu1  ;;  %v1157_v34 = vadd.f32 %v2503_v53, %v1156_v51 }
 0x173   : > { %v1406_v55 = vadd.f32 %v1405_v14, %v1117_v23  ;;  %v1159_v63 = vpop.f32.mrb[46].mxu0  ;;  %v1944_v43 = vpop.f32.mrb[46].mxu1 }
 0x174   : > { %1627 = vst.msk [vmem:[%s2514_s8 + $0x70] sm:$0xff] %vm1612_vm1, %v1414_v10  ;;  %v1417_v21 = vadd.f32 %v1944_v43, %v1128_v9  ;;  %v1161_v35 = vpop.f32.mrb[47].mxu0  ;;  %v1408_v22 = vpop.f32.mrb[47].mxu1  ;;  %v1160_v50 = vadd.f32 %v2503_v53, %v1159_v63 }
 0x175   : > { %1625 = vst.msk [vmem:[%s2514_s8 + $0x60] sm:$0xff] %vm1612_vm1, %v1406_v55  ;;  %v1409_v25 = vadd.f32 %v1408_v22, %v1120_v17 }
 0x176   : > { %1628 = vst.msk [vmem:[%s2514_s8 + $0x78] sm:$0xff] %vm1612_vm1, %v1417_v21 }
 0x177   : > { %1626 = vst.msk [vmem:[%s2514_s8 + $0x68] sm:$0xff] %vm1612_vm1, %v1409_v25 }
 0x179   : > { %v1164_v26 = vpop.f32.mrb[48].mxu0  ;;  %v1947_v29 = vpop.f32.mrb[48].mxu1 }
 0x17a   : > { %v1430_v33 = vadd.f32 %v1947_v29, %v1141_v47  ;;  %v1166_v11 = vpop.f32.mrb[49].mxu0  ;;  %v1421_v37 = vpop.f32.mrb[49].mxu1  ;;  %v1165_v62 = vadd.f32 %v2503_v53, %v1164_v26 }
 0x17b   : > { %v1422_v38 = vadd.f32 %v1421_v37, %v1133_v39  ;;  %v1167_v41 = vpop.f32.mrb[50].mxu0  ;;  %v1948_v15 = vpop.f32.mrb[50].mxu1 }
 0x17c   : > { %1631 = vst.msk [vmem:[%s2514_s8 + $0x90] sm:$0xff] %vm1612_vm1, %v1430_v33  ;;  %v1433_v18 = vadd.f32 %v1948_v15, %v1144_v30  ;;  %v1169_v7 = vpop.f32.mrb[51].mxu0  ;;  %v1424_v58 = vpop.f32.mrb[51].mxu1  ;;  %v1168_v55 = vadd.f32 %v2503_v53, %v1167_v41 }
 0x17d   : > { %1629 = vst.msk [vmem:[%s2514_s8 + $0x80] sm:$0xff] %vm1612_vm1, %v1422_v38  ;;  %v1425_v45 = vadd.f32 %v1424_v58, %v1136_v3 }
 0x17e   : > { %1632 = vst.msk [vmem:[%s2514_s8 + $0x98] sm:$0xff] %vm1612_vm1, %v1433_v18 }
 0x17f   : > { %1630 = vst.msk [vmem:[%s2514_s8 + $0x88] sm:$0xff] %vm1612_vm1, %v1425_v45 }
 0x181   : > { %v1172_v46 = vpop.f32.mrb[52].mxu0  ;;  %v1951_v49 = vpop.f32.mrb[52].mxu1 }
 0x182   : > { %v1446_v54 = vadd.f32 %v1951_v49, %v1157_v34  ;;  %v1174_v57 = vpop.f32.mrb[53].mxu0  ;;  %v1437_v61 = vpop.f32.mrb[53].mxu1  ;;  %v1173_v51 = vadd.f32 %v2503_v53, %v1172_v46 }
 0x183   : > { %v1438_v1 = vadd.f32 %v1437_v61, %v1149_v6  ;;  %v1175_v19 = vpop.f32.mrb[54].mxu0  ;;  %v1952_v59 = vpop.f32.mrb[54].mxu1 }
 0x184   : > { %1635 = vst.msk [vmem:[%s2514_s8 + $0xb0] sm:$0xff] %vm1612_vm1, %v1446_v54  ;;  %v1449_v2 = vadd.f32 %v1952_v59, %v1160_v50  ;;  %v1177_v31 = vpop.f32.mrb[55].mxu0  ;;  %v1440_v23 = vpop.f32.mrb[55].mxu1  ;;  %v1176_v10 = vadd.f32 %v2503_v53, %v1175_v19 }
 0x185   : > { %1633 = vst.msk [vmem:[%s2514_s8 + $0xa0] sm:$0xff] %vm1612_vm1, %v1438_v1  ;;  %v1441_v42 = vadd.f32 %v1440_v23, %v1152_v27 }
 0x186   : > { %1636 = vst.msk [vmem:[%s2514_s8 + $0xb8] sm:$0xff] %vm1612_vm1, %v1449_v2 }
 0x187   : > { %1634 = vst.msk [vmem:[%s2514_s8 + $0xa8] sm:$0xff] %vm1612_vm1, %v1441_v42 }
 0x189   : > { %v1180_v5 = vpop.f32.mrb[56].mxu0  ;;  %v1955_v9 = vpop.f32.mrb[56].mxu1 }
 0x18a   : > { %v1462_v13 = vadd.f32 %v1955_v9, %v1173_v51  ;;  %v1182_v14 = vpop.f32.mrb[57].mxu0  ;;  %v1453_v17 = vpop.f32.mrb[57].mxu1  ;;  %v1181_v39 = vadd.f32 %v2503_v53, %v1180_v5 }
 0x18b   : > { %v1454_v63 = vadd.f32 %v1453_v17, %v1165_v62  ;;  %v1183_v43 = vpop.f32.mrb[58].mxu0  ;;  %v1956_v21 = vpop.f32.mrb[58].mxu1 }
 0x18c   : > { %1639 = vst.msk [vmem:[%s2514_s8 + $0xd0] sm:$0xff] %vm1612_vm1, %v1462_v13  ;;  %v1465_v35 = vadd.f32 %v1956_v21, %v1176_v10  ;;  %v1185_v22 = vpop.f32.mrb[59].mxu0  ;;  %v1456_v25 = vpop.f32.mrb[59].mxu1  ;;  %v1184_v37 = vadd.f32 %v2503_v53, %v1183_v43 }
 0x18d   : > { %1637 = vst.msk [vmem:[%s2514_s8 + $0xc0] sm:$0xff] %vm1612_vm1, %v1454_v63  ;;  %v1457_v47 = vadd.f32 %v1456_v25, %v1168_v55 }
 0x18e   : > { %1640 = vst.msk [vmem:[%s2514_s8 + $0xd8] sm:$0xff] %vm1612_vm1, %v1465_v35 }
 0x18f   : > { %1638 = vst.msk [vmem:[%s2514_s8 + $0xc8] sm:$0xff] %vm1612_vm1, %v1457_v47 }
 0x191   : > { %v1188_v26 = vpop.f32.mrb[60].mxu0  ;;  %v1959_v29 = vpop.f32.mrb[60].mxu1 }
 0x192   : > { %v1189_v30 = vadd.f32 %v2503_v53, %v1188_v26  ;;  %v1190_v33 = vpop.f32.mrb[61].mxu0  ;;  %v1469_v11 = vpop.f32.mrb[61].mxu1 }
 0x193   : > { %v1470_v3 = vadd.f32 %v1469_v11, %v1181_v39  ;;  %v1191_v38 = vpop.f32.mrb[62].mxu0  ;;  %v1960_v41 = vpop.f32.mrb[62].mxu1 }
 0x194   : > { %v1478_v15 = vadd.f32 %v1959_v29, %v1189_v30  ;;  %v1192_v18 = vadd.f32 %v2503_v53, %v1191_v38  ;;  %v1193_v7 = vpop.f32.mrb[63].mxu0  ;;  %v1472_v58 = vpop.f32.mrb[63].mxu1 }
 0x195   : > { %1641 = vst.msk [vmem:[%s2514_s8 + $0xe0] sm:$0xff] %vm1612_vm1, %v1470_v3  ;;  %v1473_v45 = vadd.f32 %v1472_v58, %v1184_v37 }
 0x196   : > { %1643 = vst.msk [vmem:[%s2514_s8 + $0xf0] sm:$0xff] %vm1612_vm1, %v1478_v15  ;;  %v1481_v34 = vadd.f32 %v1960_v41, %v1192_v18 }
 0x197   : > { %1642 = vst.msk [vmem:[%s2514_s8 + $0xe8] sm:$0xff] %vm1612_vm1, %v1473_v45 }
 0x198   : > { %1644 = vst.msk [vmem:[%s2514_s8 + $0xf8] sm:$0xff] %vm1612_vm1, %v1481_v34 }
 0x199   : > { %v1196_v6 = vpop.f32.mrb[64].mxu0  ;;  %v1963_v46 = vpop.f32.mrb[64].mxu1 }
 0x19a   : > { %v1197_v49 = vadd.f32 %v2503_v53, %v1196_v6  ;;  %v1198_v50 = vpop.f32.mrb[65].mxu0  ;;  %v1485_v54 = vpop.f32.mrb[65].mxu1 }
 0x19b   : > { %v1199_v57 = vpop.f32.mrb[66].mxu0  ;;  %v1964_v61 = vpop.f32.mrb[66].mxu1 }
 0x19c   : > { %v1486_v27 = vadd.f32 %v1485_v54, %v1197_v49  ;;  %v1200_v1 = vadd.f32 %v2503_v53, %v1199_v57  ;;  %v1201_v19 = vpop.f32.mrb[67].mxu0  ;;  %v1488_v59 = vpop.f32.mrb[67].mxu1  ;;  %v1261_v49 = vadd.f32 %v2503_v53, %v2442_v52  ;;  %v1272_v57 = vadd.f32 %v2503_v53, %v2450_v0 }
 0x19e   : > { %1645 = vst.msk [vmem:[%s2514_s8 + $0x100] sm:$0xff] %vm1612_vm1, %v1486_v27  ;;  %v1489_v2 = vadd.f32 %v1488_v59, %v1200_v1 }
 0x1a0   : > { %1646 = vst.msk [vmem:[%s2514_s8 + $0x108] sm:$0xff] %vm1612_vm1, %v1489_v2 }
 0x1a1   : > { %v1204_v31 = vpop.f32.mrb[68].mxu0  ;;  %v1967_v23 = vpop.f32.mrb[68].mxu1 }
 0x1a2   : > { %v1205_v42 = vadd.f32 %v2503_v53, %v1204_v31  ;;  %v1206_v51 = vpop.f32.mrb[69].mxu0  ;;  %v1501_v62 = vpop.f32.mrb[69].mxu1 }
 0x1a3   : > { %v1207_v5 = vpop.f32.mrb[70].mxu0  ;;  %v1968_v9 = vpop.f32.mrb[70].mxu1 }
 0x1a4   : > { %v1494_v10 = vadd.f32 %v1963_v46, %v1205_v42  ;;  %v1208_v13 = vadd.f32 %v2503_v53, %v1207_v5  ;;  %v1209_v14 = vpop.f32.mrb[71].mxu0  ;;  %v1504_v17 = vpop.f32.mrb[71].mxu1  ;;  %v1269_v46 = vadd.f32 %v2503_v53, %v2448_v60  ;;  %v1264_v60 = vadd.f32 %v2503_v53, %v2446_v56 }
 0x1a5   : > { %v1285_v56 = vadd.f32 %v2503_v53, %v2462_v12  ;;  %v1288_v14 = vadd.f32 %v2503_v53, %v2466_v16  ;;  %v1280_v12 = vadd.f32 %v2503_v53, %v2458_v8 }
 0x1a6   : > { %1647 = vst.msk [vmem:[%s2514_s8 + $0x110] sm:$0xff] %vm1612_vm1, %v1494_v10  ;;  %v1497_v55 = vadd.f32 %v1964_v61, %v1208_v13 }
 0x1a8   : > { %1648 = vst.msk [vmem:[%s2514_s8 + $0x118] sm:$0xff] %vm1612_vm1, %v1497_v55 }
 0x1a9   : > { %v1212_v63 = vpop.f32.mrb[72].mxu0  ;;  %v2639_v43 = vpop.f32.mrb[72].mxu1 }
 0x1aa   : > { %v1213_v21 = vadd.f32 %v2503_v53, %v1212_v63  ;;  %v1214_v35 = vpop.f32.mrb[73].mxu0  ;;  %v1517_v22 = vpop.f32.mrb[73].mxu1 }
 0x1ab   : > { %v1215_v25 = vpop.f32.mrb[74].mxu0  ;;  %v2642_v47 = vpop.f32.mrb[74].mxu1 }
 0x1ac   : > { %v1502_v39 = vadd.f32 %v1501_v62, %v1213_v21  ;;  %v1216_v26 = vadd.f32 %v2503_v53, %v1215_v25  ;;  %v1217_v29 = vpop.f32.mrb[75].mxu0  ;;  %v1520_v30 = vpop.f32.mrb[75].mxu1 }
 0x1ae   : > { %1649 = vst.msk [vmem:[%s2514_s8 + $0x120] sm:$0xff] %vm1612_vm1, %v1502_v39  ;;  %v1505_v33 = vadd.f32 %v1504_v17, %v1216_v26 }
 0x1b0   : > { %1650 = vst.msk [vmem:[%s2514_s8 + $0x128] sm:$0xff] %vm1612_vm1, %v1505_v33  ;;  %v1293_v33 = vadd.f32 %v2503_v53, %v2470_v20 }
 0x1b1   : > { %v1220_v11 = vpop.f32.mrb[76].mxu0  ;;  %v2649_v37 = vpop.f32.mrb[76].mxu1 }
 0x1b2   : > { %v1221_v3 = vadd.f32 %v2503_v53, %v1220_v11  ;;  %v1222_v38 = vpop.f32.mrb[77].mxu0  ;;  %v2652_v41 = vpop.f32.mrb[77].mxu1 }
 0x1b3   : > { %v1223_v15 = vpop.f32.mrb[78].mxu0  ;;  %v2654_v18 = vpop.f32.mrb[78].mxu1  ;;  %v1304_v38 = vadd.f32 %v2503_v53, %v2482_v32 }
 0x1b4   : > { %v1510_v7 = vadd.f32 %v1967_v23, %v1221_v3  ;;  %v1224_v58 = vadd.f32 %v2503_v53, %v1223_v15  ;;  %v1225_v45 = vpop.f32.mrb[79].mxu0  ;;  %v2657_v34 = vpop.f32.mrb[79].mxu1 }
 0x1b6   : > { %1651 = vst.msk [vmem:[%s2514_s8 + $0x130] sm:$0xff] %vm1612_vm1, %v1510_v7  ;;  %v1513_v6 = vadd.f32 %v1968_v9, %v1224_v58  ;;  %v1277_v9 = vadd.f32 %v2503_v53, %v2454_v4 }
 0x1b8   : > { %1652 = vst.msk [vmem:[%s2514_s8 + $0x138] sm:$0xff] %vm1612_vm1, %v1513_v6 }
 0x1b9   : > { %v1228_v50 = vpop.f32.mrb[80].mxu0  ;;  %v1979_v54 = vpop.f32.mrb[80].mxu1 }
 0x1ba   : > { %v1229_v61 = vadd.f32 %v2503_v53, %v1228_v50  ;;  %v1558_v27 = vadd.f32 %v1979_v54, %v1269_v46  ;;  %v1230_v1 = vpop.f32.mrb[81].mxu0  ;;  %v1549_v19 = vpop.f32.mrb[81].mxu1 }
 0x1bb   : > { %v1550_v59 = vadd.f32 %v1549_v19, %v1261_v49  ;;  %v1231_v52 = vpop.f32.mrb[82].mxu0  ;;  %v1980_v2 = vpop.f32.mrb[82].mxu1  ;;  %v1320_v19 = vadd.f32 %v2503_v53, %v2498_v48 }
 0x1bc   : > { %v1518_v31 = vadd.f32 %v1517_v22, %v1229_v61  ;;  %1663 = vst.msk [vmem:[%s2514_s8 + $0x190] sm:$0xff] %vm1612_vm1, %v1558_v27  ;;  %v1232_v0 = vadd.f32 %v2503_v53, %v1231_v52  ;;  %v1561_v23 = vadd.f32 %v1980_v2, %v1272_v57  ;;  %v1233_v42 = vpop.f32.mrb[83].mxu0  ;;  %v1552_v51 = vpop.f32.mrb[83].mxu1  ;;  %v1309_v61 = vadd.f32 %v2503_v53, %v2486_v36 }
 0x1bd   : > { %1661 = vst.msk [vmem:[%s2514_s8 + $0x180] sm:$0xff] %vm1612_vm1, %v1550_v59  ;;  %v1553_v62 = vadd.f32 %v1552_v51, %v1264_v60 }
 0x1be   : > { %1653 = vst.msk [vmem:[%s2514_s8 + $0x140] sm:$0xff] %vm1612_vm1, %v1518_v31  ;;  %v1521_v5 = vadd.f32 %v1520_v30, %v1232_v0  ;;  %1664 = vst.msk [vmem:[%s2514_s8 + $0x198] sm:$0xff] %vm1612_vm1, %v1561_v23 }
 0x1bf   : > { %1662 = vst.msk [vmem:[%s2514_s8 + $0x188] sm:$0xff] %vm1612_vm1, %v1553_v62 }
 0x1c0   : > { %1654 = vst.msk [vmem:[%s2514_s8 + $0x148] sm:$0xff] %vm1612_vm1, %v1521_v5 }
 0x1c1   : > { %v1236_v10 = vpop.f32.mrb[84].mxu0  ;;  %v1983_v13 = vpop.f32.mrb[84].mxu1 }
 0x1c2   : > { %v1237_v17 = vadd.f32 %v2503_v53, %v1236_v10  ;;  %v1574_v55 = vadd.f32 %v1983_v13, %v1285_v56  ;;  %v1238_v63 = vpop.f32.mrb[85].mxu0  ;;  %v1565_v21 = vpop.f32.mrb[85].mxu1 }
 0x1c3   : > { %v1566_v35 = vadd.f32 %v1565_v21, %v1277_v9  ;;  %v1239_v4 = vpop.f32.mrb[86].mxu0  ;;  %v1984_v22 = vpop.f32.mrb[86].mxu1 }
 0x1c4   : > { %v1526_v25 = vadd.f32 %v2639_v43, %v1237_v17  ;;  %1667 = vst.msk [vmem:[%s2514_s8 + $0x1b0] sm:$0xff] %vm1612_vm1, %v1574_v55  ;;  %v1240_v16 = vadd.f32 %v2503_v53, %v1239_v4  ;;  %v1577_v39 = vadd.f32 %v1984_v22, %v1288_v14  ;;  %v1241_v26 = vpop.f32.mrb[87].mxu0  ;;  %v1568_v29 = vpop.f32.mrb[87].mxu1  ;;  %v1301_v43 = vadd.f32 %v2503_v53, %v2478_v28 }
 0x1c5   : > { %1665 = vst.msk [vmem:[%s2514_s8 + $0x1a0] sm:$0xff] %vm1612_vm1, %v1566_v35  ;;  %v1569_v30 = vadd.f32 %v1568_v29, %v1280_v12  ;;  %v1296_v28 = vadd.f32 %v2503_v53, %v2474_v24 }
 0x1c6   : > { %1655 = vst.msk [vmem:[%s2514_s8 + $0x150] sm:$0xff] %vm1612_vm1, %v1526_v25  ;;  %v1529_v8 = vadd.f32 %v2642_v47, %v1240_v16  ;;  %1668 = vst.msk [vmem:[%s2514_s8 + $0x1b8] sm:$0xff] %vm1612_vm1, %v1577_v39 }
 0x1c7   : > { %1666 = vst.msk [vmem:[%s2514_s8 + $0x1a8] sm:$0xff] %vm1612_vm1, %v1569_v30 }
 0x1c8   : > { %1656 = vst.msk [vmem:[%s2514_s8 + $0x158] sm:$0xff] %vm1612_vm1, %v1529_v8 }
 0x1c9   : > { %v1244_v11 = vpop.f32.mrb[88].mxu0  ;;  %v1987_v3 = vpop.f32.mrb[88].mxu1 }
 0x1ca   : > { %v1245_v47 = vadd.f32 %v2503_v53, %v1244_v11  ;;  %v1590_v15 = vadd.f32 %v1987_v3, %v1301_v43  ;;  %v1246_v7 = vpop.f32.mrb[89].mxu0  ;;  %v1581_v58 = vpop.f32.mrb[89].mxu1 }
 0x1cb   : > { %v1582_v45 = vadd.f32 %v1581_v58, %v1293_v33  ;;  %v1247_v20 = vpop.f32.mrb[90].mxu0  ;;  %v1988_v6 = vpop.f32.mrb[90].mxu1 }
 0x1cc   : > { %v1534_v46 = vadd.f32 %v2652_v41, %v1245_v47  ;;  %1671 = vst.msk [vmem:[%s2514_s8 + $0x1d0] sm:$0xff] %vm1612_vm1, %v1590_v15  ;;  %v1248_v32 = vadd.f32 %v2503_v53, %v1247_v20  ;;  %v1593_v49 = vadd.f32 %v1988_v6, %v1304_v38  ;;  %v1249_v50 = vpop.f32.mrb[91].mxu0  ;;  %v1584_v54 = vpop.f32.mrb[91].mxu1  ;;  %v1317_v41 = vadd.f32 %v2503_v53, %v2494_v44 }
 0x1cd   : > { %1669 = vst.msk [vmem:[%s2514_s8 + $0x1c0] sm:$0xff] %vm1612_vm1, %v1582_v45  ;;  %v1585_v57 = vadd.f32 %v1584_v54, %v1296_v28  ;;  %v1312_v44 = vadd.f32 %v2503_v53, %v2490_v40 }
 0x1ce   : > { %1657 = vst.msk [vmem:[%s2514_s8 + $0x160] sm:$0xff] %vm1612_vm1, %v1534_v46  ;;  %v1537_v24 = vadd.f32 %v2657_v34, %v1248_v32  ;;  %1672 = vst.msk [vmem:[%s2514_s8 + $0x1d8] sm:$0xff] %vm1612_vm1, %v1593_v49 }
 0x1cf   : > { %1670 = vst.msk [vmem:[%s2514_s8 + $0x1c8] sm:$0xff] %vm1612_vm1, %v1585_v57 }
 0x1d0   : > { %1658 = vst.msk [vmem:[%s2514_s8 + $0x168] sm:$0xff] %vm1612_vm1, %v1537_v24 }
 0x1d1   : > { %v1252_v27 = vpop.f32.mrb[92].mxu0  ;;  %v1991_v1 = vpop.f32.mrb[92].mxu1 }
 0x1d2   : > { %v1253_v34 = vadd.f32 %v2503_v53, %v1252_v27  ;;  %v1606_v60 = vadd.f32 %v1991_v1, %v1317_v41  ;;  %v1254_v59 = vpop.f32.mrb[93].mxu0  ;;  %v1597_v52 = vpop.f32.mrb[93].mxu1 }
 0x1d3   : > { %v1598_v2 = vadd.f32 %v1597_v52, %v1309_v61  ;;  %v1255_v36 = vpop.f32.mrb[94].mxu0  ;;  %v1992_v31 = vpop.f32.mrb[94].mxu1 }
 0x1d4   : > { %v1542_v0 = vadd.f32 %v2649_v37, %v1253_v34  ;;  %1675 = vst.msk [vmem:[%s2514_s8 + $0x1f0] sm:$0xff] %vm1612_vm1, %v1606_v60  ;;  %v1256_v48 = vadd.f32 %v2503_v53, %v1255_v36  ;;  %v1609_v23 = vadd.f32 %v1992_v31, %v1320_v19  ;;  %v1257_v42 = vpop.f32.mrb[95].mxu0  ;;  %v1600_v51 = vpop.f32.mrb[95].mxu1 }
 0x1d5   : > { %1673 = vst.msk [vmem:[%s2514_s8 + $0x1e0] sm:$0xff] %vm1612_vm1, %v1598_v2  ;;  %v1601_v62 = vadd.f32 %v1600_v51, %v1312_v44 }
 0x1d6   : > { %1659 = vst.msk [vmem:[%s2514_s8 + $0x170] sm:$0xff] %vm1612_vm1, %v1542_v0  ;;  %v1545_v40 = vadd.f32 %v2654_v18, %v1256_v48  ;;  %1676 = vst.msk [vmem:[%s2514_s8 + $0x1f8] sm:$0xff] %vm1612_vm1, %v1609_v23 }
 0x1d7   : > { %1674 = vst.msk [vmem:[%s2514_s8 + $0x1e8] sm:$0xff] %vm1612_vm1, %v1601_v62 }
 0x1d8   : > { %1660 = vst.msk [vmem:[%s2514_s8 + $0x178] sm:$0xff] %vm1612_vm1, %v1545_v40 }
 0x1d9 PF: > { %s13_s12 = sadd.s32 1, %s2187_s12  }
 0x1da   : > { %p10_p4 = scmp.ge.s32.totalorder %s13_s12, 6  }
 0x1dc   :  { %12 = sbr.rel (!%p10_p4) target bundleno = 1 (0x1), region = 62 }

</bundles_post_ra>
